<compile_context>
chip_gen: v6e
topology: v6e:2x2x1
jax: 0.10.0
libtpu: 0.0.40
codegen_flags: <defaults>
</compile_context>

<pallas_src>
import numpy as np
import jax
import jax.numpy as jnp
from jax.experimental import pallas as pl
from jax.experimental.pallas import tpu as pltpu


# -----------------------------------------------------------------------------
# Parameters (PyTorch layouts: Conv2d OIHW, ConvTranspose2d IOHW, Linear stored
# as (in, out) with NCHW-flatten row order so y = flat @ W + b).
# -----------------------------------------------------------------------------
def init_params(key, c_in, latent):
    ks = jax.random.split(key, 16)
    s = 0.05
    n = jax.random.normal
    return {
        "ec1_w": s * n(ks[0], (8, c_in, 3, 3), jnp.float32), "ec1_b": s * n(ks[1], (8,), jnp.float32),
        "ec2_w": s * n(ks[2], (16, 8, 3, 3), jnp.float32),   "ec2_b": s * n(ks[3], (16,), jnp.float32),
        "ec3_w": s * n(ks[4], (32, 16, 3, 3), jnp.float32),  "ec3_b": s * n(ks[5], (32,), jnp.float32),
        "el_w": s * n(ks[6], (2048, latent), jnp.float32),   "el_b": s * n(ks[7], (latent,), jnp.float32),
        "dl_w": s * n(ks[8], (latent, 2048), jnp.float32),   "dl_b": s * n(ks[9], (2048,), jnp.float32),
        "dc1_w": s * n(ks[10], (32, 16, 3, 3), jnp.float32), "dc1_b": s * n(ks[11], (16,), jnp.float32),
        "dc2_w": s * n(ks[12], (16, 8, 3, 3), jnp.float32),  "dc2_b": s * n(ks[13], (8,), jnp.float32),
        "dc3_w": s * n(ks[14], (8, c_in, 3, 3), jnp.float32),"dc3_b": s * n(ks[15], (c_in,), jnp.float32),
    }


def _round_up(n, m):
    return ((n + m - 1) // m) * m


# -----------------------------------------------------------------------------
# One-time (outside jit) weight folding.
# Per conv/convT layer we produce:
#   Rbd  (kh, Bt*Hout, Bt*Hin)  block-diagonal 0/1 row-selection matrices
#   Wcat (Kp, kh*Np)            per-dh column/channel-mixing blocks, each padded
#                               to Np = round_up(Wout*Cout, 128) lanes; rows
#                               beyond the true input width are zero.
#   brow (1, Np)                bias row (zero in the lane-padding region)
# so that   out = sum_dh R[dh] @ (a @ Wcat)[:, dh*Np:(dh+1)*Np] + brow.
# -----------------------------------------------------------------------------
def _pack_conv_layer(wgt, bias, stride, padding, h_in, w_in, k_pad, bt, transposed):
    wgt = np.asarray(wgt, np.float32)
    bias = np.asarray(bias, np.float32)
    if transposed:                                    # IOHW
        c_in, c_out, kh, kw = wgt.shape
        h_out = (h_in - 1) * stride + kh - 2 * padding
        w_out = (w_in - 1) * stride + kw - 2 * padding
    else:                                             # OIHW
        c_out, c_in, kh, kw = wgt.shape
        h_out = (h_in + 2 * padding - kh) // stride + 1
        w_out = (w_in + 2 * padding - kw) // stride + 1

    k_true = w_in * c_in
    n_true = w_out * c_out
    n_pad = _round_up(n_true, 128)
    assert k_true <= k_pad

    R = np.zeros((kh, h_out, h_in), np.float32)
    Wc = np.zeros((k_pad, kh * n_pad), np.float32)
    for dh in range(kh):
        # Row-selection matrix for this kernel row (handles padding/stride/
        # transposed-conv dilation on the H axis).
        for ho in range(h_out):
            if transposed:
                num = ho + padding - dh
                if num % stride:
                    continue
                hi = num // stride
            else:
                hi = ho * stride + dh - padding
            if 0 <= hi < h_in:
                R[dh, ho, hi] = 1.0
        # Column/channel mixing block (folds the kw W-taps of this kernel row).
        for wo in range(w_out):
            for dw in range(kw):
                if transposed:
                    num = wo + padding - dw
                    if num % stride:
                        continue
                    wi = num // stride
                else:
                    wi = wo * stride + dw - padding
                if not (0 <= wi < w_in):
                    continue
                blk = wgt[:, :, dh, dw] if transposed else wgt[:, :, dh, dw].T  # (c_in, c_out)
                Wc[wi * c_in:(wi + 1) * c_in,
                   dh * n_pad + wo * c_out: dh * n_pad + (wo + 1) * c_out] += blk

    # Block-diagonal expansion over the stacked batch dimension.
    Rbd = np.zeros((kh, bt * h_out, bt * h_in), np.float32)
    for b in range(bt):
        Rbd[:, b * h_out:(b + 1) * h_out, b * h_in:(b + 1) * h_in] = R

    brow = np.zeros((1, n_pad), np.float32)
    brow[0, :n_true] = np.tile(bias, w_out)
    return (jnp.asarray(Rbd, jnp.bfloat16), jnp.asarray(Wc, jnp.bfloat16),
            jnp.asarray(brow, jnp.float32), h_out, w_out, n_pad)


def pack_params(p, h_w, bt):
    packed = {}
    h = w = h_w
    c_in0 = int(p["ec1_w"].shape[1])
    k_pad = h_w * c_in0                                # first layer K (no padding)

    r, wc, b, h, w, n_pad = _pack_conv_layer(p["ec1_w"], p["ec1_b"], 1, 2, h, w, k_pad, bt, False)
    packed.update(r1=r, w1=wc, b1=b); k_pad = n_pad
    r, wc, b, h, w, n_pad = _pack_conv_layer(p["ec2_w"], p["ec2_b"], 1, 0, h, w, k_pad, bt, False)
    packed.update(r2=r, w2=wc, b2=b); k_pad = n_pad
    r, wc, b, h, w, n_pad = _pack_conv_layer(p["ec3_w"], p["ec3_b"], 2, 0, h, w, k_pad, bt, False)
    packed.update(r3=r, w3=wc, b3=b); k_pad = n_pad

    henc, wenc = h, w                                  # 8, 8
    cenc = int(p["ec3_w"].shape[0])                    # 32
    latent = int(p["el_w"].shape[1])
    row_k = wenc * cenc                                # 256
    assert n_pad == row_k                              # encoder output needs no lane padding
    assert p["el_w"].shape[0] == cenc * henc * wenc

    # --- encoder_linear: fold NCHW flatten (idx = c*HW + h*W + w) into a
    # column-blocked weight:  Wbig[:, h*L:(h+1)*L] applies to activation row h.
    we = np.asarray(p["el_w"], np.float32).reshape(cenc, henc, wenc, latent)   # [c,h,w,l]
    wbig = np.zeros((row_k, henc * latent), np.float32)
    for hh in range(henc):
        w_h = we[:, hh, :, :].transpose(1, 0, 2).reshape(row_k, latent)        # (w*c, l)
        wbig[:, hh * latent:(hh + 1) * latent] = w_h
    packed["el_wbig"] = jnp.asarray(wbig, jnp.bfloat16)

    el_mask = np.zeros((bt * henc, henc * latent), np.float32)                 # block-diag select
    for b_ in range(bt):
        for hh in range(henc):
            el_mask[b_ * henc + hh, hh * latent:(hh + 1) * latent] = 1.0
    packed["el_mask"] = jnp.asarray(el_mask, jnp.float32)
    packed["el_fold"] = jnp.asarray(np.tile(np.eye(latent, dtype=np.float32), (henc, 1)),
                                    jnp.bfloat16)                              # (8L, L)
    el_rows = np.zeros((bt, bt * henc), np.float32)                            # per-batch row sum
    for b_ in range(bt):
        el_rows[b_, b_ * henc:(b_ + 1) * henc] = 1.0
    packed["el_rows"] = jnp.asarray(el_rows, jnp.bfloat16)
    packed["el_b"] = jnp.asarray(np.asarray(p["el_b"], np.float32).reshape(1, latent), jnp.float32)

    # --- decoder_linear: lane-dense weight (L, 8*256); block h produces the
    # (w*C+c)-ordered row h of the decoder input.
    wd = np.asarray(p["dl_w"], np.float32).reshape(latent, cenc, henc, wenc)   # [l,c,h,w]
    wdcat = np.zeros((latent, henc * row_k), np.float32)
    for hh in range(henc):
        w_h = wd[:, :, hh, :].transpose(0, 2, 1).reshape(latent, row_k)        # (l, w*c)
        wdcat[:, hh * row_k:(hh + 1) * row_k] = w_h
    packed["dl_wcat"] = jnp.asarray(wdcat, jnp.bfloat16)

    dl_rep = np.zeros((bt * henc, bt), np.float32)                             # latent row replication
    for b_ in range(bt):
        dl_rep[b_ * henc:(b_ + 1) * henc, b_] = 1.0
    packed["dl_rep"] = jnp.asarray(dl_rep, jnp.bfloat16)
    dl_mask = np.zeros((bt * henc, henc * row_k), np.float32)
    for b_ in range(bt):
        for hh in range(henc):
            dl_mask[b_ * henc + hh, hh * row_k:(hh + 1) * row_k] = 1.0
    packed["dl_mask"] = jnp.asarray(dl_mask, jnp.float32)
    db = np.asarray(p["dl_b"], np.float32).reshape(cenc, henc, wenc)           # [c,h,w]
    brows = np.zeros((bt * henc, row_k), np.float32)
    for hh in range(henc):
        brows[hh, :] = db[:, hh, :].T.reshape(row_k)                           # (w*c,)
    for b_ in range(1, bt):
        brows[b_ * henc:(b_ + 1) * henc, :] = brows[:henc, :]
    packed["dl_b"] = jnp.asarray(brows, jnp.float32)

    # --- decoder transposed convolutions
    k_pad = row_k
    r, wc, b, h, w, n_pad = _pack_conv_layer(p["dc1_w"], p["dc1_b"], 2, 0, henc, wenc, k_pad, bt, True)
    packed.update(r4=r, w4=wc, b4=b); k_pad = n_pad
    r, wc, b, h, w, n_pad = _pack_conv_layer(p["dc2_w"], p["dc2_b"], 1, 0, h, w, k_pad, bt, True)
    packed.update(r5=r, w5=wc, b5=b); k_pad = n_pad
    r, wc, b, h, w, n_pad = _pack_conv_layer(p["dc3_w"], p["dc3_b"], 1, 2, h, w, k_pad, bt, True)
    packed.update(r6=r, w6=wc, b6=b)
    return packed


# -----------------------------------------------------------------------------
# The fused Pallas kernel: whole forward pass for Bt stacked batch elements.
# Activation layout: (Bt*H, W*C_pad) 2-D tiles, batch-major rows.
# -----------------------------------------------------------------------------
def _fused_forward_kernel(
    x_ref,
    r1_ref, w1_ref, b1_ref,
    r2_ref, w2_ref, b2_ref,
    r3_ref, w3_ref, b3_ref,
    elw_ref, elmask_ref, elfold_ref, elrows_ref, elb_ref,
    dlrep_ref, dlw_ref, dlmask_ref, dlb_ref,
    r4_ref, w4_ref, b4_ref,
    r5_ref, w5_ref, b5_ref,
    r6_ref, w6_ref, b6_ref,
    dec_ref, lat_ref,
):
    bf16, f32 = jnp.bfloat16, jnp.float32

    def sigmoid(v):                       # exact (review: avoid approx reciprocal drift)
        return 1.0 / (1.0 + jnp.exp(-v))

    def conv_block(a_bf, r_ref, w_ref, b_ref, act):
        # One wide matmul, then kh row-selection matmuls on lane-aligned slices.
        kh = r_ref.shape[0]
        n_pad = w_ref.shape[1] // kh
        p = jnp.dot(a_bf, w_ref[...], preferred_element_type=f32).astype(bf16)
        acc = jnp.dot(r_ref[0], p[:, 0:n_pad], preferred_element_type=f32)
        for dh in range(1, kh):                                   # static unroll (3)
            acc = acc + jnp.dot(r_ref[dh], p[:, dh * n_pad:(dh + 1) * n_pad],
                                preferred_element_type=f32)
        acc = acc + b_ref[...]
        return jnp.maximum(acc, 0.0) if act == "relu" else sigmoid(acc)

    # ---- encoder convolutions (activations stay in VMEM/vregs) -------------
    x = x_ref[0].astype(bf16)                                        # (Bt*17, 34)
    a1 = conv_block(x, r1_ref, w1_ref, b1_ref, "relu").astype(bf16)  # (Bt*19, 256)
    a2 = conv_block(a1, r2_ref, w2_ref, b2_ref, "relu").astype(bf16) # (Bt*17, 384)
    a3 = conv_block(a2, r3_ref, w3_ref, b3_ref, "relu").astype(bf16) # (Bt*8, 256)

    # ---- encoder_linear: one wide dot + block-diag mask + exact fold dots ---
    pe = jnp.dot(a3, elw_ref[...], preferred_element_type=f32)       # (Bt*8, 8L)
    pem = (pe * elmask_ref[...]).astype(bf16)                        # keep own h-block only
    u = jnp.dot(elrows_ref[...], pem, preferred_element_type=f32)    # (Bt, 8L)  exact select
    lat_pre = jnp.dot(u.astype(bf16), elfold_ref[...],
                      preferred_element_type=f32)                    # (Bt, L)   sum h-blocks
    lat = jnp.maximum(lat_pre + elb_ref[...], 0.0)                   # (Bt, L) f32
    lat_ref[...] = lat[None]

    # ---- decoder_linear: lane-dense single dot, no scratch round-trip -------
    lat_rep = jnp.dot(dlrep_ref[...], lat.astype(bf16),
                      preferred_element_type=f32).astype(bf16)       # (Bt*8, L) exact replicate
    pd = jnp.dot(lat_rep, dlw_ref[...], preferred_element_type=f32)  # (Bt*8, 8*256)
    pd = pd * dlmask_ref[...]
    n_row = dlb_ref.shape[1]                                         # 256
    n_blk = dlw_ref.shape[1] // n_row                                # 8
    d0 = pd[:, 0:n_row]
    for hh in range(1, n_blk):                                       # aligned lane-block sum
        d0 = d0 + pd[:, hh * n_row:(hh + 1) * n_row]
    d0 = sigmoid(d0 + dlb_ref[...]).astype(bf16)                     # (Bt*8, 256)

    # ---- decoder transposed convolutions ------------------------------------
    a4 = conv_block(d0, r4_ref, w4_ref, b4_ref, "relu").astype(bf16) # (Bt*17, 384)
    a5 = conv_block(a4, r5_ref, w5_ref, b5_ref, "relu").astype(bf16) # (Bt*19, 256)
    a6 = conv_block(a5, r6_ref, w6_ref, b6_ref, "sigmoid")           # (Bt*17, 128) f32

    n_out = dec_ref.shape[2]                                         # 34
    dec_ref[...] = a6[:, 0:n_out][None]


_WEIGHT_KEYS = ("r1", "w1", "b1", "r2", "w2", "b2", "r3", "w3", "b3",
                "el_wbig", "el_mask", "el_fold", "el_rows", "el_b",
                "dl_rep", "dl_wcat", "dl_mask", "dl_b",
                "r4", "w4", "b4", "r5", "w5", "b5", "r6", "w6", "b6")


def amphib_forward(x_nchw, packed, bt):
    B, C, H, W = x_nchw.shape
    assert B % bt == 0, "batch must be divisible by the stacking factor bt"
    nb = B // bt
    wc_in = W * C
    latent_dim = packed["el_b"].shape[1]

    # NCHW -> (nb, Bt*H, W*C): one tiny transpose + a free leading-dim reshape.
    x = jnp.transpose(x_nchw, (0, 2, 3, 1)).reshape(nb, bt * H, wc_in)

    weights = [packed[k] for k in _WEIGHT_KEYS]

    def _resident(shape):
        nd = len(shape)
        return pl.BlockSpec(shape, lambda i, _nd=nd: (0,) * _nd)   # loaded once, stays in VMEM

    in_specs = [pl.BlockSpec((1, bt * H, wc_in), lambda i: (i, 0, 0))]
    in_specs += [_resident(tuple(wgt.shape)) for wgt in weights]

    dec, lat = pl.pallas_call(
        _fused_forward_kernel,
        out_shape=(
            jax.ShapeDtypeStruct((nb, bt * H, wc_in), jnp.float32),
            jax.ShapeDtypeStruct((nb, bt, latent_dim), jnp.float32),
        ),
        grid=(nb,),
        in_specs=in_specs,
        out_specs=(
            pl.BlockSpec((1, bt * H, wc_in), lambda i: (i, 0, 0)),
            pl.BlockSpec((1, bt, latent_dim), lambda i: (i, 0, 0)),
        ),
        compiler_params=pltpu.CompilerParams(
            dimension_semantics=("parallel",),       # v7x: grid steps split across TCs
            vmem_limit_bytes=32 * 1024 * 1024,
        ),
    )(x, *weights)

    # TODO(synk): NCHW in/out layout forces one tiny transpose on each side of the
    # kernel; a pure reshape is not reachable because the kernel's row axis is H.
    decoded = jnp.transpose(dec.reshape(B, H, W, C), (0, 3, 1, 2))   # -> NCHW
    return decoded, lat.reshape(B, latent_dim)


# -----------------------------------------------------------------------------
# Pure-JAX (f32) reference of the same forward, used only for a numeric check.
# -----------------------------------------------------------------------------
def _ref_valid_conv_nhwc(x, w_hwio, b, stride):
    B, H, W, Cin = x.shape
    KH, KW, _, Cout = w_hwio.shape
    Ho = (H - KH) // stride + 1
    Wo = (W - KW) // stride + 1
    cols = [x[:, i:i + (Ho - 1) * stride + 1:stride, j:j + (Wo - 1) * stride + 1:stride, :]
            for i in range(KH) for j in range(KW)]
    patches = jnp.stack(cols, axis=3).reshape(B, Ho, Wo, KH * KW * Cin)
    return patches @ w_hwio.reshape(KH * KW * Cin, Cout) + b


def _ref_conv2d(x, w_oihw, b, stride, padding):
    if padding:
        x = jnp.pad(x, ((0, 0), (padding, padding), (padding, padding), (0, 0)))
    return _ref_valid_conv_nhwc(x, jnp.transpose(w_oihw, (2, 3, 1, 0)), b, stride)


def _ref_conv_transpose2d(x, w_iohw, b, stride, padding):
    Cin, Cout, KH, KW = w_iohw.shape
    B, H, W, _ = x.shape
    if stride > 1:
        xd = jnp.zeros((B, (H - 1) * stride + 1, (W - 1) * stride + 1, Cin), x.dtype)
        x = xd.at[:, ::stride, ::stride, :].set(x)
    ph, pw = KH - 1 - padding, KW - 1 - padding
    x = jnp.pad(x, ((0, 0), (ph, ph), (pw, pw), (0, 0)))
    w_hwio = jnp.transpose(w_iohw[:, :, ::-1, ::-1], (2, 3, 0, 1))
    return _ref_valid_conv_nhwc(x, w_hwio, b, 1)


def _reference_forward(x_nchw, p):
    relu = lambda v: jnp.maximum(v, 0.0)
    x = jnp.transpose(x_nchw, (0, 2, 3, 1))
    h = relu(_ref_conv2d(x, p["ec1_w"], p["ec1_b"], 1, 2))
    h = relu(_ref_conv2d(h, p["ec2_w"], p["ec2_b"], 1, 0))
    h = relu(_ref_conv2d(h, p["ec3_w"], p["ec3_b"], 2, 0))
    B, Ho, Wo, C = h.shape
    flat = jnp.transpose(h, (0, 3, 1, 2)).reshape(B, C * Ho * Wo)
    latent = relu(flat @ p["el_w"] + p["el_b"])
    dec = jax.nn.sigmoid(latent @ p["dl_w"] + p["dl_b"])
    d = jnp.transpose(dec.reshape(B, C, Ho, Wo), (0, 2, 3, 1))
    d = relu(_ref_conv_transpose2d(d, p["dc1_w"], p["dc1_b"], 2, 0))
    d = relu(_ref_conv_transpose2d(d, p["dc2_w"], p["dc2_b"], 1, 0))
    d = jax.nn.sigmoid(_ref_conv_transpose2d(d, p["dc3_w"], p["dc3_b"], 1, 2))
    return jnp.transpose(d, (0, 3, 1, 2)), latent


if __name__ == "__main__":
    # hparams: radii=[8,16] -> radius=8, h_w=17, C_in=2 ; latent_space_size=32
    radii = [8, 16]
    radius = min(radii)
    h_w = 2 * radius + 1          # 17 (required so the encoder flattens to 2048)
    c_in = len(radii)
    latent_size = 32
    batch = 2
    bt = 2                        # batch elements stacked along M per grid step

    key = jax.random.PRNGKey(0)
    k_x, k_p = jax.random.split(key)
    x = jax.random.normal(k_x, (batch, c_in, h_w, h_w), jnp.float32)   # NCHW input
    params = init_params(k_p, c_in, latent_size)
    packed = pack_params(params, h_w, bt)     # one-time weight folding, outside jit

    fwd = jax.jit(amphib_forward, static_argnames=("bt",))
    decoded, latent = fwd(x, packed, bt=bt)
    decoded = jax.block_until_ready(decoded)
    latent = jax.block_until_ready(latent)

    assert decoded.shape == (batch, c_in, h_w, h_w), decoded.shape
    assert latent.shape == (batch, latent_size), latent.shape
    assert decoded.dtype == jnp.float32 and latent.dtype == jnp.float32

    # Numeric check vs. the plain-JAX f32 reference (kernel uses bf16 MXU
    # operands, so use a comfortable tolerance).
    ref_dec, ref_lat = jax.jit(_reference_forward)(x, params)
    np.testing.assert_allclose(np.asarray(decoded), np.asarray(ref_dec), rtol=0.05, atol=0.03)
    np.testing.assert_allclose(np.asarray(latent), np.asarray(ref_lat), rtol=0.05, atol=0.03)

    print("KERNEL_OK")
</pallas_src>

<mosaic_0001>
module attributes {stable_mosaic.version = 11 : i64} {
  func.func @_fused_forward_kernel(%arg0: i32, %arg1: memref<1x34x34xf32, #tpu.memory_space<vmem>>, %arg2: memref<3x38x34xbf16, #tpu.memory_space<vmem>>, %arg3: memref<34x768xbf16, #tpu.memory_space<vmem>>, %arg4: memref<1x256xf32, #tpu.memory_space<vmem>>, %arg5: memref<3x34x38xbf16, #tpu.memory_space<vmem>>, %arg6: memref<256x1152xbf16, #tpu.memory_space<vmem>>, %arg7: memref<1x384xf32, #tpu.memory_space<vmem>>, %arg8: memref<3x16x34xbf16, #tpu.memory_space<vmem>>, %arg9: memref<384x768xbf16, #tpu.memory_space<vmem>>, %arg10: memref<1x256xf32, #tpu.memory_space<vmem>>, %arg11: memref<256x256xbf16, #tpu.memory_space<vmem>>, %arg12: memref<16x256xf32, #tpu.memory_space<vmem>>, %arg13: memref<256x32xbf16, #tpu.memory_space<vmem>>, %arg14: memref<2x16xbf16, #tpu.memory_space<vmem>>, %arg15: memref<1x32xf32, #tpu.memory_space<vmem>>, %arg16: memref<16x2xbf16, #tpu.memory_space<vmem>>, %arg17: memref<32x2048xbf16, #tpu.memory_space<vmem>>, %arg18: memref<16x2048xf32, #tpu.memory_space<vmem>>, %arg19: memref<16x256xf32, #tpu.memory_space<vmem>>, %arg20: memref<3x34x16xbf16, #tpu.memory_space<vmem>>, %arg21: memref<256x1152xbf16, #tpu.memory_space<vmem>>, %arg22: memref<1x384xf32, #tpu.memory_space<vmem>>, %arg23: memref<3x38x34xbf16, #tpu.memory_space<vmem>>, %arg24: memref<384x768xbf16, #tpu.memory_space<vmem>>, %arg25: memref<1x256xf32, #tpu.memory_space<vmem>>, %arg26: memref<3x34x38xbf16, #tpu.memory_space<vmem>>, %arg27: memref<256x384xbf16, #tpu.memory_space<vmem>>, %arg28: memref<1x128xf32, #tpu.memory_space<vmem>>, %arg29: memref<1x34x34xf32, #tpu.memory_space<vmem>>, %arg30: memref<1x2x32xf32, #tpu.memory_space<vmem>>) attributes {dimension_semantics = [#tpu.dimension_semantics<parallel>], iteration_bounds = array<i64: 1>, scalar_prefetch = 0 : i64, scratch_operands = 0 : i64, tpu.core_type = #tpu.core_type<tc>, window_params = [{transform_indices = @transform_0, window_bounds = array<i64: 1, 34, 34>}, {pipeline_mode = #tpu.pipeline_mode<synchronous>, transform_indices = @transform_1, window_bounds = array<i64: 3, 38, 34>}, {pipeline_mode = #tpu.pipeline_mode<synchronous>, transform_indices = @transform_2, window_bounds = array<i64: 34, 768>}, {pipeline_mode = #tpu.pipeline_mode<synchronous>, transform_indices = @transform_3, window_bounds = array<i64: 1, 256>}, {pipeline_mode = #tpu.pipeline_mode<synchronous>, transform_indices = @transform_4, window_bounds = array<i64: 3, 34, 38>}, {pipeline_mode = #tpu.pipeline_mode<synchronous>, transform_indices = @transform_5, window_bounds = array<i64: 256, 1152>}, {pipeline_mode = #tpu.pipeline_mode<synchronous>, transform_indices = @transform_6, window_bounds = array<i64: 1, 384>}, {pipeline_mode = #tpu.pipeline_mode<synchronous>, transform_indices = @transform_7, window_bounds = array<i64: 3, 16, 34>}, {pipeline_mode = #tpu.pipeline_mode<synchronous>, transform_indices = @transform_8, window_bounds = array<i64: 384, 768>}, {pipeline_mode = #tpu.pipeline_mode<synchronous>, transform_indices = @transform_9, window_bounds = array<i64: 1, 256>}, {pipeline_mode = #tpu.pipeline_mode<synchronous>, transform_indices = @transform_10, window_bounds = array<i64: 256, 256>}, {pipeline_mode = #tpu.pipeline_mode<synchronous>, transform_indices = @transform_11, window_bounds = array<i64: 16, 256>}, {pipeline_mode = #tpu.pipeline_mode<synchronous>, transform_indices = @transform_12, window_bounds = array<i64: 256, 32>}, {pipeline_mode = #tpu.pipeline_mode<synchronous>, transform_indices = @transform_13, window_bounds = array<i64: 2, 16>}, {pipeline_mode = #tpu.pipeline_mode<synchronous>, transform_indices = @transform_14, window_bounds = array<i64: 1, 32>}, {pipeline_mode = #tpu.pipeline_mode<synchronous>, transform_indices = @transform_15, window_bounds = array<i64: 16, 2>}, {pipeline_mode = #tpu.pipeline_mode<synchronous>, transform_indices = @transform_16, window_bounds = array<i64: 32, 2048>}, {pipeline_mode = #tpu.pipeline_mode<synchronous>, transform_indices = @transform_17, window_bounds = array<i64: 16, 2048>}, {pipeline_mode = #tpu.pipeline_mode<synchronous>, transform_indices = @transform_18, window_bounds = array<i64: 16, 256>}, {pipeline_mode = #tpu.pipeline_mode<synchronous>, transform_indices = @transform_19, window_bounds = array<i64: 3, 34, 16>}, {pipeline_mode = #tpu.pipeline_mode<synchronous>, transform_indices = @transform_20, window_bounds = array<i64: 256, 1152>}, {pipeline_mode = #tpu.pipeline_mode<synchronous>, transform_indices = @transform_21, window_bounds = array<i64: 1, 384>}, {pipeline_mode = #tpu.pipeline_mode<synchronous>, transform_indices = @transform_22, window_bounds = array<i64: 3, 38, 34>}, {pipeline_mode = #tpu.pipeline_mode<synchronous>, transform_indices = @transform_23, window_bounds = array<i64: 384, 768>}, {pipeline_mode = #tpu.pipeline_mode<synchronous>, transform_indices = @transform_24, window_bounds = array<i64: 1, 256>}, {pipeline_mode = #tpu.pipeline_mode<synchronous>, transform_indices = @transform_25, window_bounds = array<i64: 3, 34, 38>}, {pipeline_mode = #tpu.pipeline_mode<synchronous>, transform_indices = @transform_26, window_bounds = array<i64: 256, 384>}, {pipeline_mode = #tpu.pipeline_mode<synchronous>, transform_indices = @transform_27, window_bounds = array<i64: 1, 128>}, {transform_indices = @transform_28, window_bounds = array<i64: 1, 34, 34>}, {transform_indices = @transform_29, window_bounds = array<i64: 1, 2, 32>}]} {
    %c0 = arith.constant 0 : index
    %c0_0 = arith.constant 0 : index
    %c0_1 = arith.constant 0 : index
    %0 = vector.load %arg1[%c0, %c0_0, %c0_1] : memref<1x34x34xf32, #tpu.memory_space<vmem>>, vector<1x34x34xf32>
    %1 = vector.shape_cast %0 : vector<1x34x34xf32> to vector<34x34xf32>
    %2 = arith.truncf %1 : vector<34x34xf32> to vector<34x34xbf16>
    %c0_2 = arith.constant 0 : index
    %c0_3 = arith.constant 0 : index
    %3 = vector.load %arg3[%c0_2, %c0_3] : memref<34x768xbf16, #tpu.memory_space<vmem>>, vector<34x768xbf16>
    %cst = arith.constant dense<0.000000e+00> : vector<34x768xf32>
    %4 = tpu.matmul %2, %3, %cst {dimension_numbers = #tpu.dot_dimension_numbers<[1], [0], [0], [1], [0, 0, 1, 1], [], []>} : vector<34x34xbf16>, vector<34x768xbf16>, vector<34x768xf32> -> vector<34x768xf32>
    %5 = arith.truncf %4 : vector<34x768xf32> to vector<34x768xbf16>
    %c0_4 = arith.constant 0 : index
    %c0_5 = arith.constant 0 : index
    %c0_6 = arith.constant 0 : index
    %6 = vector.load %arg2[%c0_4, %c0_5, %c0_6] : memref<3x38x34xbf16, #tpu.memory_space<vmem>>, vector<1x38x34xbf16>
    %7 = vector.shape_cast %6 : vector<1x38x34xbf16> to vector<38x34xbf16>
    %8 = vector.extract_strided_slice %5 {offsets = [0, 0], sizes = [34, 256], strides = [1, 1]} : vector<34x768xbf16> to vector<34x256xbf16>
    %cst_7 = arith.constant dense<0.000000e+00> : vector<38x256xf32>
    %9 = tpu.matmul %7, %8, %cst_7 {dimension_numbers = #tpu.dot_dimension_numbers<[1], [0], [0], [1], [0, 0, 1, 1], [], []>} : vector<38x34xbf16>, vector<34x256xbf16>, vector<38x256xf32> -> vector<38x256xf32>
    %c1 = arith.constant 1 : index
    %c0_8 = arith.constant 0 : index
    %c0_9 = arith.constant 0 : index
    %10 = vector.load %arg2[%c1, %c0_8, %c0_9] : memref<3x38x34xbf16, #tpu.memory_space<vmem>>, vector<1x38x34xbf16>
    %11 = vector.shape_cast %10 : vector<1x38x34xbf16> to vector<38x34xbf16>
    %12 = vector.extract_strided_slice %5 {offsets = [0, 256], sizes = [34, 256], strides = [1, 1]} : vector<34x768xbf16> to vector<34x256xbf16>
    %cst_10 = arith.constant dense<0.000000e+00> : vector<38x256xf32>
    %13 = tpu.matmul %11, %12, %cst_10 {dimension_numbers = #tpu.dot_dimension_numbers<[1], [0], [0], [1], [0, 0, 1, 1], [], []>} : vector<38x34xbf16>, vector<34x256xbf16>, vector<38x256xf32> -> vector<38x256xf32>
    %14 = arith.addf %9, %13 : vector<38x256xf32>
    %c2 = arith.constant 2 : index
    %c0_11 = arith.constant 0 : index
    %c0_12 = arith.constant 0 : index
    %15 = vector.load %arg2[%c2, %c0_11, %c0_12] : memref<3x38x34xbf16, #tpu.memory_space<vmem>>, vector<1x38x34xbf16>
    %16 = vector.shape_cast %15 : vector<1x38x34xbf16> to vector<38x34xbf16>
    %17 = vector.extract_strided_slice %5 {offsets = [0, 512], sizes = [34, 256], strides = [1, 1]} : vector<34x768xbf16> to vector<34x256xbf16>
    %cst_13 = arith.constant dense<0.000000e+00> : vector<38x256xf32>
    %18 = tpu.matmul %16, %17, %cst_13 {dimension_numbers = #tpu.dot_dimension_numbers<[1], [0], [0], [1], [0, 0, 1, 1], [], []>} : vector<38x34xbf16>, vector<34x256xbf16>, vector<38x256xf32> -> vector<38x256xf32>
    %19 = arith.addf %14, %18 : vector<38x256xf32>
    %c0_14 = arith.constant 0 : index
    %c0_15 = arith.constant 0 : index
    %20 = vector.load %arg4[%c0_14, %c0_15] : memref<1x256xf32, #tpu.memory_space<vmem>>, vector<1x256xf32>
    %21 = vector.broadcast %20 : vector<1x256xf32> to vector<38x256xf32>
    %22 = arith.addf %19, %21 : vector<38x256xf32>
    %cst_16 = arith.constant 0.000000e+00 : f32
    %23 = vector.broadcast %cst_16 : f32 to vector<38x256xf32>
    %24 = arith.maximumf %22, %23 : vector<38x256xf32>
    %25 = arith.truncf %24 : vector<38x256xf32> to vector<38x256xbf16>
    %c0_17 = arith.constant 0 : index
    %c0_18 = arith.constant 0 : index
    %26 = vector.load %arg6[%c0_17, %c0_18] : memref<256x1152xbf16, #tpu.memory_space<vmem>>, vector<256x1152xbf16>
    %cst_19 = arith.constant dense<0.000000e+00> : vector<38x1152xf32>
    %27 = tpu.matmul %25, %26, %cst_19 {dimension_numbers = #tpu.dot_dimension_numbers<[1], [0], [0], [1], [0, 0, 1, 1], [], []>} : vector<38x256xbf16>, vector<256x1152xbf16>, vector<38x1152xf32> -> vector<38x1152xf32>
    %28 = arith.truncf %27 : vector<38x1152xf32> to vector<38x1152xbf16>
    %c0_20 = arith.constant 0 : index
    %c0_21 = arith.constant 0 : index
    %c0_22 = arith.constant 0 : index
    %29 = vector.load %arg5[%c0_20, %c0_21, %c0_22] : memref<3x34x38xbf16, #tpu.memory_space<vmem>>, vector<1x34x38xbf16>
    %30 = vector.shape_cast %29 : vector<1x34x38xbf16> to vector<34x38xbf16>
    %31 = vector.extract_strided_slice %28 {offsets = [0, 0], sizes = [38, 384], strides = [1, 1]} : vector<38x1152xbf16> to vector<38x384xbf16>
    %cst_23 = arith.constant dense<0.000000e+00> : vector<34x384xf32>
    %32 = tpu.matmul %30, %31, %cst_23 {dimension_numbers = #tpu.dot_dimension_numbers<[1], [0], [0], [1], [0, 0, 1, 1], [], []>} : vector<34x38xbf16>, vector<38x384xbf16>, vector<34x384xf32> -> vector<34x384xf32>
    %c1_24 = arith.constant 1 : index
    %c0_25 = arith.constant 0 : index
    %c0_26 = arith.constant 0 : index
    %33 = vector.load %arg5[%c1_24, %c0_25, %c0_26] : memref<3x34x38xbf16, #tpu.memory_space<vmem>>, vector<1x34x38xbf16>
    %34 = vector.shape_cast %33 : vector<1x34x38xbf16> to vector<34x38xbf16>
    %35 = vector.extract_strided_slice %28 {offsets = [0, 384], sizes = [38, 384], strides = [1, 1]} : vector<38x1152xbf16> to vector<38x384xbf16>
    %cst_27 = arith.constant dense<0.000000e+00> : vector<34x384xf32>
    %36 = tpu.matmul %34, %35, %cst_27 {dimension_numbers = #tpu.dot_dimension_numbers<[1], [0], [0], [1], [0, 0, 1, 1], [], []>} : vector<34x38xbf16>, vector<38x384xbf16>, vector<34x384xf32> -> vector<34x384xf32>
    %37 = arith.addf %32, %36 : vector<34x384xf32>
    %c2_28 = arith.constant 2 : index
    %c0_29 = arith.constant 0 : index
    %c0_30 = arith.constant 0 : index
    %38 = vector.load %arg5[%c2_28, %c0_29, %c0_30] : memref<3x34x38xbf16, #tpu.memory_space<vmem>>, vector<1x34x38xbf16>
    %39 = vector.shape_cast %38 : vector<1x34x38xbf16> to vector<34x38xbf16>
    %40 = vector.extract_strided_slice %28 {offsets = [0, 768], sizes = [38, 384], strides = [1, 1]} : vector<38x1152xbf16> to vector<38x384xbf16>
    %cst_31 = arith.constant dense<0.000000e+00> : vector<34x384xf32>
    %41 = tpu.matmul %39, %40, %cst_31 {dimension_numbers = #tpu.dot_dimension_numbers<[1], [0], [0], [1], [0, 0, 1, 1], [], []>} : vector<34x38xbf16>, vector<38x384xbf16>, vector<34x384xf32> -> vector<34x384xf32>
    %42 = arith.addf %37, %41 : vector<34x384xf32>
    %c0_32 = arith.constant 0 : index
    %c0_33 = arith.constant 0 : index
    %43 = vector.load %arg7[%c0_32, %c0_33] : memref<1x384xf32, #tpu.memory_space<vmem>>, vector<1x384xf32>
    %44 = vector.broadcast %43 : vector<1x384xf32> to vector<34x384xf32>
    %45 = arith.addf %42, %44 : vector<34x384xf32>
    %cst_34 = arith.constant 0.000000e+00 : f32
    %46 = vector.broadcast %cst_34 : f32 to vector<34x384xf32>
    %47 = arith.maximumf %45, %46 : vector<34x384xf32>
    %48 = arith.truncf %47 : vector<34x384xf32> to vector<34x384xbf16>
    %c0_35 = arith.constant 0 : index
    %c0_36 = arith.constant 0 : index
    %49 = vector.load %arg9[%c0_35, %c0_36] : memref<384x768xbf16, #tpu.memory_space<vmem>>, vector<384x768xbf16>
    %cst_37 = arith.constant dense<0.000000e+00> : vector<34x768xf32>
    %50 = tpu.matmul %48, %49, %cst_37 {dimension_numbers = #tpu.dot_dimension_numbers<[1], [0], [0], [1], [0, 0, 1, 1], [], []>} : vector<34x384xbf16>, vector<384x768xbf16>, vector<34x768xf32> -> vector<34x768xf32>
    %51 = arith.truncf %50 : vector<34x768xf32> to vector<34x768xbf16>
    %c0_38 = arith.constant 0 : index
    %c0_39 = arith.constant 0 : index
    %c0_40 = arith.constant 0 : index
    %52 = vector.load %arg8[%c0_38, %c0_39, %c0_40] : memref<3x16x34xbf16, #tpu.memory_space<vmem>>, vector<1x16x34xbf16>
    %53 = vector.shape_cast %52 : vector<1x16x34xbf16> to vector<16x34xbf16>
    %54 = vector.extract_strided_slice %51 {offsets = [0, 0], sizes = [34, 256], strides = [1, 1]} : vector<34x768xbf16> to vector<34x256xbf16>
    %cst_41 = arith.constant dense<0.000000e+00> : vector<16x256xf32>
    %55 = tpu.matmul %53, %54, %cst_41 {dimension_numbers = #tpu.dot_dimension_numbers<[1], [0], [0], [1], [0, 0, 1, 1], [], []>} : vector<16x34xbf16>, vector<34x256xbf16>, vector<16x256xf32> -> vector<16x256xf32>
    %c1_42 = arith.constant 1 : index
    %c0_43 = arith.constant 0 : index
    %c0_44 = arith.constant 0 : index
    %56 = vector.load %arg8[%c1_42, %c0_43, %c0_44] : memref<3x16x34xbf16, #tpu.memory_space<vmem>>, vector<1x16x34xbf16>
    %57 = vector.shape_cast %56 : vector<1x16x34xbf16> to vector<16x34xbf16>
    %58 = vector.extract_strided_slice %51 {offsets = [0, 256], sizes = [34, 256], strides = [1, 1]} : vector<34x768xbf16> to vector<34x256xbf16>
    %cst_45 = arith.constant dense<0.000000e+00> : vector<16x256xf32>
    %59 = tpu.matmul %57, %58, %cst_45 {dimension_numbers = #tpu.dot_dimension_numbers<[1], [0], [0], [1], [0, 0, 1, 1], [], []>} : vector<16x34xbf16>, vector<34x256xbf16>, vector<16x256xf32> -> vector<16x256xf32>
    %60 = arith.addf %55, %59 : vector<16x256xf32>
    %c2_46 = arith.constant 2 : index
    %c0_47 = arith.constant 0 : index
    %c0_48 = arith.constant 0 : index
    %61 = vector.load %arg8[%c2_46, %c0_47, %c0_48] : memref<3x16x34xbf16, #tpu.memory_space<vmem>>, vector<1x16x34xbf16>
    %62 = vector.shape_cast %61 : vector<1x16x34xbf16> to vector<16x34xbf16>
    %63 = vector.extract_strided_slice %51 {offsets = [0, 512], sizes = [34, 256], strides = [1, 1]} : vector<34x768xbf16> to vector<34x256xbf16>
    %cst_49 = arith.constant dense<0.000000e+00> : vector<16x256xf32>
    %64 = tpu.matmul %62, %63, %cst_49 {dimension_numbers = #tpu.dot_dimension_numbers<[1], [0], [0], [1], [0, 0, 1, 1], [], []>} : vector<16x34xbf16>, vector<34x256xbf16>, vector<16x256xf32> -> vector<16x256xf32>
    %65 = arith.addf %60, %64 : vector<16x256xf32>
    %c0_50 = arith.constant 0 : index
    %c0_51 = arith.constant 0 : index
    %66 = vector.load %arg10[%c0_50, %c0_51] : memref<1x256xf32, #tpu.memory_space<vmem>>, vector<1x256xf32>
    %67 = vector.broadcast %66 : vector<1x256xf32> to vector<16x256xf32>
    %68 = arith.addf %65, %67 : vector<16x256xf32>
    %cst_52 = arith.constant 0.000000e+00 : f32
    %69 = vector.broadcast %cst_52 : f32 to vector<16x256xf32>
    %70 = arith.maximumf %68, %69 : vector<16x256xf32>
    %71 = arith.truncf %70 : vector<16x256xf32> to vector<16x256xbf16>
    %c0_53 = arith.constant 0 : index
    %c0_54 = arith.constant 0 : index
    %72 = vector.load %arg11[%c0_53, %c0_54] : memref<256x256xbf16, #tpu.memory_space<vmem>>, vector<256x256xbf16>
    %cst_55 = arith.constant dense<0.000000e+00> : vector<16x256xf32>
    %73 = tpu.matmul %71, %72, %cst_55 {dimension_numbers = #tpu.dot_dimension_numbers<[1], [0], [0], [1], [0, 0, 1, 1], [], []>} : vector<16x256xbf16>, vector<256x256xbf16>, vector<16x256xf32> -> vector<16x256xf32>
    %c0_56 = arith.constant 0 : index
    %c0_57 = arith.constant 0 : index
    %74 = vector.load %arg12[%c0_56, %c0_57] : memref<16x256xf32, #tpu.memory_space<vmem>>, vector<16x256xf32>
    %75 = arith.mulf %73, %74 : vector<16x256xf32>
    %76 = arith.truncf %75 : vector<16x256xf32> to vector<16x256xbf16>
    %c0_58 = arith.constant 0 : index
    %c0_59 = arith.constant 0 : index
    %77 = vector.load %arg14[%c0_58, %c0_59] : memref<2x16xbf16, #tpu.memory_space<vmem>>, vector<2x16xbf16>
    %cst_60 = arith.constant dense<0.000000e+00> : vector<2x256xf32>
    %78 = tpu.matmul %77, %76, %cst_60 {dimension_numbers = #tpu.dot_dimension_numbers<[1], [0], [0], [1], [0, 0, 1, 1], [], []>} : vector<2x16xbf16>, vector<16x256xbf16>, vector<2x256xf32> -> vector<2x256xf32>
    %79 = arith.truncf %78 : vector<2x256xf32> to vector<2x256xbf16>
    %c0_61 = arith.constant 0 : index
    %c0_62 = arith.constant 0 : index
    %80 = vector.load %arg13[%c0_61, %c0_62] : memref<256x32xbf16, #tpu.memory_space<vmem>>, vector<256x32xbf16>
    %cst_63 = arith.constant dense<0.000000e+00> : vector<2x32xf32>
    %81 = tpu.matmul %79, %80, %cst_63 {dimension_numbers = #tpu.dot_dimension_numbers<[1], [0], [0], [1], [0, 0, 1, 1], [], []>} : vector<2x256xbf16>, vector<256x32xbf16>, vector<2x32xf32> -> vector<2x32xf32>
    %c0_64 = arith.constant 0 : index
    %c0_65 = arith.constant 0 : index
    %82 = vector.load %arg15[%c0_64, %c0_65] : memref<1x32xf32, #tpu.memory_space<vmem>>, vector<1x32xf32>
    %83 = vector.broadcast %82 : vector<1x32xf32> to vector<2x32xf32>
    %84 = arith.addf %81, %83 : vector<2x32xf32>
    %cst_66 = arith.constant 0.000000e+00 : f32
    %85 = vector.broadcast %cst_66 : f32 to vector<2x32xf32>
    %86 = arith.maximumf %84, %85 : vector<2x32xf32>
    %87 = vector.shape_cast %86 : vector<2x32xf32> to vector<1x2x32xf32>
    %c0_67 = arith.constant 0 : index
    %c0_68 = arith.constant 0 : index
    %c0_69 = arith.constant 0 : index
    %88 = vector.load %arg30[%c0_67, %c0_68, %c0_69] : memref<1x2x32xf32, #tpu.memory_space<vmem>>, vector<1x2x32xf32>
    tpu.vector_store %arg30[%c0_67, %c0_68, %c0_69], %87 {strides = array<i32>} : memref<1x2x32xf32, #tpu.memory_space<vmem>>, vector<1x2x32xf32>,
    %c0_70 = arith.constant 0 : index
    %c0_71 = arith.constant 0 : index
    %89 = vector.load %arg16[%c0_70, %c0_71] : memref<16x2xbf16, #tpu.memory_space<vmem>>, vector<16x2xbf16>
    %90 = arith.truncf %86 : vector<2x32xf32> to vector<2x32xbf16>
    %cst_72 = arith.constant dense<0.000000e+00> : vector<16x32xf32>
    %91 = tpu.matmul %89, %90, %cst_72 {dimension_numbers = #tpu.dot_dimension_numbers<[1], [0], [0], [1], [0, 0, 1, 1], [], []>} : vector<16x2xbf16>, vector<2x32xbf16>, vector<16x32xf32> -> vector<16x32xf32>
    %92 = arith.truncf %91 : vector<16x32xf32> to vector<16x32xbf16>
    %c0_73 = arith.constant 0 : index
    %c0_74 = arith.constant 0 : index
    %93 = vector.load %arg17[%c0_73, %c0_74] : memref<32x2048xbf16, #tpu.memory_space<vmem>>, vector<32x2048xbf16>
    %cst_75 = arith.constant dense<0.000000e+00> : vector<16x2048xf32>
    %94 = tpu.matmul %92, %93, %cst_75 {dimension_numbers = #tpu.dot_dimension_numbers<[1], [0], [0], [1], [0, 0, 1, 1], [], []>} : vector<16x32xbf16>, vector<32x2048xbf16>, vector<16x2048xf32> -> vector<16x2048xf32>
    %c0_76 = arith.constant 0 : index
    %c0_77 = arith.constant 0 : index
    %95 = vector.load %arg18[%c0_76, %c0_77] : memref<16x2048xf32, #tpu.memory_space<vmem>>, vector<16x2048xf32>
    %96 = arith.mulf %94, %95 : vector<16x2048xf32>
    %97 = vector.extract_strided_slice %96 {offsets = [0, 0], sizes = [16, 256], strides = [1, 1]} : vector<16x2048xf32> to vector<16x256xf32>
    %98 = vector.extract_strided_slice %96 {offsets = [0, 256], sizes = [16, 256], strides = [1, 1]} : vector<16x2048xf32> to vector<16x256xf32>
    %99 = arith.addf %97, %98 : vector<16x256xf32>
    %100 = vector.extract_strided_slice %96 {offsets = [0, 512], sizes = [16, 256], strides = [1, 1]} : vector<16x2048xf32> to vector<16x256xf32>
    %101 = arith.addf %99, %100 : vector<16x256xf32>
    %102 = vector.extract_strided_slice %96 {offsets = [0, 768], sizes = [16, 256], strides = [1, 1]} : vector<16x2048xf32> to vector<16x256xf32>
    %103 = arith.addf %101, %102 : vector<16x256xf32>
    %104 = vector.extract_strided_slice %96 {offsets = [0, 1024], sizes = [16, 256], strides = [1, 1]} : vector<16x2048xf32> to vector<16x256xf32>
    %105 = arith.addf %103, %104 : vector<16x256xf32>
    %106 = vector.extract_strided_slice %96 {offsets = [0, 1280], sizes = [16, 256], strides = [1, 1]} : vector<16x2048xf32> to vector<16x256xf32>
    %107 = arith.addf %105, %106 : vector<16x256xf32>
    %108 = vector.extract_strided_slice %96 {offsets = [0, 1536], sizes = [16, 256], strides = [1, 1]} : vector<16x2048xf32> to vector<16x256xf32>
    %109 = arith.addf %107, %108 : vector<16x256xf32>
    %110 = vector.extract_strided_slice %96 {offsets = [0, 1792], sizes = [16, 256], strides = [1, 1]} : vector<16x2048xf32> to vector<16x256xf32>
    %111 = arith.addf %109, %110 : vector<16x256xf32>
    %c0_78 = arith.constant 0 : index
    %c0_79 = arith.constant 0 : index
    %112 = vector.load %arg19[%c0_78, %c0_79] : memref<16x256xf32, #tpu.memory_space<vmem>>, vector<16x256xf32>
    %113 = arith.addf %111, %112 : vector<16x256xf32>
    %cst_80 = arith.constant 0.000000e+00 : f32
    %114 = vector.broadcast %cst_80 : f32 to vector<16x256xf32>
    %115 = arith.subf %114, %113 : vector<16x256xf32>
    %116 = math.exp %115 : vector<16x256xf32>
    %cst_81 = arith.constant 1.000000e+00 : f32
    %117 = vector.broadcast %cst_81 : f32 to vector<16x256xf32>
    %118 = arith.addf %117, %116 : vector<16x256xf32>
    %cst_82 = arith.constant 1.000000e+00 : f32
    %119 = vector.broadcast %cst_82 : f32 to vector<16x256xf32>
    %120 = arith.divf %119, %118 : vector<16x256xf32>
    %121 = arith.truncf %120 : vector<16x256xf32> to vector<16x256xbf16>
    %c0_83 = arith.constant 0 : index
    %c0_84 = arith.constant 0 : index
    %122 = vector.load %arg21[%c0_83, %c0_84] : memref<256x1152xbf16, #tpu.memory_space<vmem>>, vector<256x1152xbf16>
    %cst_85 = arith.constant dense<0.000000e+00> : vector<16x1152xf32>
    %123 = tpu.matmul %121, %122, %cst_85 {dimension_numbers = #tpu.dot_dimension_numbers<[1], [0], [0], [1], [0, 0, 1, 1], [], []>} : vector<16x256xbf16>, vector<256x1152xbf16>, vector<16x1152xf32> -> vector<16x1152xf32>
    %124 = arith.truncf %123 : vector<16x1152xf32> to vector<16x1152xbf16>
    %c0_86 = arith.constant 0 : index
    %c0_87 = arith.constant 0 : index
    %c0_88 = arith.constant 0 : index
    %125 = vector.load %arg20[%c0_86, %c0_87, %c0_88] : memref<3x34x16xbf16, #tpu.memory_space<vmem>>, vector<1x34x16xbf16>
    %126 = vector.shape_cast %125 : vector<1x34x16xbf16> to vector<34x16xbf16>
    %127 = vector.extract_strided_slice %124 {offsets = [0, 0], sizes = [16, 384], strides = [1, 1]} : vector<16x1152xbf16> to vector<16x384xbf16>
    %cst_89 = arith.constant dense<0.000000e+00> : vector<34x384xf32>
    %128 = tpu.matmul %126, %127, %cst_89 {dimension_numbers = #tpu.dot_dimension_numbers<[1], [0], [0], [1], [0, 0, 1, 1], [], []>} : vector<34x16xbf16>, vector<16x384xbf16>, vector<34x384xf32> -> vector<34x384xf32>
    %c1_90 = arith.constant 1 : index
    %c0_91 = arith.constant 0 : index
    %c0_92 = arith.constant 0 : index
    %129 = vector.load %arg20[%c1_90, %c0_91, %c0_92] : memref<3x34x16xbf16, #tpu.memory_space<vmem>>, vector<1x34x16xbf16>
    %130 = vector.shape_cast %129 : vector<1x34x16xbf16> to vector<34x16xbf16>
    %131 = vector.extract_strided_slice %124 {offsets = [0, 384], sizes = [16, 384], strides = [1, 1]} : vector<16x1152xbf16> to vector<16x384xbf16>
    %cst_93 = arith.constant dense<0.000000e+00> : vector<34x384xf32>
    %132 = tpu.matmul %130, %131, %cst_93 {dimension_numbers = #tpu.dot_dimension_numbers<[1], [0], [0], [1], [0, 0, 1, 1], [], []>} : vector<34x16xbf16>, vector<16x384xbf16>, vector<34x384xf32> -> vector<34x384xf32>
    %133 = arith.addf %128, %132 : vector<34x384xf32>
    %c2_94 = arith.constant 2 : index
    %c0_95 = arith.constant 0 : index
    %c0_96 = arith.constant 0 : index
    %134 = vector.load %arg20[%c2_94, %c0_95, %c0_96] : memref<3x34x16xbf16, #tpu.memory_space<vmem>>, vector<1x34x16xbf16>
    %135 = vector.shape_cast %134 : vector<1x34x16xbf16> to vector<34x16xbf16>
    %136 = vector.extract_strided_slice %124 {offsets = [0, 768], sizes = [16, 384], strides = [1, 1]} : vector<16x1152xbf16> to vector<16x384xbf16>
    %cst_97 = arith.constant dense<0.000000e+00> : vector<34x384xf32>
    %137 = tpu.matmul %135, %136, %cst_97 {dimension_numbers = #tpu.dot_dimension_numbers<[1], [0], [0], [1], [0, 0, 1, 1], [], []>} : vector<34x16xbf16>, vector<16x384xbf16>, vector<34x384xf32> -> vector<34x384xf32>
    %138 = arith.addf %133, %137 : vector<34x384xf32>
    %c0_98 = arith.constant 0 : index
    %c0_99 = arith.constant 0 : index
    %139 = vector.load %arg22[%c0_98, %c0_99] : memref<1x384xf32, #tpu.memory_space<vmem>>, vector<1x384xf32>
    %140 = vector.broadcast %139 : vector<1x384xf32> to vector<34x384xf32>
    %141 = arith.addf %138, %140 : vector<34x384xf32>
    %cst_100 = arith.constant 0.000000e+00 : f32
    %142 = vector.broadcast %cst_100 : f32 to vector<34x384xf32>
    %143 = arith.maximumf %141, %142 : vector<34x384xf32>
    %144 = arith.truncf %143 : vector<34x384xf32> to vector<34x384xbf16>
    %c0_101 = arith.constant 0 : index
    %c0_102 = arith.constant 0 : index
    %145 = vector.load %arg24[%c0_101, %c0_102] : memref<384x768xbf16, #tpu.memory_space<vmem>>, vector<384x768xbf16>
    %cst_103 = arith.constant dense<0.000000e+00> : vector<34x768xf32>
    %146 = tpu.matmul %144, %145, %cst_103 {dimension_numbers = #tpu.dot_dimension_numbers<[1], [0], [0], [1], [0, 0, 1, 1], [], []>} : vector<34x384xbf16>, vector<384x768xbf16>, vector<34x768xf32> -> vector<34x768xf32>
    %147 = arith.truncf %146 : vector<34x768xf32> to vector<34x768xbf16>
    %c0_104 = arith.constant 0 : index
    %c0_105 = arith.constant 0 : index
    %c0_106 = arith.constant 0 : index
    %148 = vector.load %arg23[%c0_104, %c0_105, %c0_106] : memref<3x38x34xbf16, #tpu.memory_space<vmem>>, vector<1x38x34xbf16>
    %149 = vector.shape_cast %148 : vector<1x38x34xbf16> to vector<38x34xbf16>
    %150 = vector.extract_strided_slice %147 {offsets = [0, 0], sizes = [34, 256], strides = [1, 1]} : vector<34x768xbf16> to vector<34x256xbf16>
    %cst_107 = arith.constant dense<0.000000e+00> : vector<38x256xf32>
    %151 = tpu.matmul %149, %150, %cst_107 {dimension_numbers = #tpu.dot_dimension_numbers<[1], [0], [0], [1], [0, 0, 1, 1], [], []>} : vector<38x34xbf16>, vector<34x256xbf16>, vector<38x256xf32> -> vector<38x256xf32>
    %c1_108 = arith.constant 1 : index
    %c0_109 = arith.constant 0 : index
    %c0_110 = arith.constant 0 : index
    %152 = vector.load %arg23[%c1_108, %c0_109, %c0_110] : memref<3x38x34xbf16, #tpu.memory_space<vmem>>, vector<1x38x34xbf16>
    %153 = vector.shape_cast %152 : vector<1x38x34xbf16> to vector<38x34xbf16>
    %154 = vector.extract_strided_slice %147 {offsets = [0, 256], sizes = [34, 256], strides = [1, 1]} : vector<34x768xbf16> to vector<34x256xbf16>
    %cst_111 = arith.constant dense<0.000000e+00> : vector<38x256xf32>
    %155 = tpu.matmul %153, %154, %cst_111 {dimension_numbers = #tpu.dot_dimension_numbers<[1], [0], [0], [1], [0, 0, 1, 1], [], []>} : vector<38x34xbf16>, vector<34x256xbf16>, vector<38x256xf32> -> vector<38x256xf32>
    %156 = arith.addf %151, %155 : vector<38x256xf32>
    %c2_112 = arith.constant 2 : index
    %c0_113 = arith.constant 0 : index
    %c0_114 = arith.constant 0 : index
    %157 = vector.load %arg23[%c2_112, %c0_113, %c0_114] : memref<3x38x34xbf16, #tpu.memory_space<vmem>>, vector<1x38x34xbf16>
    %158 = vector.shape_cast %157 : vector<1x38x34xbf16> to vector<38x34xbf16>
    %159 = vector.extract_strided_slice %147 {offsets = [0, 512], sizes = [34, 256], strides = [1, 1]} : vector<34x768xbf16> to vector<34x256xbf16>
    %cst_115 = arith.constant dense<0.000000e+00> : vector<38x256xf32>
    %160 = tpu.matmul %158, %159, %cst_115 {dimension_numbers = #tpu.dot_dimension_numbers<[1], [0], [0], [1], [0, 0, 1, 1], [], []>} : vector<38x34xbf16>, vector<34x256xbf16>, vector<38x256xf32> -> vector<38x256xf32>
    %161 = arith.addf %156, %160 : vector<38x256xf32>
    %c0_116 = arith.constant 0 : index
    %c0_117 = arith.constant 0 : index
    %162 = vector.load %arg25[%c0_116, %c0_117] : memref<1x256xf32, #tpu.memory_space<vmem>>, vector<1x256xf32>
    %163 = vector.broadcast %162 : vector<1x256xf32> to vector<38x256xf32>
    %164 = arith.addf %161, %163 : vector<38x256xf32>
    %cst_118 = arith.constant 0.000000e+00 : f32
    %165 = vector.broadcast %cst_118 : f32 to vector<38x256xf32>
    %166 = arith.maximumf %164, %165 : vector<38x256xf32>
    %167 = arith.truncf %166 : vector<38x256xf32> to vector<38x256xbf16>
    %c0_119 = arith.constant 0 : index
    %c0_120 = arith.constant 0 : index
    %168 = vector.load %arg27[%c0_119, %c0_120] : memref<256x384xbf16, #tpu.memory_space<vmem>>, vector<256x384xbf16>
    %cst_121 = arith.constant dense<0.000000e+00> : vector<38x384xf32>
    %169 = tpu.matmul %167, %168, %cst_121 {dimension_numbers = #tpu.dot_dimension_numbers<[1], [0], [0], [1], [0, 0, 1, 1], [], []>} : vector<38x256xbf16>, vector<256x384xbf16>, vector<38x384xf32> -> vector<38x384xf32>
    %170 = arith.truncf %169 : vector<38x384xf32> to vector<38x384xbf16>
    %c0_122 = arith.constant 0 : index
    %c0_123 = arith.constant 0 : index
    %c0_124 = arith.constant 0 : index
    %171 = vector.load %arg26[%c0_122, %c0_123, %c0_124] : memref<3x34x38xbf16, #tpu.memory_space<vmem>>, vector<1x34x38xbf16>
    %172 = vector.shape_cast %171 : vector<1x34x38xbf16> to vector<34x38xbf16>
    %173 = vector.extract_strided_slice %170 {offsets = [0, 0], sizes = [38, 128], strides = [1, 1]} : vector<38x384xbf16> to vector<38x128xbf16>
    %cst_125 = arith.constant dense<0.000000e+00> : vector<34x128xf32>
    %174 = tpu.matmul %172, %173, %cst_125 {dimension_numbers = #tpu.dot_dimension_numbers<[1], [0], [0], [1], [0, 0, 1, 1], [], []>} : vector<34x38xbf16>, vector<38x128xbf16>, vector<34x128xf32> -> vector<34x128xf32>
    %c1_126 = arith.constant 1 : index
    %c0_127 = arith.constant 0 : index
    %c0_128 = arith.constant 0 : index
    %175 = vector.load %arg26[%c1_126, %c0_127, %c0_128] : memref<3x34x38xbf16, #tpu.memory_space<vmem>>, vector<1x34x38xbf16>
    %176 = vector.shape_cast %175 : vector<1x34x38xbf16> to vector<34x38xbf16>
    %177 = vector.extract_strided_slice %170 {offsets = [0, 128], sizes = [38, 128], strides = [1, 1]} : vector<38x384xbf16> to vector<38x128xbf16>
    %cst_129 = arith.constant dense<0.000000e+00> : vector<34x128xf32>
    %178 = tpu.matmul %176, %177, %cst_129 {dimension_numbers = #tpu.dot_dimension_numbers<[1], [0], [0], [1], [0, 0, 1, 1], [], []>} : vector<34x38xbf16>, vector<38x128xbf16>, vector<34x128xf32> -> vector<34x128xf32>
    %179 = arith.addf %174, %178 : vector<34x128xf32>
    %c2_130 = arith.constant 2 : index
    %c0_131 = arith.constant 0 : index
    %c0_132 = arith.constant 0 : index
    %180 = vector.load %arg26[%c2_130, %c0_131, %c0_132] : memref<3x34x38xbf16, #tpu.memory_space<vmem>>, vector<1x34x38xbf16>
    %181 = vector.shape_cast %180 : vector<1x34x38xbf16> to vector<34x38xbf16>
    %182 = vector.extract_strided_slice %170 {offsets = [0, 256], sizes = [38, 128], strides = [1, 1]} : vector<38x384xbf16> to vector<38x128xbf16>
    %cst_133 = arith.constant dense<0.000000e+00> : vector<34x128xf32>
    %183 = tpu.matmul %181, %182, %cst_133 {dimension_numbers = #tpu.dot_dimension_numbers<[1], [0], [0], [1], [0, 0, 1, 1], [], []>} : vector<34x38xbf16>, vector<38x128xbf16>, vector<34x128xf32> -> vector<34x128xf32>
    %184 = arith.addf %179, %183 : vector<34x128xf32>
    %c0_134 = arith.constant 0 : index
    %c0_135 = arith.constant 0 : index
    %185 = vector.load %arg28[%c0_134, %c0_135] : memref<1x128xf32, #tpu.memory_space<vmem>>, vector<1x128xf32>
    %186 = vector.broadcast %185 : vector<1x128xf32> to vector<34x128xf32>
    %187 = arith.addf %184, %186 : vector<34x128xf32>
    %cst_136 = arith.constant 0.000000e+00 : f32
    %188 = vector.broadcast %cst_136 : f32 to vector<34x128xf32>
    %189 = arith.subf %188, %187 : vector<34x128xf32>
    %190 = math.exp %189 : vector<34x128xf32>
    %cst_137 = arith.constant 1.000000e+00 : f32
    %191 = vector.broadcast %cst_137 : f32 to vector<34x128xf32>
    %192 = arith.addf %191, %190 : vector<34x128xf32>
    %cst_138 = arith.constant 1.000000e+00 : f32
    %193 = vector.broadcast %cst_138 : f32 to vector<34x128xf32>
    %194 = arith.divf %193, %192 : vector<34x128xf32>
    %195 = vector.extract_strided_slice %194 {offsets = [0, 0], sizes = [34, 34], strides = [1, 1]} : vector<34x128xf32> to vector<34x34xf32>
    %196 = vector.shape_cast %195 : vector<34x34xf32> to vector<1x34x34xf32>
    %c0_139 = arith.constant 0 : index
    %c0_140 = arith.constant 0 : index
    %c0_141 = arith.constant 0 : index
    %197 = vector.load %arg29[%c0_139, %c0_140, %c0_141] : memref<1x34x34xf32, #tpu.memory_space<vmem>>, vector<1x34x34xf32>
    tpu.vector_store %arg29[%c0_139, %c0_140, %c0_141], %196 {strides = array<i32>} : memref<1x34x34xf32, #tpu.memory_space<vmem>>, vector<1x34x34xf32>,
    return
  }
  func.func @transform_0(%arg0: i32) -> (i32, i32, i32) {
    %c0_i32 = arith.constant 0 : i32
    %c0_i32_0 = arith.constant 0 : i32
    %c0_i32_1 = arith.constant 0 : i32
    return %arg0, %c0_i32, %c0_i32_0 : i32, i32, i32
  }
  func.func @transform_1(%arg0: i32) -> (i32, i32, i32) {
    %c0_i32 = arith.constant 0 : i32
    %c0_i32_0 = arith.constant 0 : i32
    %c0_i32_1 = arith.constant 0 : i32
    %c0_i32_2 = arith.constant 0 : i32
    return %c0_i32, %c0_i32_0, %c0_i32_1 : i32, i32, i32
  }
  func.func @transform_2(%arg0: i32) -> (i32, i32) {
    %c0_i32 = arith.constant 0 : i32
    %c0_i32_0 = arith.constant 0 : i32
    %c0_i32_1 = arith.constant 0 : i32
    return %c0_i32, %c0_i32_0 : i32, i32
  }
  func.func @transform_3(%arg0: i32) -> (i32, i32) {
    %c0_i32 = arith.constant 0 : i32
    %c0_i32_0 = arith.constant 0 : i32
    %c0_i32_1 = arith.constant 0 : i32
    return %c0_i32, %c0_i32_0 : i32, i32
  }
  func.func @transform_4(%arg0: i32) -> (i32, i32, i32) {
    %c0_i32 = arith.constant 0 : i32
    %c0_i32_0 = arith.constant 0 : i32
    %c0_i32_1 = arith.constant 0 : i32
    %c0_i32_2 = arith.constant 0 : i32
    return %c0_i32, %c0_i32_0, %c0_i32_1 : i32, i32, i32
  }
  func.func @transform_5(%arg0: i32) -> (i32, i32) {
    %c0_i32 = arith.constant 0 : i32
    %c0_i32_0 = arith.constant 0 : i32
    %c0_i32_1 = arith.constant 0 : i32
    return %c0_i32, %c0_i32_0 : i32, i32
  }
  func.func @transform_6(%arg0: i32) -> (i32, i32) {
    %c0_i32 = arith.constant 0 : i32
    %c0_i32_0 = arith.constant 0 : i32
    %c0_i32_1 = arith.constant 0 : i32
    return %c0_i32, %c0_i32_0 : i32, i32
  }
  func.func @transform_7(%arg0: i32) -> (i32, i32, i32) {
    %c0_i32 = arith.constant 0 : i32
    %c0_i32_0 = arith.constant 0 : i32
    %c0_i32_1 = arith.constant 0 : i32
    %c0_i32_2 = arith.constant 0 : i32
    return %c0_i32, %c0_i32_0, %c0_i32_1 : i32, i32, i32
  }
  func.func @transform_8(%arg0: i32) -> (i32, i32) {
    %c0_i32 = arith.constant 0 : i32
    %c0_i32_0 = arith.constant 0 : i32
    %c0_i32_1 = arith.constant 0 : i32
    return %c0_i32, %c0_i32_0 : i32, i32
  }
  func.func @transform_9(%arg0: i32) -> (i32, i32) {
    %c0_i32 = arith.constant 0 : i32
    %c0_i32_0 = arith.constant 0 : i32
    %c0_i32_1 = arith.constant 0 : i32
    return %c0_i32, %c0_i32_0 : i32, i32
  }
  func.func @transform_10(%arg0: i32) -> (i32, i32) {
    %c0_i32 = arith.constant 0 : i32
    %c0_i32_0 = arith.constant 0 : i32
    %c0_i32_1 = arith.constant 0 : i32
    return %c0_i32, %c0_i32_0 : i32, i32
  }
  func.func @transform_11(%arg0: i32) -> (i32, i32) {
    %c0_i32 = arith.constant 0 : i32
    %c0_i32_0 = arith.constant 0 : i32
    %c0_i32_1 = arith.constant 0 : i32
    return %c0_i32, %c0_i32_0 : i32, i32
  }
  func.func @transform_12(%arg0: i32) -> (i32, i32) {
    %c0_i32 = arith.constant 0 : i32
    %c0_i32_0 = arith.constant 0 : i32
    %c0_i32_1 = arith.constant 0 : i32
    return %c0_i32, %c0_i32_0 : i32, i32
  }
  func.func @transform_13(%arg0: i32) -> (i32, i32) {
    %c0_i32 = arith.constant 0 : i32
    %c0_i32_0 = arith.constant 0 : i32
    %c0_i32_1 = arith.constant 0 : i32
    return %c0_i32, %c0_i32_0 : i32, i32
  }
  func.func @transform_14(%arg0: i32) -> (i32, i32) {
    %c0_i32 = arith.constant 0 : i32
    %c0_i32_0 = arith.constant 0 : i32
    %c0_i32_1 = arith.constant 0 : i32
    return %c0_i32, %c0_i32_0 : i32, i32
  }
  func.func @transform_15(%arg0: i32) -> (i32, i32) {
    %c0_i32 = arith.constant 0 : i32
    %c0_i32_0 = arith.constant 0 : i32
    %c0_i32_1 = arith.constant 0 : i32
    return %c0_i32, %c0_i32_0 : i32, i32
  }
  func.func @transform_16(%arg0: i32) -> (i32, i32) {
    %c0_i32 = arith.constant 0 : i32
    %c0_i32_0 = arith.constant 0 : i32
    %c0_i32_1 = arith.constant 0 : i32
    return %c0_i32, %c0_i32_0 : i32, i32
  }
  func.func @transform_17(%arg0: i32) -> (i32, i32) {
    %c0_i32 = arith.constant 0 : i32
    %c0_i32_0 = arith.constant 0 : i32
    %c0_i32_1 = arith.constant 0 : i32
    return %c0_i32, %c0_i32_0 : i32, i32
  }
  func.func @transform_18(%arg0: i32) -> (i32, i32) {
    %c0_i32 = arith.constant 0 : i32
    %c0_i32_0 = arith.constant 0 : i32
    %c0_i32_1 = arith.constant 0 : i32
    return %c0_i32, %c0_i32_0 : i32, i32
  }
  func.func @transform_19(%arg0: i32) -> (i32, i32, i32) {
    %c0_i32 = arith.constant 0 : i32
    %c0_i32_0 = arith.constant 0 : i32
    %c0_i32_1 = arith.constant 0 : i32
    %c0_i32_2 = arith.constant 0 : i32
    return %c0_i32, %c0_i32_0, %c0_i32_1 : i32, i32, i32
  }
  func.func @transform_20(%arg0: i32) -> (i32, i32) {
    %c0_i32 = arith.constant 0 : i32
    %c0_i32_0 = arith.constant 0 : i32
    %c0_i32_1 = arith.constant 0 : i32
    return %c0_i32, %c0_i32_0 : i32, i32
  }
  func.func @transform_21(%arg0: i32) -> (i32, i32) {
    %c0_i32 = arith.constant 0 : i32
    %c0_i32_0 = arith.constant 0 : i32
    %c0_i32_1 = arith.constant 0 : i32
    return %c0_i32, %c0_i32_0 : i32, i32
  }
  func.func @transform_22(%arg0: i32) -> (i32, i32, i32) {
    %c0_i32 = arith.constant 0 : i32
    %c0_i32_0 = arith.constant 0 : i32
    %c0_i32_1 = arith.constant 0 : i32
    %c0_i32_2 = arith.constant 0 : i32
    return %c0_i32, %c0_i32_0, %c0_i32_1 : i32, i32, i32
  }
  func.func @transform_23(%arg0: i32) -> (i32, i32) {
    %c0_i32 = arith.constant 0 : i32
    %c0_i32_0 = arith.constant 0 : i32
    %c0_i32_1 = arith.constant 0 : i32
    return %c0_i32, %c0_i32_0 : i32, i32
  }
  func.func @transform_24(%arg0: i32) -> (i32, i32) {
    %c0_i32 = arith.constant 0 : i32
    %c0_i32_0 = arith.constant 0 : i32
    %c0_i32_1 = arith.constant 0 : i32
    return %c0_i32, %c0_i32_0 : i32, i32
  }
  func.func @transform_25(%arg0: i32) -> (i32, i32, i32) {
    %c0_i32 = arith.constant 0 : i32
    %c0_i32_0 = arith.constant 0 : i32
    %c0_i32_1 = arith.constant 0 : i32
    %c0_i32_2 = arith.constant 0 : i32
    return %c0_i32, %c0_i32_0, %c0_i32_1 : i32, i32, i32
  }
  func.func @transform_26(%arg0: i32) -> (i32, i32) {
    %c0_i32 = arith.constant 0 : i32
    %c0_i32_0 = arith.constant 0 : i32
    %c0_i32_1 = arith.constant 0 : i32
    return %c0_i32, %c0_i32_0 : i32, i32
  }
  func.func @transform_27(%arg0: i32) -> (i32, i32) {
    %c0_i32 = arith.constant 0 : i32
    %c0_i32_0 = arith.constant 0 : i32
    %c0_i32_1 = arith.constant 0 : i32
    return %c0_i32, %c0_i32_0 : i32, i32
  }
  func.func @transform_28(%arg0: i32) -> (i32, i32, i32) {
    %c0_i32 = arith.constant 0 : i32
    %c0_i32_0 = arith.constant 0 : i32
    %c0_i32_1 = arith.constant 0 : i32
    return %arg0, %c0_i32, %c0_i32_0 : i32, i32, i32
  }
  func.func @transform_29(%arg0: i32) -> (i32, i32, i32) {
    %c0_i32 = arith.constant 0 : i32
    %c0_i32_0 = arith.constant 0 : i32
    %c0_i32_1 = arith.constant 0 : i32
    return %arg0, %c0_i32, %c0_i32_0 : i32, i32, i32
  }
}

</mosaic_0001>

<bundles_post_ra>
// kernel: amphib_forward.1
= control target key start
LH: loop header
LB: loop body
LE: loop exit
PB: predicated region body
PF: predicated region fallthrough
CT: control target
= control target key end

     0   :  { %s12209_s6 = smov 1   ;;  %s12210_s10 = smov 2   ;;  %s13351_s0 = inlined_call_operand.smem [shape: u32[30], index: -1, kind: input, shape index: {}] }
   0x1   :  { %s12280_s5 = sld [smem:[%s13351_s0]]   ;;  %s12211_s14 = smov 3  }
   0x2   :  { %s12285_s9 = sld [smem:[%s13351_s0 + %s12209_s6]]   ;;  %s12212_s18 = smov 4  }
   0x3   :  { %s12290_s13 = sld [smem:[%s13351_s0 + %s12210_s10]]   ;;  %s12213_s22 = smov 5  }
   0x4   :  { %s12295_s17 = sld [smem:[%s13351_s0 + %s12211_s14]]   ;;  %s12214_s26 = smov 6  }
   0x5   :  { %s12300_s21 = sld [smem:[%s13351_s0 + %s12212_s18]]   ;;  %s12215_s30 = smov 7  }
   0x6   :  { %s12305_s25 = sld [smem:[%s13351_s0 + %s12213_s22]]   ;;  %s12216_s4 = smov 8  }
   0x7   :  { %13358 = sst [smem:[#allocation43_spill]] %s12280_s5  ;;  %s12217_s10 = smov 9  }
   0x8   :  { %13359 = sst [smem:[#allocation44_spill]] %s12285_s9  ;;  %s12218_s15 = smov 10  }
   0x9   :  { %13360 = sst [smem:[#allocation45_spill]] %s12290_s13  ;;  %s12219_s20 = smov 11  }
   0xa   :  { %s12310_s29 = sld [smem:[%s13351_s0 + %s12214_s26]]   ;;  %s12220_s26 = smov 12  }
   0xb   :  { %13361 = sst [smem:[#allocation46_spill]] %s12300_s21  ;;  %s12221_s1 = smov 13  }
   0xc   :  { %s12315_s3 = sld [smem:[%s13351_s0 + %s12215_s30]]   ;;  %s12222_s7 = smov 14  }
   0xd   :  { %s12320_s8 = sld [smem:[%s13351_s0 + %s12216_s4]]   ;;  %s12224_s22 = smov 16  }
   0xe   :  { %s12325_s14 = sld [smem:[%s13351_s0 + %s12217_s10]]   ;;  %s12225_s28 = smov 17  }
   0xf   :  { %s12330_s19 = sld [smem:[%s13351_s0 + %s12218_s15]]   ;;  %s12223_s15 = smov 15  }
  0x10   :  { %13362 = sst [smem:[#allocation47_spill]] %s12310_s29 }
  0x11   :  { %s12335_s24 = sld [smem:[%s13351_s0 + %s12219_s20]]  }
  0x12   :  { %s12340_s30 = sld [smem:[%s13351_s0 + %s12220_s26]]  }
  0x13   :  { %s12345_s6 = sld [smem:[%s13351_s0 + %s12221_s1]]  }
  0x14   :  { %s12350_s12 = sld [smem:[%s13351_s0 + %s12222_s7]]   ;;  %s12226_s7 = smov 18  }
  0x15   :  { %s12355_s20 = sld [smem:[%s13351_s0 + %s12223_s15]]   ;;  %s12227_s15 = smov 19  }
  0x16   :  { %s12360_s27 = sld [smem:[%s13351_s0 + %s12224_s22]]   ;;  %s12228_s22 = smov 20  }
  0x17   :  { %s12365_s4 = sld [smem:[%s13351_s0 + %s12225_s28]]   ;;  %s12229_s28 = smov 21  }
  0x18   :  { %13363 = sst [smem:[#allocation48_spill]] %s12340_s30 }
  0x19   :  { %13364 = sst [smem:[#allocation49_spill]] %s12345_s6 }
  0x1a   :  { %s12370_s6 = sld [smem:[%s13351_s0 + %s12226_s7]]   ;;  %s12230_s7 = smov 22  }
  0x1b   :  { %13365 = sst [smem:[#allocation50_spill]] %s12355_s20 }
  0x1c   :  { %s12375_s20 = sld [smem:[%s13351_s0 + %s12227_s15]]   ;;  %s12231_s15 = smov 23  }
  0x1d   :  { %s12380_s30 = sld [smem:[%s13351_s0 + %s12228_s22]]   ;;  %s12232_s22 = smov 24  }
  0x1e   :  { %s12385_s29 = sld [smem:[%s13351_s0 + %s12229_s28]]   ;;  %s12233_s28 = smov 25  }
  0x1f   :  { %s12390_s21 = sld [smem:[%s13351_s0 + %s12230_s7]]   ;;  %s12234_s7 = smov 26  }
  0x20   :  { %s12400_s9 = sld [smem:[%s13351_s0 + %s12232_s22]]   ;;  %s12236_s22 = smov 28  }
  0x21   :  { %s12405_s5 = sld [smem:[%s13351_s0 + %s12233_s28]]   ;;  %s12237_s28 = smov 29  }
  0x22   :  { %13366 = sst [smem:[#allocation51_spill]] %s12375_s20 }
  0x23   :  { %s12395_s20 = sld [smem:[%s13351_s0 + %s12231_s15]]   ;;  %s12235_s15 = smov 27  }
  0x24   :  { %13367 = sst [smem:[#allocation52_spill]] %s12385_s29 }
  0x25   :  { %s12410_s13 = sld [smem:[%s13351_s0 + %s12234_s7]]  }
  0x26   :  { %s12420_s29 = sld [smem:[%s13351_s0 + %s12236_s22]]  }
  0x27   :  { %13369 = sst [smem:[#allocation54_spill]] %s12405_s5 }
  0x28   :  { %s12425_s5 = sld [smem:[%s13351_s0 + %s12237_s28]]  }
  0x29   :  { %13368 = sst [smem:[#allocation53_spill]] %s12395_s20 }
  0x2a   :  { %s12415_s20 = sld [smem:[%s13351_s0 + %s12235_s15]]  }
  0x2b   :  { %65 = vsyncpa [#allocation3], 0 }
  0x2c   :  { %66 = vsyncpa [#allocation6], 0 }
  0x2d   :  { %67 = vsyncpa [#allocation9], 0 }
  0x2e   :  { %68 = vsyncpa [#allocation12], 0 }
  0x2f   :  { %69 = vsyncpa [#allocation15], 0 }
  0x30   :  { %70 = vsyncpa [#allocation18], 0 }
  0x31   :  { %71 = vsyncpa [#allocation21], 0 }
  0x32   :  { %72 = vsyncpa [#allocation24], 0 }
  0x33   :  { %73 = vsyncpa [#allocation27], 0 }
  0x34   :  { %74 = vsyncpa [#allocation30], 0 }
  0x35   :  { %75 = vsyncpa [#allocation4], 0  ;;  %s12238_s7 = smov [#allocation5]  }
  0x36   :  { %s99_s10 = sshll.u32 %s12238_s7, 4  ;;  %s100_s10 = int_to_ptr.vmem [resolvable:$true] %s99_s10 }
  0x37   :  { %s11815_s11 = scalar_lea.vmem %s100_s10, 18432  ;;  %p11820_p1 = scmp.lt.s32.totalorder %s100_s10, %s100_s10 }
  0x38   :  { %p11816_p0 = scmp.ne.s32.totalorder %s100_s10, %s11815_s11  ;;  %p11821_p2 = scmp.lt.s32.totalorder %s11815_s11, %s11815_s11 }
  0x3a   :  { %p11822_p3 = por %p11821_p2, %p11820_p1 }
  0x3c   :  { %p11823_p4 = pnand %p11822_p3, %p11816_p0 }
  0x3e   :  { %11826 = shalt.err (!%p11823_p4)
}
  0x3f   :  { %s12239_s0 = smov 576   ;;  %s12240_s15 = smov 36  }
  0x40   :  { %105 = dma.hbm_to_vmem [thread:$0]  %s12305_s25, 18432, %s100_s10, [#allocation6], %s12239_s0, %s12239_s0, %s12240_s15  }
  0x41   :  { %s12241_s16 = smov [#allocation8]  }
  0x42   :  { %s125_s18 = sshll.u32 %s12241_s16, 4  ;;  %s126_s18 = int_to_ptr.vmem [resolvable:$true] %s125_s18 }
  0x43   :  { %s11835_s22 = scalar_lea.vmem %s126_s18, 18432  ;;  %p11840_p6 = scmp.lt.s32.totalorder %s126_s18, %s126_s18 }
  0x44   :  { %p11836_p5 = scmp.ne.s32.totalorder %s126_s18, %s11835_s22  ;;  %p11841_p7 = scmp.lt.s32.totalorder %s11835_s22, %s11835_s22 }
  0x46   :  { %p11842_p8 = por %p11841_p7, %p11840_p6 }
  0x48   :  { %p11843_p9 = pnand %p11842_p8, %p11836_p5 }
  0x4a   :  { %11846 = shalt.err (!%p11843_p9)
}
  0x4b   :  { %s12242_s23 = smov 384   ;;  %s12243_s26 = smov 24  }
  0x4c   :  { %131 = dma.hbm_to_vmem [thread:$0]  %s12320_s8, 18432, %s126_s18, [#allocation9], %s12242_s23, %s12242_s23, %s12243_s26  }
  0x4d   :  { %s12244_s28 = smov [#allocation11]  }
  0x4e   :  { %s147_s1 = sshll.u32 %s12244_s28, 4  ;;  %s148_s1 = int_to_ptr.vmem [resolvable:$true] %s147_s1 }
  0x4f   :  { %s11855_s25 = scalar_lea.vmem %s148_s1, 4096  ;;  %p11860_p11 = scmp.lt.s32.totalorder %s148_s1, %s148_s1 }
  0x50   :  { %p11856_p10 = scmp.ne.s32.totalorder %s148_s1, %s11855_s25  ;;  %p11861_p12 = scmp.lt.s32.totalorder %s11855_s25, %s11855_s25 }
  0x52   :  { %p11862_p13 = por %p11861_p12, %p11860_p11 }
  0x54   :  { %p11863_p0 = pnand %p11862_p13, %p11856_p10 }
  0x56   :  { %11866 = shalt.err (!%p11863_p0)
}
  0x57   :  { %s12245_s2 = smov 128   ;;  %s12246_s7 = smov 8  }
  0x58   :  { %153 = dma.hbm_to_vmem [thread:$0]  %s12330_s19, 4096, %s148_s1, [#allocation12], %s12245_s2, %s12245_s2, %s12246_s7  }
  0x59   :  { %s12247_s10 = smov [#allocation14]   ;;  %s12248_s8 = smov [#allocation17]  }
  0x5a   :  { %s176_s11 = sshll.u32 %s12247_s10, 4  ;;  %s199_s16 = sshll.u32 %s12248_s8, 4  ;;  %s177_s11 = int_to_ptr.vmem [resolvable:$true] %s176_s11  ;;  %s200_s16 = int_to_ptr.vmem [resolvable:$true] %s199_s16 }
  0x5b   :  { %s11875_s18 = scalar_lea.vmem %s177_s11, 16  ;;  %s11879_s22 = scalar_lea.vmem %s177_s11, 32 }
  0x5c   :  { %p11876_p1 = scmp.ne.s32.totalorder %s177_s11, %s11875_s18  ;;  %p11880_p2 = scmp.lt.s32.totalorder %s177_s11, %s177_s11 }
  0x5d   :  { %p11881_p3 = scmp.lt.s32.totalorder %s11879_s22, %s11875_s18 }
  0x5f   :  { %p11882_p4 = por %p11881_p3, %p11880_p2 }
  0x61   :  { %p11883_p5 = pnand %p11882_p4, %p11876_p1 }
  0x63   :  { %11886 = shalt.err (!%p11883_p5)
}
  0x64   :  { %179 = dma.hbm_to_vmem [thread:$0]  %s12350_s12, 16, %s177_s11, [#allocation15]  }
  0x65   :  { %s11895_s28 = scalar_lea.vmem %s200_s16, 4096  ;;  %p11900_p7 = scmp.lt.s32.totalorder %s200_s16, %s200_s16 }
  0x66   :  { %p11896_p6 = scmp.ne.s32.totalorder %s200_s16, %s11895_s28  ;;  %p11901_p8 = scmp.lt.s32.totalorder %s11895_s28, %s11895_s28 }
  0x68   :  { %p11902_p9 = por %p11901_p8, %p11900_p7 }
  0x6a   :  { %p11903_p10 = pnand %p11902_p9, %p11896_p6 }
  0x6c   :  { %11906 = shalt.err (!%p11903_p10)
}
  0x6d   :  { %s12249_s19 = smov 2048   ;;  %s12250_s1 = smov [#allocation20]  }
  0x6e   :  { %205 = dma.hbm_to_vmem [thread:$0]  %s12365_s4, 4096, %s200_s16, [#allocation18], %s12249_s19, %s12249_s19, %s12245_s2  }
  0x6f   :  { %s225_s25 = sshll.u32 %s12250_s1, 4  ;;  %s226_s25 = int_to_ptr.vmem [resolvable:$true] %s225_s25 }
  0x70   :  { %s11915_s7 = scalar_lea.vmem %s226_s25, 18432  ;;  %p11920_p12 = scmp.lt.s32.totalorder %s226_s25, %s226_s25 }
  0x71   :  { %p11916_p11 = scmp.ne.s32.totalorder %s226_s25, %s11915_s7  ;;  %p11921_p13 = scmp.lt.s32.totalorder %s11915_s7, %s11915_s7 }
  0x73   :  { %p11922_p0 = por %p11921_p13, %p11920_p12 }
  0x75   :  { %p11923_p1 = pnand %p11922_p0, %p11916_p11 }
  0x77   :  { %11926 = shalt.err (!%p11923_p1)
}
  0x78   :  { %231 = dma.hbm_to_vmem [thread:$0]  %s12380_s30, 18432, %s226_s25, [#allocation21], %s12239_s0, %s12239_s0, %s12240_s15  }
  0x79   :  { %s12251_s12 = smov [#allocation23]   ;;  %s12252_s11 = smov [#allocation26]  }
  0x7a   :  { %s247_s10 = sshll.u32 %s12251_s12, 4  ;;  %s272_s4 = sshll.u32 %s12252_s11, 4  ;;  %s248_s10 = int_to_ptr.vmem [resolvable:$true] %s247_s10  ;;  %s273_s4 = int_to_ptr.vmem [resolvable:$true] %s272_s4 }
  0x7b   :  { %s11935_s2 = scalar_lea.vmem %s248_s10, 960  ;;  %p11940_p3 = scmp.lt.s32.totalorder %s248_s10, %s248_s10 }
  0x7c   :  { %p11936_p2 = scmp.ne.s32.totalorder %s248_s10, %s11935_s2  ;;  %p11941_p4 = scmp.lt.s32.totalorder %s11935_s2, %s11935_s2 }
  0x7e   :  { %p11942_p5 = por %p11941_p4, %p11940_p3 }
  0x80   :  { %p11943_p6 = pnand %p11942_p5, %p11936_p2 }
  0x82   :  { %11946 = shalt.err (!%p11943_p6)
}
  0x83   :  { %s12253_s8 = smov 64   ;;  %s12254_s16 = smov 4  }
  0x84   :  { %253 = dma.hbm_to_vmem [thread:$0]  %s12390_s21, 960, %s248_s10, [#allocation24], %s12253_s8, %s12253_s8, %s12254_s16  }
  0x85   :  { %s11955_s30 = scalar_lea.vmem %s273_s4, 32  ;;  %p11960_p8 = scmp.lt.s32.totalorder %s273_s4, %s273_s4 }
  0x86   :  { %p11956_p7 = scmp.ne.s32.totalorder %s273_s4, %s11955_s30  ;;  %p11961_p9 = scmp.lt.s32.totalorder %s11955_s30, %s11955_s30 }
  0x88   :  { %p11962_p10 = por %p11961_p9, %p11960_p8 }
  0x8a   :  { %p11963_p11 = pnand %p11962_p10, %p11956_p7 }
  0x8c   :  { %11966 = shalt.err (!%p11963_p11)
}
  0x8d   :  { %275 = dma.hbm_to_vmem [thread:$0]  %s12400_s9, 32, %s273_s4, [#allocation27]  }
  0x8e   :  { %s12255_s0 = smov [#allocation2]   ;;  %s12256_s18 = smov [#allocation7]  }
  0x8f   :  { %s88_s15 = sshll.u32 %s12255_s0, 4  ;;  %s113_s22 = sshll.u32 %s12256_s18, 4  ;;  %s89_s15 = int_to_ptr.vmem [resolvable:$true] %s88_s15  ;;  %s114_s22 = int_to_ptr.vmem [resolvable:$true] %s113_s22 }
  0x90   :  { %s11975_s28 = scalar_lea.vmem %s89_s15, 32  ;;  %p11980_p13 = scmp.lt.s32.totalorder %s89_s15, %s89_s15 }
  0x91   :  { %p11976_p12 = scmp.ne.s32.totalorder %s89_s15, %s11975_s28  ;;  %p11981_p0 = scmp.lt.s32.totalorder %s11975_s28, %s11975_s28 }
  0x93   :  { %p11982_p1 = por %p11981_p0, %p11980_p13 }
  0x95   :  { %p11983_p2 = pnand %p11982_p1, %p11976_p12 }
  0x97   :  { %11986 = shalt.err (!%p11983_p2)
}
  0x98   :  { %91 = dma.hbm_to_vmem [thread:$0]  %s12295_s17, 32, %s89_s15, [#allocation3]  }
  0x99   :  { %s11995_s21 = scalar_lea.vmem %s114_s22, 384  ;;  %p12000_p4 = scmp.lt.s32.totalorder %s114_s22, %s114_s22 }
  0x9a   :  { %p11996_p3 = scmp.ne.s32.totalorder %s114_s22, %s11995_s21  ;;  %p12001_p5 = scmp.lt.s32.totalorder %s11995_s21, %s11995_s21 }
  0x9c   :  { %p12002_p6 = por %p12001_p5, %p12000_p4 }
  0x9e   :  { %p12003_p7 = pnand %p12002_p6, %p11996_p3 }
  0xa0   :  { %12006 = shalt.err (!%p12003_p7)
}
  0xa1   :  { %119 = dma.hbm_to_vmem [thread:$0]  %s12315_s3, 384, %s114_s22, [#allocation6], %s12253_s8, %s12253_s8, %s12254_s16  }
  0xa2   :  { %s12257_s9 = smov [#allocation10]   ;;  %s12258_s1 = smov [#allocation13]  }
  0xa3   :  { %s138_s19 = sshll.u32 %s12257_s9, 4  ;;  %s159_s25 = sshll.u32 %s12258_s1, 4  ;;  %s139_s19 = int_to_ptr.vmem [resolvable:$true] %s138_s19  ;;  %s160_s25 = int_to_ptr.vmem [resolvable:$true] %s159_s25 }
  0xa4   :  { %s12015_s7 = scalar_lea.vmem %s139_s19, 32  ;;  %p12020_p9 = scmp.lt.s32.totalorder %s139_s19, %s139_s19 }
  0xa5   :  { %p12016_p8 = scmp.ne.s32.totalorder %s139_s19, %s12015_s7  ;;  %p12021_p10 = scmp.lt.s32.totalorder %s12015_s7, %s12015_s7 }
  0xa7   :  { %p12022_p11 = por %p12021_p10, %p12020_p9 }
  0xa9   :  { %p12023_p12 = pnand %p12022_p11, %p12016_p8 }
  0xab   :  { %12026 = shalt.err (!%p12023_p12)
}
  0xac   :  { %141 = dma.hbm_to_vmem [thread:$0]  %s12325_s14, 32, %s139_s19, [#allocation9]  }
  0xad   :  { %s12035_s17 = scalar_lea.vmem %s160_s25, 512  ;;  %p12040_p0 = scmp.lt.s32.totalorder %s160_s25, %s160_s25 }
  0xae   :  { %p12036_p13 = scmp.ne.s32.totalorder %s160_s25, %s12035_s17  ;;  %p12041_p1 = scmp.lt.s32.totalorder %s12035_s17, %s12035_s17 }
  0xb0   :  { %p12042_p2 = por %p12041_p1, %p12040_p0 }
  0xb2   :  { %p12043_p3 = pnand %p12042_p2, %p12036_p13 }
  0xb4   :  { %12046 = shalt.err (!%p12043_p3)
}
  0xb5   :  { %s12259_s3 = smov 256   ;;  %s12260_s12 = smov 16  }
  0xb6   :  { %165 = dma.hbm_to_vmem [thread:$0]  %s12335_s24, 512, %s160_s25, [#allocation12], %s12259_s3, %s12259_s3, %s12260_s12  }
  0xb7   :  { %s12261_s10 = smov [#allocation16]  }
  0xb8   :  { %s187_s11 = sshll.u32 %s12261_s10, 4  ;;  %s188_s11 = int_to_ptr.vmem [resolvable:$true] %s187_s11 }
  0xb9   :  { %s12055_s4 = scalar_lea.vmem %s188_s11, 4096  ;;  %p12060_p5 = scmp.lt.s32.totalorder %s188_s11, %s188_s11 }
  0xba   :  { %p12056_p4 = scmp.ne.s32.totalorder %s188_s11, %s12055_s4  ;;  %p12061_p6 = scmp.lt.s32.totalorder %s12055_s4, %s12055_s4 }
  0xbc   :  { %p12062_p7 = por %p12061_p6, %p12060_p5 }
  0xbe   :  { %p12063_p8 = pnand %p12062_p7, %p12056_p4 }
  0xc0   :  { %12066 = shalt.err (!%p12063_p8)
}
  0xc1   :  { %s12262_s14 = smov 1024   ;;  %s12263_s2 = smov [#allocation19]  }
  0xc2   :  { %193 = dma.hbm_to_vmem [thread:$0]  %s12360_s27, 4096, %s188_s11, [#allocation15], %s12262_s14, %s12262_s14, %s12253_s8  }
  0xc3   :  { %s211_s30 = sshll.u32 %s12263_s2, 4  ;;  %s12264_s0 = smov [#allocation22]   ;;  %s212_s30 = int_to_ptr.vmem [resolvable:$true] %s211_s30 }
  0xc4   :  { %s238_s15 = sshll.u32 %s12264_s0, 4  ;;  %s12075_s24 = scalar_lea.vmem %s212_s30, 512  ;;  %s239_s15 = int_to_ptr.vmem [resolvable:$true] %s238_s15 }
  0xc5   :  { %p12076_p9 = scmp.ne.s32.totalorder %s212_s30, %s12075_s24  ;;  %p12080_p10 = scmp.lt.s32.totalorder %s212_s30, %s212_s30 }
  0xc6   :  { %p12081_p11 = scmp.lt.s32.totalorder %s12075_s24, %s12075_s24 }
  0xc8   :  { %p12082_p12 = por %p12081_p11, %p12080_p10 }
  0xca   :  { %p12083_p13 = pnand %p12082_p12, %p12076_p9 }
  0xcc   :  { %12086 = shalt.err (!%p12083_p13)
}
  0xcd   :  { %217 = dma.hbm_to_vmem [thread:$0]  %s12370_s6, 512, %s212_s30, [#allocation18], %s12259_s3, %s12259_s3, %s12260_s12  }
  0xce   :  { %s12095_s18 = scalar_lea.vmem %s239_s15, 48  ;;  %s12099_s27 = scalar_lea.vmem %s239_s15, 64 }
  0xcf   :  { %p12096_p0 = scmp.ne.s32.totalorder %s239_s15, %s12095_s18  ;;  %p12100_p1 = scmp.lt.s32.totalorder %s239_s15, %s239_s15 }
  0xd0   :  { %p12101_p2 = scmp.lt.s32.totalorder %s12099_s27, %s12095_s18 }
  0xd2   :  { %p12102_p3 = por %p12101_p2, %p12100_p1 }
  0xd4   :  { %p12103_p4 = pnand %p12102_p3, %p12096_p0 }
  0xd6   :  { %12106 = shalt.err (!%p12103_p4)
}
  0xd7   :  { %s13370_s22 = sld [smem:[#allocation52_spill]]  ;;  %s12265_s28 = smov [#allocation25]  }
  0xd8   :  { %s259_s21 = sshll.u32 %s12265_s28, 4  ;;  %s12266_s9 = smov [#allocation28]   ;;  %s260_s21 = int_to_ptr.vmem [resolvable:$true] %s259_s21 }
  0xd9   :  { %s281_s19 = sshll.u32 %s12266_s9, 4  ;;  %s12115_s1 = scalar_lea.vmem %s260_s21, 18432  ;;  %s282_s19 = int_to_ptr.vmem [resolvable:$true] %s281_s19 }
  0xda   :  { %p12116_p5 = scmp.ne.s32.totalorder %s260_s21, %s12115_s1  ;;  %p12120_p6 = scmp.lt.s32.totalorder %s260_s21, %s260_s21 }
  0xdb   :  { %p12121_p7 = scmp.lt.s32.totalorder %s12115_s1, %s12115_s1 }
  0xdd   :  { %241 = dma.hbm_to_vmem [thread:$0]  %s13370_s22, 48, %s239_s15, [#allocation21]  }
  0xde   :  { %p12122_p8 = por %p12121_p7, %p12120_p6 }
  0xe0   :  { %p12123_p9 = pnand %p12122_p8, %p12116_p5 }
  0xe2   :  { %12126 = shalt.err (!%p12123_p9)
}
  0xe3   :  { %s13371_s6 = sld [smem:[#allocation53_spill]]  ;;  %s12135_s25 = scalar_lea.vmem %s282_s19, 960 }
  0xe4   :  { %p12136_p10 = scmp.ne.s32.totalorder %s282_s19, %s12135_s25  ;;  %p12140_p11 = scmp.lt.s32.totalorder %s282_s19, %s282_s19 }
  0xe5   :  { %p12141_p12 = scmp.lt.s32.totalorder %s12135_s25, %s12135_s25 }
  0xe7   :  { %p12142_p13 = por %p12141_p12, %p12140_p11 }
  0xe9   :  { %265 = dma.hbm_to_vmem [thread:$0]  %s13371_s6, 18432, %s260_s21, [#allocation24], %s12242_s23, %s12242_s23, %s12243_s26  }
  0xea   :  { %p12143_p0 = pnand %p12142_p13, %p12136_p10 }
  0xec   :  { %12146 = shalt.err (!%p12143_p0)
}
  0xed   :  { %s13372_s7 = sld [smem:[#allocation54_spill]]  ;;  %s12267_s17 = smov [#allocation29]  }
  0xee   :  { %s296_s3 = sshll.u32 %s12267_s17, 4  ;;  %s297_s3 = int_to_ptr.vmem [resolvable:$true] %s296_s3 }
  0xef   :  { %s12155_s12 = scalar_lea.vmem %s297_s3, 16  ;;  %s12159_s10 = scalar_lea.vmem %s297_s3, 32 }
  0xf0   :  { %p12156_p1 = scmp.ne.s32.totalorder %s297_s3, %s12155_s12  ;;  %p12160_p2 = scmp.lt.s32.totalorder %s297_s3, %s297_s3 }
  0xf1   :  { %p12161_p3 = scmp.lt.s32.totalorder %s12159_s10, %s12155_s12 }
  0xf3   :  { %287 = dma.hbm_to_vmem [thread:$0]  %s13372_s7, 960, %s282_s19, [#allocation27], %s12253_s8, %s12253_s8, %s12254_s16  }
  0xf4   :  { %p12162_p4 = por %p12161_p3, %p12160_p2 }
  0xf6   :  { %p12163_p5 = pnand %p12162_p4, %p12156_p1 }
  0xf8   :  { %12166 = shalt.err (!%p12163_p5)
}
  0xf9   :  { %299 = dma.hbm_to_vmem [thread:$0]  %s12415_s20, 16, %s297_s3, [#allocation30]  }
  0xfa   :  { %12187 = dma.done.wait [#allocation3], 32  }
  0xfb   :  { %12188 = vsyncadd [#allocation3], 4294967264 }
  0xfc   :  { %12189 = dma.done.wait [#allocation6], 18816  }
  0xfd   :  { %12190 = vsyncadd [#allocation6], 4294948480 }
  0xfe   :  { %12191 = dma.done.wait [#allocation9], 18464  }
  0xff   :  { %12192 = vsyncadd [#allocation9], 4294948832 }
 0x100   :  { %12193 = dma.done.wait [#allocation12], 4608  }
 0x101   :  { %12194 = vsyncadd [#allocation12], 4294962688 }
 0x102   :  { %12195 = dma.done.wait [#allocation15], 4112  }
 0x103   :  { %12196 = vsyncadd [#allocation15], 4294963184 }
 0x104   :  { %12197 = dma.done.wait [#allocation18], 4608  }
 0x105   :  { %12198 = vsyncadd [#allocation18], 4294962688 }
 0x106   :  { %12199 = dma.done.wait [#allocation21], 18480  }
 0x107   :  { %12200 = vsyncadd [#allocation21], 4294948816 }
 0x108   :  { %12201 = dma.done.wait [#allocation24], 19392  }
 0x109   :  { %12202 = vsyncadd [#allocation24], 4294947904 }
 0x10a   :  { %12203 = dma.done.wait [#allocation27], 992  }
 0x10b   :  { %12204 = vsyncadd [#allocation27], 4294966304 }
 0x10c   :  { %12205 = dma.done.wait [#allocation30], 16  }
 0x10d   :  { %12206 = vsyncadd [#allocation30], 4294967280  ;;  %s13373_s20 = sld [smem:[#allocation45_spill]]  ;;  %v12268_v0 = vmov 0   ;;  %vm463_vm0 = vcmask 1040384   ;;  %vm453_vm1 = vcmask 277504  }
 0x10e   :  { %514 = vmatprep.mubr.bf16.mxu0 %v12268_v0  ;;  %575 = vmatprep.mubr.bf16.mxu1 %v12268_v0  ;;  %s13374_s23 = sld [smem:[#allocation43_spill]]  ;;  %vm2272_vm2 = vcmask 1042432   ;;  %vm2262_vm3 = vcmask 310272   ;;  %vm12270_vm4 = vmmov 0   ;;  %vm4471_vm5 = vcmask 130048  }
 0x10f   :  { %s13375_s26 = sld [smem:[#allocation44_spill]]  ;;  %vm4694_vm6 = vcmask 254976   ;;  %vm4704_vm7 = vcmask 15360   ;;  %vm4945_vm8 = vcmask 261120  }
 0x110   :  { %s13376_s8 = sld [smem:[#allocation46_spill]] }
 0x111   :  { %s13377_s16 = sld [smem:[#allocation47_spill]] }
 0x112   :  { %s13378_s11 = sld [smem:[#allocation48_spill]] }
 0x113   :  { %v375_v1 = vld [vmem:[%s13373_s20 + $0x60] sm:$0x11]  ;;  %v376_v2 = vld [vmem:[%s13373_s20 + $0x68] sm:$0x11]  ;;  %v10728_v8 = vld [vmem:[%s13373_s20 + $0x3c] ss:$24 sps:$4 sm:$0xff]  }
 0x114   :  { %v9451_v3 = vcombine.high %v375_v1, %v375_v1  ;;  %v9453_v4 = vcombine.high %v376_v2, %v376_v2  ;;  %v9450_v5 = vcombine.low %v375_v1, %v375_v1  ;;  %v9452_v6 = vcombine.low %v376_v2, %v376_v2  ;;  %v10726_v7 = vld [vmem:[%s13373_s20 + $0x34] ss:$24 sps:$4 sm:$0xff]   ;;  %v10730_v11 = vld [vmem:[%s13373_s20 + $0x30] ss:$24 sps:$4 sm:$0xff]   ;;  %v10732_v13 = vld [vmem:[%s13373_s20 + $0x4] ss:$24 sps:$4 sm:$0xff]  }
 0x115   :  { %v10731_v12 = vld [vmem:[%s13373_s20 + $0x38] ss:$24 sps:$4 sm:$0xff]   ;;  %v10734_v14 = vld [vmem:[%s13373_s20 + $0xc] ss:$24 sps:$4 sm:$0xff]   ;;  %v10737_v16 = vld [vmem:[%s13373_s20 + $0x8] ss:$24 sps:$4 sm:$0xff]  }
 0x116   :  { %9456 = vmatprep.subr.msk.bf16.mxu0 %vm463_vm0, %v9451_v3  ;;  %9460 = vmatprep.subr.msk.bf16.mxu1 %vm463_vm0, %v9453_v4  ;;  %v465_v9 = vsel %vm463_vm0, %v9450_v5, 0  ;;  %v471_v10 = vsel %vm463_vm0, %v9452_v6, 0  ;;  %v10736_v15 = vld [vmem:[%s13373_s20] ss:$24 sps:$4 sm:$0xff]   ;;  %v377_v18 = vld [vmem:[%s13373_s20 + $0x70] sm:$0x11] }
 0x117   :  { %493 = vmatpush1.bf16.msra.mxu0 %v465_v9  ;;  %554 = vmatpush1.bf16.msra.mxu1 %v471_v10  ;;  %v355_v17 = vld [vmem:[%s13374_s23] sm:$0xff]  ;;  %v356_v19 = vld [vmem:[%s13374_s23 + $0x8] sm:$0xff]  ;;  %v9454_v20 = vcombine.low %v377_v18, %v377_v18  ;;  %v9455_v21 = vcombine.high %v377_v18, %v377_v18  ;;  %v357_v25 = vld [vmem:[%s13374_s23 + $0x10] sm:$0xff]  ;;  %s13379_s4 = sld [smem:[#allocation49_spill]] }
 0x118   :  { %494 = vmatprep.subr.bf16.mxu0 %v10726_v7  ;;  %555 = vmatprep.subr.bf16.mxu1 %v10728_v8  ;;  %v360_v23 = vpack.c.bf16 %v356_v19, %v355_v17  ;;  %v10742_v24 = vld [vmem:[%s13373_s20 + $0x44] ss:$24 sps:$4 sm:$0xff]   ;;  %v10740_v27 = vld [vmem:[%s13373_s20 + $0x40] ss:$24 sps:$4 sm:$0xff]   ;;  %v10745_v28 = vld [vmem:[%s13373_s20 + $0x14] ss:$24 sps:$4 sm:$0xff]  }
 0x119   :  { %v477_v22 = vsel %vm463_vm0, %v9454_v20, 0  ;;  %v358_v26 = vld [vmem:[%s13374_s23 + $0x18] sm:$0xff]  ;;  %v10743_v30 = vld [vmem:[%s13373_s20 + $0x10] ss:$24 sps:$4 sm:$0xff]   ;;  %v359_v31 = vld [vmem:[%s13374_s23 + $0x20] sm:$0x3] }
 0x11a   :  { %v361_v29 = vpack.c.bf16 %v358_v26, %v357_v25  ;;  %v362_v32 = vpack.c.bf16 %v359_v31, %v359_v31  ;;  %v10757_v7 = vld [vmem:[#allocation5 + $0x1fc] ss:$36 sps:$4 sm:$0xff]   ;;  %v10746_v9 = vld [vmem:[%s13375_s26 + $0x14] sm:$0xff]   ;;  %v10775_v26 = vld [vmem:[#allocation5 + $0x124] ss:$36 sps:$4 sm:$0xff]   ;;  %s13380_s14 = sld [smem:[#allocation50_spill]] }
 0x11b   :  { %495 = vmatpush1.bf16.msra.mxu0 %v10730_v11  ;;  %556 = vmatpush1.bf16.msra.mxu1 %v10731_v12  ;;  %v10747_v10 = vld [vmem:[%s13375_s26] sm:$0xff]   ;;  %v10761_v18 = vld [vmem:[#allocation5 + $0x1b0] ss:$36 sps:$4 sm:$0xff]   ;;  %s13381_s2 = sld [smem:[#allocation51_spill]] }
 0x11c   :  { %496 = vmatprep.subr.bf16.mxu0 %v10732_v13  ;;  %557 = vmatprep.subr.bf16.mxu1 %v10734_v14  ;;  %v10755_v14 = vld [vmem:[#allocation5 + $0x1f8] ss:$36 sps:$4 sm:$0xff]   ;;  %v10769_v20 = vld [vmem:[#allocation5 + $0x16c] ss:$36 sps:$4 sm:$0xff]  }
 0x11d   :  { %v10781_v31 = vld [vmem:[#allocation5 + $0xdc] ss:$36 sps:$4 sm:$0xff]  }
 0x11f   :  { %497 = vmatpush1.bf16.msra.mxu0 %v10736_v15  ;;  %558 = vmatpush1.bf16.msra.mxu1 %v10737_v16  ;;  %v10763_v16 = vld [vmem:[#allocation5 + $0x1b4] ss:$36 sps:$4 sm:$0xff]  }
 0x120   :  { %9464 = vmatprep.subr.msk.bf16.mxu0 %vm463_vm0, %v9455_v21  ;;  %v10748_v21 = vld [vmem:[%s13375_s26 + $0x1c] sm:$0xff]  }
 0x122   :  { %9457 = vmatmul.mubr.msk.bf16.vlgmr.msra.gmra.mxu0 %vm453_vm1, %v360_v23  ;;  %9461 = vmatmul.mubr.msk.bf16.vlgmr.msra.gmra.mxu1 %vm453_vm1, %v360_v23 }
 0x123   :  { %524 = vmatprep.mubr.bf16.mxu0 %v12268_v0  ;;  %585 = vmatprep.mubr.bf16.mxu1 %v12268_v0 }
 0x124   :  { %615 = vmatpush1.bf16.msra.mxu0 %v477_v22  ;;  %v10749_v22 = vld [vmem:[%s13375_s26 + $0x8] sm:$0xff]  }
 0x125   :  { %616 = vmatprep.subr.bf16.mxu0 %v10742_v24  ;;  %v10767_v24 = vld [vmem:[#allocation5 + $0x168] ss:$36 sps:$4 sm:$0xff]  }
 0x128   :  { %617 = vmatpush1.bf16.msra.mxu0 %v10740_v27 }
 0x129   :  { %618 = vmatprep.subr.bf16.mxu0 %v10745_v28 }
 0x12a   :  { %9458 = vmatmul.mubr.msk.bf16.gmra.mxu0 %vm453_vm1, %v361_v29  ;;  %9462 = vmatmul.mubr.msk.bf16.gmra.mxu1 %vm453_vm1, %v361_v29 }
 0x12b   :  { %534 = vmatprep.mubr.bf16.mxu0 %v12268_v0  ;;  %595 = vmatprep.mubr.bf16.mxu1 %v12268_v0 }
 0x12c   :  { %619 = vmatpush1.bf16.msra.mxu0 %v10743_v30 }
 0x132   :  { %9459 = vmatmul.mubr.msk.bf16.gmra.mxu0 %vm453_vm1, %v362_v32  ;;  %9463 = vmatmul.mubr.msk.bf16.gmra.mxu1 %vm453_vm1, %v362_v32 }
 0x133   :  { %636 = vmatprep.mubr.bf16.mxu0 %v12268_v0  ;;  %754 = vmatprep.mubr.bf16.mxu1 %v12268_v0 }
 0x13a   :  { %9465 = vmatmul.mubr.msk.bf16.vlgmr.msra.gmra.mxu0 %vm453_vm1, %v360_v23 }
 0x13b   :  { %646 = vmatprep.mubr.bf16.mxu0 %v12268_v0 }
 0x142   :  { %9466 = vmatmul.mubr.msk.bf16.gmra.mxu0 %vm453_vm1, %v361_v29  ;;  %v10773_v29 = vld [vmem:[#allocation5 + $0x120] ss:$36 sps:$4 sm:$0xff]  }
 0x143   :  { %656 = vmatprep.mubr.bf16.mxu0 %v12268_v0 }
 0x14a   :  { %9467 = vmatmul.mubr.msk.bf16.gmra.mxu0 %vm453_vm1, %v362_v32 }
 0x14b   :  { %843 = vmatprep.mubr.bf16.mxu0 %v12268_v0 }
 0x1e2   :  { %v516_v33 = vpop.f32.mrf.mxu0  ;;  %v577_v34 = vpop.f32.mrf.mxu1 }
 0x1e4   :  { %v518_v35 = vpop.f32.mrf.mxu0  ;;  %v579_v36 = vpop.f32.mrf.mxu1 }
 0x1e6   :  { %v520_v37 = vpop.f32.mrf.mxu0  ;;  %v581_v38 = vpop.f32.mrf.mxu1 }
 0x1e7   :  { %v665_v11 = vpack.c.bf16 %v520_v37, %v516_v33  ;;  %v667_v12 = vpack.c.bf16 %v581_v38, %v577_v34  ;;  %v10750_v33 = vld [vmem:[%s13375_s26 + $0x24] ss:$0 sps:$4 sm:$0x77]   ;;  %v10751_v34 = vld [vmem:[%s13375_s26 + $0x10] ss:$0 sps:$4 sm:$0x77]  }
 0x1e8   :  { %v522_v39 = vpop.f32.mrf.mxu0  ;;  %v583_v40 = vpop.f32.mrf.mxu1  ;;  %v10779_v38 = vld [vmem:[#allocation5 + $0xd8] ss:$36 sps:$4 sm:$0xff]  }
 0x1e9   :  { %v666_v5 = vpack.c.bf16 %v522_v39, %v518_v35  ;;  %v668_v6 = vpack.c.bf16 %v583_v40, %v579_v36  ;;  %v10787_v40 = vld [vmem:[#allocation5 + $0x94] ss:$36 sps:$4 sm:$0xff]  }
 0x1ea   :  { %v526_v41 = vpop.f32.mrf.mxu0  ;;  %v587_v42 = vpop.f32.mrf.mxu1 }
 0x1ec   :  { %v528_v43 = vpop.f32.mrf.mxu0  ;;  %v589_v44 = vpop.f32.mrf.mxu1 }
 0x1ee   :  { %v530_v45 = vpop.f32.mrf.mxu0  ;;  %v591_v46 = vpop.f32.mrf.mxu1 }
 0x1ef   :  { %v671_v2 = vpack.c.bf16 %v530_v45, %v526_v41  ;;  %v673_v3 = vpack.c.bf16 %v591_v46, %v587_v42  ;;  %v10793_v45 = vld [vmem:[#allocation5 + $0x4c] ss:$36 sps:$4 sm:$0xff]  }
 0x1f0   :  { %v532_v47 = vpop.f32.mrf.mxu0  ;;  %v593_v48 = vpop.f32.mrf.mxu1  ;;  %v10752_v46 = vld [vmem:[%s13375_s26 + $0x28] sm:$0xff]  }
 0x1f1   :  { %v672_v59 = vpack.c.bf16 %v532_v47, %v528_v43  ;;  %v674_v60 = vpack.c.bf16 %v593_v48, %v589_v44  ;;  %v10760_v43 = vld [vmem:[#allocation5 + $0x204] ss:$36 sps:$4 sm:$0xff]   ;;  %v10785_v44 = vld [vmem:[#allocation5 + $0x90] ss:$36 sps:$4 sm:$0xff]  }
 0x1f2   :  { %v536_v49 = vpop.f32.mrf.mxu0  ;;  %v597_v50 = vpop.f32.mrf.mxu1  ;;  %v10758_v48 = vld [vmem:[#allocation5 + $0x200] ss:$36 sps:$4 sm:$0xff]  }
 0x1f3   :  { %v677_v51 = vpack.c.bf16 %v536_v49, %v536_v49  ;;  %v679_v52 = vpack.c.bf16 %v597_v50, %v597_v50  ;;  %v10766_v49 = vld [vmem:[#allocation5 + $0x1bc] ss:$36 sps:$4 sm:$0xff]   ;;  %v10791_v50 = vld [vmem:[#allocation5 + $0x48] ss:$36 sps:$4 sm:$0xff]  }
 0x1f4   :  { %v538_v53 = vpop.f32.mrf.mxu0  ;;  %v599_v54 = vpop.f32.mrf.mxu1 }
 0x1f5   :  { %v678_v55 = vpack.c.bf16 %v538_v53, %v538_v53  ;;  %v680_v56 = vpack.c.bf16 %v599_v54, %v599_v54  ;;  %v806_v61 = vsel %vm463_vm0, %v677_v51, 0  ;;  %v717_v62 = vsel %vm463_vm0, %v679_v52, 0  ;;  %v10764_v51 = vld [vmem:[#allocation5 + $0x1b8] ss:$36 sps:$4 sm:$0xff]   ;;  %v10753_v53 = vld [vmem:[%s13375_s26 + $0x30] sm:$0xff]  }
 0x1f6   :  { %v540_v57 = vpop.f32.mrf.mxu0  ;;  %v601_v58 = vpop.f32.mrf.mxu1  ;;  %v10772_v52 = vld [vmem:[#allocation5 + $0x174] ss:$36 sps:$4 sm:$0xff]  }
 0x1f7   :  { %9476 = vmatprep.subr.msk.bf16.mxu1 %vm463_vm0, %v680_v56  ;;  %9483 = vmatprep.subr.msk.bf16.mxu0 %vm463_vm0, %v678_v55  ;;  %v10770_v54 = vld [vmem:[#allocation5 + $0x170] ss:$36 sps:$4 sm:$0xff]   ;;  %v10776_v56 = vld [vmem:[#allocation5 + $0x128] ss:$36 sps:$4 sm:$0xff]  }
 0x1f8   :  { %v541_v63 = vpop.f32.mrf.mxu0  ;;  %v602_v1 = vpop.f32.mrf.mxu1  ;;  %733 = vmatpush1.bf16.msra.mxu1 %v717_v62  ;;  %822 = vmatpush1.bf16.msra.mxu0 %v806_v61  ;;  %v10778_v55 = vld [vmem:[#allocation5 + $0x12c] ss:$36 sps:$4 sm:$0xff]   ;;  %v10784_v57 = vld [vmem:[#allocation5 + $0xe4] ss:$36 sps:$4 sm:$0xff]   ;;  %v10788_v61 = vld [vmem:[#allocation5 + $0x98] ss:$36 sps:$4 sm:$0xff]  }
 0x1f9   :  { %734 = vmatprep.subr.bf16.mxu1 %v674_v60  ;;  %823 = vmatprep.subr.bf16.mxu0 %v672_v59  ;;  %v10754_v58 = vld [vmem:[%s13375_s26 + $0x38] ss:$0 sps:$4 sm:$0x77]   ;;  %v10782_v59 = vld [vmem:[#allocation5 + $0xe0] ss:$36 sps:$4 sm:$0xff]  }
 0x1fa   :  { %v12526_v4 = vpop.f32.mrf.mxu0  ;;  %v10790_v60 = vld [vmem:[#allocation5 + $0x9c] ss:$36 sps:$4 sm:$0xff]   ;;  %v10796_v62 = vld [vmem:[#allocation5 + $0x54] ss:$36 sps:$4 sm:$0xff]   ;;  %v10799_v1 = vld [vmem:[#allocation5 + $0x4] ss:$36 sps:$4 sm:$0xff]  }
 0x1fb   :  { %v10794_v63 = vld [vmem:[#allocation5 + $0x50] ss:$36 sps:$4 sm:$0xff]  }
 0x1fc   :  { %v12528_v8 = vpop.f32.mrf.mxu0  ;;  %735 = vmatpush1.bf16.msra.mxu1 %v673_v3  ;;  %824 = vmatpush1.bf16.msra.mxu0 %v671_v2  ;;  %v10802_v2 = vld [vmem:[#allocation5 + $0xc] ss:$36 sps:$4 sm:$0xff]   ;;  %v10797_v3 = vld [vmem:[#allocation5] ss:$36 sps:$4 sm:$0xff]  }
 0x1fd   :  { %736 = vmatprep.subr.bf16.mxu1 %v668_v6  ;;  %825 = vmatprep.subr.bf16.mxu0 %v666_v5  ;;  %v10805_v5 = vld [vmem:[#allocation5 + $0x43c] ss:$36 sps:$4 sm:$0xff]   ;;  %v10808_v6 = vld [vmem:[#allocation5 + $0x444] ss:$36 sps:$4 sm:$0xff]  }
 0x1fe   :  { %v12532_v13 = vpop.f32.mrf.mxu0 }
 0x1ff   :  { %v669_v47 = vpack.c.bf16 %v12532_v13, %v12526_v4  ;;  %v10800_v4 = vld [vmem:[#allocation5 + $0x8] ss:$36 sps:$4 sm:$0xff]  }
 0x200   :  { %v644_v15 = vpop.f32.mrf.mxu0  ;;  %737 = vmatpush1.bf16.msra.mxu1 %v667_v12  ;;  %826 = vmatpush1.bf16.msra.mxu0 %v665_v11  ;;  %v10809_v11 = vld [vmem:[#allocation5 + $0x3f0] ss:$36 sps:$4 sm:$0xff]   ;;  %v10812_v12 = vld [vmem:[#allocation5 + $0x3f8] ss:$36 sps:$4 sm:$0xff]  }
 0x201   :  { %1911 = vmatprep.subr.bf16.mxu0 %v10757_v7  ;;  %v670_v42 = vpack.c.bf16 %v644_v15, %v12528_v8  ;;  %v10803_v7 = vld [vmem:[#allocation5 + $0x438] ss:$36 sps:$4 sm:$0xff]   ;;  %v10806_v8 = vld [vmem:[#allocation5 + $0x440] ss:$36 sps:$4 sm:$0xff]   ;;  %v10817_v13 = vld [vmem:[#allocation5 + $0x3ac] ss:$36 sps:$4 sm:$0xff]  }
 0x202   :  { %v648_v17 = vpop.f32.mrf.mxu0  ;;  %v10815_v15 = vld [vmem:[#allocation5 + $0x3a8] ss:$36 sps:$4 sm:$0xff]  }
 0x203   :  { %9477 = vmatmul.mubr.msk.bf16.vlgmr.msra.gmra.mxu1 %vm453_vm1, %v10746_v9  ;;  %9484 = vmatmul.mubr.msk.bf16.vlgmr.msra.gmra.mxu0 %vm453_vm1, %v10747_v10  ;;  %v10811_v9 = vld [vmem:[#allocation5 + $0x3f4] ss:$36 sps:$4 sm:$0xff]   ;;  %v10814_v10 = vld [vmem:[#allocation5 + $0x3fc] ss:$36 sps:$4 sm:$0xff]  }
 0x204   :  { %v650_v19 = vpop.f32.mrf.mxu0  ;;  %764 = vmatprep.mubr.bf16.mxu1 %v12268_v0  ;;  %853 = vmatprep.mubr.bf16.mxu0 %v12268_v0 }
 0x205   :  { %1912 = vmatpush1.bf16.msra.mxu0 %v10755_v14  ;;  %v10820_v14 = vld [vmem:[#allocation5 + $0x3b4] ss:$36 sps:$4 sm:$0xff]  }
 0x206   :  { %v652_v23 = vpop.f32.mrf.mxu0  ;;  %1913 = vmatprep.subr.bf16.mxu0 %v10763_v16  ;;  %v10818_v16 = vld [vmem:[#allocation5 + $0x3b0] ss:$36 sps:$4 sm:$0xff]  }
 0x207   :  { %v675_v41 = vpack.c.bf16 %v652_v23, %v648_v17  ;;  %v10823_v17 = vld [vmem:[#allocation5 + $0x364] ss:$36 sps:$4 sm:$0xff]   ;;  %v10827_v23 = vld [vmem:[#allocation5 + $0x318] ss:$36 sps:$4 sm:$0xff]  }
 0x208   :  { %v654_v25 = vpop.f32.mrf.mxu0 }
 0x209   :  { %1914 = vmatpush1.bf16.msra.mxu0 %v10761_v18  ;;  %v676_v36 = vpack.c.bf16 %v654_v25, %v650_v19  ;;  %v10826_v18 = vld [vmem:[#allocation5 + $0x36c] ss:$36 sps:$4 sm:$0xff]   ;;  %v10821_v19 = vld [vmem:[#allocation5 + $0x360] ss:$36 sps:$4 sm:$0xff]   ;;  %v10835_v25 = vld [vmem:[#allocation5 + $0x2d4] ss:$36 sps:$4 sm:$0xff]  }
 0x20a   :  { %v658_v27 = vpop.f32.mrf.mxu0  ;;  %1915 = vmatprep.subr.bf16.mxu0 %v10769_v20  ;;  %v10824_v20 = vld [vmem:[#allocation5 + $0x368] ss:$36 sps:$4 sm:$0xff]  }
 0x20b   :  { %v681_v28 = vpack.c.bf16 %v658_v27, %v658_v27  ;;  %9478 = vmatmul.mubr.msk.bf16.gmra.mxu1 %vm453_vm1, %v10748_v21  ;;  %9485 = vmatmul.mubr.msk.bf16.gmra.mxu0 %vm453_vm1, %v10749_v22  ;;  %v10829_v21 = vld [vmem:[#allocation5 + $0x31c] ss:$36 sps:$4 sm:$0xff]   ;;  %v10832_v22 = vld [vmem:[#allocation5 + $0x324] ss:$36 sps:$4 sm:$0xff]   ;;  %v10833_v27 = vld [vmem:[#allocation5 + $0x2d0] ss:$36 sps:$4 sm:$0xff]  }
 0x20c   :  { %v660_v30 = vpop.f32.mrf.mxu0  ;;  %774 = vmatprep.mubr.bf16.mxu1 %v12268_v0  ;;  %863 = vmatprep.mubr.bf16.mxu0 %v12268_v0 }
 0x20d   :  { %v682_v32 = vpack.c.bf16 %v660_v30, %v660_v30  ;;  %1916 = vmatpush1.bf16.msra.mxu0 %v10767_v24  ;;  %v901_v37 = vsel %vm463_vm0, %v681_v28, 0  ;;  %v10830_v24 = vld [vmem:[#allocation5 + $0x320] ss:$36 sps:$4 sm:$0xff]   ;;  %v10836_v28 = vld [vmem:[#allocation5 + $0x2d8] ss:$36 sps:$4 sm:$0xff]  }
 0x20e   :  { %v662_v35 = vpop.f32.mrf.mxu0  ;;  %1917 = vmatprep.subr.bf16.mxu0 %v10775_v26  ;;  %v10838_v26 = vld [vmem:[#allocation5 + $0x2dc] ss:$36 sps:$4 sm:$0xff]   ;;  %v10844_v30 = vld [vmem:[#allocation5 + $0x294] ss:$36 sps:$4 sm:$0xff]  }
 0x20f   :  { %9495 = vmatprep.subr.msk.bf16.mxu1 %vm463_vm0, %v682_v32  ;;  %v10842_v32 = vld [vmem:[#allocation5 + $0x290] ss:$36 sps:$4 sm:$0xff]   ;;  %v10845_v35 = vld [vmem:[#allocation5 + $0x240] ss:$36 sps:$4 sm:$0xff]  }
 0x210   :  { %v663_v39 = vpop.f32.mrf.mxu0  ;;  %917 = vmatpush1.bf16.msra.mxu1 %v901_v37  ;;  %v10853_v37 = vld [vmem:[#allocation5 + $0x20c] ss:$36 sps:$4 sm:$0xff]  }
 0x211   :  { %918 = vmatprep.subr.bf16.mxu1 %v676_v36  ;;  %1918 = vmatpush1.bf16.msra.mxu0 %v10773_v29  ;;  %v10841_v29 = vld [vmem:[#allocation5 + $0x28c] ss:$36 sps:$4 sm:$0xff]  }
 0x212   :  { %1919 = vmatprep.subr.bf16.mxu0 %v10781_v31  ;;  %v10839_v31 = vld [vmem:[#allocation5 + $0x288] ss:$36 sps:$4 sm:$0xff]  }
 0x213   :  { %9479 = vmatmul.mubr.msk.bf16.gmra.mxu1 %vm453_vm1, %v10750_v33  ;;  %9486 = vmatmul.mubr.msk.bf16.gmra.mxu0 %vm453_vm1, %v10751_v34  ;;  %v10847_v33 = vld [vmem:[#allocation5 + $0x244] ss:$36 sps:$4 sm:$0xff]   ;;  %v10850_v34 = vld [vmem:[#allocation5 + $0x24c] ss:$36 sps:$4 sm:$0xff]  }
 0x214   :  { %919 = vmatpush1.bf16.msra.mxu1 %v675_v41  ;;  %938 = vmatprep.mubr.bf16.mxu1 %v12268_v0  ;;  %v10848_v36 = vld [vmem:[#allocation5 + $0x248] ss:$36 sps:$4 sm:$0xff]  }
 0x215   :  { %920 = vmatprep.subr.bf16.mxu1 %v670_v42  ;;  %1920 = vmatpush1.bf16.msra.mxu0 %v10779_v38  ;;  %v10856_v38 = vld [vmem:[#allocation5 + $0x214] ss:$36 sps:$4 sm:$0xff]  }
 0x216   :  { %1921 = vmatprep.subr.bf16.mxu0 %v10787_v40 }
 0x218   :  { %921 = vmatpush1.bf16.msra.mxu1 %v669_v47 }
 0x219   :  { %1972 = vmatprep.subr.bf16.mxu1 %v10760_v43  ;;  %1922 = vmatpush1.bf16.msra.mxu0 %v10785_v44 }
 0x21a   :  { %1923 = vmatprep.subr.bf16.mxu0 %v10793_v45 }
 0x21b   :  { %9496 = vmatmul.mubr.msk.bf16.vlgmr.msra.gmra.mxu1 %vm453_vm1, %v10752_v46 }
 0x21c   :  { %948 = vmatprep.mubr.bf16.mxu1 %v12268_v0  ;;  %1973 = vmatpush1.bf16.msra.mxu1 %v10758_v48 }
 0x21d   :  { %1974 = vmatprep.subr.bf16.mxu1 %v10766_v49  ;;  %1924 = vmatpush1.bf16.msra.mxu0 %v10791_v50 }
 0x21e   :  { %1925 = vmatprep.subr.bf16.mxu0 %v10799_v1 }
 0x220   :  { %1975 = vmatpush1.bf16.msra.mxu1 %v10764_v51 }
 0x221   :  { %1976 = vmatprep.subr.bf16.mxu1 %v10772_v52  ;;  %1926 = vmatpush1.bf16.msra.mxu0 %v10797_v3 }
 0x222   :  { %1927 = vmatprep.subr.bf16.mxu0 %v10805_v5 }
 0x223   :  { %9497 = vmatmul.mubr.msk.bf16.gmra.mxu1 %vm453_vm1, %v10753_v53 }
 0x224   :  { %958 = vmatprep.mubr.bf16.mxu1 %v12268_v0  ;;  %1977 = vmatpush1.bf16.msra.mxu1 %v10770_v54 }
 0x225   :  { %1978 = vmatprep.subr.bf16.mxu1 %v10778_v55  ;;  %1928 = vmatpush2.bf16.msra.mxu0 %v10803_v7 }
 0x226   :  { %1929 = vmatprep.subr.bf16.mxu0 %v10811_v9 }
 0x228   :  { %1979 = vmatpush1.bf16.msra.mxu1 %v10776_v56 }
 0x229   :  { %1980 = vmatprep.subr.bf16.mxu1 %v10784_v57  ;;  %1930 = vmatpush2.bf16.msra.mxu0 %v10809_v11  ;;  %v979_v57 = vlaneseq }
 0x22a   :  { %1931 = vmatprep.subr.bf16.mxu0 %v10817_v13 }
 0x22b   :  { %9498 = vmatmul.mubr.msk.bf16.gmra.mxu1 %vm453_vm1, %v10754_v58 }
 0x22c   :  { %1981 = vmatpush1.bf16.msra.mxu1 %v10782_v59 }
 0x22d   :  { %1982 = vmatprep.subr.bf16.mxu1 %v10790_v60  ;;  %1932 = vmatpush2.bf16.msra.mxu0 %v10815_v15 }
 0x22e   :  { %1933 = vmatprep.subr.bf16.mxu0 %v10823_v17 }
 0x230   :  { %1983 = vmatpush1.bf16.msra.mxu1 %v10788_v61  ;;  %v12562_v61 = vshrl.u32 %v979_v57, 7 }
 0x231   :  { %1984 = vmatprep.subr.bf16.mxu1 %v10796_v62  ;;  %1934 = vmatpush2.bf16.msra.mxu0 %v10821_v19 }
 0x232   :  { %1935 = vmatprep.subr.bf16.mxu0 %v10829_v21 }
 0x234   :  { %1985 = vmatpush1.bf16.msra.mxu1 %v10794_v63 }
 0x235   :  { %1986 = vmatprep.subr.bf16.mxu1 %v10802_v2  ;;  %1936 = vmatpush2.bf16.msra.mxu0 %v10827_v23  ;;  %v12565_v2 = vsub.s32 1, %v12562_v61 }
 0x236   :  { %1937 = vmatprep.subr.bf16.mxu0 %v10835_v25 }
 0x238   :  { %1987 = vmatpush1.bf16.msra.mxu1 %v10800_v4  ;;  %v12568_v4 = vsub.s32 0, %v12562_v61 }
 0x239   :  { %1988 = vmatprep.subr.bf16.mxu1 %v10808_v6  ;;  %1938 = vmatpush2.bf16.msra.mxu0 %v10833_v27  ;;  %v977_v6 = vld [vmem:[#allocation2] sm:$0x3] }
 0x23a   :  { %1939 = vmatprep.subr.bf16.mxu0 %v10841_v29  ;;  %v986_v11 = vrot.slane %v977_v6, %v12565_v2  ;;  %v12572_v13 = vrot.slane %v977_v6, %v12568_v4 }
 0x23c   :  { %1989 = vmatpush2.bf16.msra.mxu1 %v10806_v8 }
 0x23d   :  { %1990 = vmatprep.subr.bf16.mxu1 %v10814_v10  ;;  %1940 = vmatpush2.bf16.msra.mxu0 %v10839_v31 }
 0x23e   :  { %1941 = vmatprep.subr.bf16.mxu0 %v10847_v33 }
 0x240   :  { %1991 = vmatpush2.bf16.msra.mxu1 %v10812_v12 }
 0x241   :  { %1992 = vmatprep.subr.bf16.mxu1 %v10820_v14  ;;  %1942 = vmatpush2.bf16.msra.mxu0 %v10845_v35 }
 0x242   :  { %2033 = vmatprep.subr.bf16.mxu0 %v10853_v37 }
 0x244   :  { %1993 = vmatpush2.bf16.msra.mxu1 %v10818_v16 }
 0x245   :  { %1994 = vmatprep.subr.bf16.mxu1 %v10826_v18 }
 0x248   :  { %1995 = vmatpush2.bf16.msra.mxu1 %v10824_v20 }
 0x249   :  { %1996 = vmatprep.subr.bf16.mxu1 %v10832_v22 }
 0x24c   :  { %1997 = vmatpush2.bf16.msra.mxu1 %v10830_v24 }
 0x24d   :  { %1998 = vmatprep.subr.bf16.mxu1 %v10838_v26 }
 0x250   :  { %1999 = vmatpush2.bf16.msra.mxu1 %v10836_v28 }
 0x251   :  { %2000 = vmatprep.subr.bf16.mxu1 %v10844_v30 }
 0x254   :  { %2001 = vmatpush2.bf16.msra.mxu1 %v10842_v32 }
 0x255   :  { %2002 = vmatprep.subr.bf16.mxu1 %v10850_v34 }
 0x258   :  { %2003 = vmatpush2.bf16.msra.mxu1 %v10848_v36 }
 0x259   :  { %2094 = vmatprep.subr.bf16.mxu1 %v10856_v38  ;;  %v10851_v38 = vld [vmem:[#allocation5 + $0x208] ss:$36 sps:$4 sm:$0xff]  }
 0x2c3   :  { %v756_v39 = vpop.f32.mrf.mxu1  ;;  %v845_v40 = vpop.f32.mrf.mxu0 }
 0x2c4   :  { %v846_v7 = vadd.f32 %v845_v40, %v756_v39  ;;  %v10854_v39 = vld [vmem:[#allocation5 + $0x210] ss:$36 sps:$4 sm:$0xff]  }
 0x2c5   :  { %v758_v41 = vpop.f32.mrf.mxu1  ;;  %v847_v42 = vpop.f32.mrf.mxu0 }
 0x2c6   :  { %v848_v5 = vadd.f32 %v847_v42, %v758_v41  ;;  %v10859_v42 = vld [vmem:[#allocation5 + $0x1c4] ss:$36 sps:$4 sm:$0xff]  }
 0x2c7   :  { %v760_v43 = vpop.f32.mrf.mxu1  ;;  %v849_v44 = vpop.f32.mrf.mxu0 }
 0x2c8   :  { %v850_v9 = vadd.f32 %v849_v44, %v760_v43  ;;  %v10862_v43 = vld [vmem:[#allocation5 + $0x1cc] ss:$36 sps:$4 sm:$0xff]  }
 0x2c9   :  { %v762_v45 = vpop.f32.mrf.mxu1  ;;  %v851_v46 = vpop.f32.mrf.mxu0 }
 0x2ca   :  { %v852_v15 = vadd.f32 %v851_v46, %v762_v45 }
 0x2cb   :  { %v766_v47 = vpop.f32.mrf.mxu1  ;;  %v855_v48 = vpop.f32.mrf.mxu0 }
 0x2cc   :  { %v856_v25 = vadd.f32 %v855_v48, %v766_v47 }
 0x2cd   :  { %v768_v49 = vpop.f32.mrf.mxu1  ;;  %v857_v50 = vpop.f32.mrf.mxu0 }
 0x2ce   :  { %v858_v23 = vadd.f32 %v857_v50, %v768_v49 }
 0x2cf   :  { %v770_v51 = vpop.f32.mrf.mxu1  ;;  %v859_v52 = vpop.f32.mrf.mxu0 }
 0x2d0   :  { %v860_v28 = vadd.f32 %v859_v52, %v770_v51  ;;  %v10857_v52 = vld [vmem:[#allocation5 + $0x1c0] ss:$36 sps:$4 sm:$0xff]  }
 0x2d1   :  { %v772_v53 = vpop.f32.mrf.mxu1  ;;  %v861_v54 = vpop.f32.mrf.mxu0 }
 0x2d2   :  { %v862_v35 = vadd.f32 %v861_v54, %v772_v53  ;;  %v10860_v53 = vld [vmem:[#allocation5 + $0x1c8] ss:$36 sps:$4 sm:$0xff]  }
 0x2d3   :  { %v776_v55 = vpop.f32.mrf.mxu1  ;;  %v865_v56 = vpop.f32.mrf.mxu0 }
 0x2d4   :  { %v866_v47 = vadd.f32 %v865_v56, %v776_v55  ;;  %v10868_v55 = vld [vmem:[#allocation5 + $0x184] ss:$36 sps:$4 sm:$0xff]  }
 0x2d5   :  { %v778_v58 = vpop.f32.mrf.mxu1  ;;  %v867_v59 = vpop.f32.mrf.mxu0 }
 0x2d6   :  { %v868_v50 = vadd.f32 %v867_v59, %v778_v58  ;;  %v10863_v59 = vld [vmem:[#allocation5 + $0x178] ss:$36 sps:$4 sm:$0xff]  }
 0x2d7   :  { %v780_v60 = vpop.f32.mrf.mxu1  ;;  %v869_v62 = vpop.f32.mrf.mxu0 }
 0x2d8   :  { %v10865_v62 = vld [vmem:[#allocation5 + $0x17c] ss:$36 sps:$4 sm:$0xff]  }
 0x2d9   :  { %v781_v63 = vpop.f32.mrf.mxu1  ;;  %v870_v1 = vpop.f32.mrf.mxu0 }
 0x2db   :  { %v940_v3 = vpop.f32.mrf.mxu1 }
 0x2dc   :  { %v967_v12 = vadd.f32 %v940_v3, %v846_v7  ;;  %v10866_v7 = vld [vmem:[#allocation5 + $0x180] ss:$36 sps:$4 sm:$0xff]  }
 0x2dd   :  { %v942_v8 = vpop.f32.mrf.mxu1 }
 0x2de   :  { %v968_v10 = vadd.f32 %v942_v8, %v848_v5  ;;  %v989_v21 = vadd.f32 %v12572_v13, %v967_v12  ;;  %v10874_v12 = vld [vmem:[#allocation5 + $0x13c] ss:$36 sps:$4 sm:$0xff]  }
 0x2df   :  { %v944_v14 = vpop.f32.mrf.mxu1 }
 0x2e0   :  { %v969_v16 = vadd.f32 %v944_v14, %v850_v9  ;;  %v990_v18 = vadd.f32 %v986_v11, %v968_v10  ;;  %v999_v32 = vmax.f32 %v989_v21, 0.0  ;;  %v10871_v10 = vld [vmem:[#allocation5 + $0x134] ss:$36 sps:$4 sm:$0xff]  }
 0x2e1   :  { %v946_v17 = vpop.f32.mrf.mxu1  ;;  %v10878_v21 = vld [vmem:[#allocation5 + $0xf0] ss:$36 sps:$4 sm:$0xff]  }
 0x2e2   :  { %v991_v19 = vadd.f32 %v12572_v13, %v969_v16  ;;  %v970_v20 = vadd.f32 %v946_v17, %v852_v15  ;;  %v1000_v29 = vmax.f32 %v990_v18, 0.0  ;;  %v10869_v16 = vld [vmem:[#allocation5 + $0x130] ss:$36 sps:$4 sm:$0xff]  }
 0x2e3   :  { %v950_v22 = vpop.f32.mrf.mxu1  ;;  %v10877_v18 = vld [vmem:[#allocation5 + $0xec] ss:$36 sps:$4 sm:$0xff]  }
 0x2e4   :  { %v992_v24 = vadd.f32 %v986_v11, %v970_v20  ;;  %v1001_v26 = vmax.f32 %v991_v19, 0.0  ;;  %v971_v33 = vadd.f32 %v950_v22, %v856_v25  ;;  %v10880_v19 = vld [vmem:[#allocation5 + $0xf4] ss:$36 sps:$4 sm:$0xff]   ;;  %v10875_v20 = vld [vmem:[#allocation5 + $0xe8] ss:$36 sps:$4 sm:$0xff]  }
 0x2e5   :  { %v952_v27 = vpop.f32.mrf.mxu1  ;;  %v10881_v25 = vld [vmem:[#allocation5 + $0xa0] ss:$36 sps:$4 sm:$0xff]  }
 0x2e6   :  { %v1002_v30 = vmax.f32 %v992_v24, 0.0  ;;  %v972_v31 = vadd.f32 %v952_v27, %v858_v23  ;;  %v12578_v40 = vpack.c.bf16 %v1001_v26, %v999_v32  ;;  %v993_v48 = vadd.f32 %v12572_v13, %v971_v33  ;;  %v10883_v23 = vld [vmem:[#allocation5 + $0xa4] ss:$36 sps:$4 sm:$0xff]   ;;  %v10886_v24 = vld [vmem:[#allocation5 + $0xac] ss:$36 sps:$4 sm:$0xff]  }
 0x2e7   :  { %v954_v34 = vpop.f32.mrf.mxu1  ;;  %v10884_v26 = vld [vmem:[#allocation5 + $0xa8] ss:$36 sps:$4 sm:$0xff]   ;;  %v10889_v27 = vld [vmem:[#allocation5 + $0x5c] ss:$36 sps:$4 sm:$0xff]   ;;  %v10893_v33 = vld [vmem:[#allocation5 + $0x10] ss:$36 sps:$4 sm:$0xff]  }
 0x2e8   :  { %v12576_v36 = vpack.c.bf16 %v1002_v30, %v1000_v29  ;;  %v973_v37 = vadd.f32 %v954_v34, %v860_v28  ;;  %v994_v44 = vadd.f32 %v986_v11, %v972_v31  ;;  %v1003_v3 = vmax.f32 %v993_v48, 0.0  ;;  %v10892_v28 = vld [vmem:[#allocation5 + $0x64] ss:$36 sps:$4 sm:$0xff]   ;;  %v10887_v29 = vld [vmem:[#allocation5 + $0x58] ss:$36 sps:$4 sm:$0xff]  }
 0x2e9   :  { %v956_v41 = vpop.f32.mrf.mxu1  ;;  %v10890_v30 = vld [vmem:[#allocation5 + $0x60] ss:$36 sps:$4 sm:$0xff]   ;;  %v10895_v31 = vld [vmem:[#allocation5 + $0x14] ss:$36 sps:$4 sm:$0xff]  }
 0x2ea   :  { %v995_v45 = vadd.f32 %v12572_v13, %v973_v37  ;;  %v974_v46 = vadd.f32 %v956_v41, %v862_v35  ;;  %1943 = vmatprep.mubr.bf16.mxu0 %v12576_v36  ;;  %2004 = vmatprep.mubr.bf16.mxu1 %v12576_v36  ;;  %v1004_v56 = vmax.f32 %v994_v44, 0.0  ;;  %v10898_v32 = vld [vmem:[#allocation5 + $0x1c] ss:$36 sps:$4 sm:$0xff]   ;;  %v10901_v35 = vld [vmem:[#allocation5 + $0x44c] ss:$36 sps:$4 sm:$0xff]  }
 0x2eb   :  { %v960_v49 = vpop.f32.mrf.mxu1  ;;  %1944 = vmatmul.mubr.bf16.vlgmr.msra.gmra.mxu0 %v12578_v40  ;;  %2005 = vmatmul.mubr.bf16.vlgmr.msra.gmra.mxu1 %v12578_v40  ;;  %v10896_v34 = vld [vmem:[#allocation5 + $0x18] ss:$36 sps:$4 sm:$0xff]   ;;  %v10907_v41 = vld [vmem:[#allocation5 + $0x404] ss:$36 sps:$4 sm:$0xff]  }
 0x2ec   :  { %v996_v51 = vadd.f32 %v986_v11, %v974_v46  ;;  %2034 = vmatpush1.bf16.msra.mxu0 %v10851_v38  ;;  %2095 = vmatpush1.bf16.msra.mxu1 %v10854_v39  ;;  %v1005_v54 = vmax.f32 %v995_v45, 0.0  ;;  %v975_v57 = vadd.f32 %v960_v49, %v866_v47  ;;  %v10904_v37 = vld [vmem:[#allocation5 + $0x454] ss:$36 sps:$4 sm:$0xff]   ;;  %v10899_v38 = vld [vmem:[#allocation5 + $0x448] ss:$36 sps:$4 sm:$0xff]  }
 0x2ed   :  { %v962_v60 = vpop.f32.mrf.mxu1  ;;  %2035 = vmatprep.subr.bf16.mxu0 %v10859_v42  ;;  %2096 = vmatprep.subr.bf16.mxu1 %v10862_v43  ;;  %v10902_v39 = vld [vmem:[#allocation5 + $0x450] ss:$36 sps:$4 sm:$0xff]   ;;  %v10905_v43 = vld [vmem:[#allocation5 + $0x400] ss:$36 sps:$4 sm:$0xff]   ;;  %v10908_v44 = vld [vmem:[#allocation5 + $0x408] ss:$36 sps:$4 sm:$0xff]  }
 0x2ee   :  { %v1006_v63 = vmax.f32 %v996_v51, 0.0  ;;  %v976_v1 = vadd.f32 %v962_v60, %v868_v50  ;;  %v12588_v8 = vpack.c.bf16 %v1005_v54, %v1003_v3  ;;  %v997_v9 = vadd.f32 %v12572_v13, %v975_v57  ;;  %v10872_v13 = vld [vmem:[#allocation5 + $0x138] ss:$36 sps:$4 sm:$0xff]   ;;  %v10910_v42 = vld [vmem:[#allocation5 + $0x40c] ss:$36 sps:$4 sm:$0xff]  }
 0x2ef   :  { %v964_v5 = vpop.f32.mrf.mxu1  ;;  %v10913_v45 = vld [vmem:[#allocation5 + $0x3bc] ss:$36 sps:$4 sm:$0xff]   ;;  %v10916_v46 = vld [vmem:[#allocation5 + $0x3c4] ss:$36 sps:$4 sm:$0xff]   ;;  %v10919_v49 = vld [vmem:[#allocation5 + $0x374] ss:$36 sps:$4 sm:$0xff]  }
 0x2f0   :  { %v12586_v6 = vpack.c.bf16 %v1006_v63, %v1004_v56  ;;  %v998_v58 = vadd.f32 %v986_v11, %v976_v1  ;;  %2036 = vmatpush1.bf16.msra.mxu0 %v10857_v52  ;;  %2097 = vmatpush1.bf16.msra.mxu1 %v10860_v53  ;;  %v1007_v17 = vmax.f32 %v997_v9, 0.0  ;;  %v10911_v47 = vld [vmem:[#allocation5 + $0x3b8] ss:$36 sps:$4 sm:$0xff]   ;;  %v10914_v48 = vld [vmem:[#allocation5 + $0x3c0] ss:$36 sps:$4 sm:$0xff]  }
 0x2f1   :  { %2037 = vmatprep.subr.bf16.mxu0 %v10865_v62  ;;  %2098 = vmatprep.subr.bf16.mxu1 %v10868_v55  ;;  %v965_v14 = vpop.f32.mrf.mxu1  ;;  %v10922_v50 = vld [vmem:[#allocation5 + $0x37c] ss:$36 sps:$4 sm:$0xff]   ;;  %v10917_v51 = vld [vmem:[#allocation5 + $0x370] ss:$36 sps:$4 sm:$0xff]   ;;  %v10923_v57 = vld [vmem:[#allocation5 + $0x328] ss:$36 sps:$4 sm:$0xff]  }
 0x2f2   :  { %v1008_v15 = vmax.f32 %v998_v58, 0.0  ;;  %1953 = vmatprep.mubr.bf16.mxu0 %v12586_v6  ;;  %2014 = vmatprep.mubr.bf16.mxu1 %v12586_v6  ;;  %v12599_v22 = vpack.c.bf16 %v1007_v17, %v1007_v17  ;;  %v10920_v52 = vld [vmem:[#allocation5 + $0x378] ss:$36 sps:$4 sm:$0xff]   ;;  %v10925_v53 = vld [vmem:[#allocation5 + $0x32c] ss:$36 sps:$4 sm:$0xff]  }
 0x2f3   :  { %1954 = vmatmul.mubr.bf16.gmra.mxu0 %v12588_v8  ;;  %2015 = vmatmul.mubr.bf16.gmra.mxu1 %v12588_v8  ;;  %v10928_v54 = vld [vmem:[#allocation5 + $0x334] ss:$36 sps:$4 sm:$0xff]   ;;  %v10931_v62 = vld [vmem:[#allocation5 + $0x2e4] ss:$36 sps:$4 sm:$0xff]   ;;  %v10934_v55 = vld [vmem:[#allocation5 + $0x2ec] ss:$36 sps:$4 sm:$0xff]  }
 0x2f4   :  { %v12595_v11 = vpack.c.bf16 %v1008_v15, %v1008_v15  ;;  %2038 = vmatpush1.bf16.msra.mxu0 %v10863_v59  ;;  %2099 = vmatpush1.bf16.msra.mxu1 %v10866_v7  ;;  %v10926_v60 = vld [vmem:[#allocation5 + $0x330] ss:$36 sps:$4 sm:$0xff]   ;;  %v10929_v56 = vld [vmem:[#allocation5 + $0x2e0] ss:$36 sps:$4 sm:$0xff]   ;;  %v10932_v63 = vld [vmem:[#allocation5 + $0x2e8] ss:$36 sps:$4 sm:$0xff]  }
 0x2f5   :  { %2039 = vmatprep.subr.bf16.mxu0 %v10871_v10  ;;  %2100 = vmatprep.subr.bf16.mxu1 %v10874_v12  ;;  %v10937_v1 = vld [vmem:[#allocation5 + $0x29c] ss:$36 sps:$4 sm:$0xff]   ;;  %v10940_v3 = vld [vmem:[#allocation5 + $0x2a4] ss:$36 sps:$4 sm:$0xff]   ;;  %v10943_v59 = vld [vmem:[#allocation5 + $0x254] ss:$36 sps:$4 sm:$0xff]  }
 0x2f6   :  { %1963 = vmatprep.mubr.bf16.mxu0 %v12595_v11  ;;  %2024 = vmatprep.mubr.bf16.mxu1 %v12595_v11  ;;  %v10935_v5 = vld [vmem:[#allocation5 + $0x298] ss:$36 sps:$4 sm:$0xff]   ;;  %v10938_v58 = vld [vmem:[#allocation5 + $0x2a0] ss:$36 sps:$4 sm:$0xff]   ;;  %v10941_v9 = vld [vmem:[#allocation5 + $0x250] ss:$36 sps:$4 sm:$0xff]  }
 0x2f7   :  { %v10946_v7 = vld [vmem:[#allocation5 + $0x25c] ss:$36 sps:$4 sm:$0xff]   ;;  %v10949_v15 = vld [vmem:[#allocation5 + $0x410] ss:$36 sps:$4 sm:$0xff]   ;;  %v10952_v17 = vld [vmem:[#allocation5 + $0x188] ss:$36 sps:$4 sm:$0xff]  }
 0x2f8   :  { %2040 = vmatpush1.bf16.msra.mxu0 %v10869_v16  ;;  %2101 = vmatpush1.bf16.msra.mxu1 %v10872_v13  ;;  %v10944_v10 = vld [vmem:[#allocation5 + $0x258] ss:$36 sps:$4 sm:$0xff]   ;;  %v10950_v16 = vld [vmem:[#allocation5 + $0x1d0] ss:$36 sps:$4 sm:$0xff]   ;;  %v10951_v13 = vld [vmem:[#allocation5 + $0x3c8] ss:$36 sps:$4 sm:$0xff]  }
 0x2f9   :  { %2041 = vmatprep.subr.bf16.mxu0 %v10877_v18  ;;  %2102 = vmatprep.subr.bf16.mxu1 %v10880_v19  ;;  %v10947_v12 = vld [vmem:[#allocation5 + $0x458] ss:$36 sps:$4 sm:$0xff]   ;;  %v10953_v18 = vld [vmem:[#allocation5 + $0x380] ss:$36 sps:$4 sm:$0xff]  }
 0x2fa   :  { %v10948_v14 = vld [vmem:[#allocation5 + $0x218] ss:$36 sps:$4 sm:$0xff]   ;;  %v10954_v19 = vld [vmem:[#allocation5 + $0x140] ss:$36 sps:$4 sm:$0xff]  }
 0x2fb   :  { %1964 = vmatmul.mubr.bf16.gmra.mxu0 %v12599_v22  ;;  %2025 = vmatmul.mubr.bf16.gmra.mxu1 %v12599_v22 }
 0x2fc   :  { %2042 = vmatpush1.bf16.msra.mxu0 %v10875_v20  ;;  %2103 = vmatpush1.bf16.msra.mxu1 %v10878_v21  ;;  %v10955_v20 = vld [vmem:[#allocation5 + $0x338] ss:$36 sps:$4 sm:$0xff]  }
 0x2fd   :  { %2065 = vmatprep.mubr.bf16.mxu0 %v12576_v36  ;;  %2126 = vmatprep.mubr.bf16.mxu1 %v12576_v36  ;;  %v10956_v21 = vld [vmem:[#allocation5 + $0xf8] ss:$36 sps:$4 sm:$0xff]  }
 0x2fe   :  { %2043 = vmatprep.subr.bf16.mxu0 %v10883_v23  ;;  %2104 = vmatprep.subr.bf16.mxu1 %v10886_v24  ;;  %v10957_v23 = vld [vmem:[#allocation5 + $0x2f0] ss:$36 sps:$4 sm:$0xff]  }
 0x2ff   :  { %v10958_v24 = vld [vmem:[#allocation5 + $0xb0] ss:$36 sps:$4 sm:$0xff]  }
 0x300   :  { %2044 = vmatpush1.bf16.msra.mxu0 %v10881_v25  ;;  %2105 = vmatpush1.bf16.msra.mxu1 %v10884_v26  ;;  %v10959_v25 = vld [vmem:[#allocation5 + $0x2a8] ss:$36 sps:$4 sm:$0xff]  }
 0x301   :  { %2045 = vmatprep.subr.bf16.mxu0 %v10889_v27  ;;  %2106 = vmatprep.subr.bf16.mxu1 %v10892_v28  ;;  %v10960_v26 = vld [vmem:[#allocation5 + $0x68] ss:$36 sps:$4 sm:$0xff]   ;;  %v10961_v27 = vld [vmem:[#allocation5 + $0x260] ss:$36 sps:$4 sm:$0xff]  }
 0x302   :  { %v10962_v28 = vld [vmem:[#allocation5 + $0x20] ss:$36 sps:$4 sm:$0xff]  }
 0x304   :  { %2046 = vmatpush1.bf16.msra.mxu0 %v10887_v29  ;;  %2107 = vmatpush1.bf16.msra.mxu1 %v10890_v30 }
 0x305   :  { %2047 = vmatprep.subr.bf16.mxu0 %v10895_v31  ;;  %2108 = vmatprep.subr.bf16.mxu1 %v10898_v32 }
 0x308   :  { %2048 = vmatpush1.bf16.msra.mxu0 %v10893_v33  ;;  %2109 = vmatpush1.bf16.msra.mxu1 %v10896_v34 }
 0x309   :  { %2049 = vmatprep.subr.bf16.mxu0 %v10901_v35  ;;  %2110 = vmatprep.subr.bf16.mxu1 %v10904_v37 }
 0x30c   :  { %2050 = vmatpush2.bf16.msra.mxu0 %v10899_v38  ;;  %2111 = vmatpush2.bf16.msra.mxu1 %v10902_v39 }
 0x30d   :  { %2051 = vmatprep.subr.bf16.mxu0 %v10907_v41  ;;  %2112 = vmatprep.subr.bf16.mxu1 %v10910_v42 }
 0x310   :  { %2052 = vmatpush2.bf16.msra.mxu0 %v10905_v43  ;;  %2113 = vmatpush2.bf16.msra.mxu1 %v10908_v44 }
 0x311   :  { %2053 = vmatprep.subr.bf16.mxu0 %v10913_v45  ;;  %2114 = vmatprep.subr.bf16.mxu1 %v10916_v46 }
 0x314   :  { %2054 = vmatpush2.bf16.msra.mxu0 %v10911_v47  ;;  %2115 = vmatpush2.bf16.msra.mxu1 %v10914_v48 }
 0x315   :  { %2055 = vmatprep.subr.bf16.mxu0 %v10919_v49  ;;  %2116 = vmatprep.subr.bf16.mxu1 %v10922_v50 }
 0x318   :  { %2056 = vmatpush2.bf16.msra.mxu0 %v10917_v51  ;;  %2117 = vmatpush2.bf16.msra.mxu1 %v10920_v52 }
 0x319   :  { %2057 = vmatprep.subr.bf16.mxu0 %v10925_v53  ;;  %2118 = vmatprep.subr.bf16.mxu1 %v10928_v54 }
 0x31c   :  { %2058 = vmatpush2.bf16.msra.mxu0 %v10923_v57  ;;  %2119 = vmatpush2.bf16.msra.mxu1 %v10926_v60 }
 0x31d   :  { %2059 = vmatprep.subr.bf16.mxu0 %v10931_v62  ;;  %2120 = vmatprep.subr.bf16.mxu1 %v10934_v55  ;;  %v12648_v55 = vld [vmem:[%s13376_s8] sm:$0xff]  }
 0x320   :  { %2060 = vmatpush2.bf16.msra.mxu0 %v10929_v56  ;;  %2121 = vmatpush2.bf16.msra.mxu1 %v10932_v63  ;;  %v12654_v56 = vld [vmem:[%s13376_s8 + $0x8] sm:$0xff]   ;;  %v12660_v63 = vld [vmem:[%s13376_s8 + $0x10] ss:$0 sps:$4 sm:$0x11]  }
 0x321   :  { %2061 = vmatprep.subr.bf16.mxu0 %v10937_v1  ;;  %2122 = vmatprep.subr.bf16.mxu1 %v10940_v3 }
 0x324   :  { %2062 = vmatpush2.bf16.msra.mxu0 %v10935_v5  ;;  %2123 = vmatpush2.bf16.msra.mxu1 %v10938_v58 }
 0x325   :  { %2063 = vmatprep.subr.bf16.mxu0 %v10943_v59  ;;  %2124 = vmatprep.subr.bf16.mxu1 %v10946_v7 }
 0x328   :  { %2064 = vmatpush2.bf16.msra.mxu0 %v10941_v9  ;;  %2125 = vmatpush2.bf16.msra.mxu1 %v10944_v10 }
 0x329   :  { %10341 = vmatprep.subr.bf16.mxu0 %v10947_v12 }
 0x32b   :  { %2066 = vmatmul.mubr.bf16.vlgmr.msra.gmra.mxu0 %v12578_v40  ;;  %2127 = vmatmul.mubr.bf16.vlgmr.msra.gmra.mxu1 %v12578_v40 }
 0x32c   :  { %2075 = vmatprep.mubr.bf16.mxu0 %v12586_v6  ;;  %2136 = vmatprep.mubr.bf16.mxu1 %v12586_v6 }
 0x32d   :  { %10342 = vmatpush3.bf16.msra.mxu0 %v10948_v14 }
 0x32e   :  { %10343 = vmatprep.subr.bf16.mxu0 %v10949_v15 }
 0x331   :  { %10344 = vmatpush3.bf16.msra.mxu0 %v10950_v16 }
 0x332   :  { %10345 = vmatprep.subr.bf16.mxu0 %v10951_v13 }
 0x333   :  { %2076 = vmatmul.mubr.bf16.gmra.mxu0 %v12588_v8  ;;  %2137 = vmatmul.mubr.bf16.gmra.mxu1 %v12588_v8 }
 0x334   :  { %2085 = vmatprep.mubr.bf16.mxu0 %v12595_v11  ;;  %2146 = vmatprep.mubr.bf16.mxu1 %v12595_v11 }
 0x335   :  { %10346 = vmatpush3.bf16.msra.mxu0 %v10952_v17 }
 0x336   :  { %10347 = vmatprep.subr.bf16.mxu0 %v10953_v18 }
 0x339   :  { %10348 = vmatpush3.bf16.msra.mxu0 %v10954_v19 }
 0x33a   :  { %10349 = vmatprep.subr.bf16.mxu0 %v10955_v20 }
 0x33b   :  { %2086 = vmatmul.mubr.bf16.gmra.mxu0 %v12599_v22  ;;  %2147 = vmatmul.mubr.bf16.gmra.mxu1 %v12599_v22 }
 0x33c   :  { %2187 = vmatprep.mubr.bf16.mxu0 %v12576_v36  ;;  %2314 = vmatprep.mubr.bf16.mxu1 %v12268_v0 }
 0x33d   :  { %10350 = vmatpush3.bf16.msra.mxu0 %v10956_v21 }
 0x33e   :  { %10351 = vmatprep.subr.bf16.mxu0 %v10957_v23 }
 0x341   :  { %10352 = vmatpush3.bf16.msra.mxu0 %v10958_v24 }
 0x342   :  { %10353 = vmatprep.subr.bf16.mxu0 %v10959_v25 }
 0x345   :  { %10354 = vmatpush3.bf16.msra.mxu0 %v10960_v26 }
 0x346   :  { %10355 = vmatprep.subr.bf16.mxu0 %v10961_v27 }
 0x349   :  { %10356 = vmatpush3.bf16.msra.mxu0 %v10962_v28 }
 0x34c   :  { %2188 = vmatmul.mubr.bf16.vlgmr.msra.gmra.mxu0 %v12578_v40 }
 0x34d   :  { %2195 = vmatprep.mubr.bf16.mxu0 %v12586_v6 }
 0x354   :  { %2196 = vmatmul.mubr.bf16.gmra.mxu0 %v12588_v8 }
 0x355   :  { %2203 = vmatprep.mubr.bf16.mxu0 %v12595_v11 }
 0x35c   :  { %2204 = vmatmul.mubr.bf16.gmra.mxu0 %v12599_v22 }
 0x35d   :  { %2462 = vmatprep.mubr.bf16.mxu0 %v12268_v0 }
 0x3ab   :  { %v1945_v36 = vpop.f32.mrf.mxu0  ;;  %v12623_v29 = vpop.f32.mrf.mxu1 }
 0x3ad   :  { %v1947_v30 = vpop.f32.mrf.mxu0  ;;  %v12625_v31 = vpop.f32.mrf.mxu1 }
 0x3af   :  { %v1949_v32 = vpop.f32.mrf.mxu0  ;;  %v12627_v33 = vpop.f32.mrf.mxu1 }
 0x3b0   :  { %v2213_v40 = vpack.c.bf16 %v12627_v33, %v12623_v29  ;;  %v2211_v62 = vpack.c.bf16 %v1949_v32, %v1945_v36  ;;  %v11005_v29 = vld [vmem:[#allocation8 + $0x240] ss:$24 sps:$4 sm:$0xff]  }
 0x3b1   :  { %v1951_v6 = vpop.f32.mrf.mxu0  ;;  %v12631_v8 = vpop.f32.mrf.mxu1 }
 0x3b2   :  { %v2212_v60 = vpack.c.bf16 %v1951_v6, %v1947_v30 }
 0x3b3   :  { %v1955_v11 = vpop.f32.mrf.mxu0  ;;  %v12633_v34 = vpop.f32.mrf.mxu1 }
 0x3b5   :  { %v1957_v22 = vpop.f32.mrf.mxu0  ;;  %v12635_v35 = vpop.f32.mrf.mxu1 }
 0x3b7   :  { %v1959_v37 = vpop.f32.mrf.mxu0  ;;  %v12637_v38 = vpop.f32.mrf.mxu1 }
 0x3b8   :  { %v2222_v39 = vpack.c.bf16 %v12637_v38, %v12633_v34  ;;  %v2220_v57 = vpack.c.bf16 %v1959_v37, %v1955_v11  ;;  %v10999_v34 = vld [vmem:[#allocation8 + $0x2a0] ss:$24 sps:$4 sm:$0xff]   ;;  %v11004_v38 = vld [vmem:[#allocation8 + $0x274] ss:$24 sps:$4 sm:$0xff]  }
 0x3b9   :  { %v1961_v41 = vpop.f32.mrf.mxu0  ;;  %v12641_v42 = vpop.f32.mrf.mxu1 }
 0x3ba   :  { %v2221_v51 = vpack.c.bf16 %v1961_v41, %v1957_v22  ;;  %v2223_v37 = vpack.c.bf16 %v12641_v42, %v12635_v35  ;;  %v12269_v42 = vmov 0.0  }
 0x3bb   :  { %v1965_v43 = vpop.f32.mrf.mxu0  ;;  %v12643_v44 = vpop.f32.mrf.mxu1 }
 0x3bc   :  { %v2229_v45 = vpack.c.bf16 %v1965_v43, %v1965_v43 }
 0x3bd   :  { %v1967_v46 = vpop.f32.mrf.mxu0  ;;  %v2028_v47 = vpop.f32.mrf.mxu1 }
 0x3be   :  { %v2230_v48 = vpack.c.bf16 %v1967_v46, %v1967_v46  ;;  %v2422_v52 = vsel %vm2272_vm2, %v2229_v45, 0  ;;  %v2232_v20 = vpack.c.bf16 %v2028_v47, %v2028_v47 }
 0x3bf   :  { %v1969_v49 = vpop.f32.mrf.mxu0  ;;  %v2030_v50 = vpop.f32.mrf.mxu1 }
 0x3c0   :  { %9661 = vmatprep.subr.msk.bf16.mxu0 %vm2272_vm2, %v2230_v48  ;;  %v2274_v28 = vsel %vm2272_vm2, %v2232_v20, 0  ;;  %v2214_v48 = vpack.c.bf16 %v12631_v8, %v12625_v31  ;;  %v12680_v50 = vld [vmem:[%s13376_s8 + $0x14] sm:$0xff]  }
 0x3c1   :  { %v1970_v53 = vpop.f32.mrf.mxu0  ;;  %v2031_v54 = vpop.f32.mrf.mxu1  ;;  %2441 = vmatpush1.bf16.msra.mxu0 %v2422_v52  ;;  %v12684_v52 = vld [vmem:[%s13376_s8 + $0x28] sm:$0xff]   ;;  %v10977_v31 = vld [vmem:[#allocation8 + $0x124] ss:$24 sps:$4 sm:$0xff]  }
 0x3c2   :  { %2442 = vmatprep.subr.bf16.mxu0 %v2221_v51  ;;  %v10974_v51 = vld [vmem:[#allocation8 + $0x154] ss:$24 sps:$4 sm:$0xff]   ;;  %v10972_v53 = vld [vmem:[#allocation8 + $0x150] ss:$24 sps:$4 sm:$0xff]  }
 0x3c5   :  { %2443 = vmatpush1.bf16.msra.mxu0 %v2220_v57 }
 0x3c6   :  { %2444 = vmatprep.subr.bf16.mxu0 %v2212_v60  ;;  %v10975_v60 = vld [vmem:[#allocation8 + $0x120] ss:$24 sps:$4 sm:$0xff]  }
 0x3c9   :  { %2445 = vmatpush1.bf16.msra.mxu0 %v2211_v62 }
 0x3cc   :  { %9662 = vmatmul.mubr.msk.bf16.vlgmr.msra.gmra.mxu0 %vm2262_vm3, %v12648_v55 }
 0x3cd   :  { %2472 = vmatprep.mubr.bf16.mxu0 %v12268_v0 }
 0x3d4   :  { %9663 = vmatmul.mubr.msk.bf16.gmra.mxu0 %vm2262_vm3, %v12654_v56 }
 0x3d5   :  { %2482 = vmatprep.mubr.bf16.mxu0 %v12268_v0 }
 0x3dc   :  { %9664 = vmatmul.mubr.msk.bf16.gmra.mxu0 %vm2262_vm3, %v12660_v63 }
 0x3dd   :  { %2616 = vmatprep.mubr.bf16.mxu0 %v12268_v0 }
 0x3eb   :  { %v2067_v1 = vpop.f32.mrf.mxu0  ;;  %v2128_v3 = vpop.f32.mrf.mxu1 }
 0x3ed   :  { %v12665_v5 = vpop.f32.mrf.mxu0  ;;  %v2130_v58 = vpop.f32.mrf.mxu1 }
 0x3ef   :  { %v2071_v59 = vpop.f32.mrf.mxu0  ;;  %v2132_v7 = vpop.f32.mrf.mxu1 }
 0x3f0   :  { %v2215_v45 = vpack.c.bf16 %v2071_v59, %v2067_v1  ;;  %v2217_v35 = vpack.c.bf16 %v2132_v7, %v2128_v3  ;;  %v12700_v1 = vld [vmem:[%s13376_s8 + $0x1c] sm:$0xff]   ;;  %v10980_v3 = vld [vmem:[#allocation8 + $0xf4] ss:$24 sps:$4 sm:$0xff]  }
 0x3f1   :  { %v12667_v9 = vpop.f32.mrf.mxu0  ;;  %v2134_v10 = vpop.f32.mrf.mxu1  ;;  %v12706_v59 = vld [vmem:[%s13376_s8 + $0x30] sm:$0xff]  }
 0x3f2   :  { %v2218_v47 = vpack.c.bf16 %v2134_v10, %v2130_v58  ;;  %v2216_v7 = vpack.c.bf16 %v12667_v9, %v12665_v5  ;;  %v10978_v10 = vld [vmem:[#allocation8 + $0xf0] ss:$24 sps:$4 sm:$0xff]   ;;  %v10981_v5 = vld [vmem:[#allocation8 + $0xc0] ss:$24 sps:$4 sm:$0xff]  }
 0x3f3   :  { %v2077_v12 = vpop.f32.mrf.mxu0  ;;  %v2138_v14 = vpop.f32.mrf.mxu1 }
 0x3f5   :  { %v12669_v15 = vpop.f32.mrf.mxu0  ;;  %v2140_v16 = vpop.f32.mrf.mxu1 }
 0x3f7   :  { %v2081_v13 = vpop.f32.mrf.mxu0  ;;  %v2142_v17 = vpop.f32.mrf.mxu1 }
 0x3f8   :  { %v2224_v36 = vpack.c.bf16 %v2081_v13, %v2077_v12  ;;  %v2226_v46 = vpack.c.bf16 %v2142_v17, %v2138_v14  ;;  %v10983_v14 = vld [vmem:[#allocation8 + $0xc4] ss:$24 sps:$4 sm:$0xff]   ;;  %v10986_v13 = vld [vmem:[#allocation8 + $0x94] ss:$24 sps:$4 sm:$0xff]  }
 0x3f9   :  { %v2083_v18 = vpop.f32.mrf.mxu0  ;;  %v2144_v19 = vpop.f32.mrf.mxu1 }
 0x3fa   :  { %v2227_v11 = vpack.c.bf16 %v2144_v19, %v2140_v16  ;;  %v2225_v57 = vpack.c.bf16 %v2083_v18, %v12669_v15  ;;  %v10970_v16 = vld [vmem:[%s13376_s8 + $0x24] ss:$0 sps:$4 sm:$0x11]   ;;  %v12725_v18 = vld [vmem:[%s13376_s8 + $0x38] ss:$0 sps:$4 sm:$0x11]  }
 0x3fb   :  { %v2087_v21 = vpop.f32.mrf.mxu0  ;;  %v2148_v23 = vpop.f32.mrf.mxu1  ;;  %v10984_v19 = vld [vmem:[#allocation8 + $0x90] ss:$24 sps:$4 sm:$0xff]  }
 0x3fc   :  { %v2233_v24 = vpack.c.bf16 %v2087_v21, %v2087_v21  ;;  %v2235_v25 = vpack.c.bf16 %v2148_v23, %v2148_v23  ;;  %v10989_v21 = vld [vmem:[#allocation8 + $0x64] ss:$24 sps:$4 sm:$0xff]  }
 0x3fd   :  { %v2089_v26 = vpop.f32.mrf.mxu0  ;;  %v2150_v27 = vpop.f32.mrf.mxu1 }
 0x3fe   :  { %v2236_v30 = vpack.c.bf16 %v2150_v27, %v2150_v27  ;;  %9651 = vmatprep.subr.msk.bf16.mxu1 %vm2272_vm2, %v2233_v24  ;;  %v2576_v22 = vsel %vm2272_vm2, %v2235_v25, 0  ;;  %v2234_v49 = vpack.c.bf16 %v2089_v26, %v2089_v26  ;;  %v10987_v24 = vld [vmem:[#allocation8 + $0x60] ss:$24 sps:$4 sm:$0xff]   ;;  %v2231_v25 = vpack.c.bf16 %v12643_v44, %v12643_v44  ;;  %v10992_v27 = vld [vmem:[#allocation8 + $0x34] ss:$24 sps:$4 sm:$0xff]  }
 0x3ff   :  { %v2091_v32 = vpop.f32.mrf.mxu0  ;;  %v2152_v6 = vpop.f32.mrf.mxu1  ;;  %2293 = vmatpush1.bf16.msra.mxu1 %v2274_v28  ;;  %v10993_v44 = vld [vmem:[#allocation8] ss:$24 sps:$4 sm:$0xff]  }
 0x400   :  { %2294 = vmatprep.subr.bf16.mxu1 %v2224_v36  ;;  %9676 = vmatprep.subr.msk.bf16.mxu0 %vm2272_vm2, %v2236_v30  ;;  %v2280_v54 = vsel %vm2272_vm2, %v2234_v49, 0  ;;  %v10990_v36 = vld [vmem:[#allocation8 + $0x30] ss:$24 sps:$4 sm:$0xff]   ;;  %v2428_v30 = vsel %vm2272_vm2, %v2231_v25, 0  ;;  %v10995_v6 = vld [vmem:[#allocation8 + $0x4] ss:$24 sps:$4 sm:$0xff]  }
 0x401   :  { %v2092_v41 = vpop.f32.mrf.mxu0  ;;  %v2153_v43 = vpop.f32.mrf.mxu1  ;;  %2595 = vmatpush1.bf16.msra.mxu0 %v2576_v22  ;;  %v10996_v22 = vld [vmem:[#allocation8 + $0x2d0] ss:$24 sps:$4 sm:$0xff]  }
 0x402   :  { %2596 = vmatprep.subr.bf16.mxu0 %v2227_v11  ;;  %v10998_v11 = vld [vmem:[#allocation8 + $0x2d4] ss:$24 sps:$4 sm:$0xff]   ;;  %v11007_v43 = vld [vmem:[#allocation8 + $0x244] ss:$24 sps:$4 sm:$0xff]  }
 0x403   :  { %2295 = vmatpush1.bf16.msra.mxu1 %v2223_v37  ;;  %v11001_v37 = vld [vmem:[#allocation8 + $0x2a4] ss:$24 sps:$4 sm:$0xff]  }
 0x404   :  { %2296 = vmatprep.subr.bf16.mxu1 %v2215_v45 }
 0x405   :  { %2597 = vmatpush1.bf16.msra.mxu0 %v2226_v46 }
 0x406   :  { %2598 = vmatprep.subr.bf16.mxu0 %v2218_v47 }
 0x407   :  { %2297 = vmatpush1.bf16.msra.mxu1 %v2214_v48 }
 0x408   :  { %10503 = vmatprep.subr.bf16.mxu1 %v12269_v42 }
 0x409   :  { %2599 = vmatpush1.bf16.msra.mxu0 %v2217_v35  ;;  %v11013_v35 = vld [vmem:[#allocation8 + $0x1e4] ss:$24 sps:$4 sm:$0xff]  }
 0x40a   :  { %9652 = vmatmul.mubr.msk.bf16.vlgmr.msra.gmra.mxu1 %vm2262_vm3, %v12680_v50  ;;  %3636 = vmatprep.subr.bf16.mxu0 %v10974_v51  ;;  %v11008_v51 = vld [vmem:[#allocation8 + $0x210] ss:$24 sps:$4 sm:$0xff]  }
 0x40b   :  { %10504 = vmatpush3.bf16.msra.mxu1 %v2280_v54  ;;  %2324 = vmatprep.mubr.bf16.mxu1 %v12268_v0  ;;  %v11014_v54 = vld [vmem:[#allocation8 + $0x1b0] ss:$24 sps:$4 sm:$0xff]  }
 0x40c   :  { %v12690_v8 = vpop.f32.mrf.mxu0  ;;  %9677 = vmatmul.mubr.msk.bf16.vlgmr.msra.gmra.mxu0 %vm2262_vm3, %v12684_v52  ;;  %10505 = vmatprep.subr.bf16.mxu1 %v12269_v42 }
 0x40d   :  { %2626 = vmatprep.mubr.bf16.mxu0 %v12268_v0  ;;  %3637 = vmatpush1.bf16.msra.mxu0 %v10972_v53  ;;  %v11011_v53 = vld [vmem:[#allocation8 + $0x1e0] ss:$24 sps:$4 sm:$0xff]  }
 0x40e   :  { %v12697_v62 = vpop.f32.mrf.mxu0  ;;  %3638 = vmatprep.subr.bf16.mxu0 %v10977_v31  ;;  %v11017_v31 = vld [vmem:[#allocation8 + $0x180] ss:$24 sps:$4 sm:$0xff]  }
 0x40f   :  { %10506 = vmatpush3.bf16.msra.mxu1 %v2225_v57  ;;  %v10359_v49 = vadd.f32 %v12697_v62, %v12690_v8  ;;  %v11025_v8 = vld [vmem:[#allocation8 + $0x45c] ss:$24 sps:$4 sm:$0xff]   ;;  %v11020_v57 = vld [vmem:[#allocation8 + $0x450] ss:$24 sps:$4 sm:$0xff]   ;;  %v11026_v62 = vld [vmem:[#allocation8 + $0x420] ss:$24 sps:$4 sm:$0xff]  }
 0x410   :  { %v12702_v58 = vpop.f32.mrf.mxu0  ;;  %10507 = vmatprep.subr.bf16.mxu1 %v12269_v42 }
 0x411   :  { %3639 = vmatpush1.bf16.msra.mxu0 %v10975_v60  ;;  %v11028_v60 = vld [vmem:[#allocation8 + $0x424] ss:$24 sps:$4 sm:$0xff]  }
 0x412   :  { %v12710_v12 = vpop.f32.mrf.mxu0  ;;  %9653 = vmatmul.mubr.msk.bf16.gmra.mxu1 %vm2262_vm3, %v12700_v1  ;;  %3640 = vmatprep.subr.bf16.mxu0 %v10980_v3  ;;  %v11032_v3 = vld [vmem:[#allocation8 + $0x3f0] ss:$24 sps:$4 sm:$0xff]  }
 0x413   :  { %10508 = vmatpush3.bf16.msra.mxu1 %v2216_v7  ;;  %2334 = vmatprep.mubr.bf16.mxu1 %v12268_v0  ;;  %v10362_v47 = vadd.f32 %v12710_v12, %v12702_v58  ;;  %v11040_v58 = vld [vmem:[#allocation8 + $0x3c4] ss:$24 sps:$4 sm:$0xff]  }
 0x414   :  { %v12715_v15 = vpop.f32.mrf.mxu0  ;;  %9678 = vmatmul.mubr.msk.bf16.gmra.mxu0 %vm2262_vm3, %v12706_v59  ;;  %10521 = vmatprep.subr.bf16.mxu1 %v12269_v42 }
 0x415   :  { %2636 = vmatprep.mubr.bf16.mxu0 %v12268_v0  ;;  %3641 = vmatpush1.bf16.msra.mxu0 %v10978_v10  ;;  %v11046_v10 = vld [vmem:[#allocation8 + $0x394] ss:$24 sps:$4 sm:$0xff]  }
 0x416   :  { %v12721_v9 = vpop.f32.mrf.mxu0  ;;  %3642 = vmatprep.subr.bf16.mxu0 %v10983_v14  ;;  %v11044_v14 = vld [vmem:[#allocation8 + $0x390] ss:$24 sps:$4 sm:$0xff]  }
 0x417   :  { %v10365_v46 = vadd.f32 %v12721_v9, %v12715_v15 }
 0x418   :  { %v10366_v17 = vpop.f32.mrf.mxu0 }
 0x419   :  { %3643 = vmatpush1.bf16.msra.mxu0 %v10981_v5  ;;  %v11052_v5 = vld [vmem:[#allocation8 + $0x364] ss:$24 sps:$4 sm:$0xff]  }
 0x41a   :  { %v10367_v20 = vpop.f32.mrf.mxu0  ;;  %9654 = vmatmul.mubr.msk.bf16.gmra.mxu1 %vm2262_vm3, %v10970_v16  ;;  %3644 = vmatprep.subr.bf16.mxu0 %v10986_v13 }
 0x41b   :  { %10509 = vmatprep.mubr.msk.bf16.mxu1 %vm12270_vm4, %v12269_v42 }
 0x41c   :  { %v10369_v23 = vpop.f32.mrf.mxu0  ;;  %9679 = vmatmul.mubr.msk.bf16.gmra.mxu0 %vm2262_vm3, %v12725_v18 }
 0x41d   :  { %3645 = vmatpush1.bf16.msra.mxu0 %v10984_v19  ;;  %v11056_v19 = vld [vmem:[#allocation8 + $0x330] ss:$24 sps:$4 sm:$0xff]  }
 0x41e   :  { %v10370_v26 = vpop.f32.mrf.mxu0  ;;  %3646 = vmatprep.subr.bf16.mxu0 %v10989_v21  ;;  %v11064_v21 = vld [vmem:[#allocation8 + $0x304] ss:$24 sps:$4 sm:$0xff]  }
 0x41f   :  { %v10371_v41 = vadd.f32 %v10370_v26, %v10369_v23  ;;  %v11070_v26 = vld [vmem:[#allocation8 + $0x15c] ss:$24 sps:$4 sm:$0xff]  }
 0x420   :  { %v10372_v28 = vpop.f32.mrf.mxu0 }
 0x421   :  { %3647 = vmatpush1.bf16.msra.mxu0 %v10987_v24  ;;  %v2237_v33 = vpack.c.bf16 %v10371_v41, %v10371_v41  ;;  %v11062_v24 = vld [vmem:[#allocation8 + $0x300] ss:$24 sps:$4 sm:$0xff]  }
 0x422   :  { %v10373_v32 = vpop.f32.mrf.mxu0  ;;  %10510 = vmatmul.mubr.msk.bf16.vlgmr.msra.gmra.mxu1 %vm2262_vm3, %v12680_v50  ;;  %3648 = vmatprep.subr.bf16.mxu0 %v10992_v27  ;;  %v11010_v50 = vld [vmem:[#allocation8 + $0x214] ss:$24 sps:$4 sm:$0xff]  }
 0x423   :  { %10522 = vmatpush3.bf16.msra.mxu1 %v2428_v30  ;;  %10513 = vmatprep.mubr.msk.bf16.mxu1 %vm12270_vm4, %v12269_v42  ;;  %v2582_v45 = vsel %vm2272_vm2, %v2237_v33, 0  ;;  %v12790_v30 = vld [vmem:[%s13377_s16] sm:$0x7] }
 0x424   :  { %10523 = vmatprep.subr.bf16.mxu1 %v12269_v42 }
 0x425   :  { %3649 = vmatpush1.bf16.msra.mxu0 %v10990_v36 }
 0x426   :  { %3650 = vmatprep.subr.bf16.mxu0 %v10995_v6 }
 0x427   :  { %10524 = vmatpush3.bf16.msra.mxu1 %v2222_v39  ;;  %v11002_v39 = vld [vmem:[#allocation8 + $0x270] ss:$24 sps:$4 sm:$0xff]  }
 0x428   :  { %10525 = vmatprep.subr.bf16.mxu1 %v12269_v42 }
 0x429   :  { %3651 = vmatpush1.bf16.msra.mxu0 %v10993_v44 }
 0x42a   :  { %10514 = vmatmul.mubr.msk.bf16.gmra.mxu1 %vm2262_vm3, %v12700_v1  ;;  %3652 = vmatprep.subr.bf16.mxu0 %v10998_v11  ;;  %v11034_v1 = vld [vmem:[#allocation8 + $0x3f4] ss:$24 sps:$4 sm:$0xff]  }
 0x42b   :  { %10526 = vmatpush3.bf16.msra.mxu1 %v2213_v40  ;;  %10517 = vmatprep.mubr.msk.bf16.mxu1 %vm12270_vm4, %v12269_v42  ;;  %v10368_v40 = vadd.f32 %v10367_v20, %v10366_v17  ;;  %v11058_v17 = vld [vmem:[#allocation8 + $0x334] ss:$24 sps:$4 sm:$0xff]  }
 0x42c   :  { %10539 = vmatprep.subr.bf16.mxu1 %v12269_v42 }
 0x42d   :  { %3653 = vmatpush2.bf16.msra.mxu0 %v10996_v22  ;;  %v2228_v48 = vpack.c.bf16 %v10368_v40, %v10365_v46  ;;  %v12794_v22 = vrot.slane %v12790_v30, %v12568_v4 }
 0x42e   :  { %3654 = vmatprep.subr.bf16.mxu0 %v11001_v37 }
 0x431   :  { %3655 = vmatpush2.bf16.msra.mxu0 %v10999_v34 }
 0x432   :  { %10518 = vmatmul.mubr.msk.bf16.gmra.mxu1 %vm2262_vm3, %v10970_v16  ;;  %3656 = vmatprep.subr.bf16.mxu0 %v11004_v38  ;;  %v11050_v16 = vld [vmem:[#allocation8 + $0x360] ss:$24 sps:$4 sm:$0xff]  }
 0x433   :  { %10527 = vmatprep.mubr.msk.bf16.mxu1 %vm12270_vm4, %v12269_v42 }
 0x435   :  { %3657 = vmatpush2.bf16.msra.mxu0 %v11002_v39 }
 0x436   :  { %3658 = vmatprep.subr.bf16.mxu0 %v11007_v43 }
 0x439   :  { %3659 = vmatpush2.bf16.msra.mxu0 %v11005_v29  ;;  %v2725_v29 = vrot.slane %v12790_v30, %v12565_v2 }
 0x43a   :  { %10528 = vmatmul.mubr.msk.bf16.vlgmr.msra.gmra.mxu1 %vm2262_vm3, %v12648_v55  ;;  %v2219_v55 = vpack.c.bf16 %v10362_v47, %v10359_v49  ;;  %3660 = vmatprep.subr.bf16.mxu0 %v11010_v50 }
 0x43b   :  { %10540 = vmatpush3.bf16.msra.mxu1 %v2582_v45  ;;  %10531 = vmatprep.mubr.msk.bf16.mxu1 %vm12270_vm4, %v12269_v42 }
 0x43c   :  { %10541 = vmatprep.subr.bf16.mxu1 %v12269_v42 }
 0x43d   :  { %3661 = vmatpush2.bf16.msra.mxu0 %v11008_v51 }
 0x43e   :  { %3662 = vmatprep.subr.bf16.mxu0 %v11013_v35 }
 0x43f   :  { %10542 = vmatpush3.bf16.msra.mxu1 %v2228_v48 }
 0x440   :  { %10543 = vmatprep.subr.bf16.mxu1 %v12269_v42 }
 0x441   :  { %3663 = vmatpush2.bf16.msra.mxu0 %v11011_v53 }
 0x442   :  { %10532 = vmatmul.mubr.msk.bf16.gmra.mxu1 %vm2262_vm3, %v12654_v56  ;;  %v11016_v56 = vld [vmem:[#allocation8 + $0x1b4] ss:$24 sps:$4 sm:$0xff]  }
 0x443   :  { %10544 = vmatpush3.bf16.msra.mxu1 %v2219_v55  ;;  %10535 = vmatprep.mubr.msk.bf16.mxu1 %vm12270_vm4, %v12269_v42 }
 0x444   :  { %3664 = vmatprep.subr.bf16.mxu0 %v11016_v56 }
 0x445   :  { %3665 = vmatpush2.bf16.msra.mxu0 %v11014_v54 }
 0x44a   :  { %10536 = vmatmul.mubr.msk.bf16.gmra.mxu1 %vm2262_vm3, %v12660_v63  ;;  %v11019_v63 = vld [vmem:[#allocation8 + $0x184] ss:$24 sps:$4 sm:$0xff]  }
 0x44b   :  { %10545 = vmatprep.mubr.msk.bf16.mxu1 %vm12270_vm4, %v12269_v42  ;;  %3666 = vmatprep.subr.bf16.mxu0 %v11019_v63 }
 0x44c   :  { %3667 = vmatpush2.bf16.msra.mxu0 %v11017_v31 }
 0x44d   :  { %3819 = vmatprep.subr.bf16.mxu0 %v11025_v8 }
 0x452   :  { %10546 = vmatmul.mubr.msk.bf16.vlgmr.msra.gmra.mxu1 %vm2262_vm3, %v12684_v52  ;;  %v11022_v52 = vld [vmem:[#allocation8 + $0x454] ss:$24 sps:$4 sm:$0xff]  }
 0x453   :  { %10549 = vmatprep.mubr.msk.bf16.mxu1 %vm12270_vm4, %v12269_v42  ;;  %3697 = vmatprep.subr.bf16.mxu1 %v11022_v52 }
 0x454   :  { %3698 = vmatpush1.bf16.msra.mxu1 %v11020_v57 }
 0x455   :  { %3699 = vmatprep.subr.bf16.mxu1 %v11028_v60 }
 0x458   :  { %3700 = vmatpush1.bf16.msra.mxu1 %v11026_v62 }
 0x459   :  { %3701 = vmatprep.subr.bf16.mxu1 %v11034_v1 }
 0x45a   :  { %10550 = vmatmul.mubr.msk.bf16.gmra.mxu1 %vm2262_vm3, %v12706_v59  ;;  %v11038_v59 = vld [vmem:[#allocation8 + $0x3c0] ss:$24 sps:$4 sm:$0xff]  }
 0x45b   :  { %10553 = vmatprep.mubr.msk.bf16.mxu1 %vm12270_vm4, %v12269_v42 }
 0x45c   :  { %3702 = vmatpush1.bf16.msra.mxu1 %v11032_v3 }
 0x45d   :  { %3703 = vmatprep.subr.bf16.mxu1 %v11040_v58 }
 0x460   :  { %3704 = vmatpush1.bf16.msra.mxu1 %v11038_v59 }
 0x461   :  { %3705 = vmatprep.subr.bf16.mxu1 %v11046_v10 }
 0x462   :  { %10554 = vmatmul.mubr.msk.bf16.gmra.mxu1 %vm2262_vm3, %v12725_v18 }
 0x463   :  { %3729 = vmatprep.mubr.bf16.mxu1 %v12268_v0 }
 0x464   :  { %3706 = vmatpush1.bf16.msra.mxu1 %v11044_v14 }
 0x465   :  { %3707 = vmatprep.subr.bf16.mxu1 %v11052_v5 }
 0x468   :  { %3708 = vmatpush1.bf16.msra.mxu1 %v11050_v16 }
 0x469   :  { %3709 = vmatprep.subr.bf16.mxu1 %v11058_v17  ;;  %v11031_v17 = vld [vmem:[#allocation8 + $0x42c] ss:$24 sps:$4 sm:$0xff]  }
 0x46c   :  { %3710 = vmatpush1.bf16.msra.mxu1 %v11056_v19 }
 0x46d   :  { %3711 = vmatprep.subr.bf16.mxu1 %v11064_v21 }
 0x470   :  { %3712 = vmatpush1.bf16.msra.mxu1 %v11062_v24 }
 0x471   :  { %3758 = vmatprep.subr.bf16.mxu1 %v11070_v26 }
 0x48c   :  { %v2464_v7 = vpop.f32.mrf.mxu0 }
 0x48e   :  { %v2466_v12 = vpop.f32.mrf.mxu0 }
 0x490   :  { %v2468_v15 = vpop.f32.mrf.mxu0 }
 0x492   :  { %v2470_v9 = vpop.f32.mrf.mxu0 }
 0x494   :  { %v2474_v13 = vpop.f32.mrf.mxu0 }
 0x496   :  { %v2476_v18 = vpop.f32.mrf.mxu0 }
 0x498   :  { %v2478_v20 = vpop.f32.mrf.mxu0 }
 0x49a   :  { %v2480_v23 = vpop.f32.mrf.mxu0 }
 0x49c   :  { %v2484_v25 = vpop.f32.mrf.mxu0 }
 0x49e   :  { %v12787_v27 = vpop.f32.mrf.mxu0 }
 0x4a0   :  { %v2488_v28 = vpop.f32.mrf.mxu0 }
 0x4a2   :  { %v2489_v36 = vpop.f32.mrf.mxu0 }
 0x4ca   :  { %v2316_v32 = vpop.f32.mrf.mxu1 }
 0x4cb   :  { %v2465_v6 = vadd.f32 %v2464_v7, %v2316_v32 }
 0x4cc   :  { %v2318_v44 = vpop.f32.mrf.mxu1  ;;  %v2618_v11 = vpop.f32.mrf.mxu0 }
 0x4cd   :  { %v2467_v37 = vadd.f32 %v2466_v12, %v2318_v44  ;;  %v2701_v34 = vadd.f32 %v2618_v11, %v2465_v6  ;;  %v11029_v6 = vld [vmem:[#allocation8 + $0x428] ss:$24 sps:$4 sm:$0xff]  }
 0x4ce   :  { %v2320_v38 = vpop.f32.mrf.mxu1  ;;  %v2620_v39 = vpop.f32.mrf.mxu0 }
 0x4cf   :  { %v2469_v41 = vadd.f32 %v2468_v15, %v2320_v38  ;;  %v2702_v43 = vadd.f32 %v2620_v39, %v2467_v37  ;;  %v2733_v33 = vadd.f32 %v12794_v22, %v2701_v34  ;;  %v11037_v34 = vld [vmem:[#allocation8 + $0x3fc] ss:$24 sps:$4 sm:$0xff]  }
 0x4d0   :  { %v2322_v40 = vpop.f32.mrf.mxu1  ;;  %v2622_v45 = vpop.f32.mrf.mxu0 }
 0x4d1   :  { %v2471_v46 = vadd.f32 %v2470_v9, %v2322_v40  ;;  %v2704_v47 = vadd.f32 %v2622_v45, %v2469_v41  ;;  %v2734_v55 = vadd.f32 %v2725_v29, %v2702_v43  ;;  %v2748_v53 = vmax.f32 %v2733_v33, 0.0  ;;  %v11023_v9 = vld [vmem:[#allocation8 + $0x458] ss:$24 sps:$4 sm:$0xff]  }
 0x4d2   :  { %v2326_v48 = vpop.f32.mrf.mxu1  ;;  %v2624_v49 = vpop.f32.mrf.mxu0 }
 0x4d3   :  { %v2736_v50 = vadd.f32 %v12794_v22, %v2704_v47  ;;  %v2475_v51 = vadd.f32 %v2474_v13, %v2326_v48  ;;  %v2705_v35 = vadd.f32 %v2624_v49, %v2471_v46  ;;  %v2749_v62 = vmax.f32 %v2734_v55, 0.0  ;;  %v11035_v46 = vld [vmem:[#allocation8 + $0x3f8] ss:$24 sps:$4 sm:$0xff]   ;;  %v11043_v48 = vld [vmem:[#allocation8 + $0x3cc] ss:$24 sps:$4 sm:$0xff]  }
 0x4d4   :  { %v2328_v56 = vpop.f32.mrf.mxu1  ;;  %v2628_v54 = vpop.f32.mrf.mxu0 }
 0x4d5   :  { %v2751_v63 = vmax.f32 %v2736_v50, 0.0  ;;  %v2737_v31 = vadd.f32 %v2725_v29, %v2705_v35  ;;  %v2477_v52 = vadd.f32 %v2476_v18, %v2328_v56  ;;  %v2707_v8 = vadd.f32 %v2628_v54, %v2475_v51  ;;  %v11049_v56 = vld [vmem:[#allocation8 + $0x39c] ss:$24 sps:$4 sm:$0xff]   ;;  %v11047_v54 = vld [vmem:[#allocation8 + $0x398] ss:$24 sps:$4 sm:$0xff]  }
 0x4d6   :  { %v2330_v57 = vpop.f32.mrf.mxu1  ;;  %v2630_v60 = vpop.f32.mrf.mxu0 }
 0x4d7   :  { %v12800_v1 = vpack.c.bf16 %v2751_v63, %v2748_v53  ;;  %v2752_v3 = vmax.f32 %v2737_v31, 0.0  ;;  %v2479_v58 = vadd.f32 %v2478_v20, %v2330_v57  ;;  %v2708_v59 = vadd.f32 %v2630_v60, %v2477_v52  ;;  %v11055_v52 = vld [vmem:[#allocation8 + $0x36c] ss:$24 sps:$4 sm:$0xff]   ;;  %v11053_v57 = vld [vmem:[#allocation8 + $0x368] ss:$24 sps:$4 sm:$0xff]  }
 0x4d8   :  { %v2332_v7 = vpop.f32.mrf.mxu1  ;;  %v2632_v10 = vpop.f32.mrf.mxu0  ;;  %v2739_v12 = vadd.f32 %v12794_v22, %v2707_v8 }
 0x4d9   :  { %v2481_v14 = vadd.f32 %v2480_v23, %v2332_v7  ;;  %v2710_v15 = vadd.f32 %v2632_v10, %v2479_v58  ;;  %v12803_v5 = vpack.c.bf16 %v2752_v3, %v2749_v62  ;;  %v2740_v18 = vadd.f32 %v2725_v29, %v2708_v59  ;;  %v11061_v62 = vld [vmem:[#allocation8 + $0x33c] ss:$24 sps:$4 sm:$0xff]   ;;  %v11059_v58 = vld [vmem:[#allocation8 + $0x338] ss:$24 sps:$4 sm:$0xff]   ;;  %v11067_v7 = vld [vmem:[#allocation8 + $0x30c] ss:$24 sps:$4 sm:$0xff]  }
 0x4da   :  { %v2336_v16 = vpop.f32.mrf.mxu1  ;;  %v2634_v13 = vpop.f32.mrf.mxu0  ;;  %v2754_v28 = vmax.f32 %v2739_v12, 0.0  ;;  %v11065_v12 = vld [vmem:[#allocation8 + $0x308] ss:$24 sps:$4 sm:$0xff]  }
 0x4db   :  { %v2742_v19 = vadd.f32 %v12794_v22, %v2710_v15  ;;  %v2485_v21 = vadd.f32 %v2484_v25, %v2336_v16  ;;  %v2711_v24 = vadd.f32 %v2634_v13, %v2481_v14  ;;  %3668 = vmatprep.mubr.bf16.mxu0 %v12803_v5  ;;  %v2755_v25 = vmax.f32 %v2740_v18, 0.0  ;;  %v11073_v15 = vld [vmem:[#allocation8 + $0x164] ss:$24 sps:$4 sm:$0xff]  }
 0x4dc   :  { %v2338_v20 = vpop.f32.mrf.mxu1  ;;  %v2638_v26 = vpop.f32.mrf.mxu0  ;;  %3669 = vmatmul.mubr.bf16.vlgmr.msra.gmra.mxu0 %v12800_v1 }
 0x4dd   :  { %v2757_v23 = vmax.f32 %v2742_v19, 0.0  ;;  %v2743_v36 = vadd.f32 %v2725_v29, %v2711_v24  ;;  %v2487_v32 = vadd.f32 %v12787_v27, %v2338_v20  ;;  %3820 = vmatpush1.bf16.msra.mxu0 %v11023_v9  ;;  %v2713_v44 = vadd.f32 %v2638_v26, %v2485_v21 }
 0x4de   :  { %v2340_v11 = vpop.f32.mrf.mxu1  ;;  %v2640_v37 = vpop.f32.mrf.mxu0  ;;  %3821 = vmatprep.subr.bf16.mxu0 %v11031_v17 }
 0x4df   :  { %v2758_v38 = vmax.f32 %v2743_v36, 0.0  ;;  %v2714_v39 = vadd.f32 %v2640_v37, %v2487_v32  ;;  %v12809_v41 = vpack.c.bf16 %v2757_v23, %v2754_v28  ;;  %v2745_v27 = vadd.f32 %v12794_v22, %v2713_v44 }
 0x4e0   :  { %v2341_v43 = vpop.f32.mrf.mxu1  ;;  %v2642_v33 = vpop.f32.mrf.mxu0  ;;  %v2728_v36 = vsub.s32 2, %v12562_v61  ;;  %v11577_v61 = vld [vmem:[#allocation25 + $0x12c] ss:$24 sps:$4 sm:$0xff]  }
 0x4e1   :  { %v2746_v40 = vadd.f32 %v2725_v29, %v2714_v39  ;;  %v12811_v45 = vpack.c.bf16 %v2758_v38, %v2755_v25  ;;  %3822 = vmatpush1.bf16.msra.mxu0 %v11029_v6  ;;  %v11041_v29 = vld [vmem:[#allocation8 + $0x3c8] ss:$24 sps:$4 sm:$0xff]   ;;  %v2760_v35 = vmax.f32 %v2745_v27, 0.0 }
 0x4e2   :  { %v2377_v47 = vpop.f32.mrf.mxu1  ;;  %3823 = vmatprep.subr.bf16.mxu0 %v11037_v34  ;;  %v2643_v49 = vpop.f32.mrf.mxu0  ;;  %v2729_v37 = vrot.slane %v12790_v30, %v2728_v36  ;;  %v11079_v30 = vld [vmem:[#allocation8 + $0x134] ss:$24 sps:$4 sm:$0xff]  }
 0x4e3   :  { %v2761_v55 = vmax.f32 %v2746_v40, 0.0  ;;  %3678 = vmatprep.mubr.bf16.mxu0 %v12811_v45  ;;  %v12819_v63 = vpack.c.bf16 %v2760_v35, %v2760_v35 }
 0x4e4   :  { %v10511_v50 = vpop.f32.mrf.mxu1  ;;  %3679 = vmatmul.mubr.bf16.gmra.mxu0 %v12809_v41 }
 0x4e5   :  { %v12816_v51 = vpack.c.bf16 %v2761_v55, %v2761_v55  ;;  %3824 = vmatpush1.bf16.msra.mxu0 %v11035_v46 }
 0x4e6   :  { %v2380_v53 = vpop.f32.mrf.mxu1  ;;  %3825 = vmatprep.subr.bf16.mxu0 %v11043_v48 }
 0x4e7   :  { %3688 = vmatprep.mubr.bf16.mxu0 %v12816_v51 }
 0x4e8   :  { %v10512_v22 = vpop.f32.mrf.mxu1 }
 0x4e9   :  { %3826 = vmatpush1.bf16.msra.mxu0 %v11041_v29  ;;  %v11071_v29 = vld [vmem:[#allocation8 + $0x160] ss:$24 sps:$4 sm:$0xff]   ;;  %v11076_v22 = vld [vmem:[#allocation8 + $0x12c] ss:$24 sps:$4 sm:$0xff]  }
 0x4ea   :  { %v2385_v31 = vpop.f32.mrf.mxu1  ;;  %3827 = vmatprep.subr.bf16.mxu0 %v11049_v56 }
 0x4ec   :  { %v10515_v8 = vpop.f32.mrf.mxu1  ;;  %3689 = vmatmul.mubr.bf16.gmra.mxu0 %v12819_v63 }
 0x4ed   :  { %3828 = vmatpush1.bf16.msra.mxu0 %v11047_v54  ;;  %3851 = vmatprep.mubr.bf16.mxu0 %v12268_v0  ;;  %v11074_v8 = vld [vmem:[#allocation8 + $0x128] ss:$24 sps:$4 sm:$0xff]  }
 0x4ee   :  { %v2388_v60 = vpop.f32.mrf.mxu1  ;;  %3829 = vmatprep.subr.bf16.mxu0 %v11055_v52 }
 0x4f0   :  { %v10516_v3 = vpop.f32.mrf.mxu1 }
 0x4f1   :  { %3830 = vmatpush1.bf16.msra.mxu0 %v11053_v57  ;;  %v11077_v57 = vld [vmem:[#allocation8 + $0x130] ss:$24 sps:$4 sm:$0xff]  }
 0x4f2   :  { %v2393_v59 = vpop.f32.mrf.mxu1  ;;  %3831 = vmatprep.subr.bf16.mxu0 %v11061_v62 }
 0x4f4   :  { %v10519_v10 = vpop.f32.mrf.mxu1 }
 0x4f5   :  { %3832 = vmatpush1.bf16.msra.mxu0 %v11059_v58  ;;  %v11085_v58 = vld [vmem:[#allocation8 + $0x104] ss:$24 sps:$4 sm:$0xff]  }
 0x4f6   :  { %v2396_v14 = vpop.f32.mrf.mxu1  ;;  %3833 = vmatprep.subr.bf16.mxu0 %v11067_v7 }
 0x4f8   :  { %v10520_v9 = vpop.f32.mrf.mxu1 }
 0x4f9   :  { %3834 = vmatpush1.bf16.msra.mxu0 %v11065_v12  ;;  %v11083_v9 = vld [vmem:[#allocation8 + $0x100] ss:$24 sps:$4 sm:$0xff]  }
 0x4fa   :  { %v2525_v16 = vpop.f32.mrf.mxu1  ;;  %3880 = vmatprep.subr.bf16.mxu0 %v11073_v15  ;;  %v11080_v15 = vld [vmem:[#allocation8 + $0xf8] ss:$24 sps:$4 sm:$0xff]  }
 0x4fb   :  { %v2526_v6 = vadd.f32 %v2525_v16, %v2377_v47  ;;  %v11068_v47 = vld [vmem:[#allocation8 + $0x158] ss:$24 sps:$4 sm:$0xff]  }
 0x4fc   :  { %v10529_v13 = vpop.f32.mrf.mxu1 }
 0x4fe   :  { %v2528_v17 = vpop.f32.mrf.mxu1 }
 0x4ff   :  { %v2529_v25 = vadd.f32 %v2528_v17, %v2380_v53  ;;  %v11088_v17 = vld [vmem:[#allocation8 + $0xcc] ss:$24 sps:$4 sm:$0xff]  }
 0x500   :  { %v10530_v18 = vpop.f32.mrf.mxu1 }
 0x501   :  { %v11091_v18 = vld [vmem:[#allocation8 + $0xd4] ss:$24 sps:$4 sm:$0xff]  }
 0x502   :  { %v2533_v19 = vpop.f32.mrf.mxu1 }
 0x503   :  { %v2534_v40 = vadd.f32 %v2533_v19, %v2385_v31 }
 0x504   :  { %v10533_v21 = vpop.f32.mrf.mxu1 }
 0x505   :  { %v11086_v21 = vld [vmem:[#allocation8 + $0xc8] ss:$24 sps:$4 sm:$0xff]  }
 0x506   :  { %v2536_v24 = vpop.f32.mrf.mxu1 }
 0x507   :  { %v2537_v35 = vadd.f32 %v2536_v24, %v2388_v60  ;;  %v11082_v60 = vld [vmem:[#allocation8 + $0xfc] ss:$24 sps:$4 sm:$0xff]   ;;  %v11089_v24 = vld [vmem:[#allocation8 + $0xd0] ss:$24 sps:$4 sm:$0xff]  }
 0x508   :  { %v10534_v20 = vpop.f32.mrf.mxu1 }
 0x50a   :  { %v2541_v26 = vpop.f32.mrf.mxu1 }
 0x50b   :  { %v2542_v62 = vadd.f32 %v2541_v26, %v2393_v59 }
 0x50c   :  { %v10537_v28 = vpop.f32.mrf.mxu1 }
 0x50d   :  { %v11094_v28 = vld [vmem:[#allocation8 + $0x9c] ss:$24 sps:$4 sm:$0xff]  }
 0x50e   :  { %v2544_v23 = vpop.f32.mrf.mxu1 }
 0x50f   :  { %v11097_v23 = vld [vmem:[#allocation8 + $0xa4] ss:$24 sps:$4 sm:$0xff]  }
 0x510   :  { %v10538_v32 = vpop.f32.mrf.mxu1 }
 0x511   :  { %v11092_v32 = vld [vmem:[#allocation8 + $0x98] ss:$24 sps:$4 sm:$0xff]  }
 0x512   :  { %v2679_v44 = vpop.f32.mrf.mxu1 }
 0x513   :  { %v2703_v11 = vadd.f32 %v2679_v44, %v2526_v6  ;;  %v11095_v6 = vld [vmem:[#allocation8 + $0xa0] ss:$24 sps:$4 sm:$0xff]  }
 0x514   :  { %v10547_v34 = vpop.f32.mrf.mxu1 }
 0x515   :  { %v2735_v39 = vadd.f32 %v2729_v37, %v2703_v11  ;;  %v11100_v11 = vld [vmem:[#allocation8 + $0x6c] ss:$24 sps:$4 sm:$0xff]   ;;  %v11098_v34 = vld [vmem:[#allocation8 + $0x68] ss:$24 sps:$4 sm:$0xff]  }
 0x516   :  { %v2682_v38 = vpop.f32.mrf.mxu1 }
 0x517   :  { %v2706_v43 = vadd.f32 %v2682_v38, %v2529_v25  ;;  %v2750_v48 = vmax.f32 %v2735_v39, 0.0  ;;  %v11101_v25 = vld [vmem:[#allocation8 + $0x70] ss:$24 sps:$4 sm:$0xff]   ;;  %v11106_v38 = vld [vmem:[#allocation8 + $0x3c] ss:$24 sps:$4 sm:$0xff]  }
 0x518   :  { %v10548_v33 = vpop.f32.mrf.mxu1  ;;  %v11109_v39 = vld [vmem:[#allocation8 + $0x44] ss:$24 sps:$4 sm:$0xff]  }
 0x519   :  { %v2738_v46 = vadd.f32 %v2729_v37, %v2706_v43  ;;  %v11104_v43 = vld [vmem:[#allocation8 + $0x38] ss:$24 sps:$4 sm:$0xff]  }
 0x51a   :  { %v2687_v27 = vpop.f32.mrf.mxu1  ;;  %v11107_v33 = vld [vmem:[#allocation8 + $0x40] ss:$24 sps:$4 sm:$0xff]  }
 0x51b   :  { %v2753_v49 = vmax.f32 %v2738_v46, 0.0  ;;  %v2709_v55 = vadd.f32 %v2687_v27, %v2534_v40  ;;  %v11112_v40 = vld [vmem:[#allocation8 + $0xc] ss:$24 sps:$4 sm:$0xff]   ;;  %v11110_v27 = vld [vmem:[#allocation8 + $0x8] ss:$24 sps:$4 sm:$0xff]  }
 0x51c   :  { %v10551_v50 = vpop.f32.mrf.mxu1  ;;  %v11115_v46 = vld [vmem:[#allocation8 + $0x14] ss:$24 sps:$4 sm:$0xff]  }
 0x51d   :  { %v12827_v56 = vpack.c.bf16 %v2753_v49, %v2750_v48  ;;  %v2741_v53 = vadd.f32 %v2729_v37, %v2709_v55  ;;  %v11113_v48 = vld [vmem:[#allocation8 + $0x10] ss:$24 sps:$4 sm:$0xff]   ;;  %v11118_v49 = vld [vmem:[#allocation8 + $0x2dc] ss:$24 sps:$4 sm:$0xff]   ;;  %v11119_v50 = vld [vmem:[#allocation8 + $0x2e0] ss:$24 sps:$4 sm:$0xff]  }
 0x51e   :  { %v2690_v54 = vpop.f32.mrf.mxu1  ;;  %v11116_v55 = vld [vmem:[#allocation8 + $0x2d8] ss:$24 sps:$4 sm:$0xff]  }
 0x51f   :  { %v2712_v52 = vadd.f32 %v2690_v54, %v2537_v35  ;;  %3730 = vmatmul.mubr.bf16.vlgmr.msra.gmra.mxu1 %v12827_v56  ;;  %3852 = vmatmul.mubr.bf16.vlgmr.msra.gmra.mxu0 %v12827_v56  ;;  %v2756_v10 = vmax.f32 %v2741_v53, 0.0  ;;  %v11122_v35 = vld [vmem:[#allocation8 + $0x2a8] ss:$24 sps:$4 sm:$0xff]   ;;  %v11133_v54 = vld [vmem:[#allocation8 + $0x284] ss:$24 sps:$4 sm:$0xff]  }
 0x520   :  { %3759 = vmatpush1.bf16.msra.mxu1 %v11068_v47  ;;  %3881 = vmatpush1.bf16.msra.mxu0 %v11071_v29  ;;  %v10552_v31 = vpop.f32.mrf.mxu1  ;;  %v11124_v47 = vld [vmem:[#allocation8 + $0x2ac] ss:$24 sps:$4 sm:$0xff]   ;;  %v11128_v53 = vld [vmem:[#allocation8 + $0x278] ss:$24 sps:$4 sm:$0xff]  }
 0x521   :  { %v2744_v3 = vadd.f32 %v2729_v37, %v2712_v52  ;;  %3760 = vmatprep.subr.bf16.mxu1 %v11076_v22  ;;  %3882 = vmatprep.subr.bf16.mxu0 %v11079_v30  ;;  %v11127_v29 = vld [vmem:[#allocation8 + $0x2b4] ss:$24 sps:$4 sm:$0xff]   ;;  %v11125_v22 = vld [vmem:[#allocation8 + $0x2b0] ss:$24 sps:$4 sm:$0xff]   ;;  %v11131_v52 = vld [vmem:[#allocation8 + $0x280] ss:$24 sps:$4 sm:$0xff]  }
 0x522   :  { %v2695_v7 = vpop.f32.mrf.mxu1  ;;  %3739 = vmatprep.mubr.bf16.mxu1 %v12268_v0  ;;  %3861 = vmatprep.mubr.bf16.mxu0 %v12268_v0  ;;  %v11130_v30 = vld [vmem:[#allocation8 + $0x27c] ss:$24 sps:$4 sm:$0xff]   ;;  %v11136_v31 = vld [vmem:[#allocation8 + $0x24c] ss:$24 sps:$4 sm:$0xff]  }
 0x523   :  { %v2759_v12 = vmax.f32 %v2744_v3, 0.0  ;;  %v2715_v14 = vadd.f32 %v2695_v7, %v2542_v62  ;;  %v11137_v62 = vld [vmem:[#allocation8 + $0x250] ss:$24 sps:$4 sm:$0xff]   ;;  %v11142_v3 = vld [vmem:[#allocation8 + $0x21c] ss:$24 sps:$4 sm:$0xff]  }
 0x524   :  { %3761 = vmatpush1.bf16.msra.mxu1 %v11074_v8  ;;  %3883 = vmatpush1.bf16.msra.mxu0 %v11077_v57  ;;  %v10555_v16 = vpop.f32.mrf.mxu1  ;;  %v11139_v8 = vld [vmem:[#allocation8 + $0x254] ss:$24 sps:$4 sm:$0xff]   ;;  %v11134_v57 = vld [vmem:[#allocation8 + $0x248] ss:$24 sps:$4 sm:$0xff]  }
 0x525   :  { %v12833_v13 = vpack.c.bf16 %v2759_v12, %v2756_v10  ;;  %v2747_v59 = vadd.f32 %v2729_v37, %v2715_v14  ;;  %3762 = vmatprep.subr.bf16.mxu1 %v11082_v60  ;;  %3884 = vmatprep.subr.bf16.mxu0 %v11085_v58  ;;  %v11103_v37 = vld [vmem:[#allocation8 + $0x74] ss:$24 sps:$4 sm:$0xff]   ;;  %v11145_v60 = vld [vmem:[#allocation8 + $0x224] ss:$24 sps:$4 sm:$0xff]   ;;  %v11140_v58 = vld [vmem:[#allocation8 + $0x218] ss:$24 sps:$4 sm:$0xff]  }
 0x526   :  { %v2698_v19 = vpop.f32.mrf.mxu1  ;;  %v11143_v7 = vld [vmem:[#allocation8 + $0x220] ss:$24 sps:$4 sm:$0xff]   ;;  %v11148_v10 = vld [vmem:[#allocation8 + $0x1ec] ss:$24 sps:$4 sm:$0xff]  }
 0x527   :  { %3740 = vmatmul.mubr.bf16.gmra.mxu1 %v12833_v13  ;;  %3862 = vmatmul.mubr.bf16.gmra.mxu0 %v12833_v13  ;;  %v2762_v26 = vmax.f32 %v2747_v59, 0.0  ;;  %v11151_v12 = vld [vmem:[#allocation8 + $0x1f4] ss:$24 sps:$4 sm:$0xff]   ;;  %v11146_v14 = vld [vmem:[#allocation8 + $0x1e8] ss:$24 sps:$4 sm:$0xff]  }
 0x528   :  { %3763 = vmatpush1.bf16.msra.mxu1 %v11080_v15  ;;  %3885 = vmatpush1.bf16.msra.mxu0 %v11083_v9  ;;  %v10556_v20 = vpop.f32.mrf.mxu1  ;;  %v11149_v15 = vld [vmem:[#allocation8 + $0x1f0] ss:$24 sps:$4 sm:$0xff]   ;;  %v11154_v9 = vld [vmem:[#allocation8 + $0x1bc] ss:$24 sps:$4 sm:$0xff]  }
 0x529   :  { %3764 = vmatprep.subr.bf16.mxu1 %v11088_v17  ;;  %3886 = vmatprep.subr.bf16.mxu0 %v11091_v18  ;;  %v12839_v44 = vpack.c.bf16 %v2762_v26, %v2762_v26  ;;  %v11157_v16 = vld [vmem:[#allocation8 + $0x1c4] ss:$24 sps:$4 sm:$0xff]   ;;  %v11152_v59 = vld [vmem:[#allocation8 + $0x1b8] ss:$24 sps:$4 sm:$0xff]   ;;  %v11163_v19 = vld [vmem:[#allocation8 + $0x194] ss:$24 sps:$4 sm:$0xff]  }
 0x52a   :  { %3749 = vmatprep.mubr.bf16.mxu1 %v12268_v0  ;;  %3871 = vmatprep.mubr.bf16.mxu0 %v12268_v0  ;;  %v11155_v17 = vld [vmem:[#allocation8 + $0x1c0] ss:$24 sps:$4 sm:$0xff]   ;;  %v11160_v18 = vld [vmem:[#allocation8 + $0x18c] ss:$24 sps:$4 sm:$0xff]  }
 0x52b   :  { %v11166_v20 = vld [vmem:[#allocation8 + $0x464] ss:$24 sps:$4 sm:$0xff]   ;;  %v11164_v26 = vld [vmem:[#allocation8 + $0x460] ss:$24 sps:$4 sm:$0xff]  }
 0x52c   :  { %3765 = vmatpush1.bf16.msra.mxu1 %v11086_v21  ;;  %3887 = vmatpush1.bf16.msra.mxu0 %v11089_v24  ;;  %v11158_v21 = vld [vmem:[#allocation8 + $0x188] ss:$24 sps:$4 sm:$0xff]  }
 0x52d   :  { %3766 = vmatprep.subr.bf16.mxu1 %v11094_v28  ;;  %3888 = vmatprep.subr.bf16.mxu0 %v11097_v23  ;;  %v11161_v24 = vld [vmem:[#allocation8 + $0x190] ss:$24 sps:$4 sm:$0xff]   ;;  %v11169_v28 = vld [vmem:[#allocation8 + $0x434] ss:$24 sps:$4 sm:$0xff]  }
 0x52e   :  { %v11167_v23 = vld [vmem:[#allocation8 + $0x430] ss:$24 sps:$4 sm:$0xff]  }
 0x52f   :  { %3750 = vmatmul.mubr.bf16.gmra.mxu1 %v12839_v44  ;;  %3872 = vmatmul.mubr.bf16.gmra.mxu0 %v12839_v44 }
 0x530   :  { %3767 = vmatpush1.bf16.msra.mxu1 %v11092_v32  ;;  %3889 = vmatpush1.bf16.msra.mxu0 %v11095_v6  ;;  %v11172_v32 = vld [vmem:[#allocation8 + $0x404] ss:$24 sps:$4 sm:$0xff]   ;;  %v11170_v6 = vld [vmem:[#allocation8 + $0x400] ss:$24 sps:$4 sm:$0xff]  }
 0x531   :  { %3790 = vmatprep.mubr.bf16.mxu1 %v12803_v5  ;;  %3912 = vmatprep.mubr.bf16.mxu0 %v12803_v5  ;;  %v11121_v5 = vld [vmem:[#allocation8 + $0x2e4] ss:$24 sps:$4 sm:$0xff]  }
 0x532   :  { %3768 = vmatprep.subr.bf16.mxu1 %v11100_v11  ;;  %3890 = vmatprep.subr.bf16.mxu0 %v11103_v37  ;;  %v11175_v11 = vld [vmem:[#allocation8 + $0x3d4] ss:$24 sps:$4 sm:$0xff]   ;;  %v11176_v37 = vld [vmem:[#allocation8 + $0x3a0] ss:$24 sps:$4 sm:$0xff]  }
 0x534   :  { %3769 = vmatpush1.bf16.msra.mxu1 %v11098_v34  ;;  %3891 = vmatpush1.bf16.msra.mxu0 %v11101_v25  ;;  %v11181_v34 = vld [vmem:[#allocation8 + $0x374] ss:$24 sps:$4 sm:$0xff]   ;;  %v11182_v25 = vld [vmem:[#allocation8 + $0x340] ss:$24 sps:$4 sm:$0xff]  }
 0x535   :  { %3770 = vmatprep.subr.bf16.mxu1 %v11106_v38  ;;  %3892 = vmatprep.subr.bf16.mxu0 %v11109_v39  ;;  %v11187_v38 = vld [vmem:[#allocation8 + $0x314] ss:$24 sps:$4 sm:$0xff]   ;;  %v11185_v39 = vld [vmem:[#allocation8 + $0x310] ss:$24 sps:$4 sm:$0xff]  }
 0x538   :  { %3771 = vmatpush1.bf16.msra.mxu1 %v11104_v43  ;;  %3893 = vmatpush1.bf16.msra.mxu0 %v11107_v33 }
 0x539   :  { %3772 = vmatprep.subr.bf16.mxu1 %v11112_v40  ;;  %3894 = vmatprep.subr.bf16.mxu0 %v11115_v46 }
 0x53c   :  { %3773 = vmatpush1.bf16.msra.mxu1 %v11110_v27  ;;  %3895 = vmatpush1.bf16.msra.mxu0 %v11113_v48 }
 0x53d   :  { %3774 = vmatprep.subr.bf16.mxu1 %v11118_v49  ;;  %3896 = vmatprep.subr.bf16.mxu0 %v11121_v5 }
 0x540   :  { %3775 = vmatpush2.bf16.msra.mxu1 %v11116_v55  ;;  %3897 = vmatpush2.bf16.msra.mxu0 %v11119_v50 }
 0x541   :  { %3776 = vmatprep.subr.bf16.mxu1 %v11124_v47  ;;  %3898 = vmatprep.subr.bf16.mxu0 %v11127_v29 }
 0x544   :  { %3777 = vmatpush2.bf16.msra.mxu1 %v11122_v35  ;;  %3899 = vmatpush2.bf16.msra.mxu0 %v11125_v22 }
 0x545   :  { %3778 = vmatprep.subr.bf16.mxu1 %v11130_v30  ;;  %3900 = vmatprep.subr.bf16.mxu0 %v11133_v54 }
 0x548   :  { %3779 = vmatpush2.bf16.msra.mxu1 %v11128_v53  ;;  %3901 = vmatpush2.bf16.msra.mxu0 %v11131_v52 }
 0x549   :  { %3780 = vmatprep.subr.bf16.mxu1 %v11136_v31  ;;  %3902 = vmatprep.subr.bf16.mxu0 %v11139_v8 }
 0x54c   :  { %3781 = vmatpush2.bf16.msra.mxu1 %v11134_v57  ;;  %3903 = vmatpush2.bf16.msra.mxu0 %v11137_v62 }
 0x54d   :  { %3782 = vmatprep.subr.bf16.mxu1 %v11142_v3  ;;  %3904 = vmatprep.subr.bf16.mxu0 %v11145_v60 }
 0x550   :  { %3783 = vmatpush2.bf16.msra.mxu1 %v11140_v58  ;;  %3905 = vmatpush2.bf16.msra.mxu0 %v11143_v7 }
 0x551   :  { %3784 = vmatprep.subr.bf16.mxu1 %v11148_v10  ;;  %3906 = vmatprep.subr.bf16.mxu0 %v11151_v12 }
 0x554   :  { %3785 = vmatpush2.bf16.msra.mxu1 %v11146_v14  ;;  %3907 = vmatpush2.bf16.msra.mxu0 %v11149_v15 }
 0x555   :  { %3786 = vmatprep.subr.bf16.mxu1 %v11154_v9  ;;  %3908 = vmatprep.subr.bf16.mxu0 %v11157_v16 }
 0x558   :  { %3787 = vmatpush2.bf16.msra.mxu1 %v11152_v59  ;;  %3909 = vmatpush2.bf16.msra.mxu0 %v11155_v17 }
 0x559   :  { %3788 = vmatprep.subr.bf16.mxu1 %v11160_v18  ;;  %3910 = vmatprep.subr.bf16.mxu0 %v11163_v19 }
 0x55c   :  { %3789 = vmatpush2.bf16.msra.mxu1 %v11158_v21  ;;  %3911 = vmatpush2.bf16.msra.mxu0 %v11161_v24 }
 0x55d   :  { %3941 = vmatprep.subr.bf16.mxu1 %v11166_v20 }
 0x55f   :  { %3791 = vmatmul.mubr.bf16.vlgmr.msra.gmra.mxu1 %v12800_v1  ;;  %3913 = vmatmul.mubr.bf16.vlgmr.msra.gmra.mxu0 %v12800_v1  ;;  %v11173_v1 = vld [vmem:[#allocation8 + $0x3d0] ss:$24 sps:$4 sm:$0xff]  }
 0x560   :  { %3800 = vmatprep.mubr.bf16.mxu1 %v12811_v45  ;;  %3922 = vmatprep.mubr.bf16.mxu0 %v12811_v45  ;;  %v11178_v45 = vld [vmem:[#allocation8 + $0x3a4] ss:$24 sps:$4 sm:$0xff]  }
 0x561   :  { %3942 = vmatpush1.bf16.msra.mxu1 %v11164_v26 }
 0x562   :  { %3943 = vmatprep.subr.bf16.mxu1 %v11169_v28 }
 0x565   :  { %3944 = vmatpush1.bf16.msra.mxu1 %v11167_v23 }
 0x566   :  { %3945 = vmatprep.subr.bf16.mxu1 %v11172_v32 }
 0x567   :  { %3801 = vmatmul.mubr.bf16.gmra.mxu1 %v12809_v41  ;;  %3923 = vmatmul.mubr.bf16.gmra.mxu0 %v12809_v41  ;;  %v11179_v41 = vld [vmem:[#allocation8 + $0x370] ss:$24 sps:$4 sm:$0xff]  }
 0x568   :  { %3810 = vmatprep.mubr.bf16.mxu1 %v12816_v51  ;;  %3932 = vmatprep.mubr.bf16.mxu0 %v12816_v51  ;;  %v11184_v51 = vld [vmem:[#allocation8 + $0x344] ss:$24 sps:$4 sm:$0xff]  }
 0x569   :  { %3946 = vmatpush1.bf16.msra.mxu1 %v11170_v6 }
 0x56a   :  { %3947 = vmatprep.subr.bf16.mxu1 %v11175_v11 }
 0x56d   :  { %3948 = vmatpush1.bf16.msra.mxu1 %v11173_v1 }
 0x56e   :  { %3949 = vmatprep.subr.bf16.mxu1 %v11178_v45 }
 0x56f   :  { %3811 = vmatmul.mubr.bf16.gmra.mxu1 %v12819_v63  ;;  %3933 = vmatmul.mubr.bf16.gmra.mxu0 %v12819_v63 }
 0x570   :  { %3973 = vmatprep.mubr.bf16.mxu1 %v12268_v0  ;;  %4188 = vmatprep.mubr.bf16.mxu0 %v12268_v0 }
 0x571   :  { %3950 = vmatpush1.bf16.msra.mxu1 %v11176_v37 }
 0x572   :  { %3951 = vmatprep.subr.bf16.mxu1 %v11181_v34 }
 0x575   :  { %3952 = vmatpush1.bf16.msra.mxu1 %v11179_v41 }
 0x576   :  { %3953 = vmatprep.subr.bf16.mxu1 %v11184_v51 }
 0x579   :  { %3954 = vmatpush1.bf16.msra.mxu1 %v11182_v25 }
 0x57a   :  { %3955 = vmatprep.subr.bf16.mxu1 %v11187_v38 }
 0x57d   :  { %3956 = vmatpush1.bf16.msra.mxu1 %v11185_v39 }
 0x580   :  { %3974 = vmatmul.mubr.bf16.vlgmr.msra.gmra.mxu1 %v12827_v56 }
 0x581   :  { %3983 = vmatprep.mubr.bf16.mxu1 %v12268_v0 }
 0x588   :  { %3984 = vmatmul.mubr.bf16.gmra.mxu1 %v12833_v13 }
 0x589   :  { %3993 = vmatprep.mubr.bf16.mxu1 %v12268_v0 }
 0x590   :  { %3994 = vmatmul.mubr.bf16.gmra.mxu1 %v12839_v44 }
 0x591   :  { %4071 = vmatprep.mubr.bf16.mxu1 %v12268_v0 }
 0x59c   :  { %v3670_v63 = vpop.f32.mrf.mxu0 }
 0x59e   :  { %v12863_v43 = vpop.f32.mrf.mxu0 }
 0x5a0   :  { %v3674_v33 = vpop.f32.mrf.mxu0 }
 0x5a2   :  { %v12865_v40 = vpop.f32.mrf.mxu0 }
 0x5a4   :  { %v3680_v46 = vpop.f32.mrf.mxu0 }
 0x5a6   :  { %v12867_v27 = vpop.f32.mrf.mxu0 }
 0x5a8   :  { %v3684_v56 = vpop.f32.mrf.mxu0 }
 0x5aa   :  { %v12869_v48 = vpop.f32.mrf.mxu0 }
 0x5ac   :  { %v12871_v49 = vpop.f32.mrf.mxu0 }
 0x5ae   :  { %v12873_v13 = vpop.f32.mrf.mxu0 }
 0x5b0   :  { %v3694_v5 = vpop.f32.mrf.mxu0 }
 0x5b2   :  { %v3695_v44 = vpop.f32.mrf.mxu0 }
 0x5df   :  { %v3731_v55 = vpop.f32.mrf.mxu1  ;;  %v3853_v50 = vpop.f32.mrf.mxu0 }
 0x5e0   :  { %v12879_v30 = vadd.f32 %v3731_v55, %v3670_v63 }
 0x5e1   :  { %v12875_v47 = vpop.f32.mrf.mxu1  ;;  %v12877_v29 = vpop.f32.mrf.mxu0 }
 0x5e3   :  { %v3735_v35 = vpop.f32.mrf.mxu1  ;;  %v3857_v22 = vpop.f32.mrf.mxu0 }
 0x5e4   :  { %v12881_v54 = vadd.f32 %v3735_v35, %v3674_v33 }
 0x5e5   :  { %v12883_v53 = vpop.f32.mrf.mxu1  ;;  %v3859_v52 = vpop.f32.mrf.mxu0 }
 0x5e6   :  { %v4002_v31 = vpack.c.bf16 %v12881_v54, %v12879_v30  ;;  %v11197_v54 = vld [vmem:[#allocation11 + $0x50] ss:$8 sps:$4 sm:$0xff]  }
 0x5e7   :  { %v3741_v8 = vpop.f32.mrf.mxu1  ;;  %v3863_v57 = vpop.f32.mrf.mxu0 }
 0x5e8   :  { %v12889_v7 = vadd.f32 %v3741_v8, %v3680_v46 }
 0x5e9   :  { %v12887_v62 = vpop.f32.mrf.mxu1  ;;  %v3865_v3 = vpop.f32.mrf.mxu0 }
 0x5eb   :  { %v3745_v60 = vpop.f32.mrf.mxu1  ;;  %v3867_v58 = vpop.f32.mrf.mxu0 }
 0x5ec   :  { %v12891_v10 = vadd.f32 %v3745_v60, %v3684_v56 }
 0x5ed   :  { %v3747_v12 = vpop.f32.mrf.mxu1  ;;  %v3869_v14 = vpop.f32.mrf.mxu0 }
 0x5ee   :  { %v4008_v15 = vpack.c.bf16 %v12891_v10, %v12889_v7  ;;  %v11199_v10 = vld [vmem:[#allocation11 + $0x54] ss:$8 sps:$4 sm:$0xff]  }
 0x5ef   :  { %v3751_v9 = vpop.f32.mrf.mxu1  ;;  %v3873_v16 = vpop.f32.mrf.mxu0 }
 0x5f1   :  { %v3753_v59 = vpop.f32.mrf.mxu1  ;;  %v3875_v17 = vpop.f32.mrf.mxu0 }
 0x5f3   :  { %v3755_v18 = vpop.f32.mrf.mxu1  ;;  %v3877_v19 = vpop.f32.mrf.mxu0 }
 0x5f5   :  { %v3756_v21 = vpop.f32.mrf.mxu1  ;;  %v3878_v24 = vpop.f32.mrf.mxu0 }
 0x61f   :  { %v3792_v20 = vpop.f32.mrf.mxu1  ;;  %v12895_v26 = vpop.f32.mrf.mxu0 }
 0x620   :  { %v3854_v11 = vadd.f32 %v3853_v50, %v3792_v20 }
 0x621   :  { %v3794_v28 = vpop.f32.mrf.mxu1  ;;  %v12897_v23 = vpop.f32.mrf.mxu0 }
 0x623   :  { %v3796_v32 = vpop.f32.mrf.mxu1  ;;  %v12899_v6 = vpop.f32.mrf.mxu0 }
 0x624   :  { %v3858_v1 = vadd.f32 %v3857_v22, %v3796_v32 }
 0x625   :  { %v3798_v45 = vpop.f32.mrf.mxu1  ;;  %v12901_v37 = vpop.f32.mrf.mxu0 }
 0x626   :  { %v4004_v34 = vpack.c.bf16 %v3858_v1, %v3854_v11  ;;  %v3860_v11 = vadd.f32 %v3859_v52, %v3798_v45  ;;  %v11188_v45 = vld [vmem:[#allocation7 + $0x8] sm:$0xff]  }
 0x627   :  { %v3802_v41 = vpop.f32.mrf.mxu1  ;;  %v12903_v51 = vpop.f32.mrf.mxu0 }
 0x628   :  { %v3864_v33 = vadd.f32 %v3863_v57, %v3802_v41 }
 0x629   :  { %v3804_v25 = vpop.f32.mrf.mxu1  ;;  %v12905_v38 = vpop.f32.mrf.mxu0 }
 0x62a   :  { %v3866_v20 = vadd.f32 %v3865_v3, %v3804_v25  ;;  %v3748_v3 = vadd.f32 %v3747_v12, %v12869_v48  ;;  %v3734_v48 = vadd.f32 %v12875_v47, %v12863_v43  ;;  %v11196_v43 = vld [vmem:[#allocation11 + $0x64] ss:$8 sps:$4 sm:$0xff]  }
 0x62b   :  { %v3806_v39 = vpop.f32.mrf.mxu1  ;;  %v12907_v63 = vpop.f32.mrf.mxu0 }
 0x62c   :  { %v3868_v46 = vadd.f32 %v3867_v58, %v3806_v39 }
 0x62d   :  { %v3808_v56 = vpop.f32.mrf.mxu1  ;;  %v12909_v5 = vpop.f32.mrf.mxu0 }
 0x62e   :  { %v4010_v44 = vpack.c.bf16 %v3868_v46, %v3864_v33  ;;  %v3870_v60 = vadd.f32 %v3869_v14, %v3808_v56  ;;  %v3752_v14 = vadd.f32 %v3751_v9, %v12871_v49  ;;  %v3744_v33 = vadd.f32 %v12887_v62, %v12867_v27 }
 0x62f   :  { %v3812_v55 = vpop.f32.mrf.mxu1  ;;  %v12911_v50 = vpop.f32.mrf.mxu0  ;;  %v3738_v49 = vadd.f32 %v12883_v53, %v12865_v40  ;;  %v11193_v53 = vld [vmem:[#allocation11 + $0x74] ss:$8 sps:$4 sm:$0xff]  }
 0x630   :  { %v3874_v35 = vadd.f32 %v3873_v16, %v3812_v55  ;;  %v4011_v1 = vpack.c.bf16 %v3870_v60, %v3866_v20  ;;  %v3856_v16 = vadd.f32 %v12877_v29, %v3794_v28  ;;  %v4014_v25 = vpack.c.bf16 %v3752_v14, %v3752_v14  ;;  %v11189_v28 = vld [vmem:[#allocation7] sm:$0xff]  }
 0x631   :  { %v3814_v22 = vpop.f32.mrf.mxu1  ;;  %v12913_v8 = vpop.f32.mrf.mxu0  ;;  %v4003_v62 = vpack.c.bf16 %v3738_v49, %v3734_v48  ;;  %v11202_v60 = vld [vmem:[#allocation11 + $0x44] ss:$8 sps:$4 sm:$0xff]   ;;  %v11206_v14 = vld [vmem:[#allocation11 + $0x20] ss:$8 sps:$4 sm:$0xff]  }
 0x632   :  { %v4016_v18 = vpack.c.bf16 %v3874_v35, %v3874_v35  ;;  %v3876_v19 = vadd.f32 %v3875_v17, %v3814_v22  ;;  %v3754_v17 = vadd.f32 %v3753_v59, %v12873_v13  ;;  %v4005_v39 = vpack.c.bf16 %v3860_v11, %v3856_v16  ;;  %v11190_v16 = vld [vmem:[#allocation7 + $0x10] sm:$0xff]   ;;  %v11224_v49 = vld [vmem:[#allocation11 + $0xc0] ss:$8 sps:$4 sm:$0xff]  }
 0x633   :  { %v3816_v21 = vpop.f32.mrf.mxu1  ;;  %v3938_v24 = vpop.f32.mrf.mxu0  ;;  %v4009_v13 = vpack.c.bf16 %v3748_v3, %v3744_v33  ;;  %v4091_v29 = vsel %vm463_vm0, %v4014_v25, 0  ;;  %v11217_v3 = vld [vmem:[#allocation11 + $0xf4] ss:$8 sps:$4 sm:$0xff]   ;;  %v11218_v25 = vld [vmem:[#allocation11 + $0xe0] ss:$8 sps:$4 sm:$0xff]  }
 0x634   :  { %v4017_v32 = vpack.c.bf16 %v3876_v19, %v3876_v19  ;;  %v4034_v41 = vsel %vm463_vm0, %v4016_v18, 0  ;;  %v4015_v52 = vpack.c.bf16 %v3754_v17, %v3754_v17  ;;  %v11214_v17 = vld [vmem:[#allocation11 + $0x4] ss:$8 sps:$4 sm:$0xff]   ;;  %v11221_v33 = vld [vmem:[#allocation11 + $0xd0] ss:$8 sps:$4 sm:$0xff]  }
 0x635   :  { %v3817_v57 = vpop.f32.mrf.mxu1  ;;  %v3939_v58 = vpop.f32.mrf.mxu0  ;;  %v11230_v48 = vld [vmem:[#allocation11 + $0xa0] ss:$8 sps:$4 sm:$0xff]  }
 0x636   :  { %9828 = vmatprep.subr.msk.bf16.mxu1 %vm463_vm0, %v4017_v32  ;;  %v11205_v57 = vld [vmem:[#allocation11 + $0x34] ss:$8 sps:$4 sm:$0xff]  }
 0x637   :  { %4050 = vmatpush1.bf16.msra.mxu1 %v4034_v41  ;;  %v11208_v41 = vld [vmem:[#allocation11 + $0x24] ss:$8 sps:$4 sm:$0xff]  }
 0x638   :  { %4051 = vmatprep.subr.bf16.mxu1 %v4011_v1 }
 0x63b   :  { %4052 = vmatpush1.bf16.msra.mxu1 %v4010_v44  ;;  %v11194_v44 = vld [vmem:[#allocation11 + $0x60] ss:$8 sps:$4 sm:$0xff]  }
 0x63c   :  { %4053 = vmatprep.subr.bf16.mxu1 %v4005_v39  ;;  %v11215_v39 = vld [vmem:[#allocation11 + $0xf0] ss:$8 sps:$4 sm:$0xff]  }
 0x63f   :  { %4054 = vmatpush1.bf16.msra.mxu1 %v4004_v34  ;;  %v11191_v34 = vld [vmem:[#allocation11 + $0x70] ss:$8 sps:$4 sm:$0xff]  }
 0x640   :  { %v12923_v46 = vpop.f32.mrf.mxu1  ;;  %9831 = vmatprep.subr.msk.bf16.mxu1 %vm463_vm0, %v4015_v52  ;;  %v11220_v52 = vld [vmem:[#allocation11 + $0xe4] ss:$8 sps:$4 sm:$0xff]  }
 0x641   :  { %v3976_v1 = vadd.f32 %v12923_v46, %v12895_v26  ;;  %v11212_v26 = vld [vmem:[#allocation11] ss:$8 sps:$4 sm:$0xff]   ;;  %v11226_v46 = vld [vmem:[#allocation11 + $0xc4] ss:$8 sps:$4 sm:$0xff]  }
 0x642   :  { %v3977_v9 = vpop.f32.mrf.mxu1  ;;  %9829 = vmatmul.mubr.msk.bf16.vlgmr.msra.gmra.mxu1 %vm453_vm1, %v11188_v45  ;;  %v11223_v45 = vld [vmem:[#allocation11 + $0xd4] ss:$8 sps:$4 sm:$0xff]  }
 0x643   :  { %4107 = vmatpush1.bf16.msra.mxu1 %v4091_v29  ;;  %4128 = vmatprep.mubr.bf16.mxu1 %v12268_v0  ;;  %v11227_v29 = vld [vmem:[#allocation11 + $0xb0] ss:$8 sps:$4 sm:$0xff]  }
 0x644   :  { %v3979_v27 = vpop.f32.mrf.mxu1  ;;  %4108 = vmatprep.subr.bf16.mxu1 %v4009_v13  ;;  %v11229_v13 = vld [vmem:[#allocation11 + $0xb4] ss:$8 sps:$4 sm:$0xff]  }
 0x646   :  { %v3981_v12 = vpop.f32.mrf.mxu1 }
 0x647   :  { %4109 = vmatpush1.bf16.msra.mxu1 %v4008_v15  ;;  %v3982_v20 = vadd.f32 %v3981_v12, %v12901_v37  ;;  %v11203_v37 = vld [vmem:[#allocation11 + $0x30] ss:$8 sps:$4 sm:$0xff]   ;;  %v11238_v12 = vld [vmem:[#allocation11 + $0x84] ss:$8 sps:$4 sm:$0xff]  }
 0x648   :  { %v3985_v40 = vpop.f32.mrf.mxu1  ;;  %4110 = vmatprep.subr.bf16.mxu1 %v4003_v62  ;;  %v11233_v62 = vld [vmem:[#allocation11 + $0x90] ss:$8 sps:$4 sm:$0xff]  }
 0x64a   :  { %v3987_v59 = vpop.f32.mrf.mxu1 }
 0x64b   :  { %4111 = vmatpush1.bf16.msra.mxu1 %v4002_v31  ;;  %v3988_v18 = vadd.f32 %v3987_v59, %v12905_v38  ;;  %v3978_v38 = vadd.f32 %v3977_v9, %v12897_v23  ;;  %v11209_v23 = vld [vmem:[#allocation11 + $0x10] ss:$8 sps:$4 sm:$0xff]   ;;  %v11232_v9 = vld [vmem:[#allocation11 + $0xa4] ss:$8 sps:$4 sm:$0xff]  }
 0x64c   :  { %v3989_v56 = vpop.f32.mrf.mxu1  ;;  %4417 = vmatprep.subr.bf16.mxu1 %v11193_v53 }
 0x64d   :  { %v3990_v21 = vadd.f32 %v3989_v56, %v12907_v63  ;;  %v3980_v63 = vadd.f32 %v3979_v27, %v12899_v6  ;;  %v4007_v11 = vpack.c.bf16 %v3982_v20, %v3978_v38  ;;  %v11211_v6 = vld [vmem:[#allocation11 + $0x14] ss:$8 sps:$4 sm:$0xff]  }
 0x64e   :  { %v3991_v47 = vpop.f32.mrf.mxu1  ;;  %9832 = vmatmul.mubr.msk.bf16.vlgmr.msra.gmra.mxu1 %vm453_vm1, %v11189_v28  ;;  %v11235_v27 = vld [vmem:[#allocation11 + $0x94] ss:$8 sps:$4 sm:$0xff]  }
 0x64f   :  { %4418 = vmatpush1.bf16.msra.mxu1 %v11191_v34  ;;  %v3992_v35 = vadd.f32 %v3991_v47, %v12909_v5  ;;  %v11200_v5 = vld [vmem:[#allocation11 + $0x40] ss:$8 sps:$4 sm:$0xff]  }
 0x650   :  { %v3995_v7 = vpop.f32.mrf.mxu1  ;;  %4419 = vmatprep.subr.bf16.mxu1 %v11196_v43 }
 0x651   :  { %v3996_v15 = vadd.f32 %v3995_v7, %v12911_v50  ;;  %v4013_v50 = vpack.c.bf16 %v3992_v35, %v3988_v18 }
 0x652   :  { %v3997_v55 = vpop.f32.mrf.mxu1 }
 0x653   :  { %v4018_v22 = vpack.c.bf16 %v3996_v15, %v3996_v15  ;;  %v3998_v30 = vadd.f32 %v3997_v55, %v12913_v8  ;;  %4420 = vmatpush1.bf16.msra.mxu1 %v11194_v44  ;;  %v3986_v8 = vadd.f32 %v3985_v40, %v12903_v51  ;;  %v4006_v51 = vpack.c.bf16 %v3980_v63, %v3976_v1  ;;  %v11236_v40 = vld [vmem:[#allocation11 + $0x80] ss:$8 sps:$4 sm:$0xff]  }
 0x654   :  { %v3999_v31 = vpop.f32.mrf.mxu1  ;;  %4421 = vmatprep.subr.bf16.mxu1 %v11199_v10  ;;  %v4203_v10 = vld [vmem:[#allocation10] sm:$0x3] }
 0x655   :  { %v4019_v19 = vpack.c.bf16 %v3998_v30, %v3998_v30  ;;  %v4151_v32 = vsel %vm463_vm0, %v4018_v22, 0  ;;  %v4012_v58 = vpack.c.bf16 %v3990_v21, %v3986_v8 }
 0x656   :  { %v4000_v24 = vpop.f32.mrf.mxu1 }
 0x657   :  { %9834 = vmatprep.subr.msk.bf16.mxu0 %vm463_vm0, %v4019_v19  ;;  %4422 = vmatpush1.bf16.msra.mxu1 %v11197_v54  ;;  %v4212_v54 = vrot.slane %v4203_v10, %v12565_v2 }
 0x658   :  { %4167 = vmatpush1.bf16.msra.mxu0 %v4151_v32  ;;  %4423 = vmatprep.subr.bf16.mxu1 %v11202_v60  ;;  %v4208_v60 = vrot.slane %v4203_v10, %v12568_v4 }
 0x659   :  { %4168 = vmatprep.subr.bf16.mxu0 %v4013_v50 }
 0x65b   :  { %4424 = vmatpush1.bf16.msra.mxu1 %v11200_v5 }
 0x65c   :  { %4169 = vmatpush1.bf16.msra.mxu0 %v4012_v58  ;;  %4425 = vmatprep.subr.bf16.mxu1 %v11205_v57 }
 0x65d   :  { %4170 = vmatprep.subr.bf16.mxu0 %v4007_v11 }
 0x65f   :  { %4426 = vmatpush1.bf16.msra.mxu1 %v11203_v37 }
 0x660   :  { %4171 = vmatpush1.bf16.msra.mxu0 %v4006_v51  ;;  %4427 = vmatprep.subr.bf16.mxu1 %v11208_v41  ;;  %v4462_v51 = vld [vmem:[#allocation13 + $0x10] sm:$0xff] }
 0x663   :  { %9835 = vmatmul.mubr.msk.bf16.vlgmr.msra.gmra.mxu0 %vm453_vm1, %v11190_v16  ;;  %4428 = vmatpush1.bf16.msra.mxu1 %v11206_v14  ;;  %v4461_v16 = vld [vmem:[#allocation13 + $0x8] sm:$0xff] }
 0x664   :  { %4507 = vmatprep.mubr.bf16.mxu0 %v12268_v0  ;;  %4429 = vmatprep.subr.bf16.mxu1 %v11211_v6  ;;  %v4460_v6 = vld [vmem:[#allocation13] sm:$0xff] }
 0x667   :  { %4430 = vmatpush1.bf16.msra.mxu1 %v11209_v23  ;;  %v4463_v23 = vld [vmem:[#allocation13 + $0x18] sm:$0xff] }
 0x668   :  { %4431 = vmatprep.subr.bf16.mxu1 %v11214_v17 }
 0x66b   :  { %4432 = vmatpush1.bf16.msra.mxu1 %v11212_v26 }
 0x66c   :  { %4433 = vmatprep.subr.bf16.mxu1 %v11217_v3 }
 0x66f   :  { %4434 = vmatpush2.bf16.msra.mxu1 %v11215_v39 }
 0x670   :  { %4435 = vmatprep.subr.bf16.mxu1 %v11220_v52 }
 0x673   :  { %4436 = vmatpush2.bf16.msra.mxu1 %v11218_v25 }
 0x674   :  { %4437 = vmatprep.subr.bf16.mxu1 %v11223_v45  ;;  %v11239_v45 = vld [vmem:[%s13378_s11 + $0x78] sm:$0xff]  }
 0x677   :  { %4438 = vmatpush2.bf16.msra.mxu1 %v11221_v33 }
 0x678   :  { %4439 = vmatprep.subr.bf16.mxu1 %v11226_v46  ;;  %v4470_v46 = vld [vmem:[%s13379_s4] sm:$0x1] }
 0x67b   :  { %4440 = vmatpush2.bf16.msra.mxu1 %v11224_v49  ;;  %v11240_v49 = vld [vmem:[%s13378_s11 + $0x38] sm:$0xff]  }
 0x67c   :  { %4441 = vmatprep.subr.bf16.mxu1 %v11229_v13  ;;  %v11241_v13 = vld [vmem:[%s13378_s11 + $0x70] sm:$0xff]  }
 0x67f   :  { %4442 = vmatpush2.bf16.msra.mxu1 %v11227_v29  ;;  %v11242_v29 = vld [vmem:[%s13378_s11 + $0x30] sm:$0xff]  }
 0x680   :  { %4443 = vmatprep.subr.bf16.mxu1 %v11232_v9  ;;  %v11243_v9 = vld [vmem:[%s13378_s11 + $0x68] sm:$0xff]  }
 0x683   :  { %4444 = vmatpush2.bf16.msra.mxu1 %v11230_v48  ;;  %v11244_v48 = vld [vmem:[%s13378_s11 + $0x28] sm:$0xff]  }
 0x684   :  { %4445 = vmatprep.subr.bf16.mxu1 %v11235_v27  ;;  %v11245_v27 = vld [vmem:[%s13378_s11 + $0x60] sm:$0xff]  }
 0x687   :  { %4446 = vmatpush2.bf16.msra.mxu1 %v11233_v62  ;;  %v11246_v62 = vld [vmem:[%s13378_s11 + $0x20] sm:$0xff]  }
 0x688   :  { %4447 = vmatprep.subr.bf16.mxu1 %v11238_v12  ;;  %v11247_v12 = vld [vmem:[%s13378_s11 + $0x58] sm:$0xff]  }
 0x68b   :  { %4448 = vmatpush2.bf16.msra.mxu1 %v11236_v40  ;;  %v11248_v40 = vld [vmem:[%s13378_s11 + $0x18] sm:$0xff]  }
 0x702   :  { %v4073_v53 = vpop.f32.mrf.mxu1 }
 0x704   :  { %v4075_v59 = vpop.f32.mrf.mxu1 }
 0x706   :  { %v4077_v28 = vpop.f32.mrf.mxu1 }
 0x708   :  { %v4079_v34 = vpop.f32.mrf.mxu1 }
 0x70e   :  { %v4130_v56 = vpop.f32.mrf.mxu1 }
 0x70f   :  { %v4131_v15 = vadd.f32 %v4130_v56, %v4073_v53  ;;  %v11249_v53 = vld [vmem:[%s13378_s11 + $0x50] sm:$0xff]   ;;  %v11253_v56 = vld [vmem:[%s13378_s11 + $0x40] sm:$0xff]  }
 0x710   :  { %v4132_v43 = vpop.f32.mrf.mxu1 }
 0x711   :  { %v4133_v7 = vadd.f32 %v4132_v43, %v4075_v59  ;;  %v11250_v59 = vld [vmem:[%s13378_s11 + $0x10] sm:$0xff]   ;;  %v11254_v43 = vld [vmem:[%s13378_s11] sm:$0xff]  }
 0x712   :  { %v4134_v47 = vpop.f32.mrf.mxu1 }
 0x713   :  { %v4135_v22 = vadd.f32 %v4134_v47, %v4077_v28  ;;  %v11251_v28 = vld [vmem:[%s13378_s11 + $0x48] sm:$0xff]  }
 0x714   :  { %v4136_v55 = vpop.f32.mrf.mxu1 }
 0x715   :  { %v4137_v19 = vadd.f32 %v4136_v55, %v4079_v34  ;;  %v11252_v34 = vld [vmem:[%s13378_s11 + $0x8] sm:$0xff]  }
 0x723   :  { %v4190_v44 = vpop.f32.mrf.mxu0 }
 0x724   :  { %v4199_v31 = vadd.f32 %v4190_v44, %v4131_v15 }
 0x725   :  { %v4192_v35 = vpop.f32.mrf.mxu0 }
 0x726   :  { %v4200_v30 = vadd.f32 %v4192_v35, %v4133_v7  ;;  %v4215_v5 = vadd.f32 %v4208_v60, %v4199_v31  ;;  %v4771_v35 = vld [vmem:[#allocation16 + $0x90] sm:$0xff] }
 0x727   :  { %v4194_v18 = vpop.f32.mrf.mxu0 }
 0x728   :  { %v4201_v21 = vadd.f32 %v4194_v18, %v4135_v22  ;;  %v4216_v20 = vadd.f32 %v4212_v54, %v4200_v30  ;;  %v4219_v58 = vmax.f32 %v4215_v5, 0.0  ;;  %v4779_v22 = vld [vmem:[#allocation16 + $0xd0] sm:$0xff] }
 0x729   :  { %v4196_v24 = vpop.f32.mrf.mxu0  ;;  %v9908_v30 = vcombine.low %v4771_v35, %v4779_v22 }
 0x72a   :  { %v4217_v50 = vadd.f32 %v4208_v60, %v4201_v21  ;;  %v4202_v32 = vadd.f32 %v4196_v24, %v4137_v19  ;;  %v4220_v38 = vmax.f32 %v4216_v20, 0.0  ;;  %v9869_v60 = vld [vmem:[#allocation14] ss:$0 sm:$0xff] }
 0x72c   :  { %v4218_v8 = vadd.f32 %v4212_v54, %v4202_v32  ;;  %v4221_v57 = vmax.f32 %v4217_v50, 0.0  ;;  %v9909_v54 = vcombine.high %v4771_v35, %v4779_v22  ;;  %v4769_v50 = vld [vmem:[#allocation16 + $0x80] sm:$0xff] }
 0x72d   :  { %v4777_v32 = vld [vmem:[#allocation16 + $0xc0] sm:$0xff] }
 0x72e   :  { %v4222_v63 = vmax.f32 %v4218_v8, 0.0  ;;  %v4223_v37 = vpack.c.bf16 %v4221_v57, %v4219_v58  ;;  %5047 = vmatprep.subr.bf16.mxu1 %v9909_v54  ;;  %v9905_v57 = vcombine.high %v4769_v50, %v4777_v32  ;;  %v9904_v58 = vcombine.low %v4769_v50, %v4777_v32 }
 0x730   :  { %v4224_v11 = vpack.c.bf16 %v4222_v63, %v4220_v38  ;;  %v11255_v63 = vld [vmem:[%s13380_s14] sm:$0xff]  }
 0x732   :  { %4449 = vmatprep.mubr.bf16.mxu1 %v4224_v11  ;;  %v4753_v11 = vld [vmem:[#allocation16] sm:$0xff] }
 0x733   :  { %4450 = vmatmul.mubr.bf16.vlgmr.msra.gmra.mxu1 %v4223_v37  ;;  %v4761_v37 = vld [vmem:[#allocation16 + $0x40] sm:$0xff] }
 0x734   :  { %5067 = vmatprep.mubr.bf16.mxu1 %v12268_v0  ;;  %5048 = vmatpush1.bf16.msra.mxu1 %v9908_v30 }
 0x7f3   :  { %v4451_v1 = vpop.f32.mrf.mxu1 }
 0x7f4   :  { %v4464_v25 = vmul.f32 %v4460_v6, %v4451_v1  ;;  %v4755_v1 = vld [vmem:[#allocation16 + $0x10] sm:$0xff]  ;;  %v4770_v6 = vld [vmem:[#allocation16 + $0x88] sm:$0xff] }
 0x7f5   :  { %v4453_v41 = vpop.f32.mrf.mxu1 }
 0x7f6   :  { %v4465_v39 = vmul.f32 %v4461_v16, %v4453_v41  ;;  %v9889_v41 = vcombine.high %v4753_v11, %v4761_v37  ;;  %v9888_v16 = vcombine.low %v4753_v11, %v4761_v37 }
 0x7f7   :  { %v4455_v14 = vpop.f32.mrf.mxu1 }
 0x7f8   :  { %v4466_v26 = vmul.f32 %v4462_v51, %v4455_v14  ;;  %v4763_v51 = vld [vmem:[#allocation16 + $0x50] sm:$0xff] }
 0x7f9   :  { %v4457_v17 = vpop.f32.mrf.mxu1  ;;  %v9892_v14 = vcombine.low %v4755_v1, %v4763_v51 }
 0x7fa   :  { %v4467_v3 = vmul.f32 %v4463_v23, %v4457_v17  ;;  %v4468_v33 = vpack.c.bf16 %v4466_v26, %v4464_v25  ;;  %v9893_v23 = vcombine.high %v4755_v1, %v4763_v51  ;;  %v4778_v26 = vld [vmem:[#allocation16 + $0xc8] sm:$0xff]  ;;  %v4773_v17 = vld [vmem:[#allocation16 + $0xa0] sm:$0xff] }
 0x7fb   :  { %v9906_v25 = vcombine.low %v4770_v6, %v4778_v26  ;;  %v11261_v51 = vld [vmem:[#allocation20 + $0x204] ss:$36 sps:$4 sm:$0xff]  }
 0x7fc   :  { %v4469_v52 = vpack.c.bf16 %v4467_v3, %v4465_v39  ;;  %5049 = vmatprep.subr.bf16.mxu1 %v9893_v23  ;;  %v9907_v39 = vcombine.high %v4770_v6, %v4778_v26  ;;  %v4781_v3 = vld [vmem:[#allocation16 + $0xe0] sm:$0xff]  ;;  %v11264_v23 = vld [vmem:[#allocation20 + $0x1b4] ss:$36 sps:$4 sm:$0xff]  }
 0x7fd   :  { %5050 = vmatpush1.bf16.msra.mxu1 %v9892_v14  ;;  %v11259_v14 = vld [vmem:[#allocation20 + $0x200] ss:$36 sps:$4 sm:$0xff]   ;;  %v11262_v26 = vld [vmem:[#allocation20 + $0x1b0] ss:$36 sps:$4 sm:$0xff]  }
 0x7fe   :  { %4489 = vmatprep.subr.bf16.mxu0 %v4469_v52  ;;  %v9912_v52 = vcombine.low %v4773_v17, %v4781_v3  ;;  %v11267_v6 = vld [vmem:[#allocation20 + $0x1bc] ss:$36 sps:$4 sm:$0xff]  }
 0x7ff   :  { %4490 = vmatpush1.bf16.msra.mxu0 %v4468_v33 }
 0x800   :  { %10393 = vmatprep.subr.bf16.mxu0 %v11239_v45  ;;  %v9913_v45 = vcombine.high %v4773_v17, %v4781_v3  ;;  %v11265_v17 = vld [vmem:[#allocation20 + $0x1b8] ss:$36 sps:$4 sm:$0xff]  }
 0x801   :  { %v11273_v3 = vld [vmem:[#allocation20 + $0x174] ss:$36 sps:$4 sm:$0xff]  }
 0x802   :  { %9868 = vmatmul.mubr.msk.bf16.vlgmr.msra.gmra.mxu0 %vm4471_vm5, %v4470_v46  ;;  %5133 = vmatprep.subr.bf16.mxu1 %v9913_v45  ;;  %v4754_v46 = vld [vmem:[#allocation16 + $0x8] sm:$0xff] }
 0x803   :  { %10394 = vmatpush3.bf16.msra.mxu0 %v11240_v49  ;;  %v11276_v45 = vld [vmem:[#allocation20 + $0x124] ss:$36 sps:$4 sm:$0xff]  }
 0x804   :  { %10395 = vmatprep.subr.bf16.mxu0 %v11241_v13  ;;  %v4762_v13 = vld [vmem:[#allocation16 + $0x48] sm:$0xff] }
 0x807   :  { %10396 = vmatpush3.bf16.msra.mxu0 %v11242_v29  ;;  %v4757_v29 = vld [vmem:[#allocation16 + $0x20] sm:$0xff] }
 0x808   :  { %10397 = vmatprep.subr.bf16.mxu0 %v11243_v9  ;;  %v4765_v9 = vld [vmem:[#allocation16 + $0x60] sm:$0xff] }
 0x80b   :  { %10398 = vmatpush3.bf16.msra.mxu0 %v11244_v48 }
 0x80c   :  { %10399 = vmatprep.subr.bf16.mxu0 %v11245_v27 }
 0x80f   :  { %10400 = vmatpush3.bf16.msra.mxu0 %v11246_v62  ;;  %v9891_v62 = vcombine.high %v4754_v46, %v4762_v13 }
 0x810   :  { %10401 = vmatprep.subr.bf16.mxu0 %v11247_v12  ;;  %v9897_v12 = vcombine.high %v4757_v29, %v4765_v9 }
 0x813   :  { %10402 = vmatpush3.bf16.msra.mxu0 %v11248_v40  ;;  %v4772_v40 = vld [vmem:[#allocation16 + $0x98] sm:$0xff] }
 0x814   :  { %10403 = vmatprep.subr.bf16.mxu0 %v11249_v53 }
 0x817   :  { %10404 = vmatpush3.bf16.msra.mxu0 %v11250_v59  ;;  %v4780_v59 = vld [vmem:[#allocation16 + $0xd8] sm:$0xff] }
 0x818   :  { %10405 = vmatprep.subr.bf16.mxu0 %v11251_v28  ;;  %v4775_v28 = vld [vmem:[#allocation16 + $0xb0] sm:$0xff]  ;;  %v9910_v35 = vcombine.low %v4772_v40, %v4780_v59 }
 0x81b   :  { %10406 = vmatpush3.bf16.msra.mxu0 %v11252_v34  ;;  %v4783_v34 = vld [vmem:[#allocation16 + $0xf0] sm:$0xff] }
 0x81c   :  { %10407 = vmatprep.subr.bf16.mxu0 %v11253_v56  ;;  %v9890_v56 = vcombine.low %v4754_v46, %v4762_v13  ;;  %v9916_v22 = vcombine.low %v4775_v28, %v4783_v34  ;;  %v11274_v46 = vld [vmem:[#allocation20 + $0x120] ss:$36 sps:$4 sm:$0xff]  }
 0x81d   :  { %v11282_v13 = vld [vmem:[#allocation20 + $0xdc] ss:$36 sps:$4 sm:$0xff]  }
 0x81f   :  { %10408 = vmatpush3.bf16.msra.mxu0 %v11254_v43  ;;  %v9896_v43 = vcombine.low %v4757_v29, %v4765_v9  ;;  %v11285_v29 = vld [vmem:[#allocation20 + $0xe4] ss:$36 sps:$4 sm:$0xff]   ;;  %v11280_v9 = vld [vmem:[#allocation20 + $0xd8] ss:$36 sps:$4 sm:$0xff]  }
 0x820   :  { %10557 = vmatprep.subr.bf16.mxu0 %v12269_v42 }
 0x8c2   :  { %v4509_v47 = vpop.f32.mrf.mxu0 }
 0x8c3   :  { %v4516_v10 = vpack.c.bf16 %v4509_v47, %v4509_v47  ;;  %v9911_v47 = vcombine.high %v4772_v40, %v4780_v59  ;;  %v11289_v40 = vld [vmem:[#allocation20 + $0x98] ss:$36 sps:$4 sm:$0xff]  }
 0x8c4   :  { %v4511_v44 = vpop.f32.mrf.mxu0  ;;  %v11297_v59 = vld [vmem:[#allocation20 + $0x54] ss:$36 sps:$4 sm:$0xff]  }
 0x8c5   :  { %v4517_v7 = vpack.c.bf16 %v4511_v44, %v4511_v44  ;;  %v9917_v44 = vcombine.high %v4775_v28, %v4783_v34  ;;  %v11292_v28 = vld [vmem:[#allocation20 + $0x48] ss:$36 sps:$4 sm:$0xff]   ;;  %v11295_v34 = vld [vmem:[#allocation20 + $0x50] ss:$36 sps:$4 sm:$0xff]  }
 0x8c6   :  { %v4513_v15 = vpop.f32.mrf.mxu0 }
 0x8c7   :  { %4685 = vmatprep.mubr.bf16.mxu0 %v4517_v7  ;;  %v4756_v7 = vld [vmem:[#allocation16 + $0x18] sm:$0xff]  ;;  %v4759_v15 = vld [vmem:[#allocation16 + $0x30] sm:$0xff] }
 0x8c8   :  { %v4514_v55 = vpop.f32.mrf.mxu0  ;;  %4686 = vmatmul.mubr.bf16.vlgmr.msra.gmra.mxu0 %v4516_v10  ;;  %v4764_v10 = vld [vmem:[#allocation16 + $0x58] sm:$0xff] }
 0x8c9   :  { %10559 = vmatprep.mubr.msk.bf16.mxu0 %vm12270_vm4, %v12269_v42  ;;  %v4767_v55 = vld [vmem:[#allocation16 + $0x70] sm:$0xff]  ;;  %v9895_v30 = vcombine.high %v4756_v7, %v4764_v10 }
 0x8ca   :  { %v9901_v54 = vcombine.high %v4759_v15, %v4767_v55 }
 0x988   :  { %v10409_v31 = vpop.f32.mrf.mxu0 }
 0x98a   :  { %v10410_v18 = vpop.f32.mrf.mxu0 }
 0x98b   :  { %v10411_v19 = vadd.f32 %v10410_v18, %v10409_v31  ;;  %v4774_v31 = vld [vmem:[#allocation16 + $0xa8] sm:$0xff]  ;;  %v9894_v18 = vcombine.low %v4756_v7, %v4764_v10  ;;  %v11306_v7 = vld [vmem:[#allocation20 + $0x43c] ss:$36 sps:$4 sm:$0xff]  }
 0x98c   :  { %v10412_v21 = vpop.f32.mrf.mxu0  ;;  %v11309_v10 = vld [vmem:[#allocation20 + $0x444] ss:$36 sps:$4 sm:$0xff]  }
 0x98d   :  { %v4688_v24 = vadd.f32 %v10411_v19, %v9869_v60  ;;  %v4782_v60 = vld [vmem:[#allocation16 + $0xe8] sm:$0xff]  ;;  %v9900_v19 = vcombine.low %v4759_v15, %v4767_v55  ;;  %v11304_v15 = vld [vmem:[#allocation20 + $0x438] ss:$36 sps:$4 sm:$0xff]   ;;  %v11307_v55 = vld [vmem:[#allocation20 + $0x440] ss:$36 sps:$4 sm:$0xff]  }
 0x98e   :  { %v10413_v20 = vpop.f32.mrf.mxu0  ;;  %v9915_v21 = vcombine.high %v4774_v31, %v4782_v60  ;;  %v9914_v50 = vcombine.low %v4774_v31, %v4782_v60  ;;  %v11318_v31 = vld [vmem:[#allocation20 + $0x3ac] ss:$36 sps:$4 sm:$0xff]   ;;  %v11321_v60 = vld [vmem:[#allocation20 + $0x3b4] ss:$36 sps:$4 sm:$0xff]  }
 0x98f   :  { %v4693_v5 = vmax.f32 %v4688_v24, 0.0  ;;  %v4758_v24 = vld [vmem:[#allocation16 + $0x28] sm:$0xff] }
 0x990   :  { %v4766_v20 = vld [vmem:[#allocation16 + $0x68] sm:$0xff] }
 0x991   :  { %v4698_v8 = vpack.c.bf16 %v4693_v5, %v4693_v5  ;;  %4695 = vst.msk [vmem:[#allocation31] sm:$0x3] %vm4694_vm6, %v4693_v5  ;;  %v9899_v32 = vcombine.high %v4758_v24, %v4766_v20  ;;  %v4776_v5 = vld [vmem:[#allocation16 + $0xb8] sm:$0xff] }
 0x993   :  { %v4709_v38 = vsel %vm463_vm0, %v4698_v8, 0  ;;  %v4784_v8 = vld [vmem:[#allocation16 + $0xf8] sm:$0xff] }
 0x994   :  { %10558 = vmatpush3.bf16.msra.mxu0 %v4709_v38  ;;  %v9919_v38 = vcombine.high %v4776_v5, %v4784_v8  ;;  %v9918_v11 = vcombine.low %v4776_v5, %v4784_v8  ;;  %v11333_v5 = vld [vmem:[#allocation20 + $0x324] ss:$36 sps:$4 sm:$0xff]   ;;  %v11328_v8 = vld [vmem:[#allocation20 + $0x318] ss:$36 sps:$4 sm:$0xff]  }
 0x995   :  { %4961 = vmatprep.subr.bf16.mxu0 %v9905_v57  ;;  %v9898_v57 = vcombine.low %v4758_v24, %v4766_v20  ;;  %v11327_v24 = vld [vmem:[#allocation20 + $0x36c] ss:$36 sps:$4 sm:$0xff]   ;;  %v11322_v20 = vld [vmem:[#allocation20 + $0x360] ss:$36 sps:$4 sm:$0xff]  }
 0x997   :  { %10560 = vmatmul.mubr.msk.bf16.vlgmr.msra.gmra.mxu0 %vm4704_vm7, %v11255_v63  ;;  %v4760_v63 = vld [vmem:[#allocation16 + $0x38] sm:$0xff] }
 0x998   :  { %4962 = vmatpush1.bf16.msra.mxu0 %v9904_v58  ;;  %4981 = vmatprep.mubr.bf16.mxu0 %v12268_v0  ;;  %v4768_v58 = vld [vmem:[#allocation16 + $0x78] sm:$0xff] }
 0x999   :  { %4963 = vmatprep.subr.bf16.mxu0 %v9889_v41  ;;  %v9903_v37 = vcombine.high %v4760_v63, %v4768_v58  ;;  %v9902_v1 = vcombine.low %v4760_v63, %v4768_v58  ;;  %v11258_v41 = vld [vmem:[#allocation20 + $0x1fc] ss:$36 sps:$4 sm:$0xff]   ;;  %v11334_v63 = vld [vmem:[#allocation20 + $0x2d0] ss:$36 sps:$4 sm:$0xff]  }
 0x99a   :  { %v11339_v58 = vld [vmem:[#allocation20 + $0x2dc] ss:$36 sps:$4 sm:$0xff]  }
 0x99c   :  { %4964 = vmatpush1.bf16.msra.mxu0 %v9888_v16  ;;  %v11256_v16 = vld [vmem:[#allocation20 + $0x1f8] ss:$36 sps:$4 sm:$0xff]  }
 0x99d   :  { %5004 = vmatprep.subr.bf16.mxu0 %v9907_v39  ;;  %v11270_v39 = vld [vmem:[#allocation20 + $0x16c] ss:$36 sps:$4 sm:$0xff]  }
 0xa57   :  { %v4745_v33 = vpop.f32.mrf.mxu0 }
 0xa59   :  { %v10561_v49 = vpop.f32.mrf.mxu0 }
 0xa5a   :  { %v11277_v49 = vld [vmem:[#allocation20 + $0x128] ss:$36 sps:$4 sm:$0xff]  }
 0xa5b   :  { %v4748_v48 = vpop.f32.mrf.mxu0 }
 0xa5c   :  { %v12982_v27 = vpack.c.bf16 %v4748_v48, %v4745_v33  ;;  %v11279_v33 = vld [vmem:[#allocation20 + $0x12c] ss:$36 sps:$4 sm:$0xff]   ;;  %v11283_v48 = vld [vmem:[#allocation20 + $0xe0] ss:$36 sps:$4 sm:$0xff]  }
 0xa5d   :  { %v10562_v53 = vpop.f32.mrf.mxu0 }
 0xa5e   :  { %9920 = vmatmul.mubr.msk.bf16.vlgmr.msra.gmra.mxu0 %vm4945_vm8, %v12982_v27  ;;  %9922 = vmatmul.mubr.msk.bf16.vlgmr.msra.gmra.mxu1 %vm4945_vm8, %v12982_v27  ;;  %v11294_v53 = vld [vmem:[#allocation20 + $0x4c] ss:$36 sps:$4 sm:$0xff]  }
 0xa5f   :  { %5005 = vmatpush1.bf16.msra.mxu0 %v9906_v25  ;;  %5134 = vmatpush1.bf16.msra.mxu1 %v9912_v52  ;;  %v11268_v25 = vld [vmem:[#allocation20 + $0x168] ss:$36 sps:$4 sm:$0xff]   ;;  %v11271_v52 = vld [vmem:[#allocation20 + $0x170] ss:$36 sps:$4 sm:$0xff]  }
 0xa60   :  { %5006 = vmatprep.subr.bf16.mxu0 %v9891_v62  ;;  %5135 = vmatprep.subr.bf16.mxu1 %v9897_v12  ;;  %v11291_v62 = vld [vmem:[#allocation20 + $0x9c] ss:$36 sps:$4 sm:$0xff]   ;;  %v11286_v12 = vld [vmem:[#allocation20 + $0x90] ss:$36 sps:$4 sm:$0xff]  }
 0xa61   :  { %5024 = vmatprep.mubr.bf16.mxu0 %v12268_v0  ;;  %5153 = vmatprep.mubr.bf16.mxu1 %v12268_v0 }
 0xa63   :  { %5007 = vmatpush1.bf16.msra.mxu0 %v9890_v56  ;;  %5136 = vmatpush1.bf16.msra.mxu1 %v9896_v43  ;;  %v11300_v56 = vld [vmem:[#allocation20 + $0x4] ss:$36 sps:$4 sm:$0xff]   ;;  %v11303_v43 = vld [vmem:[#allocation20 + $0xc] ss:$36 sps:$4 sm:$0xff]  }
 0xa64   :  { %5090 = vmatprep.subr.bf16.mxu0 %v9911_v47  ;;  %5219 = vmatprep.subr.bf16.mxu1 %v9917_v44  ;;  %v11298_v47 = vld [vmem:[#allocation20] ss:$36 sps:$4 sm:$0xff]   ;;  %v11301_v44 = vld [vmem:[#allocation20 + $0x8] ss:$36 sps:$4 sm:$0xff]  }
 0xa66   :  { %9921 = vmatmul.mubr.msk.bf16.vlgmr.msra.gmra.mxu0 %vm4945_vm8, %v12982_v27  ;;  %9924 = vmatmul.mubr.msk.bf16.vlgmr.msra.gmra.mxu1 %vm4945_vm8, %v12982_v27 }
 0xa67   :  { %5091 = vmatpush1.bf16.msra.mxu0 %v9910_v35  ;;  %5220 = vmatpush1.bf16.msra.mxu1 %v9916_v22  ;;  %v11312_v35 = vld [vmem:[#allocation20 + $0x3f4] ss:$36 sps:$4 sm:$0xff]   ;;  %v11315_v22 = vld [vmem:[#allocation20 + $0x3fc] ss:$36 sps:$4 sm:$0xff]  }
 0xa68   :  { %5092 = vmatprep.subr.bf16.mxu0 %v9895_v30  ;;  %5221 = vmatprep.subr.bf16.mxu1 %v9901_v54  ;;  %v11310_v30 = vld [vmem:[#allocation20 + $0x3f0] ss:$36 sps:$4 sm:$0xff]   ;;  %v11313_v54 = vld [vmem:[#allocation20 + $0x3f8] ss:$36 sps:$4 sm:$0xff]  }
 0xa69   :  { %5110 = vmatprep.mubr.bf16.mxu0 %v12268_v0  ;;  %5239 = vmatprep.mubr.bf16.mxu1 %v12268_v0 }
 0xa6b   :  { %5093 = vmatpush1.bf16.msra.mxu0 %v9894_v18  ;;  %5222 = vmatpush1.bf16.msra.mxu1 %v9900_v19  ;;  %v11316_v18 = vld [vmem:[#allocation20 + $0x3a8] ss:$36 sps:$4 sm:$0xff]   ;;  %v11319_v19 = vld [vmem:[#allocation20 + $0x3b0] ss:$36 sps:$4 sm:$0xff]  }
 0xa6c   :  { %5176 = vmatprep.subr.bf16.mxu0 %v9915_v21  ;;  %6315 = vmatprep.subr.bf16.mxu1 %v11258_v41  ;;  %v11324_v21 = vld [vmem:[#allocation20 + $0x364] ss:$36 sps:$4 sm:$0xff]  }
 0xa6d   :  { %v11340_v41 = vld [vmem:[#allocation20 + $0x288] ss:$36 sps:$4 sm:$0xff]  }
 0xa6e   :  { %9923 = vmatmul.mubr.msk.bf16.vlgmr.msra.gmra.mxu0 %vm4945_vm8, %v12982_v27  ;;  %9926 = vmatmul.mubr.msk.bf16.vlgmr.msra.gmra.mxu1 %vm4945_vm8, %v12982_v27 }
 0xa6f   :  { %5177 = vmatpush1.bf16.msra.mxu0 %v9914_v50  ;;  %5196 = vmatprep.mubr.bf16.mxu0 %v12268_v0  ;;  %v11325_v50 = vld [vmem:[#allocation20 + $0x368] ss:$36 sps:$4 sm:$0xff]  }
 0xa70   :  { %5178 = vmatprep.subr.bf16.mxu0 %v9899_v32  ;;  %6316 = vmatpush1.bf16.msra.mxu1 %v11256_v16  ;;  %v11330_v32 = vld [vmem:[#allocation20 + $0x31c] ss:$36 sps:$4 sm:$0xff]   ;;  %v11348_v16 = vld [vmem:[#allocation20 + $0x244] ss:$36 sps:$4 sm:$0xff]  }
 0xa71   :  { %6317 = vmatprep.subr.bf16.mxu1 %v11264_v23  ;;  %v11346_v23 = vld [vmem:[#allocation20 + $0x240] ss:$36 sps:$4 sm:$0xff]  }
 0xa73   :  { %5179 = vmatpush1.bf16.msra.mxu0 %v9898_v57  ;;  %v11331_v57 = vld [vmem:[#allocation20 + $0x320] ss:$36 sps:$4 sm:$0xff]  }
 0xa74   :  { %5262 = vmatprep.subr.bf16.mxu0 %v9919_v38  ;;  %6318 = vmatpush1.bf16.msra.mxu1 %v11262_v26  ;;  %v11336_v38 = vld [vmem:[#allocation20 + $0x2d4] ss:$36 sps:$4 sm:$0xff]   ;;  %v11354_v26 = vld [vmem:[#allocation20 + $0x20c] ss:$36 sps:$4 sm:$0xff]  }
 0xa75   :  { %6319 = vmatprep.subr.bf16.mxu1 %v11270_v39 }
 0xa76   :  { %9925 = vmatmul.mubr.msk.bf16.vlgmr.msra.gmra.mxu0 %vm4945_vm8, %v12982_v27 }
 0xa77   :  { %5263 = vmatpush1.bf16.msra.mxu0 %v9918_v11  ;;  %5282 = vmatprep.mubr.bf16.mxu0 %v12268_v0  ;;  %v11337_v11 = vld [vmem:[#allocation20 + $0x2d8] ss:$36 sps:$4 sm:$0xff]  }
 0xa78   :  { %5264 = vmatprep.subr.bf16.mxu0 %v9903_v37  ;;  %6320 = vmatpush1.bf16.msra.mxu1 %v11268_v25  ;;  %v11342_v37 = vld [vmem:[#allocation20 + $0x28c] ss:$36 sps:$4 sm:$0xff]  }
 0xa79   :  { %6321 = vmatprep.subr.bf16.mxu1 %v11276_v45 }
 0xa7b   :  { %5265 = vmatpush1.bf16.msra.mxu0 %v9902_v1  ;;  %v11345_v1 = vld [vmem:[#allocation20 + $0x294] ss:$36 sps:$4 sm:$0xff]  }
 0xa7c   :  { %6358 = vmatprep.subr.bf16.mxu0 %v11261_v51  ;;  %6322 = vmatpush1.bf16.msra.mxu1 %v11274_v46  ;;  %v11343_v51 = vld [vmem:[#allocation20 + $0x290] ss:$36 sps:$4 sm:$0xff]  }
 0xa7d   :  { %6323 = vmatprep.subr.bf16.mxu1 %v11282_v13 }
 0xa7e   :  { %9927 = vmatmul.mubr.msk.bf16.vlgmr.msra.gmra.mxu0 %vm4945_vm8, %v12982_v27  ;;  %v11288_v27 = vld [vmem:[#allocation20 + $0x94] ss:$36 sps:$4 sm:$0xff]  }
 0xa7f   :  { %6359 = vmatpush1.bf16.msra.mxu0 %v11259_v14  ;;  %v11351_v14 = vld [vmem:[#allocation20 + $0x24c] ss:$36 sps:$4 sm:$0xff]  }
 0xa80   :  { %6360 = vmatprep.subr.bf16.mxu0 %v11267_v6  ;;  %6324 = vmatpush1.bf16.msra.mxu1 %v11280_v9  ;;  %v11349_v6 = vld [vmem:[#allocation20 + $0x248] ss:$36 sps:$4 sm:$0xff]   ;;  %v5295_v9 = vld [vmem:[#allocation17 + $0x10] sm:$0xff] }
 0xa81   :  { %6325 = vmatprep.subr.bf16.mxu1 %v11288_v27 }
 0xa83   :  { %6361 = vmatpush1.bf16.msra.mxu0 %v11265_v17  ;;  %v11357_v17 = vld [vmem:[#allocation20 + $0x214] ss:$36 sps:$4 sm:$0xff]  }
 0xa84   :  { %6362 = vmatprep.subr.bf16.mxu0 %v11273_v3  ;;  %6326 = vmatpush1.bf16.msra.mxu1 %v11286_v12  ;;  %v5296_v12 = vld [vmem:[#allocation17 + $0x18] sm:$0xff] }
 0xa85   :  { %6327 = vmatprep.subr.bf16.mxu1 %v11294_v53 }
 0xa87   :  { %6363 = vmatpush1.bf16.msra.mxu0 %v11271_v52 }
 0xa88   :  { %6364 = vmatprep.subr.bf16.mxu0 %v11279_v33  ;;  %6328 = vmatpush1.bf16.msra.mxu1 %v11292_v28  ;;  %v5294_v28 = vld [vmem:[#allocation17 + $0x8] sm:$0xff] }
 0xa89   :  { %6329 = vmatprep.subr.bf16.mxu1 %v11300_v56 }
 0xa8b   :  { %6365 = vmatpush1.bf16.msra.mxu0 %v11277_v49 }
 0xa8c   :  { %6366 = vmatprep.subr.bf16.mxu0 %v11285_v29  ;;  %6330 = vmatpush1.bf16.msra.mxu1 %v11298_v47 }
 0xa8d   :  { %6331 = vmatprep.subr.bf16.mxu1 %v11306_v7  ;;  %v5297_v7 = vld [vmem:[#allocation17 + $0x20] sm:$0xff] }
 0xa8f   :  { %6367 = vmatpush1.bf16.msra.mxu0 %v11283_v48 }
 0xa90   :  { %6368 = vmatprep.subr.bf16.mxu0 %v11291_v62  ;;  %6332 = vmatpush2.bf16.msra.mxu1 %v11304_v15  ;;  %v5293_v62 = vld [vmem:[#allocation17] sm:$0xff] }
 0xa91   :  { %6333 = vmatprep.subr.bf16.mxu1 %v11312_v35 }
 0xa93   :  { %6369 = vmatpush1.bf16.msra.mxu0 %v11289_v40 }
 0xa94   :  { %6370 = vmatprep.subr.bf16.mxu0 %v11297_v59  ;;  %6334 = vmatpush2.bf16.msra.mxu1 %v11310_v30 }
 0xa95   :  { %6335 = vmatprep.subr.bf16.mxu1 %v11318_v31 }
 0xa97   :  { %6371 = vmatpush1.bf16.msra.mxu0 %v11295_v34  ;;  %v5311_v34 = vld [vmem:[#allocation17 + $0x90] sm:$0xff] }
 0xa98   :  { %6372 = vmatprep.subr.bf16.mxu0 %v11303_v43  ;;  %6336 = vmatpush2.bf16.msra.mxu1 %v11316_v18 }
 0xa99   :  { %6337 = vmatprep.subr.bf16.mxu1 %v11324_v21  ;;  %v5300_v21 = vld [vmem:[#allocation17 + $0x38] sm:$0xff] }
 0xa9b   :  { %6373 = vmatpush1.bf16.msra.mxu0 %v11301_v44  ;;  %v5312_v44 = vld [vmem:[#allocation17 + $0x98] sm:$0xff] }
 0xa9c   :  { %6374 = vmatprep.subr.bf16.mxu0 %v11309_v10  ;;  %6338 = vmatpush2.bf16.msra.mxu1 %v11322_v20  ;;  %v5309_v10 = vld [vmem:[#allocation17 + $0x80] sm:$0xff] }
 0xa9d   :  { %6339 = vmatprep.subr.bf16.mxu1 %v11330_v32 }
 0xa9f   :  { %6375 = vmatpush2.bf16.msra.mxu0 %v11307_v55  ;;  %v5299_v55 = vld [vmem:[#allocation17 + $0x30] sm:$0xff] }
 0xaa0   :  { %6376 = vmatprep.subr.bf16.mxu0 %v11315_v22  ;;  %6340 = vmatpush2.bf16.msra.mxu1 %v11328_v8  ;;  %v5310_v22 = vld [vmem:[#allocation17 + $0x88] sm:$0xff] }
 0xaa1   :  { %6341 = vmatprep.subr.bf16.mxu1 %v11336_v38  ;;  %v5315_v38 = vld [vmem:[#allocation17 + $0xb0] sm:$0xff] }
 0xaa3   :  { %6377 = vmatpush2.bf16.msra.mxu0 %v11313_v54 }
 0xaa4   :  { %6378 = vmatprep.subr.bf16.mxu0 %v11321_v60  ;;  %6342 = vmatpush2.bf16.msra.mxu1 %v11334_v63  ;;  %v5298_v60 = vld [vmem:[#allocation17 + $0x28] sm:$0xff] }
 0xaa5   :  { %6343 = vmatprep.subr.bf16.mxu1 %v11342_v37 }
 0xaa7   :  { %6379 = vmatpush2.bf16.msra.mxu0 %v11319_v19 }
 0xaa8   :  { %6380 = vmatprep.subr.bf16.mxu0 %v11327_v24  ;;  %6344 = vmatpush2.bf16.msra.mxu1 %v11340_v41 }
 0xaa9   :  { %6345 = vmatprep.subr.bf16.mxu1 %v11348_v16  ;;  %v5301_v16 = vld [vmem:[#allocation17 + $0x40] sm:$0xff] }
 0xaab   :  { %6381 = vmatpush2.bf16.msra.mxu0 %v11325_v50 }
 0xaac   :  { %6382 = vmatprep.subr.bf16.mxu0 %v11333_v5  ;;  %6346 = vmatpush2.bf16.msra.mxu1 %v11346_v23  ;;  %v5313_v5 = vld [vmem:[#allocation17 + $0xa0] sm:$0xff] }
 0xaad   :  { %6401 = vmatprep.subr.bf16.mxu1 %v11354_v26 }
 0xaaf   :  { %6383 = vmatpush2.bf16.msra.mxu0 %v11331_v57 }
 0xab0   :  { %6384 = vmatprep.subr.bf16.mxu0 %v11339_v58  ;;  %v5314_v58 = vld [vmem:[#allocation17 + $0xa8] sm:$0xff] }
 0xab3   :  { %6385 = vmatpush2.bf16.msra.mxu0 %v11337_v11 }
 0xab4   :  { %6386 = vmatprep.subr.bf16.mxu0 %v11345_v1 }
 0xab7   :  { %6387 = vmatpush2.bf16.msra.mxu0 %v11343_v51  ;;  %v5316_v51 = vld [vmem:[#allocation17 + $0xb8] sm:$0xff] }
 0xab8   :  { %6388 = vmatprep.subr.bf16.mxu0 %v11351_v14 }
 0xabb   :  { %6389 = vmatpush2.bf16.msra.mxu0 %v11349_v6  ;;  %v5303_v6 = vld [vmem:[#allocation17 + $0x50] sm:$0xff] }
 0xabc   :  { %6444 = vmatprep.subr.bf16.mxu0 %v11357_v17 }
 0xb1e   :  { %v4983_v39 = vpop.f32.mrf.mxu0  ;;  %v5069_v3 = vpop.f32.mrf.mxu1 }
 0xb1f   :  { %v5325_v43 = vmul.f32 %v5293_v62, %v4983_v39  ;;  %v5329_v24 = vmul.f32 %v5297_v7, %v5069_v3 }
 0xb20   :  { %v4985_v25 = vpop.f32.mrf.mxu0  ;;  %v5071_v52 = vpop.f32.mrf.mxu1 }
 0xb21   :  { %v5326_v35 = vmul.f32 %v5294_v28, %v4985_v25  ;;  %v5330_v63 = vmul.f32 %v5298_v60, %v5071_v52 }
 0xb22   :  { %v4987_v45 = vpop.f32.mrf.mxu0  ;;  %v5073_v33 = vpop.f32.mrf.mxu1 }
 0xb23   :  { %v5341_v20 = vmul.f32 %v5309_v10, %v4987_v45  ;;  %v5345_v26 = vmul.f32 %v5313_v5, %v5073_v33  ;;  %v5302_v45 = vld [vmem:[#allocation17 + $0x48] sm:$0xff]  ;;  %v5305_v10 = vld [vmem:[#allocation17 + $0x60] sm:$0xff] }
 0xb24   :  { %v4989_v46 = vpop.f32.mrf.mxu0  ;;  %v5075_v49 = vpop.f32.mrf.mxu1 }
 0xb25   :  { %v5342_v8 = vmul.f32 %v5310_v22, %v4989_v46  ;;  %v5346_v25 = vmul.f32 %v5314_v58, %v5075_v49  ;;  %v5322_v58 = vld [vmem:[#allocation17 + $0xe8] sm:$0xff] }
 0xb26   :  { %v5026_v13 = vpop.f32.mrf.mxu0  ;;  %v5155_v29 = vpop.f32.mrf.mxu1 }
 0xb27   :  { %v5327_v53 = vmul.f32 %v5295_v9, %v5026_v13  ;;  %v5304_v9 = vld [vmem:[#allocation17 + $0x58] sm:$0xff]  ;;  %v5333_v52 = vmul.f32 %v5301_v16, %v5155_v29  ;;  %v5323_v16 = vld [vmem:[#allocation17 + $0xf0] sm:$0xff] }
 0xb28   :  { %v5028_v48 = vpop.f32.mrf.mxu0  ;;  %v5157_v27 = vpop.f32.mrf.mxu1 }
 0xb29   :  { %v5328_v47 = vmul.f32 %v5296_v12, %v5028_v48  ;;  %v5357_v30 = vadd.f32 %v5327_v53, %v5325_v43  ;;  %v5317_v53 = vld [vmem:[#allocation17 + $0xc0] sm:$0xff]  ;;  %v5334_v43 = vmul.f32 %v5302_v45, %v5157_v27 }
 0xb2a   :  { %v5030_v40 = vpop.f32.mrf.mxu0  ;;  %v13006_v59 = vpop.f32.mrf.mxu1 }
 0xb2b   :  { %v5343_v54 = vmul.f32 %v5311_v34, %v5030_v40  ;;  %v5358_v50 = vadd.f32 %v5328_v47, %v5326_v35  ;;  %v5361_v37 = vadd.f32 %v5357_v30, %v5329_v24  ;;  %v5318_v47 = vld [vmem:[#allocation17 + $0xc8] sm:$0xff]  ;;  %v5349_v35 = vmul.f32 %v5317_v53, %v13006_v59 }
 0xb2c   :  { %v5032_v56 = vpop.f32.mrf.mxu0  ;;  %v5161_v31 = vpop.f32.mrf.mxu1 }
 0xb2d   :  { %v5344_v18 = vmul.f32 %v5312_v44, %v5032_v56  ;;  %v5359_v11 = vadd.f32 %v5343_v54, %v5341_v20  ;;  %v5362_v39 = vadd.f32 %v5358_v50, %v5330_v63  ;;  %v5319_v56 = vld [vmem:[#allocation17 + $0xd0] sm:$0xff]  ;;  %v5350_v60 = vmul.f32 %v5318_v47, %v5161_v31 }
 0xb2e   :  { %v5112_v15 = vpop.f32.mrf.mxu0  ;;  %v5241_v1 = vpop.f32.mrf.mxu1 }
 0xb2f   :  { %v5331_v32 = vmul.f32 %v5299_v55, %v5112_v15  ;;  %v5360_v14 = vadd.f32 %v5344_v18, %v5342_v8  ;;  %v5363_v12 = vadd.f32 %v5359_v11, %v5345_v26  ;;  %v5320_v55 = vld [vmem:[#allocation17 + $0xd8] sm:$0xff]  ;;  %v5306_v18 = vld [vmem:[#allocation17 + $0x68] sm:$0xff]  ;;  %v5337_v24 = vmul.f32 %v5305_v10, %v5241_v1 }
 0xb30   :  { %v5114_v19 = vpop.f32.mrf.mxu0  ;;  %v5243_v62 = vpop.f32.mrf.mxu1 }
 0xb31   :  { %v5332_v41 = vmul.f32 %v5300_v21, %v5114_v19  ;;  %v5365_v17 = vadd.f32 %v5361_v37, %v5331_v32  ;;  %v5364_v28 = vadd.f32 %v5360_v14, %v5346_v25  ;;  %v5307_v21 = vld [vmem:[#allocation17 + $0x70] sm:$0xff]  ;;  %v5321_v32 = vld [vmem:[#allocation17 + $0xe0] sm:$0xff] }
 0xb32   :  { %v5116_v57 = vpop.f32.mrf.mxu0  ;;  %v5245_v29 = vpop.f32.mrf.mxu1 }
 0xb33   :  { %v5347_v3 = vmul.f32 %v5315_v38, %v5116_v57  ;;  %v5366_v48 = vadd.f32 %v5362_v39, %v5332_v41  ;;  %v5369_v44 = vadd.f32 %v5365_v17, %v5333_v52  ;;  %v5308_v57 = vld [vmem:[#allocation17 + $0x78] sm:$0xff]  ;;  %v5338_v38 = vmul.f32 %v5306_v18, %v5243_v62  ;;  %v5386_v17 = vld [vmem:[#allocation19 + $0x8] sm:$0xff] }
 0xb34   :  { %v5118_v23 = vpop.f32.mrf.mxu0  ;;  %v5247_v63 = vpop.f32.mrf.mxu1  ;;  %v5353_v14 = vmul.f32 %v5321_v32, %v5245_v29  ;;  %v11355_v32 = vld [vmem:[#allocation20 + $0x210] ss:$36 sps:$4 sm:$0xff]  }
 0xb35   :  { %v5348_v46 = vmul.f32 %v5316_v51, %v5118_v23  ;;  %v5367_v33 = vadd.f32 %v5363_v12, %v5347_v3  ;;  %v5370_v30 = vadd.f32 %v5366_v48, %v5334_v43  ;;  %v5385_v51 = vld [vmem:[#allocation19] sm:$0xff]  ;;  %v5354_v26 = vmul.f32 %v5322_v58, %v5247_v63  ;;  %v5324_v3 = vld [vmem:[#allocation17 + $0xf8] sm:$0xff]  ;;  %v11361_v63 = vld [vmem:[#allocation20 + $0x1c8] ss:$36 sps:$4 sm:$0xff]  }
 0xb36   :  { %v5198_v13 = vpop.f32.mrf.mxu0  ;;  %v11366_v58 = vld [vmem:[#allocation20 + $0x17c] ss:$36 sps:$4 sm:$0xff]  }
 0xb37   :  { %v5335_v40 = vmul.f32 %v5303_v6, %v5198_v13  ;;  %v5368_v49 = vadd.f32 %v5364_v28, %v5348_v46  ;;  %v5371_v20 = vadd.f32 %v5367_v33, %v5349_v35  ;;  %v5388_v28 = vld [vmem:[#allocation19 + $0x18] sm:$0xff] }
 0xb38   :  { %v5200_v34 = vpop.f32.mrf.mxu0 }
 0xb39   :  { %v5336_v7 = vmul.f32 %v5304_v9, %v5200_v34  ;;  %v5373_v22 = vadd.f32 %v5369_v44, %v5335_v40  ;;  %v5372_v5 = vadd.f32 %v5368_v49, %v5350_v60  ;;  %v5387_v9 = vld [vmem:[#allocation19 + $0x10] sm:$0xff] }
 0xb3a   :  { %v5202_v15 = vpop.f32.mrf.mxu0 }
 0xb3b   :  { %v5351_v54 = vmul.f32 %v5319_v56, %v5202_v15  ;;  %v5374_v27 = vadd.f32 %v5370_v30, %v5336_v7  ;;  %v5377_v37 = vadd.f32 %v5373_v22, %v5337_v24 }
 0xb3c   :  { %v5204_v19 = vpop.f32.mrf.mxu0 }
 0xb3d   :  { %v5352_v50 = vmul.f32 %v5320_v55, %v5204_v19  ;;  %v5375_v59 = vadd.f32 %v5371_v20, %v5351_v54  ;;  %v5378_v6 = vadd.f32 %v5374_v27, %v5338_v38  ;;  %v11358_v38 = vld [vmem:[#allocation20 + $0x1c0] ss:$36 sps:$4 sm:$0xff]  }
 0xb3e   :  { %v5284_v8 = vpop.f32.mrf.mxu0 }
 0xb3f   :  { %v5339_v11 = vmul.f32 %v5307_v21, %v5284_v8  ;;  %v5376_v41 = vadd.f32 %v5372_v5, %v5352_v50  ;;  %v5379_v13 = vadd.f32 %v5375_v59, %v5353_v14  ;;  %v11352_v50 = vld [vmem:[#allocation20 + $0x208] ss:$36 sps:$4 sm:$0xff]  }
 0xb40   :  { %v5286_v31 = vpop.f32.mrf.mxu0  ;;  %v11360_v8 = vld [vmem:[#allocation20 + $0x1c4] ss:$36 sps:$4 sm:$0xff]   ;;  %v11378_v14 = vld [vmem:[#allocation20 + $0xec] ss:$36 sps:$4 sm:$0xff]  }
 0xb41   :  { %v5381_v23 = vadd.f32 %v5377_v37, %v5339_v11  ;;  %v5340_v1 = vmul.f32 %v5308_v57, %v5286_v31  ;;  %v5380_v48 = vadd.f32 %v5376_v41, %v5354_v26  ;;  %v11363_v57 = vld [vmem:[#allocation20 + $0x1cc] ss:$36 sps:$4 sm:$0xff]   ;;  %v11369_v59 = vld [vmem:[#allocation20 + $0x184] ss:$36 sps:$4 sm:$0xff]   ;;  %v11364_v11 = vld [vmem:[#allocation20 + $0x178] ss:$36 sps:$4 sm:$0xff]  }
 0xb42   :  { %v5288_v39 = vpop.f32.mrf.mxu0  ;;  %v11367_v37 = vld [vmem:[#allocation20 + $0x180] ss:$36 sps:$4 sm:$0xff]   ;;  %v11372_v41 = vld [vmem:[#allocation20 + $0x134] ss:$36 sps:$4 sm:$0xff]  }
 0xb43   :  { %v5389_v25 = vadd.f32 %v5385_v51, %v5381_v23  ;;  %v5382_v45 = vadd.f32 %v5378_v6, %v5340_v1  ;;  %v5355_v46 = vmul.f32 %v5323_v16, %v5288_v39  ;;  %v11375_v51 = vld [vmem:[#allocation20 + $0x13c] ss:$36 sps:$4 sm:$0xff]   ;;  %v11370_v31 = vld [vmem:[#allocation20 + $0x130] ss:$36 sps:$4 sm:$0xff]   ;;  %v11376_v1 = vld [vmem:[#allocation20 + $0xe8] ss:$36 sps:$4 sm:$0xff]  }
 0xb44   :  { %v5290_v52 = vpop.f32.mrf.mxu0  ;;  %v11373_v16 = vld [vmem:[#allocation20 + $0x138] ss:$36 sps:$4 sm:$0xff]   ;;  %v11379_v6 = vld [vmem:[#allocation20 + $0xf0] ss:$36 sps:$4 sm:$0xff]   ;;  %v11384_v26 = vld [vmem:[#allocation20 + $0xa4] ss:$36 sps:$4 sm:$0xff]  }
 0xb45   :  { %v5393_v62 = vsub.f32 0.0, %v5389_v25  ;;  %v5390_v12 = vadd.f32 %v5386_v17, %v5382_v45  ;;  %v5383_v40 = vadd.f32 %v5379_v13, %v5355_v46  ;;  %v5356_v53 = vmul.f32 %v5324_v3, %v5290_v52  ;;  %v11381_v23 = vld [vmem:[#allocation20 + $0xf4] ss:$36 sps:$4 sm:$0xff]   ;;  %v11387_v17 = vld [vmem:[#allocation20 + $0xac] ss:$36 sps:$4 sm:$0xff]  }
 0xb46   :  { %v11382_v39 = vld [vmem:[#allocation20 + $0xa0] ss:$36 sps:$4 sm:$0xff]   ;;  %v11385_v3 = vld [vmem:[#allocation20 + $0xa8] ss:$36 sps:$4 sm:$0xff]   ;;  %v11388_v46 = vld [vmem:[#allocation20 + $0x58] ss:$36 sps:$4 sm:$0xff]  }
 0xb47   :  { %v5394_v34 = vsub.f32 0.0, %v5390_v12  ;;  %v5391_v56 = vadd.f32 %v5387_v9, %v5383_v40  ;;  %v5384_v43 = vadd.f32 %v5380_v48, %v5356_v53  ;;  %v5397_v47 = vmul.f32 1.442695, %v5393_v62  ;;  %v11390_v25 = vld [vmem:[#allocation20 + $0x5c] ss:$36 sps:$4 sm:$0xff]  }
 0xb48   :  { %v11393_v45 = vld [vmem:[#allocation20 + $0x64] ss:$36 sps:$4 sm:$0xff]   ;;  %v11396_v9 = vld [vmem:[#allocation20 + $0x14] ss:$36 sps:$4 sm:$0xff]   ;;  %v11399_v52 = vld [vmem:[#allocation20 + $0x1c] ss:$36 sps:$4 sm:$0xff]  }
 0xb49   :  { %v5399_v33 = vmul.f32 1.442695, %v5394_v34  ;;  %v5395_v44 = vsub.f32 0.0, %v5391_v56  ;;  %v5392_v7 = vadd.f32 %v5388_v28, %v5384_v43  ;;  %v11391_v13 = vld [vmem:[#allocation20 + $0x60] ss:$36 sps:$4 sm:$0xff]  }
 0xb4a   :  { %v11394_v48 = vld [vmem:[#allocation20 + $0x10] ss:$36 sps:$4 sm:$0xff]   ;;  %v11397_v62 = vld [vmem:[#allocation20 + $0x18] ss:$36 sps:$4 sm:$0xff]   ;;  %v11400_v53 = vld [vmem:[#allocation20 + $0x448] ss:$36 sps:$4 sm:$0xff]  }
 0xb4b   :  { %11771 = vpow2.f32 %v5399_v33  ;;  %v5401_v10 = vmul.f32 1.442695, %v5395_v44  ;;  %v5396_v49 = vsub.f32 0.0, %v5392_v7  ;;  %v11402_v12 = vld [vmem:[#allocation20 + $0x44c] ss:$36 sps:$4 sm:$0xff]  }
 0xb4c   :  { %11773 = vpow2.f32 %v5397_v47  ;;  %v11405_v40 = vld [vmem:[#allocation20 + $0x454] ss:$36 sps:$4 sm:$0xff]   ;;  %v11408_v34 = vld [vmem:[#allocation20 + $0x404] ss:$36 sps:$4 sm:$0xff]   ;;  %v11411_v56 = vld [vmem:[#allocation20 + $0x40c] ss:$36 sps:$4 sm:$0xff]  }
 0xb4d   :  { %11775 = vpow2.f32 %v5401_v10  ;;  %v5403_v15 = vmul.f32 1.442695, %v5396_v49  ;;  %v11403_v28 = vld [vmem:[#allocation20 + $0x450] ss:$36 sps:$4 sm:$0xff]   ;;  %v11406_v43 = vld [vmem:[#allocation20 + $0x400] ss:$36 sps:$4 sm:$0xff]  }
 0xb4e   :  { %v11409_v47 = vld [vmem:[#allocation20 + $0x408] ss:$36 sps:$4 sm:$0xff]   ;;  %v11414_v33 = vld [vmem:[#allocation20 + $0x3bc] ss:$36 sps:$4 sm:$0xff]   ;;  %v11420_v49 = vld [vmem:[#allocation20 + $0x374] ss:$36 sps:$4 sm:$0xff]  }
 0xb4f   :  { %11777 = vpow2.f32 %v5403_v15  ;;  %v11417_v44 = vld [vmem:[#allocation20 + $0x3c4] ss:$36 sps:$4 sm:$0xff]   ;;  %v11412_v7 = vld [vmem:[#allocation20 + $0x3b8] ss:$36 sps:$4 sm:$0xff]  }
 0xb50   :  { %v11415_v10 = vld [vmem:[#allocation20 + $0x3c0] ss:$36 sps:$4 sm:$0xff]  }
 0xb51   :  { %v11423_v15 = vld [vmem:[#allocation20 + $0x37c] ss:$36 sps:$4 sm:$0xff]  }
 0xb58   :  { %v11772_v55 = vpop.eup %11771 }
 0xb59   :  { %v11774_v35 = vpop.eup %11773  ;;  %v5406_v29 = vadd.f32 1.0, %v11772_v55  ;;  %v11418_v55 = vld [vmem:[#allocation20 + $0x370] ss:$36 sps:$4 sm:$0xff]  }
 0xb5a   :  { %v11776_v22 = vpop.eup %11775  ;;  %v5405_v60 = vadd.f32 1.0, %v11774_v35  ;;  %v11421_v35 = vld [vmem:[#allocation20 + $0x378] ss:$36 sps:$4 sm:$0xff]  }
 0xb5b   :  { %v5407_v30 = vadd.f32 1.0, %v11776_v22  ;;  %11779 = vrcp.f32 %v5406_v29  ;;  %v11426_v29 = vld [vmem:[#allocation20 + $0x32c] ss:$36 sps:$4 sm:$0xff]   ;;  %v11429_v22 = vld [vmem:[#allocation20 + $0x334] ss:$36 sps:$4 sm:$0xff]  }
 0xb5c   :  { %v11778_v54 = vpop.eup %11777 }
 0xb5d   :  { %v5408_v18 = vadd.f32 1.0, %v11778_v54  ;;  %11781 = vrcp.f32 %v5407_v30  ;;  %v11424_v30 = vld [vmem:[#allocation20 + $0x328] ss:$36 sps:$4 sm:$0xff]   ;;  %v11427_v54 = vld [vmem:[#allocation20 + $0x330] ss:$36 sps:$4 sm:$0xff]  }
 0xb5f   :  { %11783 = vrcp.f32 %v5408_v18  ;;  %v11435_v18 = vld [vmem:[#allocation20 + $0x2ec] ss:$36 sps:$4 sm:$0xff]  }
 0xb60   :  { %11785 = vrcp.f32 %v5405_v60  ;;  %v11432_v60 = vld [vmem:[#allocation20 + $0x2e4] ss:$36 sps:$4 sm:$0xff]  }
 0xb68   :  { %v11780_v19 = vpop.eup %11779 }
 0xb6a   :  { %v11782_v21 = vpop.eup %11781 }
 0xb6c   :  { %v11784_v24 = vpop.eup %11783 }
 0xb6d   :  { %v11786_v27 = vpop.eup %11785  ;;  %v13009_v20 = vpack.c.bf16 %v11784_v24, %v11780_v19  ;;  %v11430_v19 = vld [vmem:[#allocation20 + $0x2e0] ss:$36 sps:$4 sm:$0xff]  }
 0xb6e   :  { %v13011_v5 = vpack.c.bf16 %v11782_v21, %v11786_v27  ;;  %v11433_v21 = vld [vmem:[#allocation20 + $0x2e8] ss:$36 sps:$4 sm:$0xff]   ;;  %v11438_v24 = vld [vmem:[#allocation20 + $0x29c] ss:$36 sps:$4 sm:$0xff]  }
 0xb6f   :  { %6347 = vmatprep.mubr.bf16.mxu1 %v13009_v20  ;;  %6390 = vmatprep.mubr.bf16.mxu0 %v13009_v20  ;;  %v11441_v27 = vld [vmem:[#allocation20 + $0x2a4] ss:$36 sps:$4 sm:$0xff]  }
 0xb70   :  { %6348 = vmatmul.mubr.bf16.vlgmr.msra.gmra.mxu1 %v13011_v5  ;;  %6391 = vmatmul.mubr.bf16.vlgmr.msra.gmra.mxu0 %v13011_v5 }
 0xb71   :  { %6402 = vmatpush1.bf16.msra.mxu1 %v11352_v50  ;;  %6445 = vmatpush1.bf16.msra.mxu0 %v11355_v32  ;;  %v11436_v50 = vld [vmem:[#allocation20 + $0x298] ss:$36 sps:$4 sm:$0xff]   ;;  %v11439_v32 = vld [vmem:[#allocation20 + $0x2a0] ss:$36 sps:$4 sm:$0xff]  }
 0xb72   :  { %6433 = vmatprep.mubr.bf16.mxu1 %v13009_v20  ;;  %6476 = vmatprep.mubr.bf16.mxu0 %v13009_v20 }
 0xb73   :  { %6403 = vmatprep.subr.bf16.mxu1 %v11360_v8  ;;  %6446 = vmatprep.subr.bf16.mxu0 %v11363_v57  ;;  %v11444_v8 = vld [vmem:[#allocation20 + $0x254] ss:$36 sps:$4 sm:$0xff]   ;;  %v11447_v57 = vld [vmem:[#allocation20 + $0x25c] ss:$36 sps:$4 sm:$0xff]  }
 0xb75   :  { %6404 = vmatpush1.bf16.msra.mxu1 %v11358_v38  ;;  %6447 = vmatpush1.bf16.msra.mxu0 %v11361_v63  ;;  %v11442_v38 = vld [vmem:[#allocation20 + $0x250] ss:$36 sps:$4 sm:$0xff]   ;;  %v11445_v63 = vld [vmem:[#allocation20 + $0x258] ss:$36 sps:$4 sm:$0xff]  }
 0xb76   :  { %6405 = vmatprep.subr.bf16.mxu1 %v11366_v58  ;;  %6448 = vmatprep.subr.bf16.mxu0 %v11369_v59  ;;  %v11448_v58 = vld [vmem:[#allocation20 + $0x458] ss:$36 sps:$4 sm:$0xff]  }
 0xb77   :  { %v11449_v59 = vld [vmem:[#allocation20 + $0x218] ss:$36 sps:$4 sm:$0xff]  }
 0xb79   :  { %6406 = vmatpush1.bf16.msra.mxu1 %v11364_v11  ;;  %6449 = vmatpush1.bf16.msra.mxu0 %v11367_v37  ;;  %v11450_v11 = vld [vmem:[#allocation20 + $0x410] ss:$36 sps:$4 sm:$0xff]  }
 0xb7a   :  { %6407 = vmatprep.subr.bf16.mxu1 %v11372_v41  ;;  %6450 = vmatprep.subr.bf16.mxu0 %v11375_v51  ;;  %v11451_v37 = vld [vmem:[#allocation20 + $0x1d0] ss:$36 sps:$4 sm:$0xff]   ;;  %v11452_v41 = vld [vmem:[#allocation20 + $0x3c8] ss:$36 sps:$4 sm:$0xff]  }
 0xb7b   :  { %v11453_v51 = vld [vmem:[#allocation20 + $0x188] ss:$36 sps:$4 sm:$0xff]  }
 0xb7d   :  { %6408 = vmatpush1.bf16.msra.mxu1 %v11370_v31  ;;  %6451 = vmatpush1.bf16.msra.mxu0 %v11373_v16  ;;  %v11454_v31 = vld [vmem:[#allocation20 + $0x380] ss:$36 sps:$4 sm:$0xff]  }
 0xb7e   :  { %6409 = vmatprep.subr.bf16.mxu1 %v11378_v14  ;;  %6452 = vmatprep.subr.bf16.mxu0 %v11381_v23  ;;  %v11455_v16 = vld [vmem:[#allocation20 + $0x140] ss:$36 sps:$4 sm:$0xff]   ;;  %v11456_v14 = vld [vmem:[#allocation20 + $0x338] ss:$36 sps:$4 sm:$0xff]  }
 0xb7f   :  { %v11457_v23 = vld [vmem:[#allocation20 + $0xf8] ss:$36 sps:$4 sm:$0xff]  }
 0xb81   :  { %6410 = vmatpush1.bf16.msra.mxu1 %v11376_v1  ;;  %6453 = vmatpush1.bf16.msra.mxu0 %v11379_v6  ;;  %v11458_v1 = vld [vmem:[#allocation20 + $0x2f0] ss:$36 sps:$4 sm:$0xff]  }
 0xb82   :  { %6411 = vmatprep.subr.bf16.mxu1 %v11384_v26  ;;  %6454 = vmatprep.subr.bf16.mxu0 %v11387_v17  ;;  %v11459_v6 = vld [vmem:[#allocation20 + $0xb0] ss:$36 sps:$4 sm:$0xff]   ;;  %v11461_v26 = vld [vmem:[#allocation20 + $0x68] ss:$36 sps:$4 sm:$0xff]   ;;  %v11462_v17 = vld [vmem:[#allocation20 + $0x260] ss:$36 sps:$4 sm:$0xff]  }
 0xb85   :  { %6412 = vmatpush1.bf16.msra.mxu1 %v11382_v39  ;;  %6455 = vmatpush1.bf16.msra.mxu0 %v11385_v3  ;;  %v11463_v39 = vld [vmem:[#allocation20 + $0x20] ss:$36 sps:$4 sm:$0xff]  }
 0xb86   :  { %6413 = vmatprep.subr.bf16.mxu1 %v11390_v25  ;;  %6456 = vmatprep.subr.bf16.mxu0 %v11393_v45 }
 0xb89   :  { %6414 = vmatpush1.bf16.msra.mxu1 %v11388_v46  ;;  %6457 = vmatpush1.bf16.msra.mxu0 %v11391_v13 }
 0xb8a   :  { %6415 = vmatprep.subr.bf16.mxu1 %v11396_v9  ;;  %6458 = vmatprep.subr.bf16.mxu0 %v11399_v52  ;;  %v13026_v52 = vld [vmem:[%s13381_s2] sm:$0xff]  }
 0xb8d   :  { %6416 = vmatpush1.bf16.msra.mxu1 %v11394_v48  ;;  %6459 = vmatpush1.bf16.msra.mxu0 %v11397_v62  ;;  %v13032_v48 = vld [vmem:[%s13381_s2 + $0x8] sm:$0xff]  }
 0xb8e   :  { %6417 = vmatprep.subr.bf16.mxu1 %v11402_v12  ;;  %6460 = vmatprep.subr.bf16.mxu0 %v11405_v40 }
 0xb91   :  { %6418 = vmatpush2.bf16.msra.mxu1 %v11400_v53  ;;  %6461 = vmatpush2.bf16.msra.mxu0 %v11403_v28 }
 0xb92   :  { %6419 = vmatprep.subr.bf16.mxu1 %v11408_v34  ;;  %6462 = vmatprep.subr.bf16.mxu0 %v11411_v56 }
 0xb95   :  { %6420 = vmatpush2.bf16.msra.mxu1 %v11406_v43  ;;  %6463 = vmatpush2.bf16.msra.mxu0 %v11409_v47 }
 0xb96   :  { %6421 = vmatprep.subr.bf16.mxu1 %v11414_v33  ;;  %6464 = vmatprep.subr.bf16.mxu0 %v11417_v44 }
 0xb99   :  { %6422 = vmatpush2.bf16.msra.mxu1 %v11412_v7  ;;  %6465 = vmatpush2.bf16.msra.mxu0 %v11415_v10 }
 0xb9a   :  { %6423 = vmatprep.subr.bf16.mxu1 %v11420_v49  ;;  %6466 = vmatprep.subr.bf16.mxu0 %v11423_v15 }
 0xb9d   :  { %6424 = vmatpush2.bf16.msra.mxu1 %v11418_v55  ;;  %6467 = vmatpush2.bf16.msra.mxu0 %v11421_v35  ;;  %v11467_v55 = vld [vmem:[%s13381_s2 + $0x14] sm:$0xff]  }
 0xb9e   :  { %6425 = vmatprep.subr.bf16.mxu1 %v11426_v29  ;;  %6468 = vmatprep.subr.bf16.mxu0 %v11429_v22  ;;  %v11475_v35 = vld [vmem:[#allocation25 + $0x154] ss:$24 sps:$4 sm:$0xff]  }
 0xb9f   :  { %v13050_v22 = vld [vmem:[%s13381_s2 + $0x28] sm:$0xff]  }
 0xba1   :  { %6426 = vmatpush2.bf16.msra.mxu1 %v11424_v30  ;;  %6469 = vmatpush2.bf16.msra.mxu0 %v11427_v54  ;;  %v11473_v54 = vld [vmem:[#allocation25 + $0x150] ss:$24 sps:$4 sm:$0xff]  }
 0xba2   :  { %6427 = vmatprep.subr.bf16.mxu1 %v11432_v60  ;;  %6470 = vmatprep.subr.bf16.mxu0 %v11435_v18  ;;  %v11478_v60 = vld [vmem:[#allocation25 + $0x124] ss:$24 sps:$4 sm:$0xff]   ;;  %v11476_v18 = vld [vmem:[#allocation25 + $0x120] ss:$24 sps:$4 sm:$0xff]  }
 0xba5   :  { %6428 = vmatpush2.bf16.msra.mxu1 %v11430_v19  ;;  %6471 = vmatpush2.bf16.msra.mxu0 %v11433_v21  ;;  %v11469_v19 = vld [vmem:[%s13381_s2 + $0x1c] sm:$0xff]   ;;  %v11481_v21 = vld [vmem:[#allocation25 + $0xf4] ss:$24 sps:$4 sm:$0xff]  }
 0xba6   :  { %6429 = vmatprep.subr.bf16.mxu1 %v11438_v24  ;;  %6472 = vmatprep.subr.bf16.mxu0 %v11441_v27  ;;  %v13060_v24 = vld [vmem:[%s13381_s2 + $0x30] sm:$0xff]  }
 0xba7   :  { %v11479_v27 = vld [vmem:[#allocation25 + $0xf0] ss:$24 sps:$4 sm:$0xff]  }
 0xba9   :  { %6430 = vmatpush2.bf16.msra.mxu1 %v11436_v50  ;;  %6473 = vmatpush2.bf16.msra.mxu0 %v11439_v32  ;;  %v11484_v50 = vld [vmem:[#allocation25 + $0xc4] ss:$24 sps:$4 sm:$0xff]   ;;  %v11482_v32 = vld [vmem:[#allocation25 + $0xc0] ss:$24 sps:$4 sm:$0xff]  }
 0xbaa   :  { %6431 = vmatprep.subr.bf16.mxu1 %v11444_v8  ;;  %6474 = vmatprep.subr.bf16.mxu0 %v11447_v57  ;;  %v11471_v8 = vld [vmem:[%s13381_s2 + $0x24] ss:$0 sps:$4 sm:$0x11]   ;;  %v11487_v57 = vld [vmem:[#allocation25 + $0x94] ss:$24 sps:$4 sm:$0xff]  }
 0xbad   :  { %6432 = vmatpush2.bf16.msra.mxu1 %v11442_v38  ;;  %6475 = vmatpush2.bf16.msra.mxu0 %v11445_v63  ;;  %v13069_v38 = vld [vmem:[%s13381_s2 + $0x38] ss:$0 sps:$4 sm:$0x11]   ;;  %v11485_v63 = vld [vmem:[#allocation25 + $0x90] ss:$24 sps:$4 sm:$0xff]  }
 0xbae   :  { %10417 = vmatprep.subr.bf16.mxu1 %v11448_v58  ;;  %v11490_v58 = vld [vmem:[#allocation25 + $0x64] ss:$24 sps:$4 sm:$0xff]  }
 0xbb0   :  { %6434 = vmatmul.mubr.bf16.vlgmr.msra.gmra.mxu1 %v13011_v5  ;;  %6477 = vmatmul.mubr.bf16.vlgmr.msra.gmra.mxu0 %v13011_v5 }
 0xbb1   :  { %10418 = vmatpush3.bf16.msra.mxu1 %v11449_v59  ;;  %6519 = vmatprep.mubr.bf16.mxu1 %v13009_v20  ;;  %v11460_v20 = vld [vmem:[#allocation20 + $0x2a8] ss:$36 sps:$4 sm:$0xff]   ;;  %v11488_v59 = vld [vmem:[#allocation25 + $0x60] ss:$24 sps:$4 sm:$0xff]  }
 0xbb2   :  { %10419 = vmatprep.subr.bf16.mxu1 %v11450_v11  ;;  %6602 = vmatprep.mubr.bf16.mxu0 %v12268_v0  ;;  %v11493_v11 = vld [vmem:[#allocation25 + $0x34] ss:$24 sps:$4 sm:$0xff]  }
 0xbb5   :  { %10420 = vmatpush3.bf16.msra.mxu1 %v11451_v37 }
 0xbb6   :  { %10421 = vmatprep.subr.bf16.mxu1 %v11452_v41  ;;  %v11491_v41 = vld [vmem:[#allocation25 + $0x30] ss:$24 sps:$4 sm:$0xff]  }
 0xbb9   :  { %10422 = vmatpush3.bf16.msra.mxu1 %v11453_v51  ;;  %v11496_v51 = vld [vmem:[#allocation25 + $0x4] ss:$24 sps:$4 sm:$0xff]  }
 0xbba   :  { %10423 = vmatprep.subr.bf16.mxu1 %v11454_v31  ;;  %v11494_v31 = vld [vmem:[#allocation25] ss:$24 sps:$4 sm:$0xff]  }
 0xbbd   :  { %10424 = vmatpush3.bf16.msra.mxu1 %v11455_v16 }
 0xbbe   :  { %10425 = vmatprep.subr.bf16.mxu1 %v11456_v14  ;;  %v11499_v14 = vld [vmem:[#allocation25 + $0x2d4] ss:$24 sps:$4 sm:$0xff]  }
 0xbc1   :  { %10426 = vmatpush3.bf16.msra.mxu1 %v11457_v23  ;;  %v11497_v23 = vld [vmem:[#allocation25 + $0x2d0] ss:$24 sps:$4 sm:$0xff]  }
 0xbc2   :  { %10427 = vmatprep.subr.bf16.mxu1 %v11458_v1 }
 0xbc5   :  { %10428 = vmatpush3.bf16.msra.mxu1 %v11459_v6  ;;  %v11502_v6 = vld [vmem:[#allocation25 + $0x2a4] ss:$24 sps:$4 sm:$0xff]  }
 0xbc6   :  { %10429 = vmatprep.subr.bf16.mxu1 %v11460_v20  ;;  %v11500_v20 = vld [vmem:[#allocation25 + $0x2a0] ss:$24 sps:$4 sm:$0xff]  }
 0xbc9   :  { %10430 = vmatpush3.bf16.msra.mxu1 %v11461_v26 }
 0xbca   :  { %10431 = vmatprep.subr.bf16.mxu1 %v11462_v17  ;;  %v11505_v17 = vld [vmem:[#allocation25 + $0x274] ss:$24 sps:$4 sm:$0xff]  }
 0xbcd   :  { %10432 = vmatpush3.bf16.msra.mxu1 %v11463_v39  ;;  %v11503_v39 = vld [vmem:[#allocation25 + $0x270] ss:$24 sps:$4 sm:$0xff]  }
 0xbd0   :  { %6520 = vmatmul.mubr.bf16.vlgmr.msra.gmra.mxu1 %v13011_v5  ;;  %v13038_v5 = vld [vmem:[%s13381_s2 + $0x10] ss:$0 sps:$4 sm:$0x11]  }
 0xbd1   :  { %6741 = vmatprep.mubr.bf16.mxu1 %v12268_v0 }
 0xc30   :  { %v6349_v3 = vpop.f32.mrf.mxu1  ;;  %v13043_v62 = vpop.f32.mrf.mxu0 }
 0xc32   :  { %v6351_v25 = vpop.f32.mrf.mxu1  ;;  %v6394_v12 = vpop.f32.mrf.mxu0 }
 0xc34   :  { %v6353_v45 = vpop.f32.mrf.mxu1  ;;  %v13045_v40 = vpop.f32.mrf.mxu0 }
 0xc35   :  { %v6528_v9 = vpack.c.bf16 %v6353_v45, %v6349_v3  ;;  %v6530_v37 = vpack.c.bf16 %v13045_v40, %v13043_v62  ;;  %v11511_v62 = vld [vmem:[#allocation25 + $0x214] ss:$24 sps:$4 sm:$0xff]   ;;  %v11512_v40 = vld [vmem:[#allocation25 + $0x1e0] ss:$24 sps:$4 sm:$0xff]  }
 0xc36   :  { %v6355_v46 = vpop.f32.mrf.mxu1  ;;  %v6398_v53 = vpop.f32.mrf.mxu0 }
 0xc37   :  { %v6529_v13 = vpack.c.bf16 %v6355_v46, %v6351_v25  ;;  %v6531_v7 = vpack.c.bf16 %v6398_v53, %v6394_v12  ;;  %v11508_v25 = vld [vmem:[#allocation25 + $0x244] ss:$24 sps:$4 sm:$0xff]   ;;  %v11506_v46 = vld [vmem:[#allocation25 + $0x240] ss:$24 sps:$4 sm:$0xff]   ;;  %v11509_v12 = vld [vmem:[#allocation25 + $0x210] ss:$24 sps:$4 sm:$0xff]  }
 0xc38   :  { %v11515_v53 = vld [vmem:[#allocation25 + $0x1b0] ss:$24 sps:$4 sm:$0xff]  }
 0xc39   :  { %6723 = vmatprep.subr.bf16.mxu1 %v6529_v13 }
 0xc3a   :  { %6724 = vmatpush1.bf16.msra.mxu1 %v6528_v9 }
 0xc3d   :  { %10089 = vmatmul.mubr.msk.bf16.vlgmr.msra.gmra.mxu1 %vm4471_vm5, %v13026_v52 }
 0xc3e   :  { %6751 = vmatprep.mubr.bf16.mxu1 %v12268_v0 }
 0xc45   :  { %10090 = vmatmul.mubr.msk.bf16.gmra.mxu1 %vm4471_vm5, %v13032_v48 }
 0xc46   :  { %6761 = vmatprep.mubr.bf16.mxu1 %v12268_v0 }
 0xc4d   :  { %10091 = vmatmul.mubr.msk.bf16.gmra.mxu1 %vm4471_vm5, %v13038_v5 }
 0xc4e   :  { %6886 = vmatprep.mubr.bf16.mxu1 %v12268_v0 }
 0xc70   :  { %v6435_v28 = vpop.f32.mrf.mxu1  ;;  %v6478_v34 = vpop.f32.mrf.mxu0 }
 0xc72   :  { %v6437_v56 = vpop.f32.mrf.mxu1  ;;  %v6480_v43 = vpop.f32.mrf.mxu0 }
 0xc74   :  { %v6439_v47 = vpop.f32.mrf.mxu1  ;;  %v6482_v33 = vpop.f32.mrf.mxu0 }
 0xc75   :  { %v6532_v44 = vpack.c.bf16 %v6439_v47, %v6435_v28  ;;  %v6534_v29 = vpack.c.bf16 %v6482_v33, %v6478_v34  ;;  %v11518_v28 = vld [vmem:[#allocation25 + $0x180] ss:$24 sps:$4 sm:$0xff]   ;;  %v11523_v34 = vld [vmem:[#allocation25 + $0x454] ss:$24 sps:$4 sm:$0xff]   ;;  %v11529_v47 = vld [vmem:[#allocation25 + $0x424] ss:$24 sps:$4 sm:$0xff]  }
 0xc76   :  { %v6484_v10 = vpop.f32.mrf.mxu0  ;;  %v6441_v49 = vpop.f32.mrf.mxu1  ;;  %v11527_v33 = vld [vmem:[#allocation25 + $0x420] ss:$24 sps:$4 sm:$0xff]  }
 0xc77   :  { %v6535_v15 = vpack.c.bf16 %v6484_v10, %v6480_v43  ;;  %6584 = vmatprep.subr.bf16.mxu0 %v6532_v44  ;;  %v6533_v30 = vpack.c.bf16 %v6441_v49, %v6437_v56  ;;  %v11526_v56 = vld [vmem:[#allocation25 + $0x45c] ss:$24 sps:$4 sm:$0xff]   ;;  %v11521_v43 = vld [vmem:[#allocation25 + $0x450] ss:$24 sps:$4 sm:$0xff]   ;;  %v11539_v49 = vld [vmem:[#allocation25 + $0x3c0] ss:$24 sps:$4 sm:$0xff]  }
 0xc78   :  { %6585 = vmatpush1.bf16.msra.mxu0 %v6531_v7  ;;  %v11535_v44 = vld [vmem:[#allocation25 + $0x3f4] ss:$24 sps:$4 sm:$0xff]   ;;  %v11533_v7 = vld [vmem:[#allocation25 + $0x3f0] ss:$24 sps:$4 sm:$0xff]   ;;  %v11541_v10 = vld [vmem:[#allocation25 + $0x3c4] ss:$24 sps:$4 sm:$0xff]  }
 0xc79   :  { %6868 = vmatprep.subr.bf16.mxu1 %v6535_v15  ;;  %10563 = vmatprep.subr.bf16.mxu0 %v12269_v42 }
 0xc7a   :  { %6869 = vmatpush1.bf16.msra.mxu1 %v6534_v29  ;;  %v11545_v29 = vld [vmem:[#allocation25 + $0x390] ss:$24 sps:$4 sm:$0xff]  }
 0xc7b   :  { %10080 = vmatmul.mubr.msk.bf16.vlgmr.msra.gmra.mxu0 %vm4471_vm5, %v11467_v55  ;;  %7906 = vmatprep.subr.bf16.mxu1 %v11475_v35 }
 0xc7c   :  { %10564 = vmatpush3.bf16.msra.mxu0 %v6533_v30  ;;  %6612 = vmatprep.mubr.bf16.mxu0 %v12268_v0  ;;  %v11553_v30 = vld [vmem:[#allocation25 + $0x364] ss:$24 sps:$4 sm:$0xff]  }
 0xc7d   :  { %10103 = vmatmul.mubr.msk.bf16.vlgmr.msra.gmra.mxu1 %vm4471_vm5, %v13050_v22  ;;  %10577 = vmatprep.subr.bf16.mxu0 %v12269_v42 }
 0xc7e   :  { %6896 = vmatprep.mubr.bf16.mxu1 %v12268_v0  ;;  %7907 = vmatpush1.bf16.msra.mxu1 %v11473_v54 }
 0xc7f   :  { %7908 = vmatprep.subr.bf16.mxu1 %v11478_v60  ;;  %v11551_v60 = vld [vmem:[#allocation25 + $0x360] ss:$24 sps:$4 sm:$0xff]  }
 0xc82   :  { %7909 = vmatpush1.bf16.msra.mxu1 %v11476_v18 }
 0xc83   :  { %10081 = vmatmul.mubr.msk.bf16.gmra.mxu0 %vm4471_vm5, %v11469_v19  ;;  %7910 = vmatprep.subr.bf16.mxu1 %v11481_v21 }
 0xc84   :  { %6622 = vmatprep.mubr.bf16.mxu0 %v12268_v0 }
 0xc85   :  { %10104 = vmatmul.mubr.msk.bf16.gmra.mxu1 %vm4471_vm5, %v13060_v24 }
 0xc86   :  { %6906 = vmatprep.mubr.bf16.mxu1 %v12268_v0  ;;  %7911 = vmatpush1.bf16.msra.mxu1 %v11479_v27 }
 0xc87   :  { %7912 = vmatprep.subr.bf16.mxu1 %v11484_v50  ;;  %v11565_v50 = vld [vmem:[#allocation25 + $0x304] ss:$24 sps:$4 sm:$0xff]  }
 0xc8a   :  { %7913 = vmatpush1.bf16.msra.mxu1 %v11482_v32 }
 0xc8b   :  { %10082 = vmatmul.mubr.msk.bf16.gmra.mxu0 %vm4471_vm5, %v11471_v8  ;;  %7914 = vmatprep.subr.bf16.mxu1 %v11487_v57 }
 0xc8c   :  { %10565 = vmatprep.mubr.msk.bf16.mxu0 %vm12270_vm4, %v12269_v42 }
 0xc8d   :  { %10105 = vmatmul.mubr.msk.bf16.gmra.mxu1 %vm4471_vm5, %v13069_v38 }
 0xc8e   :  { %7915 = vmatpush1.bf16.msra.mxu1 %v11485_v63 }
 0xc8f   :  { %7916 = vmatprep.subr.bf16.mxu1 %v11490_v58 }
 0xc90   :  { %v10433_v16 = vpop.f32.mrf.mxu1 }
 0xc92   :  { %7917 = vmatpush1.bf16.msra.mxu1 %v11488_v59  ;;  %v10434_v1 = vpop.f32.mrf.mxu1 }
 0xc93   :  { %10566 = vmatmul.mubr.msk.bf16.vlgmr.msra.gmra.mxu0 %vm4471_vm5, %v11467_v55  ;;  %7918 = vmatprep.subr.bf16.mxu1 %v11493_v11  ;;  %v10435_v13 = vadd.f32 %v10434_v1, %v10433_v16  ;;  %v11547_v55 = vld [vmem:[#allocation25 + $0x394] ss:$24 sps:$4 sm:$0xff]   ;;  %v13113_v11 = vld [vmem:[#allocation22] sm:$0x7] }
 0xc94   :  { %10578 = vmatpush3.bf16.msra.mxu0 %v6530_v37  ;;  %10569 = vmatprep.mubr.msk.bf16.mxu0 %vm12270_vm4, %v12269_v42  ;;  %v10436_v26 = vpop.f32.mrf.mxu1  ;;  %v13117_v16 = vrot.slane %v13113_v11, %v12568_v4 }
 0xc95   :  { %10591 = vmatprep.subr.bf16.mxu0 %v12269_v42 }
 0xc96   :  { %7919 = vmatpush1.bf16.msra.mxu1 %v11491_v41  ;;  %v10437_v3 = vpop.f32.mrf.mxu1 }
 0xc97   :  { %7920 = vmatprep.subr.bf16.mxu1 %v11496_v51  ;;  %v10438_v45 = vadd.f32 %v10437_v3, %v10436_v26 }
 0xc99   :  { %v6536_v9 = vpack.c.bf16 %v10438_v45, %v10435_v13 }
 0xc9a   :  { %7921 = vmatpush1.bf16.msra.mxu1 %v11494_v31 }
 0xc9b   :  { %10570 = vmatmul.mubr.msk.bf16.gmra.mxu0 %vm4471_vm5, %v11469_v19  ;;  %7922 = vmatprep.subr.bf16.mxu1 %v11499_v14  ;;  %v11559_v19 = vld [vmem:[#allocation25 + $0x334] ss:$24 sps:$4 sm:$0xff]  }
 0xc9c   :  { %10573 = vmatprep.mubr.msk.bf16.mxu0 %vm12270_vm4, %v12269_v42 }
 0xc9e   :  { %7923 = vmatpush2.bf16.msra.mxu1 %v11497_v23 }
 0xc9f   :  { %7924 = vmatprep.subr.bf16.mxu1 %v11502_v6 }
 0xca2   :  { %7925 = vmatpush2.bf16.msra.mxu1 %v11500_v20 }
 0xca3   :  { %10574 = vmatmul.mubr.msk.bf16.gmra.mxu0 %vm4471_vm5, %v11471_v8  ;;  %7926 = vmatprep.subr.bf16.mxu1 %v11505_v17  ;;  %v11563_v8 = vld [vmem:[#allocation25 + $0x300] ss:$24 sps:$4 sm:$0xff]   ;;  %v6995_v17 = vrot.slane %v13113_v11, %v12565_v2 }
 0xca4   :  { %10579 = vmatprep.mubr.msk.bf16.mxu0 %vm12270_vm4, %v12269_v42 }
 0xca6   :  { %7927 = vmatpush2.bf16.msra.mxu1 %v11503_v39 }
 0xca7   :  { %7928 = vmatprep.subr.bf16.mxu1 %v11508_v25 }
 0xcaa   :  { %7929 = vmatpush2.bf16.msra.mxu1 %v11506_v46 }
 0xcab   :  { %10580 = vmatmul.mubr.msk.bf16.vlgmr.msra.gmra.mxu0 %vm4471_vm5, %v13026_v52  ;;  %7930 = vmatprep.subr.bf16.mxu1 %v11511_v62  ;;  %v11514_v52 = vld [vmem:[#allocation25 + $0x1e4] ss:$24 sps:$4 sm:$0xff]  }
 0xcac   :  { %10592 = vmatpush3.bf16.msra.mxu0 %v6536_v9  ;;  %10583 = vmatprep.mubr.msk.bf16.mxu0 %vm12270_vm4, %v12269_v42 }
 0xcad   :  { %7967 = vmatprep.subr.bf16.mxu0 %v11523_v34 }
 0xcae   :  { %7931 = vmatpush2.bf16.msra.mxu1 %v11509_v12 }
 0xcaf   :  { %7932 = vmatprep.subr.bf16.mxu1 %v11514_v52 }
 0xcb2   :  { %7933 = vmatpush2.bf16.msra.mxu1 %v11512_v40 }
 0xcb3   :  { %10584 = vmatmul.mubr.msk.bf16.gmra.mxu0 %vm4471_vm5, %v13032_v48  ;;  %v11517_v48 = vld [vmem:[#allocation25 + $0x1b4] ss:$24 sps:$4 sm:$0xff]  }
 0xcb4   :  { %10587 = vmatprep.mubr.msk.bf16.mxu0 %vm12270_vm4, %v12269_v42  ;;  %7934 = vmatprep.subr.bf16.mxu1 %v11517_v48 }
 0xcb6   :  { %7935 = vmatpush2.bf16.msra.mxu1 %v11515_v53 }
 0xcbb   :  { %10588 = vmatmul.mubr.msk.bf16.gmra.mxu0 %vm4471_vm5, %v13038_v5  ;;  %v11520_v5 = vld [vmem:[#allocation25 + $0x184] ss:$24 sps:$4 sm:$0xff]  }
 0xcbc   :  { %10593 = vmatprep.mubr.msk.bf16.mxu0 %vm12270_vm4, %v12269_v42  ;;  %7936 = vmatprep.subr.bf16.mxu1 %v11520_v5 }
 0xcbd   :  { %7937 = vmatpush2.bf16.msra.mxu1 %v11518_v28 }
 0xcbe   :  { %8089 = vmatprep.subr.bf16.mxu1 %v11526_v56 }
 0xcc3   :  { %10594 = vmatmul.mubr.msk.bf16.vlgmr.msra.gmra.mxu0 %vm4471_vm5, %v13050_v22 }
 0xcc4   :  { %10597 = vmatprep.mubr.msk.bf16.mxu0 %vm12270_vm4, %v12269_v42  ;;  %7968 = vmatpush1.bf16.msra.mxu0 %v11521_v43 }
 0xcc5   :  { %7969 = vmatprep.subr.bf16.mxu0 %v11529_v47 }
 0xcc8   :  { %7970 = vmatpush1.bf16.msra.mxu0 %v11527_v33 }
 0xcc9   :  { %7971 = vmatprep.subr.bf16.mxu0 %v11535_v44 }
 0xccb   :  { %10598 = vmatmul.mubr.msk.bf16.gmra.mxu0 %vm4471_vm5, %v13060_v24  ;;  %v11557_v24 = vld [vmem:[#allocation25 + $0x330] ss:$24 sps:$4 sm:$0xff]  }
 0xccc   :  { %10601 = vmatprep.mubr.msk.bf16.mxu0 %vm12270_vm4, %v12269_v42  ;;  %7972 = vmatpush1.bf16.msra.mxu0 %v11533_v7 }
 0xccd   :  { %7973 = vmatprep.subr.bf16.mxu0 %v11541_v10 }
 0xcd0   :  { %7974 = vmatpush1.bf16.msra.mxu0 %v11539_v49 }
 0xcd1   :  { %7975 = vmatprep.subr.bf16.mxu0 %v11547_v55 }
 0xcd3   :  { %10602 = vmatmul.mubr.msk.bf16.gmra.mxu0 %vm4471_vm5, %v13069_v38  ;;  %v11571_v38 = vld [vmem:[#allocation25 + $0x15c] ss:$24 sps:$4 sm:$0xff]  }
 0xcd4   :  { %7999 = vmatprep.mubr.bf16.mxu0 %v12268_v0  ;;  %7976 = vmatpush1.bf16.msra.mxu0 %v11545_v29 }
 0xcd5   :  { %7977 = vmatprep.subr.bf16.mxu0 %v11553_v30 }
 0xcd8   :  { %7978 = vmatpush1.bf16.msra.mxu0 %v11551_v60  ;;  %v11524_v60 = vld [vmem:[#allocation25 + $0x458] ss:$24 sps:$4 sm:$0xff]  }
 0xcd9   :  { %7979 = vmatprep.subr.bf16.mxu0 %v11559_v19 }
 0xcdc   :  { %7980 = vmatpush1.bf16.msra.mxu0 %v11557_v24 }
 0xcdd   :  { %7981 = vmatprep.subr.bf16.mxu0 %v11565_v50 }
 0xce0   :  { %7982 = vmatpush1.bf16.msra.mxu0 %v11563_v8 }
 0xce1   :  { %8028 = vmatprep.subr.bf16.mxu0 %v11571_v38 }
 0xcfd   :  { %v6743_v15 = vpop.f32.mrf.mxu1 }
 0xcff   :  { %v6745_v35 = vpop.f32.mrf.mxu1 }
 0xd01   :  { %v6747_v22 = vpop.f32.mrf.mxu1 }
 0xd03   :  { %v6749_v54 = vpop.f32.mrf.mxu1 }
 0xd05   :  { %v6753_v18 = vpop.f32.mrf.mxu1 }
 0xd07   :  { %v6755_v21 = vpop.f32.mrf.mxu1 }
 0xd09   :  { %v6757_v27 = vpop.f32.mrf.mxu1 }
 0xd0b   :  { %v6759_v32 = vpop.f32.mrf.mxu1 }
 0xd0d   :  { %v6763_v57 = vpop.f32.mrf.mxu1 }
 0xd0f   :  { %v13111_v63 = vpop.f32.mrf.mxu1 }
 0xd11   :  { %v6767_v58 = vpop.f32.mrf.mxu1 }
 0xd13   :  { %v6768_v59 = vpop.f32.mrf.mxu1 }
 0xd3b   :  { %v6604_v37 = vpop.f32.mrf.mxu0 }
 0xd3c   :  { %v6744_v41 = vadd.f32 %v6743_v15, %v6604_v37 }
 0xd3d   :  { %v6606_v51 = vpop.f32.mrf.mxu0  ;;  %v6888_v31 = vpop.f32.mrf.mxu1 }
 0xd3e   :  { %v6746_v14 = vadd.f32 %v6745_v35, %v6606_v51  ;;  %v6971_v23 = vadd.f32 %v6888_v31, %v6744_v41  ;;  %v11530_v51 = vld [vmem:[#allocation25 + $0x428] ss:$24 sps:$4 sm:$0xff]  }
 0xd3f   :  { %v6608_v1 = vpop.f32.mrf.mxu0  ;;  %v6890_v6 = vpop.f32.mrf.mxu1 }
 0xd40   :  { %v6748_v20 = vadd.f32 %v6747_v22, %v6608_v1  ;;  %v6972_v26 = vadd.f32 %v6890_v6, %v6746_v14  ;;  %v7003_v39 = vadd.f32 %v13117_v16, %v6971_v23  ;;  %v11538_v1 = vld [vmem:[#allocation25 + $0x3fc] ss:$24 sps:$4 sm:$0xff]  }
 0xd41   :  { %v6610_v3 = vpop.f32.mrf.mxu0  ;;  %v6892_v25 = vpop.f32.mrf.mxu1 }
 0xd42   :  { %v6750_v45 = vadd.f32 %v6749_v54, %v6610_v3  ;;  %v6974_v46 = vadd.f32 %v6892_v25, %v6748_v20  ;;  %v7004_v62 = vadd.f32 %v6995_v17, %v6972_v26  ;;  %v7018_v48 = vmax.f32 %v7003_v39, 0.0 }
 0xd43   :  { %v6614_v13 = vpop.f32.mrf.mxu0  ;;  %v6894_v9 = vpop.f32.mrf.mxu1 }
 0xd44   :  { %v7006_v12 = vadd.f32 %v13117_v16, %v6974_v46  ;;  %v6754_v52 = vadd.f32 %v6753_v18, %v6614_v13  ;;  %v6975_v40 = vadd.f32 %v6894_v9, %v6750_v45  ;;  %v7019_v44 = vmax.f32 %v7004_v62, 0.0  ;;  %v11536_v46 = vld [vmem:[#allocation25 + $0x3f8] ss:$24 sps:$4 sm:$0xff]   ;;  %v11544_v9 = vld [vmem:[#allocation25 + $0x3cc] ss:$24 sps:$4 sm:$0xff]  }
 0xd45   :  { %v6616_v53 = vpop.f32.mrf.mxu0  ;;  %v6898_v5 = vpop.f32.mrf.mxu1 }
 0xd46   :  { %v7021_v28 = vmax.f32 %v7006_v12, 0.0  ;;  %v7007_v34 = vadd.f32 %v6995_v17, %v6975_v40  ;;  %v6756_v56 = vadd.f32 %v6755_v21, %v6616_v53  ;;  %v6977_v43 = vadd.f32 %v6898_v5, %v6754_v52  ;;  %v11532_v21 = vld [vmem:[#allocation25 + $0x42c] ss:$24 sps:$4 sm:$0xff]   ;;  %v11550_v5 = vld [vmem:[#allocation25 + $0x39c] ss:$24 sps:$4 sm:$0xff]  }
 0xd47   :  { %v6618_v47 = vpop.f32.mrf.mxu0  ;;  %v6900_v33 = vpop.f32.mrf.mxu1 }
 0xd48   :  { %v13123_v7 = vpack.c.bf16 %v7021_v28, %v7018_v48  ;;  %v7022_v10 = vmax.f32 %v7007_v34, 0.0  ;;  %v6758_v49 = vadd.f32 %v6757_v27, %v6618_v47  ;;  %v6978_v15 = vadd.f32 %v6900_v33, %v6756_v56  ;;  %v11548_v28 = vld [vmem:[#allocation25 + $0x398] ss:$24 sps:$4 sm:$0xff]   ;;  %v11554_v33 = vld [vmem:[#allocation25 + $0x368] ss:$24 sps:$4 sm:$0xff]  }
 0xd49   :  { %v6620_v55 = vpop.f32.mrf.mxu0  ;;  %v6902_v35 = vpop.f32.mrf.mxu1  ;;  %v7009_v29 = vadd.f32 %v13117_v16, %v6977_v43  ;;  %v11556_v43 = vld [vmem:[#allocation25 + $0x36c] ss:$24 sps:$4 sm:$0xff]  }
 0xd4a   :  { %v6760_v22 = vadd.f32 %v6759_v32, %v6620_v55  ;;  %v6980_v30 = vadd.f32 %v6902_v35, %v6758_v49  ;;  %v13126_v54 = vpack.c.bf16 %v7022_v10, %v7019_v44  ;;  %v7010_v24 = vadd.f32 %v6995_v17, %v6978_v15  ;;  %v11562_v10 = vld [vmem:[#allocation25 + $0x33c] ss:$24 sps:$4 sm:$0xff]   ;;  %v11560_v15 = vld [vmem:[#allocation25 + $0x338] ss:$24 sps:$4 sm:$0xff]   ;;  %v11568_v35 = vld [vmem:[#allocation25 + $0x30c] ss:$24 sps:$4 sm:$0xff]  }
 0xd4b   :  { %v6624_v18 = vpop.f32.mrf.mxu0  ;;  %v6904_v19 = vpop.f32.mrf.mxu1  ;;  %v7024_v59 = vmax.f32 %v7009_v29, 0.0 }
 0xd4c   :  { %v7012_v50 = vadd.f32 %v13117_v16, %v6980_v30  ;;  %v6764_v8 = vadd.f32 %v6763_v57, %v6624_v18  ;;  %v6981_v38 = vadd.f32 %v6904_v19, %v6760_v22  ;;  %7938 = vmatprep.mubr.bf16.mxu1 %v13126_v54  ;;  %v7025_v57 = vmax.f32 %v7010_v24, 0.0  ;;  %v11566_v22 = vld [vmem:[#allocation25 + $0x308] ss:$24 sps:$4 sm:$0xff]  }
 0xd4d   :  { %v6626_v27 = vpop.f32.mrf.mxu0  ;;  %v6908_v58 = vpop.f32.mrf.mxu1  ;;  %7939 = vmatmul.mubr.bf16.vlgmr.msra.gmra.mxu1 %v13123_v7 }
 0xd4e   :  { %v7027_v32 = vmax.f32 %v7012_v50, 0.0  ;;  %v7013_v37 = vadd.f32 %v6995_v17, %v6981_v38  ;;  %v6766_v41 = vadd.f32 %v13111_v63, %v6626_v27  ;;  %8090 = vmatpush1.bf16.msra.mxu1 %v11524_v60  ;;  %v6983_v31 = vadd.f32 %v6908_v58, %v6764_v8  ;;  %v11574_v60 = vld [vmem:[#allocation25 + $0x164] ss:$24 sps:$4 sm:$0xff]  }
 0xd4f   :  { %v6628_v14 = vpop.f32.mrf.mxu0  ;;  %v6910_v23 = vpop.f32.mrf.mxu1  ;;  %8091 = vmatprep.subr.bf16.mxu1 %v11532_v21 }
 0xd50   :  { %v13132_v6 = vpack.c.bf16 %v7027_v32, %v7024_v59  ;;  %v7028_v20 = vmax.f32 %v7013_v37, 0.0  ;;  %v6984_v26 = vadd.f32 %v6910_v23, %v6766_v41  ;;  %v7015_v63 = vadd.f32 %v13117_v16, %v6983_v31 }
 0xd51   :  { %v6629_v39 = vpop.f32.mrf.mxu0  ;;  %v6912_v3 = vpop.f32.mrf.mxu1  ;;  %v6999_v23 = vrot.slane %v13113_v11, %v2728_v36  ;;  %v11580_v36 = vld [vmem:[#allocation25 + $0x134] ss:$24 sps:$4 sm:$0xff]  }
 0xd52   :  { %v7016_v25 = vadd.f32 %v6995_v17, %v6984_v26  ;;  %v13134_v45 = vpack.c.bf16 %v7028_v20, %v7025_v57  ;;  %8092 = vmatpush1.bf16.msra.mxu1 %v11530_v51  ;;  %v11542_v17 = vld [vmem:[#allocation25 + $0x3c8] ss:$24 sps:$4 sm:$0xff]   ;;  %v7030_v48 = vmax.f32 %v7015_v63, 0.0 }
 0xd53   :  { %v6665_v13 = vpop.f32.mrf.mxu0  ;;  %8093 = vmatprep.subr.bf16.mxu1 %v11538_v1  ;;  %v6913_v62 = vpop.f32.mrf.mxu1 }
 0xd54   :  { %v7031_v12 = vmax.f32 %v7016_v25, 0.0  ;;  %7948 = vmatprep.mubr.bf16.mxu1 %v13134_v45  ;;  %v13142_v34 = vpack.c.bf16 %v7030_v48, %v7030_v48 }
 0xd55   :  { %v10567_v52 = vpop.f32.mrf.mxu0  ;;  %7949 = vmatmul.mubr.bf16.gmra.mxu1 %v13132_v6 }
 0xd56   :  { %v13139_v40 = vpack.c.bf16 %v7031_v12, %v7031_v12  ;;  %8094 = vmatpush1.bf16.msra.mxu1 %v11536_v46 }
 0xd57   :  { %v6668_v53 = vpop.f32.mrf.mxu0  ;;  %8095 = vmatprep.subr.bf16.mxu1 %v11544_v9 }
 0xd58   :  { %7958 = vmatprep.mubr.bf16.mxu1 %v13139_v40 }
 0xd59   :  { %v10568_v16 = vpop.f32.mrf.mxu0 }
 0xd5a   :  { %8096 = vmatpush1.bf16.msra.mxu1 %v11542_v17  ;;  %v11572_v17 = vld [vmem:[#allocation25 + $0x160] ss:$24 sps:$4 sm:$0xff]  }
 0xd5b   :  { %v6673_v56 = vpop.f32.mrf.mxu0  ;;  %8097 = vmatprep.subr.bf16.mxu1 %v11550_v5 }
 0xd5d   :  { %v10571_v47 = vpop.f32.mrf.mxu0  ;;  %7959 = vmatmul.mubr.bf16.gmra.mxu1 %v13142_v34 }
 0xd5e   :  { %8098 = vmatpush1.bf16.msra.mxu1 %v11548_v28  ;;  %8121 = vmatprep.mubr.bf16.mxu1 %v12268_v0 }
 0xd5f   :  { %v6676_v44 = vpop.f32.mrf.mxu0  ;;  %8099 = vmatprep.subr.bf16.mxu1 %v11556_v43  ;;  %v11578_v43 = vld [vmem:[#allocation25 + $0x130] ss:$24 sps:$4 sm:$0xff]  }
 0xd61   :  { %v10572_v49 = vpop.f32.mrf.mxu0 }
 0xd62   :  { %8100 = vmatpush1.bf16.msra.mxu1 %v11554_v33 }
 0xd63   :  { %v6681_v55 = vpop.f32.mrf.mxu0  ;;  %8101 = vmatprep.subr.bf16.mxu1 %v11562_v10  ;;  %v11586_v10 = vld [vmem:[#allocation25 + $0x104] ss:$24 sps:$4 sm:$0xff]  }
 0xd65   :  { %v10575_v29 = vpop.f32.mrf.mxu0 }
 0xd66   :  { %8102 = vmatpush1.bf16.msra.mxu1 %v11560_v15 }
 0xd67   :  { %v6684_v30 = vpop.f32.mrf.mxu0  ;;  %8103 = vmatprep.subr.bf16.mxu1 %v11568_v35 }
 0xd68   :  { %v11584_v30 = vld [vmem:[#allocation25 + $0x100] ss:$24 sps:$4 sm:$0xff]  }
 0xd69   :  { %v10576_v18 = vpop.f32.mrf.mxu0 }
 0xd6a   :  { %8104 = vmatpush1.bf16.msra.mxu1 %v11566_v22  ;;  %v11581_v22 = vld [vmem:[#allocation25 + $0xf8] ss:$24 sps:$4 sm:$0xff]  }
 0xd6b   :  { %v6804_v19 = vpop.f32.mrf.mxu0  ;;  %8150 = vmatprep.subr.bf16.mxu1 %v11574_v60 }
 0xd6c   :  { %v6805_v51 = vadd.f32 %v6804_v19, %v6665_v13  ;;  %v11569_v13 = vld [vmem:[#allocation25 + $0x158] ss:$24 sps:$4 sm:$0xff]   ;;  %v11589_v19 = vld [vmem:[#allocation25 + $0xcc] ss:$24 sps:$4 sm:$0xff]  }
 0xd6d   :  { %v10581_v21 = vpop.f32.mrf.mxu0 }
 0xd6e   :  { %v11592_v21 = vld [vmem:[#allocation25 + $0xd4] ss:$24 sps:$4 sm:$0xff]  }
 0xd6f   :  { %v6807_v24 = vpop.f32.mrf.mxu0 }
 0xd70   :  { %v6808_v57 = vadd.f32 %v6807_v24, %v6668_v53 }
 0xd71   :  { %v10582_v50 = vpop.f32.mrf.mxu0 }
 0xd72   :  { %v11587_v50 = vld [vmem:[#allocation25 + $0xc8] ss:$24 sps:$4 sm:$0xff]  }
 0xd73   :  { %v6812_v8 = vpop.f32.mrf.mxu0 }
 0xd74   :  { %v6813_v25 = vadd.f32 %v6812_v8, %v6673_v56  ;;  %v11575_v56 = vld [vmem:[#allocation25 + $0x128] ss:$24 sps:$4 sm:$0xff]  }
 0xd75   :  { %v10585_v38 = vpop.f32.mrf.mxu0  ;;  %v11590_v8 = vld [vmem:[#allocation25 + $0xd0] ss:$24 sps:$4 sm:$0xff]  }
 0xd77   :  { %v6815_v27 = vpop.f32.mrf.mxu0 }
 0xd78   :  { %v6816_v48 = vadd.f32 %v6815_v27, %v6676_v44  ;;  %v11583_v44 = vld [vmem:[#allocation25 + $0xfc] ss:$24 sps:$4 sm:$0xff]  }
 0xd79   :  { %v10586_v58 = vpop.f32.mrf.mxu0 }
 0xd7a   :  { %v11595_v58 = vld [vmem:[#allocation25 + $0x9c] ss:$24 sps:$4 sm:$0xff]  }
 0xd7b   :  { %v6820_v59 = vpop.f32.mrf.mxu0 }
 0xd7c   :  { %v6821_v47 = vadd.f32 %v6820_v59, %v6681_v55  ;;  %v11598_v59 = vld [vmem:[#allocation25 + $0xa4] ss:$24 sps:$4 sm:$0xff]  }
 0xd7d   :  { %v10589_v32 = vpop.f32.mrf.mxu0 }
 0xd7e   :  { %v11593_v32 = vld [vmem:[#allocation25 + $0x98] ss:$24 sps:$4 sm:$0xff]  }
 0xd7f   :  { %v6823_v37 = vpop.f32.mrf.mxu0 }
 0xd80   :  { %v11596_v37 = vld [vmem:[#allocation25 + $0xa0] ss:$24 sps:$4 sm:$0xff]  }
 0xd81   :  { %v10590_v41 = vpop.f32.mrf.mxu0 }
 0xd83   :  { %v6949_v31 = vpop.f32.mrf.mxu0 }
 0xd84   :  { %v6973_v14 = vadd.f32 %v6949_v31, %v6805_v51  ;;  %v11601_v51 = vld [vmem:[#allocation25 + $0x6c] ss:$24 sps:$4 sm:$0xff]  }
 0xd85   :  { %v10595_v1 = vpop.f32.mrf.mxu0  ;;  %v11604_v31 = vld [vmem:[#allocation25 + $0x74] ss:$24 sps:$4 sm:$0xff]  }
 0xd86   :  { %v7005_v26 = vadd.f32 %v6999_v23, %v6973_v14  ;;  %v11599_v14 = vld [vmem:[#allocation25 + $0x68] ss:$24 sps:$4 sm:$0xff]   ;;  %v11607_v1 = vld [vmem:[#allocation25 + $0x3c] ss:$24 sps:$4 sm:$0xff]  }
 0xd87   :  { %v6952_v20 = vpop.f32.mrf.mxu0 }
 0xd88   :  { %v6976_v39 = vadd.f32 %v6952_v20, %v6808_v57  ;;  %v7020_v9 = vmax.f32 %v7005_v26, 0.0  ;;  %v11610_v57 = vld [vmem:[#allocation25 + $0x44] ss:$24 sps:$4 sm:$0xff]   ;;  %v11605_v20 = vld [vmem:[#allocation25 + $0x38] ss:$24 sps:$4 sm:$0xff]  }
 0xd89   :  { %v10596_v3 = vpop.f32.mrf.mxu0  ;;  %v11608_v26 = vld [vmem:[#allocation25 + $0x40] ss:$24 sps:$4 sm:$0xff]  }
 0xd8a   :  { %v7008_v46 = vadd.f32 %v6999_v23, %v6976_v39  ;;  %v11613_v39 = vld [vmem:[#allocation25 + $0xc] ss:$24 sps:$4 sm:$0xff]  }
 0xd8b   :  { %v6957_v63 = vpop.f32.mrf.mxu0  ;;  %v11616_v3 = vld [vmem:[#allocation25 + $0x14] ss:$24 sps:$4 sm:$0xff]  }
 0xd8c   :  { %v7023_v62 = vmax.f32 %v7008_v46, 0.0  ;;  %v6979_v12 = vadd.f32 %v6957_v63, %v6813_v25  ;;  %v11611_v25 = vld [vmem:[#allocation25 + $0x8] ss:$24 sps:$4 sm:$0xff]   ;;  %v11619_v63 = vld [vmem:[#allocation25 + $0x2dc] ss:$24 sps:$4 sm:$0xff]  }
 0xd8d   :  { %v10599_v52 = vpop.f32.mrf.mxu0  ;;  %v11614_v46 = vld [vmem:[#allocation25 + $0x10] ss:$24 sps:$4 sm:$0xff]  }
 0xd8e   :  { %v13149_v5 = vpack.c.bf16 %v7023_v62, %v7020_v9  ;;  %v7011_v53 = vadd.f32 %v6999_v23, %v6979_v12  ;;  %v11617_v9 = vld [vmem:[#allocation25 + $0x2d8] ss:$24 sps:$4 sm:$0xff]   ;;  %v11625_v12 = vld [vmem:[#allocation25 + $0x2ac] ss:$24 sps:$4 sm:$0xff]  }
 0xd8f   :  { %v6960_v11 = vpop.f32.mrf.mxu0  ;;  %v11620_v62 = vld [vmem:[#allocation25 + $0x2e0] ss:$24 sps:$4 sm:$0xff]   ;;  %v11628_v52 = vld [vmem:[#allocation25 + $0x2b4] ss:$24 sps:$4 sm:$0xff]  }
 0xd90   :  { %v6982_v16 = vadd.f32 %v6960_v11, %v6816_v48  ;;  %8000 = vmatmul.mubr.bf16.vlgmr.msra.gmra.mxu0 %v13149_v5  ;;  %8122 = vmatmul.mubr.bf16.vlgmr.msra.gmra.mxu1 %v13149_v5  ;;  %v7026_v15 = vmax.f32 %v7011_v53, 0.0  ;;  %v11631_v48 = vld [vmem:[#allocation25 + $0x27c] ss:$24 sps:$4 sm:$0xff]   ;;  %v11632_v11 = vld [vmem:[#allocation25 + $0x280] ss:$24 sps:$4 sm:$0xff]  }
 0xd91   :  { %8029 = vmatpush1.bf16.msra.mxu0 %v11569_v13  ;;  %8151 = vmatpush1.bf16.msra.mxu1 %v11572_v17  ;;  %v10600_v28 = vpop.f32.mrf.mxu0  ;;  %v11623_v13 = vld [vmem:[#allocation25 + $0x2a8] ss:$24 sps:$4 sm:$0xff]   ;;  %v11637_v53 = vld [vmem:[#allocation25 + $0x24c] ss:$24 sps:$4 sm:$0xff]  }
 0xd92   :  { %v7014_v33 = vadd.f32 %v6999_v23, %v6982_v16  ;;  %8030 = vmatprep.subr.bf16.mxu0 %v11577_v61  ;;  %8152 = vmatprep.subr.bf16.mxu1 %v11580_v36  ;;  %v11626_v17 = vld [vmem:[#allocation25 + $0x2b0] ss:$24 sps:$4 sm:$0xff]   ;;  %v11634_v61 = vld [vmem:[#allocation25 + $0x284] ss:$24 sps:$4 sm:$0xff]   ;;  %v11640_v16 = vld [vmem:[#allocation25 + $0x254] ss:$24 sps:$4 sm:$0xff]  }
 0xd93   :  { %v6965_v49 = vpop.f32.mrf.mxu0  ;;  %8009 = vmatprep.mubr.bf16.mxu0 %v12268_v0  ;;  %8131 = vmatprep.mubr.bf16.mxu1 %v12268_v0  ;;  %v11629_v36 = vld [vmem:[#allocation25 + $0x278] ss:$24 sps:$4 sm:$0xff]   ;;  %v11635_v28 = vld [vmem:[#allocation25 + $0x248] ss:$24 sps:$4 sm:$0xff]  }
 0xd94   :  { %v7029_v35 = vmax.f32 %v7014_v33, 0.0  ;;  %v6985_v29 = vadd.f32 %v6965_v49, %v6821_v47  ;;  %v11646_v47 = vld [vmem:[#allocation25 + $0x224] ss:$24 sps:$4 sm:$0xff]   ;;  %v11641_v33 = vld [vmem:[#allocation25 + $0x218] ss:$24 sps:$4 sm:$0xff]  }
 0xd95   :  { %8031 = vmatpush1.bf16.msra.mxu0 %v11575_v56  ;;  %8153 = vmatpush1.bf16.msra.mxu1 %v11578_v43  ;;  %v10603_v60 = vpop.f32.mrf.mxu0  ;;  %v11638_v56 = vld [vmem:[#allocation25 + $0x250] ss:$24 sps:$4 sm:$0xff]   ;;  %v11643_v43 = vld [vmem:[#allocation25 + $0x21c] ss:$24 sps:$4 sm:$0xff]  }
 0xd96   :  { %v13155_v18 = vpack.c.bf16 %v7029_v35, %v7026_v15  ;;  %v7017_v55 = vadd.f32 %v6999_v23, %v6985_v29  ;;  %8032 = vmatprep.subr.bf16.mxu0 %v11583_v44  ;;  %8154 = vmatprep.subr.bf16.mxu1 %v11586_v10  ;;  %v11602_v23 = vld [vmem:[#allocation25 + $0x70] ss:$24 sps:$4 sm:$0xff]   ;;  %v11644_v44 = vld [vmem:[#allocation25 + $0x220] ss:$24 sps:$4 sm:$0xff]   ;;  %v11649_v10 = vld [vmem:[#allocation25 + $0x1ec] ss:$24 sps:$4 sm:$0xff]  }
 0xd97   :  { %v6968_v24 = vpop.f32.mrf.mxu0  ;;  %v11652_v49 = vld [vmem:[#allocation25 + $0x1f4] ss:$24 sps:$4 sm:$0xff]   ;;  %v11647_v15 = vld [vmem:[#allocation25 + $0x1e8] ss:$24 sps:$4 sm:$0xff]  }
 0xd98   :  { %8010 = vmatmul.mubr.bf16.gmra.mxu0 %v13155_v18  ;;  %8132 = vmatmul.mubr.bf16.gmra.mxu1 %v13155_v18  ;;  %v7032_v27 = vmax.f32 %v7017_v55, 0.0  ;;  %v11650_v35 = vld [vmem:[#allocation25 + $0x1f0] ss:$24 sps:$4 sm:$0xff]   ;;  %v11655_v29 = vld [vmem:[#allocation25 + $0x1bc] ss:$24 sps:$4 sm:$0xff]  }
 0xd99   :  { %8033 = vmatpush1.bf16.msra.mxu0 %v11581_v22  ;;  %8155 = vmatpush1.bf16.msra.mxu1 %v11584_v30  ;;  %v10604_v38 = vpop.f32.mrf.mxu0  ;;  %v11658_v22 = vld [vmem:[#allocation25 + $0x1c4] ss:$24 sps:$4 sm:$0xff]   ;;  %v11653_v30 = vld [vmem:[#allocation25 + $0x1b8] ss:$24 sps:$4 sm:$0xff]  }
 0xd9a   :  { %8034 = vmatprep.subr.bf16.mxu0 %v11589_v19  ;;  %8156 = vmatprep.subr.bf16.mxu1 %v11592_v21  ;;  %v13161_v41 = vpack.c.bf16 %v7032_v27, %v7032_v27  ;;  %v11656_v60 = vld [vmem:[#allocation25 + $0x1c0] ss:$24 sps:$4 sm:$0xff]   ;;  %v11661_v55 = vld [vmem:[#allocation25 + $0x18c] ss:$24 sps:$4 sm:$0xff]   ;;  %v11662_v24 = vld [vmem:[#allocation25 + $0x190] ss:$24 sps:$4 sm:$0xff]  }
 0xd9b   :  { %8019 = vmatprep.mubr.bf16.mxu0 %v12268_v0  ;;  %8141 = vmatprep.mubr.bf16.mxu1 %v12268_v0  ;;  %v11664_v19 = vld [vmem:[#allocation25 + $0x194] ss:$24 sps:$4 sm:$0xff]   ;;  %v11659_v21 = vld [vmem:[#allocation25 + $0x188] ss:$24 sps:$4 sm:$0xff]  }
 0xd9c   :  { %v11670_v38 = vld [vmem:[#allocation25 + $0x434] ss:$24 sps:$4 sm:$0xff]   ;;  %v11668_v27 = vld [vmem:[#allocation25 + $0x430] ss:$24 sps:$4 sm:$0xff]  }
 0xd9d   :  { %8035 = vmatpush1.bf16.msra.mxu0 %v11587_v50  ;;  %8157 = vmatpush1.bf16.msra.mxu1 %v11590_v8  ;;  %v11667_v50 = vld [vmem:[#allocation25 + $0x464] ss:$24 sps:$4 sm:$0xff]   ;;  %v11665_v8 = vld [vmem:[#allocation25 + $0x460] ss:$24 sps:$4 sm:$0xff]  }
 0xd9e   :  { %8036 = vmatprep.subr.bf16.mxu0 %v11595_v58  ;;  %8158 = vmatprep.subr.bf16.mxu1 %v11598_v59  ;;  %v11673_v58 = vld [vmem:[#allocation25 + $0x404] ss:$24 sps:$4 sm:$0xff]   ;;  %v11671_v59 = vld [vmem:[#allocation25 + $0x400] ss:$24 sps:$4 sm:$0xff]  }
 0xda0   :  { %8020 = vmatmul.mubr.bf16.gmra.mxu0 %v13161_v41  ;;  %8142 = vmatmul.mubr.bf16.gmra.mxu1 %v13161_v41 }
 0xda1   :  { %8037 = vmatpush1.bf16.msra.mxu0 %v11593_v32  ;;  %8159 = vmatpush1.bf16.msra.mxu1 %v11596_v37  ;;  %v11676_v32 = vld [vmem:[#allocation25 + $0x3d4] ss:$24 sps:$4 sm:$0xff]   ;;  %v11677_v37 = vld [vmem:[#allocation25 + $0x3a0] ss:$24 sps:$4 sm:$0xff]  }
 0xda2   :  { %8060 = vmatprep.mubr.bf16.mxu0 %v13126_v54  ;;  %8182 = vmatprep.mubr.bf16.mxu1 %v13126_v54  ;;  %v11622_v54 = vld [vmem:[#allocation25 + $0x2e4] ss:$24 sps:$4 sm:$0xff]  }
 0xda3   :  { %8038 = vmatprep.subr.bf16.mxu0 %v11601_v51  ;;  %8160 = vmatprep.subr.bf16.mxu1 %v11604_v31  ;;  %v11682_v51 = vld [vmem:[#allocation25 + $0x374] ss:$24 sps:$4 sm:$0xff]   ;;  %v11683_v31 = vld [vmem:[#allocation25 + $0x340] ss:$24 sps:$4 sm:$0xff]  }
 0xda5   :  { %8039 = vmatpush1.bf16.msra.mxu0 %v11599_v14  ;;  %8161 = vmatpush1.bf16.msra.mxu1 %v11602_v23  ;;  %v11688_v14 = vld [vmem:[#allocation25 + $0x314] ss:$24 sps:$4 sm:$0xff]   ;;  %v11686_v23 = vld [vmem:[#allocation25 + $0x310] ss:$24 sps:$4 sm:$0xff]  }
 0xda6   :  { %8040 = vmatprep.subr.bf16.mxu0 %v11607_v1  ;;  %8162 = vmatprep.subr.bf16.mxu1 %v11610_v57 }
 0xda9   :  { %8041 = vmatpush1.bf16.msra.mxu0 %v11605_v20  ;;  %8163 = vmatpush1.bf16.msra.mxu1 %v11608_v26 }
 0xdaa   :  { %8042 = vmatprep.subr.bf16.mxu0 %v11613_v39  ;;  %8164 = vmatprep.subr.bf16.mxu1 %v11616_v3 }
 0xdad   :  { %8043 = vmatpush1.bf16.msra.mxu0 %v11611_v25  ;;  %8165 = vmatpush1.bf16.msra.mxu1 %v11614_v46 }
 0xdae   :  { %8044 = vmatprep.subr.bf16.mxu0 %v11619_v63  ;;  %8166 = vmatprep.subr.bf16.mxu1 %v11622_v54 }
 0xdb1   :  { %8045 = vmatpush2.bf16.msra.mxu0 %v11617_v9  ;;  %8167 = vmatpush2.bf16.msra.mxu1 %v11620_v62 }
 0xdb2   :  { %8046 = vmatprep.subr.bf16.mxu0 %v11625_v12  ;;  %8168 = vmatprep.subr.bf16.mxu1 %v11628_v52 }
 0xdb5   :  { %8047 = vmatpush2.bf16.msra.mxu0 %v11623_v13  ;;  %8169 = vmatpush2.bf16.msra.mxu1 %v11626_v17 }
 0xdb6   :  { %8048 = vmatprep.subr.bf16.mxu0 %v11631_v48  ;;  %8170 = vmatprep.subr.bf16.mxu1 %v11634_v61 }
 0xdb9   :  { %8049 = vmatpush2.bf16.msra.mxu0 %v11629_v36  ;;  %8171 = vmatpush2.bf16.msra.mxu1 %v11632_v11 }
 0xdba   :  { %8050 = vmatprep.subr.bf16.mxu0 %v11637_v53  ;;  %8172 = vmatprep.subr.bf16.mxu1 %v11640_v16 }
 0xdbd   :  { %8051 = vmatpush2.bf16.msra.mxu0 %v11635_v28  ;;  %8173 = vmatpush2.bf16.msra.mxu1 %v11638_v56 }
 0xdbe   :  { %8052 = vmatprep.subr.bf16.mxu0 %v11643_v43  ;;  %8174 = vmatprep.subr.bf16.mxu1 %v11646_v47 }
 0xdc1   :  { %8053 = vmatpush2.bf16.msra.mxu0 %v11641_v33  ;;  %8175 = vmatpush2.bf16.msra.mxu1 %v11644_v44 }
 0xdc2   :  { %8054 = vmatprep.subr.bf16.mxu0 %v11649_v10  ;;  %8176 = vmatprep.subr.bf16.mxu1 %v11652_v49 }
 0xdc5   :  { %8055 = vmatpush2.bf16.msra.mxu0 %v11647_v15  ;;  %8177 = vmatpush2.bf16.msra.mxu1 %v11650_v35 }
 0xdc6   :  { %8056 = vmatprep.subr.bf16.mxu0 %v11655_v29  ;;  %8178 = vmatprep.subr.bf16.mxu1 %v11658_v22 }
 0xdc9   :  { %8057 = vmatpush2.bf16.msra.mxu0 %v11653_v30  ;;  %8179 = vmatpush2.bf16.msra.mxu1 %v11656_v60 }
 0xdca   :  { %8058 = vmatprep.subr.bf16.mxu0 %v11661_v55  ;;  %8180 = vmatprep.subr.bf16.mxu1 %v11664_v19 }
 0xdcd   :  { %8059 = vmatpush2.bf16.msra.mxu0 %v11659_v21  ;;  %8181 = vmatpush2.bf16.msra.mxu1 %v11662_v24 }
 0xdce   :  { %8211 = vmatprep.subr.bf16.mxu0 %v11667_v50 }
 0xdd0   :  { %8061 = vmatmul.mubr.bf16.vlgmr.msra.gmra.mxu0 %v13123_v7  ;;  %8183 = vmatmul.mubr.bf16.vlgmr.msra.gmra.mxu1 %v13123_v7  ;;  %v11674_v7 = vld [vmem:[#allocation25 + $0x3d0] ss:$24 sps:$4 sm:$0xff]  }
 0xdd1   :  { %8070 = vmatprep.mubr.bf16.mxu0 %v13134_v45  ;;  %8192 = vmatprep.mubr.bf16.mxu1 %v13134_v45  ;;  %v11679_v45 = vld [vmem:[#allocation25 + $0x3a4] ss:$24 sps:$4 sm:$0xff]  }
 0xdd2   :  { %8212 = vmatpush1.bf16.msra.mxu0 %v11665_v8 }
 0xdd3   :  { %8213 = vmatprep.subr.bf16.mxu0 %v11670_v38 }
 0xdd6   :  { %8214 = vmatpush1.bf16.msra.mxu0 %v11668_v27 }
 0xdd7   :  { %8215 = vmatprep.subr.bf16.mxu0 %v11673_v58 }
 0xdd8   :  { %8071 = vmatmul.mubr.bf16.gmra.mxu0 %v13132_v6  ;;  %8193 = vmatmul.mubr.bf16.gmra.mxu1 %v13132_v6  ;;  %v11680_v6 = vld [vmem:[#allocation25 + $0x370] ss:$24 sps:$4 sm:$0xff]  }
 0xdd9   :  { %8080 = vmatprep.mubr.bf16.mxu0 %v13139_v40  ;;  %8202 = vmatprep.mubr.bf16.mxu1 %v13139_v40  ;;  %v11685_v40 = vld [vmem:[#allocation25 + $0x344] ss:$24 sps:$4 sm:$0xff]  }
 0xdda   :  { %8216 = vmatpush1.bf16.msra.mxu0 %v11671_v59 }
 0xddb   :  { %8217 = vmatprep.subr.bf16.mxu0 %v11676_v32 }
 0xdde   :  { %8218 = vmatpush1.bf16.msra.mxu0 %v11674_v7 }
 0xddf   :  { %8219 = vmatprep.subr.bf16.mxu0 %v11679_v45  ;;  %v11700_v45 = vld [vmem:[%s12410_s13 + $0xac] ss:$12 sps:$4 sm:$0xff]  }
 0xde0   :  { %8081 = vmatmul.mubr.bf16.gmra.mxu0 %v13142_v34  ;;  %8203 = vmatmul.mubr.bf16.gmra.mxu1 %v13142_v34 }
 0xde1   :  { %8243 = vmatprep.mubr.bf16.mxu0 %v12268_v0  ;;  %8450 = vmatprep.mubr.bf16.mxu1 %v12268_v0 }
 0xde2   :  { %8220 = vmatpush1.bf16.msra.mxu0 %v11677_v37 }
 0xde3   :  { %8221 = vmatprep.subr.bf16.mxu0 %v11682_v51  ;;  %v11690_v51 = vld [vmem:[#allocation23] sm:$0xff]  }
 0xde6   :  { %8222 = vmatpush1.bf16.msra.mxu0 %v11680_v6  ;;  %v11698_v6 = vld [vmem:[%s12410_s13 + $0xa8] ss:$12 sps:$4 sm:$0xff]  }
 0xde7   :  { %8223 = vmatprep.subr.bf16.mxu0 %v11685_v40  ;;  %v11703_v40 = vld [vmem:[%s12410_s13 + $0x94] ss:$12 sps:$4 sm:$0xff]  }
 0xdea   :  { %8224 = vmatpush1.bf16.msra.mxu0 %v11683_v31  ;;  %v11701_v31 = vld [vmem:[%s12410_s13 + $0x90] ss:$12 sps:$4 sm:$0xff]  }
 0xdeb   :  { %8225 = vmatprep.subr.bf16.mxu0 %v11688_v14  ;;  %v11706_v14 = vld [vmem:[%s12410_s13 + $0x7c] ss:$12 sps:$4 sm:$0xff]  }
 0xdee   :  { %8226 = vmatpush1.bf16.msra.mxu0 %v11686_v23  ;;  %v11692_v23 = vld [vmem:[#allocation23 + $0x8] sm:$0xff]  }
 0xdf1   :  { %8244 = vmatmul.mubr.bf16.vlgmr.msra.gmra.mxu0 %v13149_v5 }
 0xdf2   :  { %8253 = vmatprep.mubr.bf16.mxu0 %v12268_v0 }
 0xdf9   :  { %8254 = vmatmul.mubr.bf16.gmra.mxu0 %v13155_v18 }
 0xdfa   :  { %8263 = vmatprep.mubr.bf16.mxu0 %v12268_v0 }
 0xe01   :  { %8264 = vmatmul.mubr.bf16.gmra.mxu0 %v13161_v41 }
 0xe02   :  { %8361 = vmatprep.mubr.bf16.mxu0 %v12268_v0 }
 0xe0d   :  { %v7940_v34 = vpop.f32.mrf.mxu1 }
 0xe0f   :  { %v7942_v1 = vpop.f32.mrf.mxu1 }
 0xe11   :  { %v7944_v57 = vpop.f32.mrf.mxu1 }
 0xe13   :  { %v7946_v20 = vpop.f32.mrf.mxu1 }
 0xe15   :  { %v7950_v26 = vpop.f32.mrf.mxu1 }
 0xe17   :  { %v7952_v39 = vpop.f32.mrf.mxu1 }
 0xe19   :  { %v7954_v3 = vpop.f32.mrf.mxu1 }
 0xe1b   :  { %v7956_v25 = vpop.f32.mrf.mxu1 }
 0xe1d   :  { %v7960_v46 = vpop.f32.mrf.mxu1 }
 0xe1f   :  { %v7962_v5 = vpop.f32.mrf.mxu1 }
 0xe21   :  { %v7964_v63 = vpop.f32.mrf.mxu1 }
 0xe23   :  { %v7965_v54 = vpop.f32.mrf.mxu1 }
 0xe50   :  { %v8001_v9 = vpop.f32.mrf.mxu0  ;;  %v13185_v18 = vpop.f32.mrf.mxu1 }
 0xe51   :  { %v8002_v7 = vadd.f32 %v8001_v9, %v7940_v34  ;;  %v11704_v34 = vld [vmem:[%s12410_s13 + $0x78] ss:$12 sps:$4 sm:$0xff]  }
 0xe52   :  { %v8003_v62 = vpop.f32.mrf.mxu0  ;;  %v13187_v12 = vpop.f32.mrf.mxu1 }
 0xe53   :  { %v8004_v27 = vadd.f32 %v8003_v62, %v7942_v1  ;;  %v11709_v1 = vld [vmem:[%s12410_s13 + $0x64] ss:$12 sps:$4 sm:$0xff]  }
 0xe54   :  { %v8005_v41 = vpop.f32.mrf.mxu0  ;;  %v13189_v52 = vpop.f32.mrf.mxu1 }
 0xe55   :  { %v8006_v58 = vadd.f32 %v8005_v41, %v7944_v57  ;;  %v11707_v57 = vld [vmem:[%s12410_s13 + $0x60] ss:$12 sps:$4 sm:$0xff]  }
 0xe56   :  { %v8007_v13 = vpop.f32.mrf.mxu0  ;;  %v13191_v17 = vpop.f32.mrf.mxu1 }
 0xe57   :  { %v8008_v24 = vadd.f32 %v8007_v13, %v7946_v20  ;;  %v8272_v37 = vpack.c.bf16 %v8006_v58, %v8002_v7  ;;  %v11712_v20 = vld [vmem:[%s12410_s13 + $0x4c] ss:$12 sps:$4 sm:$0xff]  }
 0xe58   :  { %v8011_v48 = vpop.f32.mrf.mxu0  ;;  %v13193_v61 = vpop.f32.mrf.mxu1 }
 0xe59   :  { %v8012_v38 = vadd.f32 %v8011_v48, %v7950_v26  ;;  %v8273_v32 = vpack.c.bf16 %v8008_v24, %v8004_v27  ;;  %v11694_v26 = vld [vmem:[#allocation23 + $0x10] ss:$0 sps:$4 sm:$0x77]  }
 0xe5a   :  { %v8013_v36 = vpop.f32.mrf.mxu0  ;;  %v13195_v11 = vpop.f32.mrf.mxu1 }
 0xe5b   :  { %v8014_v30 = vadd.f32 %v8013_v36, %v7952_v39  ;;  %v11710_v39 = vld [vmem:[%s12410_s13 + $0x48] ss:$12 sps:$4 sm:$0xff]  }
 0xe5c   :  { %v8015_v53 = vpop.f32.mrf.mxu0  ;;  %v13197_v16 = vpop.f32.mrf.mxu1 }
 0xe5d   :  { %v8016_v55 = vadd.f32 %v8015_v53, %v7954_v3 }
 0xe5e   :  { %v8017_v28 = vpop.f32.mrf.mxu0  ;;  %v13199_v56 = vpop.f32.mrf.mxu1 }
 0xe5f   :  { %v8018_v49 = vadd.f32 %v8017_v28, %v7956_v25  ;;  %v8278_v59 = vpack.c.bf16 %v8016_v55, %v8012_v38 }
 0xe60   :  { %v8021_v43 = vpop.f32.mrf.mxu0  ;;  %v13201_v47 = vpop.f32.mrf.mxu1 }
 0xe61   :  { %v8022_v33 = vadd.f32 %v8021_v43, %v7960_v46  ;;  %v8279_v50 = vpack.c.bf16 %v8018_v49, %v8014_v30 }
 0xe62   :  { %v8023_v44 = vpop.f32.mrf.mxu0  ;;  %v13203_v10 = vpop.f32.mrf.mxu1 }
 0xe63   :  { %v8284_v15 = vpack.c.bf16 %v8022_v33, %v8022_v33  ;;  %v8024_v35 = vadd.f32 %v8023_v44, %v7962_v5 }
 0xe64   :  { %v8025_v29 = vpop.f32.mrf.mxu0  ;;  %v8147_v22 = vpop.f32.mrf.mxu1 }
 0xe65   :  { %v8285_v60 = vpack.c.bf16 %v8024_v35, %v8024_v35  ;;  %v8413_v8 = vsel %vm463_vm0, %v8284_v15, 0 }
 0xe66   :  { %v8026_v19 = vpop.f32.mrf.mxu0  ;;  %v8148_v21 = vpop.f32.mrf.mxu1 }
 0xe67   :  { %10263 = vmatprep.subr.msk.bf16.mxu1 %vm463_vm0, %v8285_v60 }
 0xe68   :  { %8429 = vmatpush1.bf16.msra.mxu1 %v8413_v8 }
 0xe69   :  { %8430 = vmatprep.subr.bf16.mxu1 %v8279_v50 }
 0xe6c   :  { %8431 = vmatpush1.bf16.msra.mxu1 %v8278_v59 }
 0xe6d   :  { %8432 = vmatprep.subr.bf16.mxu1 %v8273_v32 }
 0xe70   :  { %8433 = vmatpush1.bf16.msra.mxu1 %v8272_v37 }
 0xe71   :  { %8942 = vmatprep.subr.bf16.mxu1 %v11700_v45  ;;  %v11691_v45 = vld [vmem:[#allocation23 + $0x1c] sm:$0xff]  }
 0xe73   :  { %10264 = vmatmul.mubr.msk.bf16.vlgmr.msra.gmra.mxu1 %vm453_vm1, %v11690_v51 }
 0xe74   :  { %8460 = vmatprep.mubr.bf16.mxu1 %v12268_v0  ;;  %8943 = vmatpush1.bf16.msra.mxu1 %v11698_v6 }
 0xe75   :  { %8944 = vmatprep.subr.bf16.mxu1 %v11703_v40 }
 0xe78   :  { %8945 = vmatpush1.bf16.msra.mxu1 %v11701_v31  ;;  %v11693_v31 = vld [vmem:[#allocation23 + $0x24] ss:$0 sps:$4 sm:$0x77]  }
 0xe79   :  { %8946 = vmatprep.subr.bf16.mxu1 %v11706_v14 }
 0xe7b   :  { %10265 = vmatmul.mubr.msk.bf16.gmra.mxu1 %vm453_vm1, %v11692_v23 }
 0xe7c   :  { %8470 = vmatprep.mubr.bf16.mxu1 %v12268_v0  ;;  %8947 = vmatpush1.bf16.msra.mxu1 %v11704_v34 }
 0xe7d   :  { %8948 = vmatprep.subr.bf16.mxu1 %v11709_v1 }
 0xe80   :  { %8949 = vmatpush1.bf16.msra.mxu1 %v11707_v57 }
 0xe81   :  { %8950 = vmatprep.subr.bf16.mxu1 %v11712_v20 }
 0xe83   :  { %10266 = vmatmul.mubr.msk.bf16.gmra.mxu1 %vm453_vm1, %v11694_v26 }
 0xe84   :  { %8951 = vmatpush1.bf16.msra.mxu1 %v11710_v39 }
 0xe90   :  { %v8062_v3 = vpop.f32.mrf.mxu0  ;;  %v13222_v25 = vpop.f32.mrf.mxu1 }
 0xe91   :  { %v8124_v9 = vadd.f32 %v13185_v18, %v8062_v3 }
 0xe92   :  { %v8064_v46 = vpop.f32.mrf.mxu0  ;;  %v13224_v5 = vpop.f32.mrf.mxu1 }
 0xe93   :  { %v8126_v48 = vadd.f32 %v13187_v12, %v8064_v46 }
 0xe94   :  { %v8066_v63 = vpop.f32.mrf.mxu0  ;;  %v13226_v54 = vpop.f32.mrf.mxu1 }
 0xe95   :  { %v8128_v62 = vadd.f32 %v13189_v52, %v8066_v63 }
 0xe96   :  { %v8068_v41 = vpop.f32.mrf.mxu0  ;;  %v13230_v13 = vpop.f32.mrf.mxu1 }
 0xe97   :  { %v8274_v36 = vpack.c.bf16 %v8128_v62, %v8124_v9  ;;  %v8130_v53 = vadd.f32 %v13191_v17, %v8068_v41 }
 0xe98   :  { %v8072_v28 = vpop.f32.mrf.mxu0  ;;  %v13234_v43 = vpop.f32.mrf.mxu1 }
 0xe99   :  { %v8275_v33 = vpack.c.bf16 %v8130_v53, %v8126_v48  ;;  %v8134_v18 = vadd.f32 %v13193_v61, %v8072_v28 }
 0xe9a   :  { %v8074_v44 = vpop.f32.mrf.mxu0  ;;  %v8196_v49 = vpop.f32.mrf.mxu1 }
 0xe9b   :  { %v8136_v30 = vadd.f32 %v13195_v11, %v8074_v44 }
 0xe9c   :  { %v8076_v15 = vpop.f32.mrf.mxu0  ;;  %v8198_v35 = vpop.f32.mrf.mxu1 }
 0xe9d   :  { %v8138_v52 = vadd.f32 %v13197_v16, %v8076_v15  ;;  %v11716_v15 = vld [vmem:[%s12410_s13 + $0x18] ss:$12 sps:$4 sm:$0xff]  }
 0xe9e   :  { %v8078_v29 = vpop.f32.mrf.mxu0  ;;  %v8200_v22 = vpop.f32.mrf.mxu1 }
 0xe9f   :  { %v8280_v12 = vpack.c.bf16 %v8138_v52, %v8134_v18  ;;  %v8140_v60 = vadd.f32 %v13199_v56, %v8078_v29  ;;  %v11689_v56 = vld [vmem:[#allocation23 + $0x14] sm:$0xff]   ;;  %v11719_v18 = vld [vmem:[%s12410_s13] ss:$12 sps:$4 sm:$0xff]  }
 0xea0   :  { %v8082_v17 = vpop.f32.mrf.mxu0  ;;  %v8204_v55 = vpop.f32.mrf.mxu1  ;;  %v11722_v52 = vld [vmem:[%s12410_s13 + $0x168] ss:$12 sps:$4 sm:$0xff]   ;;  %v11724_v29 = vld [vmem:[%s12410_s13 + $0x16c] ss:$12 sps:$4 sm:$0xff]  }
 0xea1   :  { %v8281_v19 = vpack.c.bf16 %v8140_v60, %v8136_v30  ;;  %v8144_v21 = vadd.f32 %v13201_v47, %v8082_v17  ;;  %v11726_v30 = vld [vmem:[%s12410_s13 + $0xb0] ss:$12 sps:$4 sm:$0xff]   ;;  %v11729_v60 = vld [vmem:[%s12410_s13 + $0x154] ss:$12 sps:$4 sm:$0xff]   ;;  %v11730_v17 = vld [vmem:[%s12410_s13 + $0x158] ss:$12 sps:$4 sm:$0xff]  }
 0xea2   :  { %v8084_v24 = vpop.f32.mrf.mxu0  ;;  %v8206_v50 = vpop.f32.mrf.mxu1 }
 0xea3   :  { %v8286_v8 = vpack.c.bf16 %v8144_v21, %v8144_v21  ;;  %v8146_v38 = vadd.f32 %v13203_v10, %v8084_v24  ;;  %v11734_v21 = vld [vmem:[%s12410_s13 + $0x13c] ss:$12 sps:$4 sm:$0xff]   ;;  %v11735_v24 = vld [vmem:[%s12410_s13 + $0x140] ss:$12 sps:$4 sm:$0xff]  }
 0xea4   :  { %v8086_v61 = vpop.f32.mrf.mxu0  ;;  %v8208_v27 = vpop.f32.mrf.mxu1 }
 0xea5   :  { %v8287_v16 = vpack.c.bf16 %v8146_v38, %v8146_v38  ;;  %v8324_v11 = vsel %vm463_vm0, %v8286_v8, 0  ;;  %v11739_v8 = vld [vmem:[%s12410_s13 + $0x124] ss:$12 sps:$4 sm:$0xff]   ;;  %v11740_v38 = vld [vmem:[%s12410_s13 + $0x128] ss:$12 sps:$4 sm:$0xff]  }
 0xea6   :  { %v8087_v58 = vpop.f32.mrf.mxu0  ;;  %v8209_v59 = vpop.f32.mrf.mxu1  ;;  %v11737_v61 = vld [vmem:[%s12410_s13 + $0x120] ss:$12 sps:$4 sm:$0xff]   ;;  %v11741_v27 = vld [vmem:[%s12410_s13 + $0x68] ss:$12 sps:$4 sm:$0xff]  }
 0xea7   :  { %10256 = vmatprep.subr.msk.bf16.mxu0 %vm463_vm0, %v8287_v16  ;;  %v11744_v16 = vld [vmem:[%s12410_s13 + $0x10c] ss:$12 sps:$4 sm:$0xff]   ;;  %v11745_v58 = vld [vmem:[%s12410_s13 + $0x110] ss:$12 sps:$4 sm:$0xff]   ;;  %v11742_v59 = vld [vmem:[%s12410_s13 + $0x108] ss:$12 sps:$4 sm:$0xff]  }
 0xea8   :  { %8340 = vmatpush1.bf16.msra.mxu0 %v8324_v11  ;;  %v11746_v11 = vld [vmem:[%s12410_s13 + $0x50] ss:$12 sps:$4 sm:$0xff]  }
 0xea9   :  { %8341 = vmatprep.subr.bf16.mxu0 %v8281_v19  ;;  %v11732_v19 = vld [vmem:[%s12410_s13 + $0x138] ss:$12 sps:$4 sm:$0xff]  }
 0xeac   :  { %8342 = vmatpush1.bf16.msra.mxu0 %v8280_v12  ;;  %v11727_v12 = vld [vmem:[%s12410_s13 + $0x150] ss:$12 sps:$4 sm:$0xff]  }
 0xead   :  { %8343 = vmatprep.subr.bf16.mxu0 %v8275_v33 }
 0xeb0   :  { %8344 = vmatpush1.bf16.msra.mxu0 %v8274_v36 }
 0xeb1   :  { %v8245_v47 = vpop.f32.mrf.mxu0 }
 0xeb2   :  { %v8246_v44 = vadd.f32 %v8245_v47, %v13222_v25  ;;  %v11697_v25 = vld [vmem:[#allocation23 + $0x38] ss:$0 sps:$4 sm:$0x77]  }
 0xeb3   :  { %v8247_v32 = vpop.f32.mrf.mxu0  ;;  %10257 = vmatmul.mubr.msk.bf16.vlgmr.msra.gmra.mxu0 %vm453_vm1, %v11689_v56  ;;  %v11749_v56 = vld [vmem:[%s12410_s13 + $0xf4] ss:$12 sps:$4 sm:$0xff]   ;;  %v11750_v47 = vld [vmem:[%s12410_s13 + $0xf8] ss:$12 sps:$4 sm:$0xff]  }
 0xeb4   :  { %8371 = vmatprep.mubr.bf16.mxu0 %v12268_v0  ;;  %v8248_v36 = vadd.f32 %v8247_v32, %v13224_v5  ;;  %v11696_v5 = vld [vmem:[#allocation23 + $0x30] sm:$0xff]  }
 0xeb5   :  { %v8249_v10 = vpop.f32.mrf.mxu0  ;;  %v11747_v32 = vld [vmem:[%s12410_s13 + $0xf0] ss:$12 sps:$4 sm:$0xff]  }
 0xeb6   :  { %v8250_v53 = vadd.f32 %v8249_v10, %v13226_v54  ;;  %v11713_v54 = vld [vmem:[%s12410_s13 + $0x30] ss:$12 sps:$4 sm:$0xff]   ;;  %v11751_v10 = vld [vmem:[%s12410_s13 + $0x38] ss:$12 sps:$4 sm:$0xff]  }
 0xeb7   :  { %v8251_v7 = vpop.f32.mrf.mxu0 }
 0xeb8   :  { %v8252_v9 = vadd.f32 %v8251_v7, %v13230_v13  ;;  %v8276_v13 = vpack.c.bf16 %v8250_v53, %v8246_v44  ;;  %v11754_v7 = vld [vmem:[%s12410_s13 + $0xdc] ss:$12 sps:$4 sm:$0xff]  }
 0xeb9   :  { %v8255_v37 = vpop.f32.mrf.mxu0 }
 0xeba   :  { %v8256_v48 = vadd.f32 %v8255_v37, %v13234_v43  ;;  %v8277_v33 = vpack.c.bf16 %v8252_v9, %v8248_v36  ;;  %v11715_v43 = vld [vmem:[%s12410_s13 + $0x34] ss:$12 sps:$4 sm:$0xff]   ;;  %v11752_v37 = vld [vmem:[%s12410_s13 + $0xd8] ss:$12 sps:$4 sm:$0xff]  }
 0xebb   :  { %v8257_v51 = vpop.f32.mrf.mxu0  ;;  %10258 = vmatmul.mubr.msk.bf16.gmra.mxu0 %vm453_vm1, %v11691_v45  ;;  %8952 = vmatprep.subr.bf16.mxu1 %v11715_v43  ;;  %v11755_v45 = vld [vmem:[%s12410_s13 + $0xe0] ss:$12 sps:$4 sm:$0xff]   ;;  %v8584_v43 = vld [vmem:[#allocation26] sm:$0x3] }
 0xebc   :  { %8381 = vmatprep.mubr.bf16.mxu0 %v12268_v0  ;;  %v8258_v39 = vadd.f32 %v8257_v51, %v8196_v49  ;;  %v11695_v49 = vld [vmem:[#allocation23 + $0x28] sm:$0xff]   ;;  %8953 = vmatpush1.bf16.msra.mxu1 %v11713_v54 }
 0xebd   :  { %v8259_v6 = vpop.f32.mrf.mxu0  ;;  %v11756_v51 = vld [vmem:[%s12410_s13 + $0x20] ss:$12 sps:$4 sm:$0xff]  }
 0xebe   :  { %v8260_v46 = vadd.f32 %v8259_v6, %v8198_v35  ;;  %v11718_v35 = vld [vmem:[%s12410_s13 + $0x1c] ss:$12 sps:$4 sm:$0xff]   ;;  %v11759_v6 = vld [vmem:[%s12410_s13 + $0xc4] ss:$12 sps:$4 sm:$0xff]  }
 0xebf   :  { %v8261_v40 = vpop.f32.mrf.mxu0  ;;  %8954 = vmatprep.subr.bf16.mxu1 %v11718_v35 }
 0xec0   :  { %v8262_v1 = vadd.f32 %v8261_v40, %v8200_v22  ;;  %v8282_v28 = vpack.c.bf16 %v8260_v46, %v8256_v48  ;;  %8955 = vmatpush1.bf16.msra.mxu1 %v11716_v15  ;;  %v11725_v22 = vld [vmem:[%s12410_s13 + $0x170] ss:$12 sps:$4 sm:$0xff]   ;;  %v11760_v40 = vld [vmem:[%s12410_s13 + $0xc8] ss:$12 sps:$4 sm:$0xff]  }
 0xec1   :  { %v8265_v14 = vpop.f32.mrf.mxu0 }
 0xec2   :  { %v8266_v23 = vadd.f32 %v8265_v14, %v8204_v55  ;;  %v8283_v62 = vpack.c.bf16 %v8262_v1, %v8258_v39  ;;  %v11731_v55 = vld [vmem:[%s12410_s13 + $0x98] ss:$12 sps:$4 sm:$0xff]   ;;  %v11761_v14 = vld [vmem:[%s12410_s13 + $0x8] ss:$12 sps:$4 sm:$0xff]  }
 0xec3   :  { %v8267_v34 = vpop.f32.mrf.mxu0  ;;  %10259 = vmatmul.mubr.msk.bf16.gmra.mxu0 %vm453_vm1, %v11693_v31  ;;  %v11757_v31 = vld [vmem:[%s12410_s13 + $0xc0] ss:$12 sps:$4 sm:$0xff]  }
 0xec4   :  { %v8288_v57 = vpack.c.bf16 %v8266_v23, %v8266_v23  ;;  %v8268_v20 = vadd.f32 %v8267_v34, %v8206_v50  ;;  %8545 = vmatprep.mubr.bf16.mxu0 %v12268_v0  ;;  %v11736_v50 = vld [vmem:[%s12410_s13 + $0x80] ss:$12 sps:$4 sm:$0xff]  }
 0xec5   :  { %v8269_v26 = vpop.f32.mrf.mxu0 }
 0xec6   :  { %v8289_v3 = vpack.c.bf16 %v8268_v20, %v8268_v20  ;;  %v8508_v41 = vsel %vm463_vm0, %v8288_v57, 0 }
 0xec7   :  { %v8270_v63 = vpop.f32.mrf.mxu0 }
 0xec8   :  { %10270 = vmatprep.subr.msk.bf16.mxu0 %vm463_vm0, %v8289_v3 }
 0xec9   :  { %8524 = vmatpush1.bf16.msra.mxu0 %v8508_v41 }
 0xeca   :  { %8525 = vmatprep.subr.bf16.mxu0 %v8283_v62 }
 0xecd   :  { %8526 = vmatpush1.bf16.msra.mxu0 %v8282_v28 }
 0xece   :  { %8527 = vmatprep.subr.bf16.mxu0 %v8277_v33 }
 0xed1   :  { %8528 = vmatpush1.bf16.msra.mxu0 %v8276_v13 }
 0xed2   :  { %10451 = vmatprep.subr.bf16.mxu0 %v11725_v22 }
 0xed4   :  { %10271 = vmatmul.mubr.msk.bf16.vlgmr.msra.gmra.mxu0 %vm453_vm1, %v11695_v49 }
 0xed5   :  { %8555 = vmatprep.mubr.bf16.mxu0 %v12268_v0  ;;  %10452 = vmatpush3.bf16.msra.mxu0 %v11726_v30 }
 0xed6   :  { %10453 = vmatprep.subr.bf16.mxu0 %v11730_v17 }
 0xed9   :  { %10454 = vmatpush3.bf16.msra.mxu0 %v11731_v55 }
 0xeda   :  { %10455 = vmatprep.subr.bf16.mxu0 %v11735_v24 }
 0xedc   :  { %10272 = vmatmul.mubr.msk.bf16.gmra.mxu0 %vm453_vm1, %v11696_v5 }
 0xedd   :  { %8565 = vmatprep.mubr.bf16.mxu0 %v12268_v0  ;;  %v11721_v0 = vld [vmem:[%s12410_s13 + $0x4] ss:$12 sps:$4 sm:$0xff]   ;;  %10456 = vmatpush3.bf16.msra.mxu0 %v11736_v50  ;;  %s12271_s13 = smov [#allocation31]  }
 0xede   :  { %8956 = vmatprep.subr.bf16.mxu1 %v11721_v0  ;;  %10457 = vmatprep.subr.bf16.mxu0 %v11740_v38  ;;  %s9389_s30 = sshll.u32 %s12271_s13, 4  ;;  %s9390_s30 = int_to_ptr.vmem [resolvable:$true] %s9389_s30 }
 0xedf   :  { %8957 = vmatpush1.bf16.msra.mxu1 %v11719_v18  ;;  %s12167_s0 = scalar_lea.vmem %s9390_s30, 32  ;;  %p12172_p7 = scmp.lt.s32.totalorder %s9390_s30, %s9390_s30 }
 0xee0   :  { %8958 = vmatprep.subr.bf16.mxu1 %v11724_v29  ;;  %p12168_p6 = scmp.ne.s32.totalorder %s9390_s30, %s12167_s0  ;;  %p12173_p8 = scmp.lt.s32.totalorder %s12167_s0, %s12167_s0 }
 0xee1   :  { %10458 = vmatpush3.bf16.msra.mxu0 %v11741_v27 }
 0xee2   :  { %10459 = vmatprep.subr.bf16.mxu0 %v11745_v58  ;;  %p12174_p9 = por %p12173_p8, %p12172_p7 }
 0xee3   :  { %8959 = vmatpush2.bf16.msra.mxu1 %v11722_v52  ;;  %v8589_v52 = vrot.slane %v8584_v43, %v12568_v4 }
 0xee4   :  { %10273 = vmatmul.mubr.msk.bf16.gmra.mxu0 %vm453_vm1, %v11697_v25  ;;  %8960 = vmatprep.subr.bf16.mxu1 %v11729_v60  ;;  %p12175_p10 = pnand %p12174_p9, %p12168_p6 }
 0xee5   :  { %10460 = vmatpush3.bf16.msra.mxu0 %v11746_v11 }
 0xee6   :  { %10461 = vmatprep.subr.bf16.mxu0 %v11750_v47 }
 0xee7   :  { %8961 = vmatpush2.bf16.msra.mxu1 %v11727_v12  ;;  %v8593_v12 = vrot.slane %v8584_v43, %v12565_v2 }
 0xee8   :  { %8962 = vmatprep.subr.bf16.mxu1 %v11734_v21 }
 0xee9   :  { %10462 = vmatpush3.bf16.msra.mxu0 %v11751_v10 }
 0xeea   :  { %10463 = vmatprep.subr.bf16.mxu0 %v11755_v45 }
 0xeeb   :  { %8963 = vmatpush2.bf16.msra.mxu1 %v11732_v19 }
 0xeec   :  { %8964 = vmatprep.subr.bf16.mxu1 %v11739_v8 }
 0xeed   :  { %10464 = vmatpush3.bf16.msra.mxu0 %v11756_v51 }
 0xeee   :  { %10465 = vmatprep.subr.bf16.mxu0 %v11760_v40 }
 0xeef   :  { %8965 = vmatpush2.bf16.msra.mxu1 %v11737_v61 }
 0xef0   :  { %8966 = vmatprep.subr.bf16.mxu1 %v11744_v16 }
 0xef1   :  { %10466 = vmatpush3.bf16.msra.mxu0 %v11761_v14 }
 0xef2   :  { %10605 = vmatprep.subr.bf16.mxu0 %v12269_v42 }
 0xef3   :  { %8967 = vmatpush2.bf16.msra.mxu1 %v11742_v59 }
 0xef4   :  { %8968 = vmatprep.subr.bf16.mxu1 %v11749_v56 }
 0xef7   :  { %8969 = vmatpush2.bf16.msra.mxu1 %v11747_v32 }
 0xef8   :  { %8970 = vmatprep.subr.bf16.mxu1 %v11754_v7 }
 0xefb   :  { %8971 = vmatpush2.bf16.msra.mxu1 %v11752_v37 }
 0xefc   :  { %8972 = vmatprep.subr.bf16.mxu1 %v11759_v6 }
 0xeff   :  { %8973 = vmatpush2.bf16.msra.mxu1 %v11757_v31 }
 0xf00   :  { %10623 = vmatprep.subr.bf16.mxu1 %v12269_v42 }
 0xf33   :  { %v8452_v23 = vpop.f32.mrf.mxu1 }
 0xf35   :  { %v8454_v34 = vpop.f32.mrf.mxu1 }
 0xf37   :  { %v8456_v1 = vpop.f32.mrf.mxu1 }
 0xf39   :  { %v8458_v57 = vpop.f32.mrf.mxu1 }
 0xf3b   :  { %v8462_v20 = vpop.f32.mrf.mxu1 }
 0xf3d   :  { %v8464_v26 = vpop.f32.mrf.mxu1 }
 0xf3f   :  { %v8466_v39 = vpop.f32.mrf.mxu1 }
 0xf41   :  { %v8468_v3 = vpop.f32.mrf.mxu1 }
 0xf43   :  { %v8472_v46 = vpop.f32.mrf.mxu1 }
 0xf45   :  { %v8474_v63 = vpop.f32.mrf.mxu1 }
 0xf47   :  { %v8476_v9 = vpop.f32.mrf.mxu1 }
 0xf49   :  { %v8477_v62 = vpop.f32.mrf.mxu1 }
 0xf73   :  { %v8363_v41 = vpop.f32.mrf.mxu0 }
 0xf74   :  { %v8453_v15 = vadd.f32 %v8452_v23, %v8363_v41 }
 0xf75   :  { %v8365_v48 = vpop.f32.mrf.mxu0 }
 0xf76   :  { %v8455_v18 = vadd.f32 %v8454_v34, %v8365_v48 }
 0xf77   :  { %v8367_v36 = vpop.f32.mrf.mxu0 }
 0xf78   :  { %v8457_v22 = vadd.f32 %v8456_v1, %v8367_v36 }
 0xf79   :  { %v8369_v53 = vpop.f32.mrf.mxu0 }
 0xf7a   :  { %v8459_v17 = vadd.f32 %v8458_v57, %v8369_v53 }
 0xf7b   :  { %v8373_v28 = vpop.f32.mrf.mxu0 }
 0xf7c   :  { %v8463_v24 = vadd.f32 %v8462_v20, %v8373_v28 }
 0xf7d   :  { %v8375_v33 = vpop.f32.mrf.mxu0 }
 0xf7e   :  { %v8465_v61 = vadd.f32 %v8464_v26, %v8375_v33 }
 0xf7f   :  { %v8377_v44 = vpop.f32.mrf.mxu0 }
 0xf80   :  { %v8467_v11 = vadd.f32 %v8466_v39, %v8377_v44 }
 0xf81   :  { %v8379_v13 = vpop.f32.mrf.mxu0 }
 0xf82   :  { %v8469_v45 = vadd.f32 %v8468_v3, %v8379_v13 }
 0xf83   :  { %v8383_v49 = vpop.f32.mrf.mxu0 }
 0xf84   :  { %v8473_v34 = vadd.f32 %v8472_v46, %v8383_v49 }
 0xf85   :  { %v8385_v5 = vpop.f32.mrf.mxu0 }
 0xf86   :  { %v8475_v57 = vadd.f32 %v8474_v63, %v8385_v5 }
 0xf87   :  { %v8387_v25 = vpop.f32.mrf.mxu0 }
 0xf89   :  { %v8388_v54 = vpop.f32.mrf.mxu0 }
 0xf94   :  { %v8547_v35 = vpop.f32.mrf.mxu0 }
 0xf95   :  { %v8574_v0 = vadd.f32 %v8547_v35, %v8453_v15 }
 0xf96   :  { %v8549_v29 = vpop.f32.mrf.mxu0 }
 0xf97   :  { %v8575_v30 = vadd.f32 %v8549_v29, %v8455_v18  ;;  %v8596_v55 = vadd.f32 %v8589_v52, %v8574_v0 }
 0xf98   :  { %v8551_v60 = vpop.f32.mrf.mxu0 }
 0xf99   :  { %v8576_v19 = vadd.f32 %v8551_v60, %v8457_v22  ;;  %v8597_v50 = vadd.f32 %v8593_v12, %v8575_v30  ;;  %v8606_v16 = vmax.f32 %v8596_v55, 0.0 }
 0xf9a   :  { %v8553_v21 = vpop.f32.mrf.mxu0 }
 0xf9b   :  { %v8598_v8 = vadd.f32 %v8589_v52, %v8576_v19  ;;  %v8577_v38 = vadd.f32 %v8553_v21, %v8459_v17  ;;  %v8607_v47 = vmax.f32 %v8597_v50, 0.0 }
 0xf9c   :  { %v8557_v27 = vpop.f32.mrf.mxu0 }
 0xf9d   :  { %v8608_v58 = vmax.f32 %v8598_v8, 0.0  ;;  %v8599_v59 = vadd.f32 %v8593_v12, %v8577_v38  ;;  %v8578_v4 = vadd.f32 %v8557_v27, %v8463_v24 }
 0xf9e   :  { %v8559_v56 = vpop.f32.mrf.mxu0 }
 0xf9f   :  { %v8616_v32 = vpack.c.bf16 %v8608_v58, %v8606_v16  ;;  %v8609_v2 = vmax.f32 %v8599_v59, 0.0  ;;  %v8579_v10 = vadd.f32 %v8559_v56, %v8465_v61  ;;  %v8600_v37 = vadd.f32 %v8589_v52, %v8578_v4 }
 0xfa0   :  { %v8561_v7 = vpop.f32.mrf.mxu0 }
 0xfa1   :  { %v8580_v51 = vadd.f32 %v8561_v7, %v8467_v11  ;;  %v8617_v6 = vpack.c.bf16 %v8609_v2, %v8607_v47  ;;  %v8601_v31 = vadd.f32 %v8593_v12, %v8579_v10  ;;  %v8610_v20 = vmax.f32 %v8600_v37, 0.0  ;;  %v11764_v10 = vld [vmem:[#allocation28] sm:$0xff]   ;;  %v11762_v37 = vld [vmem:[#allocation28 + $0x14] sm:$0xff]  }
 0xfa2   :  { %v8563_v40 = vpop.f32.mrf.mxu0 }
 0xfa3   :  { %v8602_v14 = vadd.f32 %v8589_v52, %v8580_v51  ;;  %v8581_v23 = vadd.f32 %v8563_v40, %v8469_v45  ;;  %8974 = vmatprep.mubr.bf16.mxu1 %v8617_v6  ;;  %9035 = vmatprep.mubr.bf16.mxu0 %v8617_v6  ;;  %v8611_v3 = vmax.f32 %v8601_v31, 0.0  ;;  %v11766_v31 = vld [vmem:[#allocation28 + $0x8] sm:$0xff]  }
 0xfa4   :  { %v8567_v1 = vpop.f32.mrf.mxu0  ;;  %8975 = vmatmul.mubr.bf16.vlgmr.msra.gmra.mxu1 %v8616_v32  ;;  %9036 = vmatmul.mubr.bf16.vlgmr.msra.gmra.mxu0 %v8616_v32 }
 0xfa5   :  { %v8612_v26 = vmax.f32 %v8602_v14, 0.0  ;;  %v8603_v39 = vadd.f32 %v8593_v12, %v8581_v23  ;;  %v8582_v9 = vadd.f32 %v8567_v1, %v8473_v34  ;;  %v11763_v34 = vld [vmem:[#allocation28 + $0x1c] sm:$0xff]  }
 0xfa6   :  { %v8569_v62 = vpop.f32.mrf.mxu0 }
 0xfa7   :  { %v8618_v41 = vpack.c.bf16 %v8612_v26, %v8610_v20  ;;  %v8613_v48 = vmax.f32 %v8603_v39, 0.0  ;;  %v8583_v36 = vadd.f32 %v8569_v62, %v8475_v57  ;;  %v8604_v44 = vadd.f32 %v8589_v52, %v8582_v9  ;;  %v11768_v20 = vld [vmem:[#allocation28 + $0x10] ss:$0 sps:$4 sm:$0x11]   ;;  %v11767_v39 = vld [vmem:[#allocation28 + $0x28] sm:$0xff]  }
 0xfa8   :  { %v8571_v53 = vpop.f32.mrf.mxu0  ;;  %v11765_v26 = vld [vmem:[#allocation28 + $0x24] ss:$0 sps:$4 sm:$0x11]   ;;  %v11769_v9 = vld [vmem:[#allocation28 + $0x30] sm:$0xff]  }
 0xfa9   :  { %v8605_v28 = vadd.f32 %v8593_v12, %v8583_v36  ;;  %v8619_v33 = vpack.c.bf16 %v8613_v48, %v8611_v3  ;;  %v8614_v63 = vmax.f32 %v8604_v44, 0.0  ;;  %v11770_v62 = vld [vmem:[#allocation28 + $0x38] ss:$0 sps:$4 sm:$0x11]  }
 0xfaa   :  { %v8572_v13 = vpop.f32.mrf.mxu0 }
 0xfab   :  { %v8615_v25 = vmax.f32 %v8605_v28, 0.0  ;;  %8984 = vmatprep.mubr.bf16.mxu1 %v8619_v33  ;;  %9043 = vmatprep.mubr.bf16.mxu0 %v8619_v33  ;;  %v8620_v49 = vpack.c.bf16 %v8614_v63, %v8614_v63 }
 0xfac   :  { %8985 = vmatmul.mubr.bf16.gmra.mxu1 %v8618_v41  ;;  %9044 = vmatmul.mubr.bf16.gmra.mxu0 %v8618_v41 }
 0xfad   :  { %v8621_v46 = vpack.c.bf16 %v8615_v25, %v8615_v25 }
 0xfaf   :  { %8994 = vmatprep.mubr.bf16.mxu1 %v8621_v46  ;;  %9051 = vmatprep.mubr.bf16.mxu0 %v8621_v46 }
 0xfb4   :  { %8995 = vmatmul.mubr.bf16.gmra.mxu1 %v8620_v49  ;;  %9052 = vmatmul.mubr.bf16.gmra.mxu0 %v8620_v49 }
 0xfb5   :  { %10611 = vmatprep.mubr.msk.bf16.mxu0 %vm12270_vm4, %v12269_v42  ;;  %10629 = vmatprep.mubr.msk.bf16.mxu1 %vm12270_vm4, %v12269_v42 }
0x1064   :  { %v8976_v5 = vpop.f32.mrf.mxu1  ;;  %v10467_v54 = vpop.f32.mrf.mxu0 }
0x1066   :  { %v8978_v43 = vpop.f32.mrf.mxu1  ;;  %v10468_v15 = vpop.f32.mrf.mxu0 }
0x1067   :  { %v10469_v1 = vadd.f32 %v10468_v15, %v10467_v54 }
0x1068   :  { %v8980_v35 = vpop.f32.mrf.mxu1  ;;  %v10470_v18 = vpop.f32.mrf.mxu0 }
0x1069   :  { %v9059_v2 = vpack.c.bf16 %v8980_v35, %v8976_v5 }
0x106a   :  { %v8982_v0 = vpop.f32.mrf.mxu1  ;;  %v10471_v52 = vpop.f32.mrf.mxu0 }
0x106b   :  { %v9060_v7 = vpack.c.bf16 %v8982_v0, %v8978_v43  ;;  %v10472_v14 = vadd.f32 %v10471_v52, %v10470_v18 }
0x106c   :  { %v8986_v29 = vpop.f32.mrf.mxu1  ;;  %v10473_v22 = vpop.f32.mrf.mxu0 }
0x106d   :  { %v9061_v57 = vpack.c.bf16 %v10472_v14, %v10469_v1 }
0x106e   :  { %v8988_v30 = vpop.f32.mrf.mxu1  ;;  %v10474_v12 = vpop.f32.mrf.mxu0 }
0x106f   :  { %v10475_v40 = vadd.f32 %v10474_v12, %v10473_v22 }
0x1070   :  { %v8990_v60 = vpop.f32.mrf.mxu1  ;;  %v10476_v17 = vpop.f32.mrf.mxu0 }
0x1071   :  { %v9062_v4 = vpack.c.bf16 %v8990_v60, %v8986_v29 }
0x1072   :  { %v8992_v55 = vpop.f32.mrf.mxu1  ;;  %v10477_v19 = vpop.f32.mrf.mxu0 }
0x1073   :  { %v9063_v47 = vpack.c.bf16 %v8992_v55, %v8988_v30  ;;  %v10478_v51 = vadd.f32 %v10477_v19, %v10476_v17 }
0x1074   :  { %v8996_v21 = vpop.f32.mrf.mxu1  ;;  %v10479_v24 = vpop.f32.mrf.mxu0 }
0x1075   :  { %v9065_v50 = vpack.c.bf16 %v8996_v21, %v8996_v21  ;;  %v9064_v23 = vpack.c.bf16 %v10478_v51, %v10475_v40 }
0x1076   :  { %v8998_v8 = vpop.f32.mrf.mxu1  ;;  %v10480_v38 = vpop.f32.mrf.mxu0 }
0x1077   :  { %v9183_v61 = vsel %vm2272_vm2, %v9065_v50, 0  ;;  %v9066_v27 = vpack.c.bf16 %v8998_v8, %v8998_v8  ;;  %v10481_v32 = vadd.f32 %v10480_v38, %v10479_v24 }
0x1078   :  { %v9000_v16 = vpop.f32.mrf.mxu1  ;;  %v10482_v58 = vpop.f32.mrf.mxu0  ;;  %10624 = vmatpush3.bf16.msra.mxu1 %v9183_v61 }
0x1079   :  { %v9102_v59 = vsel %vm2272_vm2, %v9066_v27, 0  ;;  %10625 = vmatprep.subr.bf16.mxu1 %v12269_v42  ;;  %v9067_v45 = vpack.c.bf16 %v10481_v32, %v10481_v32 }
0x107a   :  { %v9001_v11 = vpop.f32.mrf.mxu1  ;;  %v10483_v56 = vpop.f32.mrf.mxu0  ;;  %10606 = vmatpush3.bf16.msra.mxu0 %v9102_v59 }
0x107b   :  { %10607 = vmatprep.subr.bf16.mxu0 %v12269_v42  ;;  %v9270_v6 = vsel %vm2272_vm2, %v9067_v45, 0 }
0x107c   :  { %10626 = vmatpush3.bf16.msra.mxu1 %v9062_v4 }
0x107d   :  { %10627 = vmatprep.subr.bf16.mxu1 %v12269_v42 }
0x107e   :  { %10608 = vmatpush3.bf16.msra.mxu0 %v9063_v47 }
0x107f   :  { %10609 = vmatprep.subr.bf16.mxu0 %v12269_v42 }
0x1080   :  { %10628 = vmatpush3.bf16.msra.mxu1 %v9059_v2 }
0x1082   :  { %10610 = vmatpush3.bf16.msra.mxu0 %v9060_v7 }
0x1083   :  { %10641 = vmatprep.subr.bf16.mxu0 %v12269_v42  ;;  %10630 = vmatmul.mubr.msk.bf16.vlgmr.msra.gmra.mxu1 %vm2262_vm3, %v11764_v10 }
0x1084   :  { %10633 = vmatprep.mubr.msk.bf16.mxu1 %vm12270_vm4, %v12269_v42 }
0x1085   :  { %10612 = vmatmul.mubr.msk.bf16.vlgmr.msra.gmra.mxu0 %vm2262_vm3, %v11762_v37 }
0x1086   :  { %10642 = vmatpush3.bf16.msra.mxu0 %v9270_v6  ;;  %10615 = vmatprep.mubr.msk.bf16.mxu0 %vm12270_vm4, %v12269_v42 }
0x1087   :  { %10643 = vmatprep.subr.bf16.mxu0 %v12269_v42 }
0x108a   :  { %10644 = vmatpush3.bf16.msra.mxu0 %v9064_v23 }
0x108b   :  { %10645 = vmatprep.subr.bf16.mxu0 %v12269_v42  ;;  %10634 = vmatmul.mubr.msk.bf16.gmra.mxu1 %vm2262_vm3, %v11766_v31 }
0x108c   :  { %10637 = vmatprep.mubr.msk.bf16.mxu1 %vm12270_vm4, %v12269_v42 }
0x108d   :  { %10616 = vmatmul.mubr.msk.bf16.gmra.mxu0 %vm2262_vm3, %v11763_v34 }
0x108e   :  { %10646 = vmatpush3.bf16.msra.mxu0 %v9061_v57  ;;  %10619 = vmatprep.mubr.msk.bf16.mxu0 %vm12270_vm4, %v12269_v42 }
0x1093   :  { %10638 = vmatmul.mubr.msk.bf16.gmra.mxu1 %vm2262_vm3, %v11768_v20 }
0x1095   :  { %10620 = vmatmul.mubr.msk.bf16.gmra.mxu0 %vm2262_vm3, %v11765_v26 }
0x1096   :  { %10647 = vmatprep.mubr.msk.bf16.mxu0 %vm12270_vm4, %v12269_v42 }
0x109d   :  { %10648 = vmatmul.mubr.msk.bf16.vlgmr.msra.gmra.mxu0 %vm2262_vm3, %v11767_v39 }
0x109e   :  { %10651 = vmatprep.mubr.msk.bf16.mxu0 %vm12270_vm4, %v12269_v42 }
0x10a5   :  { %10652 = vmatmul.mubr.msk.bf16.gmra.mxu0 %vm2262_vm3, %v11769_v9 }
0x10a6   :  { %10655 = vmatprep.mubr.msk.bf16.mxu0 %vm12270_vm4, %v12269_v42 }
0x10ad   :  { %10656 = vmatmul.mubr.msk.bf16.gmra.mxu0 %vm2262_vm3, %v11770_v62 }
0x10ae   :  { %12178 = shalt.err (!%p12175_p10)
}
0x10af   :  { %9392 = dma.vmem_to_hbm [thread:$0]  %s9390_s30, 32, %s12425_s5, [#allocation4]   ;;  %v10340_v60 = vld [vmem:[#allocation29] ss:$0 sm:$0xff]  ;;  %vm9379_vm9 = vcmask 271360  }
0x1143   :  { %v9219_v3 = vpop.f32.mrf.mxu1 }
0x1145   :  { %v9138_v41 = vpop.f32.mrf.mxu0  ;;  %v10631_v48 = vpop.f32.mrf.mxu1 }
0x1146   :  { %v9220_v30 = vadd.f32 %v9219_v3, %v9138_v41 }
0x1147   :  { %v10613_v36 = vpop.f32.mrf.mxu0  ;;  %v9222_v42 = vpop.f32.mrf.mxu1 }
0x1149   :  { %v9141_v53 = vpop.f32.mrf.mxu0  ;;  %v10632_v28 = vpop.f32.mrf.mxu1 }
0x114a   :  { %v9223_v19 = vadd.f32 %v9222_v42, %v9141_v53 }
0x114b   :  { %v10614_v33 = vpop.f32.mrf.mxu0  ;;  %v9227_v44 = vpop.f32.mrf.mxu1 }
0x114d   :  { %v9146_v13 = vpop.f32.mrf.mxu0  ;;  %v10635_v25 = vpop.f32.mrf.mxu1 }
0x114e   :  { %v9228_v61 = vadd.f32 %v9227_v44, %v9146_v13 }
0x114f   :  { %v10617_v46 = vpop.f32.mrf.mxu0  ;;  %v9230_v63 = vpop.f32.mrf.mxu1 }
0x1151   :  { %v9149_v49 = vpop.f32.mrf.mxu0  ;;  %v10636_v5 = vpop.f32.mrf.mxu1 }
0x1152   :  { %v9231_v56 = vadd.f32 %v9230_v63, %v9149_v49 }
0x1153   :  { %v10618_v54 = vpop.f32.mrf.mxu0  ;;  %v9235_v43 = vpop.f32.mrf.mxu1 }
0x1155   :  { %v9154_v15 = vpop.f32.mrf.mxu0  ;;  %v10639_v35 = vpop.f32.mrf.mxu1 }
0x1156   :  { %v9236_v37 = vadd.f32 %v9235_v43, %v9154_v15 }
0x1157   :  { %v10621_v18 = vpop.f32.mrf.mxu0  ;;  %v9238_v0 = vpop.f32.mrf.mxu1 }
0x1159   :  { %v9157_v52 = vpop.f32.mrf.mxu0  ;;  %v10640_v29 = vpop.f32.mrf.mxu1 }
0x115b   :  { %v10622_v22 = vpop.f32.mrf.mxu0 }
0x115d   :  { %v9306_v12 = vpop.f32.mrf.mxu0 }
0x115e   :  { %v9328_v17 = vadd.f32 %v9306_v12, %v9220_v30 }
0x115f   :  { %v10649_v55 = vpop.f32.mrf.mxu0 }
0x1160   :  { %v9340_v21 = vadd.f32 %v10340_v60, %v9328_v17 }
0x1161   :  { %v9309_v24 = vpop.f32.mrf.mxu0 }
0x1162   :  { %v9345_v50 = vsub.f32 0.0, %v9340_v21  ;;  %v9329_v8 = vadd.f32 %v9309_v24, %v9223_v19 }
0x1163   :  { %v10650_v38 = vpop.f32.mrf.mxu0 }
0x1164   :  { %v9350_v27 = vmul.f32 1.442695, %v9345_v50  ;;  %v9341_v16 = vadd.f32 %v10340_v60, %v9329_v8 }
0x1165   :  { %v9314_v58 = vpop.f32.mrf.mxu0 }
0x1166   :  { %11787 = vpow2.f32 %v9350_v27  ;;  %v9346_v59 = vsub.f32 0.0, %v9341_v16  ;;  %v9330_v4 = vadd.f32 %v9314_v58, %v9228_v61 }
0x1167   :  { %v10653_v11 = vpop.f32.mrf.mxu0 }
0x1168   :  { %v9352_v47 = vmul.f32 1.442695, %v9346_v59  ;;  %v9342_v32 = vadd.f32 %v10340_v60, %v9330_v4 }
0x1169   :  { %v9317_v2 = vpop.f32.mrf.mxu0 }
0x116a   :  { %11789 = vpow2.f32 %v9352_v47  ;;  %v9347_v10 = vsub.f32 0.0, %v9342_v32  ;;  %v9331_v7 = vadd.f32 %v9317_v2, %v9231_v56 }
0x116b   :  { %v10654_v45 = vpop.f32.mrf.mxu0 }
0x116c   :  { %v9354_v51 = vmul.f32 1.442695, %v9347_v10  ;;  %v9343_v6 = vadd.f32 %v10340_v60, %v9331_v7 }
0x116d   :  { %v9322_v40 = vpop.f32.mrf.mxu0 }
0x116e   :  { %11791 = vpow2.f32 %v9354_v51  ;;  %v9348_v31 = vsub.f32 0.0, %v9343_v6  ;;  %v9332_v14 = vadd.f32 %v9322_v40, %v9236_v37 }
0x116f   :  { %v10657_v23 = vpop.f32.mrf.mxu0 }
0x1170   :  { %v9356_v34 = vmul.f32 1.442695, %v9348_v31  ;;  %v9344_v1 = vadd.f32 %v10340_v60, %v9332_v14 }
0x1171   :  { %v9325_v57 = vpop.f32.mrf.mxu0 }
0x1172   :  { %11793 = vpow2.f32 %v9356_v34  ;;  %v9349_v20 = vsub.f32 0.0, %v9344_v1 }
0x1173   :  { %v11788_v26 = vpop.eup %11787  ;;  %v10658_v39 = vpop.f32.mrf.mxu0 }
0x1174   :  { %v9360_v9 = vadd.f32 1.0, %v11788_v26  ;;  %v9358_v62 = vmul.f32 1.442695, %v9349_v20 }
0x1176   :  { %11795 = vrcp.f32 %v9360_v9 }
0x1177   :  { %v11790_v3 = vpop.eup %11789  ;;  %11797 = vpow2.f32 %v9358_v62 }
0x1178   :  { %v9361_v41 = vadd.f32 1.0, %v11790_v3 }
0x117a   :  { %11799 = vrcp.f32 %v9361_v41 }
0x117b   :  { %v11792_v48 = vpop.eup %11791 }
0x117c   :  { %v9362_v36 = vadd.f32 1.0, %v11792_v48 }
0x117e   :  { %11801 = vrcp.f32 %v9362_v36 }
0x117f   :  { %v11794_v42 = vpop.eup %11793 }
0x1180   :  { %v9363_v53 = vadd.f32 1.0, %v11794_v42 }
0x1182   :  { %11803 = vrcp.f32 %v9363_v53 }
0x1183   :  { %v11796_v28 = vpop.eup %11795 }
0x1184   :  { %v11798_v33 = vpop.eup %11797  ;;  %9375 = vst.msk [vmem:[%s12420_s29] sm:$0xff] %vm453_vm1, %v11796_v28 }
0x1185   :  { %v9364_v44 = vadd.f32 1.0, %v11798_v33 }
0x1187   :  { %v11800_v13 = vpop.eup %11799  ;;  %11805 = vrcp.f32 %v9364_v44 }
0x1188   :  { %9376 = vst.msk [vmem:[%s12420_s29 + $0x8] sm:$0xff] %vm453_vm1, %v11800_v13 }
0x118b   :  { %v11802_v25 = vpop.eup %11801 }
0x118c   :  { %9377 = vst.msk [vmem:[%s12420_s29 + $0x10] sm:$0xff] %vm453_vm1, %v11802_v25 }
0x118f   :  { %v11804_v46 = vpop.eup %11803 }
0x1190   :  { %9378 = vst.msk [vmem:[%s12420_s29 + $0x18] sm:$0xff] %vm453_vm1, %v11804_v46 }
0x1194   :  { %v11806_v63 = vpop.eup %11805 }
0x1195   :  { %9380 = vst.msk [vmem:[%s12420_s29 + $0x20] sm:$0x3] %vm9379_vm9, %v11806_v63 }
0x1196   :  { %12207 = dma.done.wait [#allocation4], 32  }
0x1197   :  { %12208 = vsyncadd [#allocation4], 4294967264 }
0x1198   :  { %9398 = vsyncpa [#allocation3], 1 }
0x1199   :  { %9399 = vsyncpa [#allocation6], 1 }
0x119a   :  { %9400 = vsyncpa [#allocation9], 1 }
0x119b   :  { %9401 = vsyncpa [#allocation12], 1 }
0x119c   :  { %9402 = vsyncpa [#allocation15], 1 }
0x119d   :  { %9403 = vsyncpa [#allocation18], 1 }
0x119e   :  { %9404 = vsyncpa [#allocation21], 1 }
0x119f   :  { %9405 = vsyncpa [#allocation24], 1 }
0x11a0   :  { %9406 = vsyncpa [#allocation27], 1 }
0x11a1   :  { %9407 = vsyncpa [#allocation30], 1 }
0x11a2   :  { %9408 = vsyncpa [#allocation4], 1 }

</bundles_post_ra>
